<compile_context>
chip_gen: v7x
topology: tpu7x:2x2x1
jax: 0.10.0
libtpu: 0.0.40
codegen_flags: <defaults>
</compile_context>

<pallas_src>
import math
import jax
import jax.numpy as jnp
from jax.experimental import pallas as pl
from jax.experimental.pallas import tpu as pltpu

D_MODEL = 100
N_HEAD = 2
HEAD_DIM = D_MODEL // N_HEAD          # 50
D_FF = 1024
N_LAYERS = 6
FIXED_BATCH = 20                      # Linear(100 * 20, 512) forces batch dim = 20
D_HEAD_IN = D_MODEL * FIXED_BATCH     # 2000
D_HID = 512
N_CLASSES = 3
LN_EPS = 1e-5

D_PAD = 128                           # 100 -> 128 (lane-dense)
HD_PAD = 64                           # 50  -> 64
QKV_COLS = 3 * N_HEAD * HD_PAD        # 384


# ---------------------------------------------------------------------------
# Fused kernel: 6 encoder layers (grid axis) + head on the last grid step.
# ---------------------------------------------------------------------------
def fused_trans_kernel(x_ref,
                       wqkv_ref, bqkv_ref, wo_ref, bo_ref,
                       g1_ref, be1_ref,
                       w1_ref, b1_ref, w2_ref, b2_ref,
                       g2_ref, be2_ref,
                       hw1_ref, hb1_ref, hw2_ref, hb2_ref,
                       o_ref, acc_ref):
    l = pl.program_id(0)
    n_layers = pl.num_programs(0)
    B, S, DP = acc_ref.shape

    @pl.when(l == 0)
    def _():
        acc_ref[...] = x_ref[...]

    x = acc_ref[...].reshape(B * S, DP)                       # f32 residual stream

    feat_idx = jax.lax.broadcasted_iota(jnp.int32, (1, DP), 1)
    feat_mask = (feat_idx < D_MODEL).astype(jnp.float32)
    inv_d = 1.0 / float(D_MODEL)

    def layer_norm(v, g, b):
        # statistics over the real 100 features only; padded cols stay 0
        mu = jnp.sum(v * feat_mask, axis=-1, keepdims=True) * inv_d
        xc = (v - mu) * feat_mask
        var = jnp.sum(xc * xc, axis=-1, keepdims=True) * inv_d
        return xc * jax.lax.rsqrt(var + LN_EPS) * g + b

    # ----- multi-head self-attention (single fused QKV projection) -----
    qkv = jnp.dot(x.astype(jnp.bfloat16), wqkv_ref[...],
                  preferred_element_type=jnp.float32) + bqkv_ref[...]     # (B*S, 384)
    scale = 1.0 / math.sqrt(float(HEAD_DIM))
    k_off = N_HEAD * HD_PAD
    v_off = 2 * N_HEAD * HD_PAD
    ctx_heads = []
    for h in range(N_HEAD):                                   # static unroll (H=2)
        q = qkv[:, h * HD_PAD:(h + 1) * HD_PAD].reshape(B, S, HD_PAD)
        k = qkv[:, k_off + h * HD_PAD:k_off + (h + 1) * HD_PAD].reshape(B, S, HD_PAD)
        v = qkv[:, v_off + h * HD_PAD:v_off + (h + 1) * HD_PAD].reshape(B, S, HD_PAD)
        s = jnp.einsum('bqd,bkd->bqk', q, k,
                       preferred_element_type=jnp.float32) * scale        # (B, S, S)
        s = s - jnp.max(s, axis=-1, keepdims=True)
        p = jnp.exp(s)
        p = p * pl.reciprocal(jnp.sum(p, axis=-1, keepdims=True), approx=True)
        ctx_heads.append(jnp.einsum('bqk,bkd->bqd', p, v,
                                    preferred_element_type=jnp.float32))  # (B, S, 64)
    ctx = jnp.concatenate(ctx_heads, axis=-1).reshape(B * S, DP)          # (B*S, 128)
    attn = jnp.dot(ctx.astype(jnp.bfloat16), wo_ref[...],
                   preferred_element_type=jnp.float32) + bo_ref[...]

    y = layer_norm(x + attn, g1_ref[...], be1_ref[...])                   # norm1

    # ----- feed-forward -----
    ff = jnp.dot(y.astype(jnp.bfloat16), w1_ref[...],
                 preferred_element_type=jnp.float32) + b1_ref[...]
    ff = jnp.maximum(ff, 0.0)
    ff = jnp.dot(ff.astype(jnp.bfloat16), w2_ref[...],
                 preferred_element_type=jnp.float32) + b2_ref[...]
    y2 = layer_norm(y + ff, g2_ref[...], be2_ref[...])                    # norm2

    acc_ref[...] = y2.reshape(B, S, DP)

    # ----- head: Flatten(S, B*D) -> 512 -> 3 -> Softmax, last layer only -----
    @pl.when(l == n_layers - 1)
    def _():
        h1 = jnp.zeros((S, D_HID), jnp.float32)
        for b in range(B):                                    # contraction over batch
            xb = y2[b * S:(b + 1) * S, :].astype(jnp.bfloat16)            # (S, 128)
            wb = hw1_ref[b * DP:(b + 1) * DP, :]                          # (128, 512)
            h1 = h1 + jnp.dot(xb, wb, preferred_element_type=jnp.float32)
        h1 = h1 + hb1_ref[...]
        logits = jnp.dot(h1.astype(jnp.bfloat16), hw2_ref[...],
                         preferred_element_type=jnp.float32) + hb2_ref[...]
        cls_idx = jax.lax.broadcasted_iota(jnp.int32, (1, DP), 1)
        logits = jnp.where(cls_idx < N_CLASSES, logits, -1e30)
        m = jnp.max(logits, axis=-1, keepdims=True)
        e = jnp.exp(logits - m)
        o_ref[...] = e * pl.reciprocal(jnp.sum(e, axis=-1, keepdims=True), approx=True)


# ---------------------------------------------------------------------------
# Wrapper
# ---------------------------------------------------------------------------
@jax.jit
def trans_forward(x_sbd, kp):
    S, B, D = x_sbd.shape
    assert B == FIXED_BATCH and D == D_MODEL
    xk = jnp.transpose(x_sbd, (1, 0, 2))                       # (B, S, D)
    xk = jnp.pad(xk, ((0, 0), (0, 0), (0, D_PAD - D)))         # (B, S, 128)

    def full_spec(shape):
        nd = len(shape)
        return pl.BlockSpec(shape, lambda l: (0,) * nd)

    def layer_spec(shape):                                     # stacked per-layer weight
        nd = len(shape)
        return pl.BlockSpec((None,) + shape, lambda l: (l,) + (0,) * nd)

    in_specs = [
        full_spec((B, S, D_PAD)),                 # x
        layer_spec((D_PAD, QKV_COLS)),            # wqkv
        layer_spec((1, QKV_COLS)),                # bqkv
        layer_spec((D_PAD, D_PAD)),               # wo
        layer_spec((1, D_PAD)),                   # bo
        layer_spec((1, D_PAD)),                   # g1
        layer_spec((1, D_PAD)),                   # be1
        layer_spec((D_PAD, D_FF)),                # w1
        layer_spec((1, D_FF)),                    # b1
        layer_spec((D_FF, D_PAD)),                # w2
        layer_spec((1, D_PAD)),                   # b2
        layer_spec((1, D_PAD)),                   # g2
        layer_spec((1, D_PAD)),                   # be2
        full_spec((B * D_PAD, D_HID)),            # head w1
        full_spec((1, D_HID)),                    # head b1
        full_spec((D_HID, D_PAD)),                # head w2
        full_spec((1, D_PAD)),                    # head b2
    ]

    out = pl.pallas_call(
        fused_trans_kernel,
        out_shape=jax.ShapeDtypeStruct((S, D_PAD), jnp.float32),
        grid_spec=pltpu.PrefetchScalarGridSpec(
            num_scalar_prefetch=0,
            grid=(N_LAYERS,),
            in_specs=in_specs,
            out_specs=pl.BlockSpec((S, D_PAD), lambda l: (0, 0)),
            scratch_shapes=[pltpu.VMEM((B, S, D_PAD), jnp.float32)],
        ),
        compiler_params=pltpu.CompilerParams(
            dimension_semantics=("arbitrary",),
            vmem_limit_bytes=32 * 1024 * 1024,
        ),
    )(xk, kp['wqkv'], kp['bqkv'], kp['wo'], kp['bo'],
      kp['g1'], kp['be1'], kp['w1'], kp['b1'], kp['w2'], kp['b2'],
      kp['g2'], kp['be2'], kp['hw1'], kp['hb1'], kp['hw2'], kp['hb2'])
    return out[:, :N_CLASSES]


# ---------------------------------------------------------------------------
# Synthetic parameters in PyTorch layout (bf16-representable big matrices so
# the f32 reference and the bf16 kernel share exact weight values).
# ---------------------------------------------------------------------------
def init_params(key):
    def uni(k, shape, bound):
        return jax.random.uniform(k, shape, jnp.float32, -bound, bound)

    def q(w):  # round-trip through bf16 so kernel & reference use identical weights
        return w.astype(jnp.bfloat16).astype(jnp.float32)

    layers = []
    for l in range(N_LAYERS):
        ks = jax.random.split(jax.random.fold_in(key, l), 6)
        layers.append(dict(
            in_w=q(uni(ks[0], (3 * D_MODEL, D_MODEL), math.sqrt(6.0 / (4 * D_MODEL)))),
            in_b=jnp.zeros((3 * D_MODEL,), jnp.float32),
            out_w=q(uni(ks[1], (D_MODEL, D_MODEL), 1.0 / math.sqrt(D_MODEL))),
            out_b=jnp.zeros((D_MODEL,), jnp.float32),
            w1=q(uni(ks[2], (D_FF, D_MODEL), 1.0 / math.sqrt(D_MODEL))),
            b1=uni(ks[3], (D_FF,), 1.0 / math.sqrt(D_MODEL)),
            w2=q(uni(ks[4], (D_MODEL, D_FF), 1.0 / math.sqrt(D_FF))),
            b2=uni(ks[5], (D_MODEL,), 1.0 / math.sqrt(D_FF)),
            g1=jnp.ones((D_MODEL,), jnp.float32), be1=jnp.zeros((D_MODEL,), jnp.float32),
            g2=jnp.ones((D_MODEL,), jnp.float32), be2=jnp.zeros((D_MODEL,), jnp.float32)))

    hk = jax.random.split(jax.random.fold_in(key, 10_000), 4)
    head = dict(
        w1=q(uni(hk[0], (D_HID, D_HEAD_IN), 1.0 / math.sqrt(D_HEAD_IN))),
        b1=uni(hk[1], (D_HID,), 1.0 / math.sqrt(D_HEAD_IN)),
        w2=q(uni(hk[2], (N_CLASSES, D_HID), 1.0 / math.sqrt(D_HID))),
        b2=uni(hk[3], (N_CLASSES,), 1.0 / math.sqrt(D_HID)))
    return dict(layers=layers, head=head)


# ---------------------------------------------------------------------------
# Convert PyTorch-layout params to stacked / padded / bf16 kernel layout.
# ---------------------------------------------------------------------------
def _pad2(a, rows, cols):
    return jnp.pad(a, ((0, rows - a.shape[0]), (0, cols - a.shape[1])))


def pack_kernel_params(raw):
    bf = jnp.bfloat16
    acc = {k: [] for k in ('wqkv', 'bqkv', 'wo', 'bo', 'g1', 'be1',
                           'w1', 'b1', 'w2', 'b2', 'g2', 'be2')}
    for p in raw['layers']:
        wcols, bcols = [], []
        for sec in range(3):                      # q, k, v
            for h in range(N_HEAD):
                r0 = sec * D_MODEL + h * HEAD_DIM
                wcols.append(_pad2(p['in_w'][r0:r0 + HEAD_DIM, :].T, D_PAD, HD_PAD))
                bcols.append(jnp.pad(p['in_b'][r0:r0 + HEAD_DIM], (0, HD_PAD - HEAD_DIM)))
        acc['wqkv'].append(jnp.concatenate(wcols, axis=1))                 # (128, 384)
        acc['bqkv'].append(jnp.concatenate(bcols)[None, :])                # (1, 384)

        wo_rows = [_pad2(p['out_w'].T[h * HEAD_DIM:(h + 1) * HEAD_DIM, :], HD_PAD, D_PAD)
                   for h in range(N_HEAD)]
        acc['wo'].append(jnp.concatenate(wo_rows, axis=0))                 # (128, 128)
        acc['bo'].append(jnp.pad(p['out_b'], (0, D_PAD - D_MODEL))[None, :])

        acc['g1'].append(jnp.pad(p['g1'], (0, D_PAD - D_MODEL))[None, :])  # zero-padded!
        acc['be1'].append(jnp.pad(p['be1'], (0, D_PAD - D_MODEL))[None, :])
        acc['g2'].append(jnp.pad(p['g2'], (0, D_PAD - D_MODEL))[None, :])
        acc['be2'].append(jnp.pad(p['be2'], (0, D_PAD - D_MODEL))[None, :])

        acc['w1'].append(_pad2(p['w1'].T, D_PAD, D_FF))                    # (128, 1024)
        acc['b1'].append(p['b1'][None, :])
        acc['w2'].append(_pad2(p['w2'].T, D_FF, D_PAD))                    # (1024, 128)
        acc['b2'].append(jnp.pad(p['b2'], (0, D_PAD - D_MODEL))[None, :])

    hp = raw['head']
    hw1 = hp['w1'].T.reshape(FIXED_BATCH, D_MODEL, D_HID)                  # (20, 100, 512)
    hw1 = jnp.pad(hw1, ((0, 0), (0, D_PAD - D_MODEL), (0, 0)))
    hw1 = hw1.reshape(FIXED_BATCH * D_PAD, D_HID)                          # (2560, 512)
    hw2 = _pad2(hp['w2'].T, D_HID, D_PAD)                                  # (512, 128)

    return dict(
        wqkv=jnp.stack(acc['wqkv']).astype(bf), bqkv=jnp.stack(acc['bqkv']),
        wo=jnp.stack(acc['wo']).astype(bf), bo=jnp.stack(acc['bo']),
        g1=jnp.stack(acc['g1']), be1=jnp.stack(acc['be1']),
        w1=jnp.stack(acc['w1']).astype(bf), b1=jnp.stack(acc['b1']),
        w2=jnp.stack(acc['w2']).astype(bf), b2=jnp.stack(acc['b2']),
        g2=jnp.stack(acc['g2']), be2=jnp.stack(acc['be2']),
        hw1=hw1.astype(bf), hb1=hp['b1'][None, :],
        hw2=hw2.astype(bf), hb2=jnp.pad(hp['b2'], (0, D_PAD - N_CLASSES))[None, :])


# ---------------------------------------------------------------------------
# Pure-JAX f32 reference (PyTorch-layout math) for numerical sanity check.
# ---------------------------------------------------------------------------
def _layer_norm_ref(x, g, b):
    mu = jnp.mean(x, axis=-1, keepdims=True)
    xc = x - mu
    var = jnp.mean(xc * xc, axis=-1, keepdims=True)
    return xc * jax.lax.rsqrt(var + LN_EPS) * g + b


def reference_forward(x_sbd, params):
    S, B, D = x_sbd.shape
    x = jnp.transpose(x_sbd, (1, 0, 2)).reshape(B * S, D)
    for p in params['layers']:
        attn = jnp.zeros_like(x)
        for h in range(N_HEAD):
            sl = slice(h * HEAD_DIM, (h + 1) * HEAD_DIM)
            wq, wk, wv = (p['in_w'][0:D_MODEL][sl], p['in_w'][D_MODEL:2 * D_MODEL][sl],
                          p['in_w'][2 * D_MODEL:3 * D_MODEL][sl])
            bq, bk, bv = (p['in_b'][0:D_MODEL][sl], p['in_b'][D_MODEL:2 * D_MODEL][sl],
                          p['in_b'][2 * D_MODEL:3 * D_MODEL][sl])
            q = (x @ wq.T + bq).reshape(B, S, HEAD_DIM)
            k = (x @ wk.T + bk).reshape(B, S, HEAD_DIM)
            v = (x @ wv.T + bv).reshape(B, S, HEAD_DIM)
            s = jnp.einsum('bqd,bkd->bqk', q, k) / math.sqrt(HEAD_DIM)
            pr = jax.nn.softmax(s, axis=-1)
            ctx = jnp.einsum('bqk,bkd->bqd', pr, v).reshape(B * S, HEAD_DIM)
            attn = attn + ctx @ p['out_w'][:, sl].T
        attn = attn + p['out_b']
        x = _layer_norm_ref(x + attn, p['g1'], p['be1'])
        ff = jnp.maximum(x @ p['w1'].T + p['b1'], 0.0) @ p['w2'].T + p['b2']
        x = _layer_norm_ref(x + ff, p['g2'], p['be2'])
    flat = x.reshape(B, S, D).transpose(1, 0, 2).reshape(S, B * D)
    hp = params['head']
    logits = (flat @ hp['w1'].T + hp['b1']) @ hp['w2'].T + hp['b2']
    return jax.nn.softmax(logits, axis=-1)


if __name__ == "__main__":
    key = jax.random.PRNGKey(0)
    S = 8                                             # seq length (small)
    x = jax.random.normal(jax.random.fold_in(key, 1),
                          (S, FIXED_BATCH, D_MODEL), jnp.float32)   # (S, B=20, D=100)
    params = init_params(jax.random.fold_in(key, 2))
    kparams = pack_kernel_params(params)

    out = jax.block_until_ready(trans_forward(x, kparams))

    assert out.shape == (S, N_CLASSES)
    assert bool(jnp.all(jnp.isfinite(out)))
    assert bool(jnp.allclose(jnp.sum(out, axis=-1), 1.0, atol=5e-3))
    ref = reference_forward(x, params)
    err = float(jnp.max(jnp.abs(out - ref)))
    assert err < 5e-2, err

    print("KERNEL_OK")
</pallas_src>

<mosaic_0001>
module attributes {stable_mosaic.version = 11 : i64} {
  func.func @fused_trans_kernel(%arg0: i32, %arg1: memref<20x8x128xf32, #tpu.memory_space<vmem>>, %arg2: memref<1x128x384xbf16, #tpu.memory_space<vmem>>, %arg3: memref<1x1x384xf32, #tpu.memory_space<vmem>>, %arg4: memref<1x128x128xbf16, #tpu.memory_space<vmem>>, %arg5: memref<1x1x128xf32, #tpu.memory_space<vmem>>, %arg6: memref<1x1x128xf32, #tpu.memory_space<vmem>>, %arg7: memref<1x1x128xf32, #tpu.memory_space<vmem>>, %arg8: memref<1x128x1024xbf16, #tpu.memory_space<vmem>>, %arg9: memref<1x1x1024xf32, #tpu.memory_space<vmem>>, %arg10: memref<1x1024x128xbf16, #tpu.memory_space<vmem>>, %arg11: memref<1x1x128xf32, #tpu.memory_space<vmem>>, %arg12: memref<1x1x128xf32, #tpu.memory_space<vmem>>, %arg13: memref<1x1x128xf32, #tpu.memory_space<vmem>>, %arg14: memref<2560x512xbf16, #tpu.memory_space<vmem>>, %arg15: memref<1x512xf32, #tpu.memory_space<vmem>>, %arg16: memref<512x128xbf16, #tpu.memory_space<vmem>>, %arg17: memref<1x128xf32, #tpu.memory_space<vmem>>, %arg18: memref<8x128xf32, #tpu.memory_space<vmem>>, %arg19: memref<20x8x128xf32, #tpu.memory_space<vmem>>) attributes {dimension_semantics = [#tpu.dimension_semantics<arbitrary>], iteration_bounds = array<i64: 6>, scalar_prefetch = 0 : i64, scratch_operands = 1 : i64, tpu.core_type = #tpu.core_type<tc>, window_params = [{pipeline_mode = #tpu.pipeline_mode<synchronous>, transform_indices = @transform_0, window_bounds = array<i64: 20, 8, 128>}, {transform_indices = @transform_1, window_bounds = array<i64: 1, 128, 384>}, {transform_indices = @transform_2, window_bounds = array<i64: 1, 1, 384>}, {transform_indices = @transform_3, window_bounds = array<i64: 1, 128, 128>}, {transform_indices = @transform_4, window_bounds = array<i64: 1, 1, 128>}, {transform_indices = @transform_5, window_bounds = array<i64: 1, 1, 128>}, {transform_indices = @transform_6, window_bounds = array<i64: 1, 1, 128>}, {transform_indices = @transform_7, window_bounds = array<i64: 1, 128, 1024>}, {transform_indices = @transform_8, window_bounds = array<i64: 1, 1, 1024>}, {transform_indices = @transform_9, window_bounds = array<i64: 1, 1024, 128>}, {transform_indices = @transform_10, window_bounds = array<i64: 1, 1, 128>}, {transform_indices = @transform_11, window_bounds = array<i64: 1, 1, 128>}, {transform_indices = @transform_12, window_bounds = array<i64: 1, 1, 128>}, {pipeline_mode = #tpu.pipeline_mode<synchronous>, transform_indices = @transform_13, window_bounds = array<i64: 2560, 512>}, {pipeline_mode = #tpu.pipeline_mode<synchronous>, transform_indices = @transform_14, window_bounds = array<i64: 1, 512>}, {pipeline_mode = #tpu.pipeline_mode<synchronous>, transform_indices = @transform_15, window_bounds = array<i64: 512, 128>}, {pipeline_mode = #tpu.pipeline_mode<synchronous>, transform_indices = @transform_16, window_bounds = array<i64: 1, 128>}, {pipeline_mode = #tpu.pipeline_mode<synchronous>, transform_indices = @transform_17, window_bounds = array<i64: 8, 128>}]} {
    %c0_i32 = arith.constant 0 : i32
    %0 = arith.cmpi eq, %arg0, %c0_i32 : i32
    %1 = arith.extui %0 : i1 to i32
    %c0_i32_0 = arith.constant 0 : i32
    %2 = arith.cmpi ne, %1, %c0_i32_0 : i32
    scf.if %2 {
      %c0_67 = arith.constant 0 : index
      %c0_68 = arith.constant 0 : index
      %c0_69 = arith.constant 0 : index
      %149 = vector.load %arg1[%c0_67, %c0_68, %c0_69] : memref<20x8x128xf32, #tpu.memory_space<vmem>>, vector<20x8x128xf32>
      %c0_70 = arith.constant 0 : index
      %c0_71 = arith.constant 0 : index
      %c0_72 = arith.constant 0 : index
      %150 = vector.load %arg19[%c0_70, %c0_71, %c0_72] : memref<20x8x128xf32, #tpu.memory_space<vmem>>, vector<20x8x128xf32>
      tpu.vector_store %arg19[%c0_70, %c0_71, %c0_72], %149 {strides = array<i32>} : memref<20x8x128xf32, #tpu.memory_space<vmem>>, vector<20x8x128xf32>,
    } else {
    }
    %c0 = arith.constant 0 : index
    %c0_1 = arith.constant 0 : index
    %c0_2 = arith.constant 0 : index
    %3 = vector.load %arg19[%c0, %c0_1, %c0_2] : memref<20x8x128xf32, #tpu.memory_space<vmem>>, vector<20x8x128xf32>
    %4 = vector.shape_cast %3 : vector<20x8x128xf32> to vector<160x128xf32>
    %5 = tpu.iota {dimensions = array<i32: 1>} : vector<1x128xi32>
    %c100_i32 = arith.constant 100 : i32
    %6 = vector.broadcast %c100_i32 : i32 to vector<1x128xi32>
    %7 = arith.cmpi slt, %5, %6 : vector<1x128xi32>
    %8 = arith.extui %7 : vector<1x128xi1> to vector<1x128xi32>
    %9 = arith.sitofp %8 : vector<1x128xi32> to vector<1x128xf32>
    %10 = arith.truncf %4 : vector<160x128xf32> to vector<160x128xbf16>
    %c0_3 = arith.constant 0 : index
    %c0_4 = arith.constant 0 : index
    %c0_5 = arith.constant 0 : index
    %11 = vector.load %arg2[%c0_3, %c0_4, %c0_5] : memref<1x128x384xbf16, #tpu.memory_space<vmem>>, vector<1x128x384xbf16>
    %12 = vector.shape_cast %11 : vector<1x128x384xbf16> to vector<128x384xbf16>
    %cst = arith.constant dense<0.000000e+00> : vector<160x384xf32>
    %13 = tpu.matmul %10, %12, %cst {dimension_numbers = #tpu.dot_dimension_numbers<[1], [0], [0], [1], [0, 0, 1, 1], [], []>} : vector<160x128xbf16>, vector<128x384xbf16>, vector<160x384xf32> -> vector<160x384xf32>
    %c0_6 = arith.constant 0 : index
    %c0_7 = arith.constant 0 : index
    %c0_8 = arith.constant 0 : index
    %14 = vector.load %arg3[%c0_6, %c0_7, %c0_8] : memref<1x1x384xf32, #tpu.memory_space<vmem>>, vector<1x1x384xf32>
    %15 = vector.shape_cast %14 : vector<1x1x384xf32> to vector<1x384xf32>
    %16 = vector.broadcast %15 : vector<1x384xf32> to vector<160x384xf32>
    %17 = arith.addf %13, %16 : vector<160x384xf32>
    %18 = vector.extract_strided_slice %17 {offsets = [0, 0], sizes = [160, 64], strides = [1, 1]} : vector<160x384xf32> to vector<160x64xf32>
    %19 = vector.shape_cast %18 : vector<160x64xf32> to vector<20x8x64xf32>
    %20 = vector.extract_strided_slice %17 {offsets = [0, 128], sizes = [160, 64], strides = [1, 1]} : vector<160x384xf32> to vector<160x64xf32>
    %21 = vector.shape_cast %20 : vector<160x64xf32> to vector<20x8x64xf32>
    %22 = vector.extract_strided_slice %17 {offsets = [0, 256], sizes = [160, 64], strides = [1, 1]} : vector<160x384xf32> to vector<160x64xf32>
    %23 = vector.shape_cast %22 : vector<160x64xf32> to vector<20x8x64xf32>
    "tpu.trace_start"() <{level = 10 : i32, message = "bqd,bkd->bqk"}> : () -> ()
    %cst_9 = arith.constant dense<0.000000e+00> : vector<20x8x8xf32>
    %24 = tpu.matmul %19, %21, %cst_9 {dimension_numbers = #tpu.dot_dimension_numbers<[2], [2], [1], [1], [0, 0, 0, 1, 1, 1], [0], [0]>} : vector<20x8x64xf32>, vector<20x8x64xf32>, vector<20x8x8xf32> -> vector<20x8x8xf32>
    "tpu.trace_stop"() : () -> ()
    %cst_10 = arith.constant 0.141421363 : f32
    %25 = vector.broadcast %cst_10 : f32 to vector<20x8x8xf32>
    %26 = arith.mulf %24, %25 : vector<20x8x8xf32>
    %cst_11 = arith.constant dense<0xFF800000> : vector<20x8xf32>
    %27 = vector.multi_reduction <maximumf>, %26, %cst_11 [2] : vector<20x8x8xf32> to vector<20x8xf32>
    %28 = vector.shape_cast %27 : vector<20x8xf32> to vector<20x8x1xf32>
    %29 = vector.broadcast %28 : vector<20x8x1xf32> to vector<20x8x8xf32>
    %30 = arith.subf %26, %29 : vector<20x8x8xf32>
    %31 = math.exp %30 : vector<20x8x8xf32>
    %cst_12 = arith.constant dense<0.000000e+00> : vector<20x8xf32>
    %32 = vector.multi_reduction <add>, %31, %cst_12 [2] : vector<20x8x8xf32> to vector<20x8xf32>
    %33 = vector.shape_cast %32 : vector<20x8xf32> to vector<20x8x1xf32>
    %34 = tpu.reciprocal %33 {approx = true} : vector<20x8x1xf32> -> vector<20x8x1xf32>
    %35 = vector.broadcast %34 : vector<20x8x1xf32> to vector<20x8x8xf32>
    %36 = arith.mulf %31, %35 : vector<20x8x8xf32>
    "tpu.trace_start"() <{level = 10 : i32, message = "bqk,bkd->bqd"}> : () -> ()
    %cst_13 = arith.constant dense<0.000000e+00> : vector<20x8x64xf32>
    %37 = tpu.matmul %36, %23, %cst_13 {dimension_numbers = #tpu.dot_dimension_numbers<[2], [1], [1], [2], [0, 0, 0, 1, 1, 2], [0], [0]>} : vector<20x8x8xf32>, vector<20x8x64xf32>, vector<20x8x64xf32> -> vector<20x8x64xf32>
    "tpu.trace_stop"() : () -> ()
    %38 = vector.extract_strided_slice %17 {offsets = [0, 64], sizes = [160, 64], strides = [1, 1]} : vector<160x384xf32> to vector<160x64xf32>
    %39 = vector.shape_cast %38 : vector<160x64xf32> to vector<20x8x64xf32>
    %40 = vector.extract_strided_slice %17 {offsets = [0, 192], sizes = [160, 64], strides = [1, 1]} : vector<160x384xf32> to vector<160x64xf32>
    %41 = vector.shape_cast %40 : vector<160x64xf32> to vector<20x8x64xf32>
    %42 = vector.extract_strided_slice %17 {offsets = [0, 320], sizes = [160, 64], strides = [1, 1]} : vector<160x384xf32> to vector<160x64xf32>
    %43 = vector.shape_cast %42 : vector<160x64xf32> to vector<20x8x64xf32>
    "tpu.trace_start"() <{level = 10 : i32, message = "bqd,bkd->bqk"}> : () -> ()
    %cst_14 = arith.constant dense<0.000000e+00> : vector<20x8x8xf32>
    %44 = tpu.matmul %39, %41, %cst_14 {dimension_numbers = #tpu.dot_dimension_numbers<[2], [2], [1], [1], [0, 0, 0, 1, 1, 1], [0], [0]>} : vector<20x8x64xf32>, vector<20x8x64xf32>, vector<20x8x8xf32> -> vector<20x8x8xf32>
    "tpu.trace_stop"() : () -> ()
    %cst_15 = arith.constant 0.141421363 : f32
    %45 = vector.broadcast %cst_15 : f32 to vector<20x8x8xf32>
    %46 = arith.mulf %44, %45 : vector<20x8x8xf32>
    %cst_16 = arith.constant dense<0xFF800000> : vector<20x8xf32>
    %47 = vector.multi_reduction <maximumf>, %46, %cst_16 [2] : vector<20x8x8xf32> to vector<20x8xf32>
    %48 = vector.shape_cast %47 : vector<20x8xf32> to vector<20x8x1xf32>
    %49 = vector.broadcast %48 : vector<20x8x1xf32> to vector<20x8x8xf32>
    %50 = arith.subf %46, %49 : vector<20x8x8xf32>
    %51 = math.exp %50 : vector<20x8x8xf32>
    %cst_17 = arith.constant dense<0.000000e+00> : vector<20x8xf32>
    %52 = vector.multi_reduction <add>, %51, %cst_17 [2] : vector<20x8x8xf32> to vector<20x8xf32>
    %53 = vector.shape_cast %52 : vector<20x8xf32> to vector<20x8x1xf32>
    %54 = tpu.reciprocal %53 {approx = true} : vector<20x8x1xf32> -> vector<20x8x1xf32>
    %55 = vector.broadcast %54 : vector<20x8x1xf32> to vector<20x8x8xf32>
    %56 = arith.mulf %51, %55 : vector<20x8x8xf32>
    "tpu.trace_start"() <{level = 10 : i32, message = "bqk,bkd->bqd"}> : () -> ()
    %cst_18 = arith.constant dense<0.000000e+00> : vector<20x8x64xf32>
    %57 = tpu.matmul %56, %43, %cst_18 {dimension_numbers = #tpu.dot_dimension_numbers<[2], [1], [1], [2], [0, 0, 0, 1, 1, 2], [0], [0]>} : vector<20x8x8xf32>, vector<20x8x64xf32>, vector<20x8x64xf32> -> vector<20x8x64xf32>
    "tpu.trace_stop"() : () -> ()
    %58 = tpu.concatenate %37, %57 in 2 : vector<20x8x64xf32>, vector<20x8x64xf32> -> vector<20x8x128xf32>
    %59 = vector.shape_cast %58 : vector<20x8x128xf32> to vector<160x128xf32>
    %60 = arith.truncf %59 : vector<160x128xf32> to vector<160x128xbf16>
    %c0_19 = arith.constant 0 : index
    %c0_20 = arith.constant 0 : index
    %c0_21 = arith.constant 0 : index
    %61 = vector.load %arg4[%c0_19, %c0_20, %c0_21] : memref<1x128x128xbf16, #tpu.memory_space<vmem>>, vector<1x128x128xbf16>
    %62 = vector.shape_cast %61 : vector<1x128x128xbf16> to vector<128x128xbf16>
    %cst_22 = arith.constant dense<0.000000e+00> : vector<160x128xf32>
    %63 = tpu.matmul %60, %62, %cst_22 {dimension_numbers = #tpu.dot_dimension_numbers<[1], [0], [0], [1], [0, 0, 1, 1], [], []>} : vector<160x128xbf16>, vector<128x128xbf16>, vector<160x128xf32> -> vector<160x128xf32>
    %c0_23 = arith.constant 0 : index
    %c0_24 = arith.constant 0 : index
    %c0_25 = arith.constant 0 : index
    %64 = vector.load %arg5[%c0_23, %c0_24, %c0_25] : memref<1x1x128xf32, #tpu.memory_space<vmem>>, vector<1x1x128xf32>
    %65 = vector.shape_cast %64 : vector<1x1x128xf32> to vector<1x128xf32>
    %66 = vector.broadcast %65 : vector<1x128xf32> to vector<160x128xf32>
    %67 = arith.addf %63, %66 : vector<160x128xf32>
    %68 = arith.addf %4, %67 : vector<160x128xf32>
    %c0_26 = arith.constant 0 : index
    %c0_27 = arith.constant 0 : index
    %c0_28 = arith.constant 0 : index
    %69 = vector.load %arg6[%c0_26, %c0_27, %c0_28] : memref<1x1x128xf32, #tpu.memory_space<vmem>>, vector<1x1x128xf32>
    %70 = vector.shape_cast %69 : vector<1x1x128xf32> to vector<1x128xf32>
    %c0_29 = arith.constant 0 : index
    %c0_30 = arith.constant 0 : index
    %c0_31 = arith.constant 0 : index
    %71 = vector.load %arg7[%c0_29, %c0_30, %c0_31] : memref<1x1x128xf32, #tpu.memory_space<vmem>>, vector<1x1x128xf32>
    %72 = vector.shape_cast %71 : vector<1x1x128xf32> to vector<1x128xf32>
    %73 = vector.broadcast %9 : vector<1x128xf32> to vector<160x128xf32>
    %74 = arith.mulf %68, %73 : vector<160x128xf32>
    %cst_32 = arith.constant dense<0.000000e+00> : vector<160xf32>
    %75 = vector.multi_reduction <add>, %74, %cst_32 [1] : vector<160x128xf32> to vector<160xf32>
    %76 = vector.shape_cast %75 : vector<160xf32> to vector<160x1xf32>
    %cst_33 = arith.constant 0.00999999977 : f32
    %77 = vector.broadcast %cst_33 : f32 to vector<160x1xf32>
    %78 = arith.mulf %76, %77 : vector<160x1xf32>
    %79 = vector.broadcast %78 : vector<160x1xf32> to vector<160x128xf32>
    %80 = arith.subf %68, %79 : vector<160x128xf32>
    %81 = vector.broadcast %9 : vector<1x128xf32> to vector<160x128xf32>
    %82 = arith.mulf %80, %81 : vector<160x128xf32>
    %83 = arith.mulf %82, %82 : vector<160x128xf32>
    %cst_34 = arith.constant dense<0.000000e+00> : vector<160xf32>
    %84 = vector.multi_reduction <add>, %83, %cst_34 [1] : vector<160x128xf32> to vector<160xf32>
    %85 = vector.shape_cast %84 : vector<160xf32> to vector<160x1xf32>
    %cst_35 = arith.constant 0.00999999977 : f32
    %86 = vector.broadcast %cst_35 : f32 to vector<160x1xf32>
    %87 = arith.mulf %85, %86 : vector<160x1xf32>
    %cst_36 = arith.constant 9.99999974E-6 : f32
    %88 = vector.broadcast %cst_36 : f32 to vector<160x1xf32>
    %89 = arith.addf %87, %88 : vector<160x1xf32>
    %90 = math.rsqrt %89 : vector<160x1xf32>
    %91 = vector.broadcast %90 : vector<160x1xf32> to vector<160x128xf32>
    %92 = arith.mulf %82, %91 : vector<160x128xf32>
    %93 = vector.broadcast %70 : vector<1x128xf32> to vector<160x128xf32>
    %94 = arith.mulf %92, %93 : vector<160x128xf32>
    %95 = vector.broadcast %72 : vector<1x128xf32> to vector<160x128xf32>
    %96 = arith.addf %94, %95 : vector<160x128xf32>
    %97 = arith.truncf %96 : vector<160x128xf32> to vector<160x128xbf16>
    %c0_37 = arith.constant 0 : index
    %c0_38 = arith.constant 0 : index
    %c0_39 = arith.constant 0 : index
    %98 = vector.load %arg8[%c0_37, %c0_38, %c0_39] : memref<1x128x1024xbf16, #tpu.memory_space<vmem>>, vector<1x128x1024xbf16>
    %99 = vector.shape_cast %98 : vector<1x128x1024xbf16> to vector<128x1024xbf16>
    %cst_40 = arith.constant dense<0.000000e+00> : vector<160x1024xf32>
    %100 = tpu.matmul %97, %99, %cst_40 {dimension_numbers = #tpu.dot_dimension_numbers<[1], [0], [0], [1], [0, 0, 1, 1], [], []>} : vector<160x128xbf16>, vector<128x1024xbf16>, vector<160x1024xf32> -> vector<160x1024xf32>
    %c0_41 = arith.constant 0 : index
    %c0_42 = arith.constant 0 : index
    %c0_43 = arith.constant 0 : index
    %101 = vector.load %arg9[%c0_41, %c0_42, %c0_43] : memref<1x1x1024xf32, #tpu.memory_space<vmem>>, vector<1x1x1024xf32>
    %102 = vector.shape_cast %101 : vector<1x1x1024xf32> to vector<1x1024xf32>
    %103 = vector.broadcast %102 : vector<1x1024xf32> to vector<160x1024xf32>
    %104 = arith.addf %100, %103 : vector<160x1024xf32>
    %cst_44 = arith.constant 0.000000e+00 : f32
    %105 = vector.broadcast %cst_44 : f32 to vector<160x1024xf32>
    %106 = arith.maximumf %104, %105 : vector<160x1024xf32>
    %107 = arith.truncf %106 : vector<160x1024xf32> to vector<160x1024xbf16>
    %c0_45 = arith.constant 0 : index
    %c0_46 = arith.constant 0 : index
    %c0_47 = arith.constant 0 : index
    %108 = vector.load %arg10[%c0_45, %c0_46, %c0_47] : memref<1x1024x128xbf16, #tpu.memory_space<vmem>>, vector<1x1024x128xbf16>
    %109 = vector.shape_cast %108 : vector<1x1024x128xbf16> to vector<1024x128xbf16>
    %cst_48 = arith.constant dense<0.000000e+00> : vector<160x128xf32>
    %110 = tpu.matmul %107, %109, %cst_48 {dimension_numbers = #tpu.dot_dimension_numbers<[1], [0], [0], [1], [0, 0, 1, 1], [], []>} : vector<160x1024xbf16>, vector<1024x128xbf16>, vector<160x128xf32> -> vector<160x128xf32>
    %c0_49 = arith.constant 0 : index
    %c0_50 = arith.constant 0 : index
    %c0_51 = arith.constant 0 : index
    %111 = vector.load %arg11[%c0_49, %c0_50, %c0_51] : memref<1x1x128xf32, #tpu.memory_space<vmem>>, vector<1x1x128xf32>
    %112 = vector.shape_cast %111 : vector<1x1x128xf32> to vector<1x128xf32>
    %113 = vector.broadcast %112 : vector<1x128xf32> to vector<160x128xf32>
    %114 = arith.addf %110, %113 : vector<160x128xf32>
    %115 = arith.addf %96, %114 : vector<160x128xf32>
    %c0_52 = arith.constant 0 : index
    %c0_53 = arith.constant 0 : index
    %c0_54 = arith.constant 0 : index
    %116 = vector.load %arg12[%c0_52, %c0_53, %c0_54] : memref<1x1x128xf32, #tpu.memory_space<vmem>>, vector<1x1x128xf32>
    %117 = vector.shape_cast %116 : vector<1x1x128xf32> to vector<1x128xf32>
    %c0_55 = arith.constant 0 : index
    %c0_56 = arith.constant 0 : index
    %c0_57 = arith.constant 0 : index
    %118 = vector.load %arg13[%c0_55, %c0_56, %c0_57] : memref<1x1x128xf32, #tpu.memory_space<vmem>>, vector<1x1x128xf32>
    %119 = vector.shape_cast %118 : vector<1x1x128xf32> to vector<1x128xf32>
    %120 = vector.broadcast %9 : vector<1x128xf32> to vector<160x128xf32>
    %121 = arith.mulf %115, %120 : vector<160x128xf32>
    %cst_58 = arith.constant dense<0.000000e+00> : vector<160xf32>
    %122 = vector.multi_reduction <add>, %121, %cst_58 [1] : vector<160x128xf32> to vector<160xf32>
    %123 = vector.shape_cast %122 : vector<160xf32> to vector<160x1xf32>
    %cst_59 = arith.constant 0.00999999977 : f32
    %124 = vector.broadcast %cst_59 : f32 to vector<160x1xf32>
    %125 = arith.mulf %123, %124 : vector<160x1xf32>
    %126 = vector.broadcast %125 : vector<160x1xf32> to vector<160x128xf32>
    %127 = arith.subf %115, %126 : vector<160x128xf32>
    %128 = vector.broadcast %9 : vector<1x128xf32> to vector<160x128xf32>
    %129 = arith.mulf %127, %128 : vector<160x128xf32>
    %130 = arith.mulf %129, %129 : vector<160x128xf32>
    %cst_60 = arith.constant dense<0.000000e+00> : vector<160xf32>
    %131 = vector.multi_reduction <add>, %130, %cst_60 [1] : vector<160x128xf32> to vector<160xf32>
    %132 = vector.shape_cast %131 : vector<160xf32> to vector<160x1xf32>
    %cst_61 = arith.constant 0.00999999977 : f32
    %133 = vector.broadcast %cst_61 : f32 to vector<160x1xf32>
    %134 = arith.mulf %132, %133 : vector<160x1xf32>
    %cst_62 = arith.constant 9.99999974E-6 : f32
    %135 = vector.broadcast %cst_62 : f32 to vector<160x1xf32>
    %136 = arith.addf %134, %135 : vector<160x1xf32>
    %137 = math.rsqrt %136 : vector<160x1xf32>
    %138 = vector.broadcast %137 : vector<160x1xf32> to vector<160x128xf32>
    %139 = arith.mulf %129, %138 : vector<160x128xf32>
    %140 = vector.broadcast %117 : vector<1x128xf32> to vector<160x128xf32>
    %141 = arith.mulf %139, %140 : vector<160x128xf32>
    %142 = vector.broadcast %119 : vector<1x128xf32> to vector<160x128xf32>
    %143 = arith.addf %141, %142 : vector<160x128xf32>
    %144 = vector.shape_cast %143 : vector<160x128xf32> to vector<20x8x128xf32>
    %c0_63 = arith.constant 0 : index
    %c0_64 = arith.constant 0 : index
    %c0_65 = arith.constant 0 : index
    %145 = vector.load %arg19[%c0_63, %c0_64, %c0_65] : memref<20x8x128xf32, #tpu.memory_space<vmem>>, vector<20x8x128xf32>
    tpu.vector_store %arg19[%c0_63, %c0_64, %c0_65], %144 {strides = array<i32>} : memref<20x8x128xf32, #tpu.memory_space<vmem>>, vector<20x8x128xf32>,
    %c5_i32 = arith.constant 5 : i32
    %146 = arith.cmpi eq, %arg0, %c5_i32 : i32
    %147 = arith.extui %146 : i1 to i32
    %c0_i32_66 = arith.constant 0 : i32
    %148 = arith.cmpi ne, %147, %c0_i32_66 : i32
    scf.if %148 {
      %cst_67 = arith.constant 0.000000e+00 : f32
      %149 = vector.broadcast %cst_67 : f32 to vector<8x512xf32>
      %150 = vector.extract_strided_slice %143 {offsets = [0, 0], sizes = [8, 128], strides = [1, 1]} : vector<160x128xf32> to vector<8x128xf32>
      %151 = arith.truncf %150 : vector<8x128xf32> to vector<8x128xbf16>
      %c0_68 = arith.constant 0 : index
      %c0_69 = arith.constant 0 : index
      %152 = vector.load %arg14[%c0_68, %c0_69] : memref<2560x512xbf16, #tpu.memory_space<vmem>>, vector<128x512xbf16>
      %cst_70 = arith.constant dense<0.000000e+00> : vector<8x512xf32>
      %153 = tpu.matmul %151, %152, %cst_70 {dimension_numbers = #tpu.dot_dimension_numbers<[1], [0], [0], [1], [0, 0, 1, 1], [], []>} : vector<8x128xbf16>, vector<128x512xbf16>, vector<8x512xf32> -> vector<8x512xf32>
      %154 = arith.addf %149, %153 : vector<8x512xf32>
      %155 = vector.extract_strided_slice %143 {offsets = [8, 0], sizes = [8, 128], strides = [1, 1]} : vector<160x128xf32> to vector<8x128xf32>
      %156 = arith.truncf %155 : vector<8x128xf32> to vector<8x128xbf16>
      %c128 = arith.constant 128 : index
      %c0_71 = arith.constant 0 : index
      %157 = vector.load %arg14[%c128, %c0_71] : memref<2560x512xbf16, #tpu.memory_space<vmem>>, vector<128x512xbf16>
      %cst_72 = arith.constant dense<0.000000e+00> : vector<8x512xf32>
      %158 = tpu.matmul %156, %157, %cst_72 {dimension_numbers = #tpu.dot_dimension_numbers<[1], [0], [0], [1], [0, 0, 1, 1], [], []>} : vector<8x128xbf16>, vector<128x512xbf16>, vector<8x512xf32> -> vector<8x512xf32>
      %159 = arith.addf %154, %158 : vector<8x512xf32>
      %160 = vector.extract_strided_slice %143 {offsets = [16, 0], sizes = [8, 128], strides = [1, 1]} : vector<160x128xf32> to vector<8x128xf32>
      %161 = arith.truncf %160 : vector<8x128xf32> to vector<8x128xbf16>
      %c256 = arith.constant 256 : index
      %c0_73 = arith.constant 0 : index
      %162 = vector.load %arg14[%c256, %c0_73] : memref<2560x512xbf16, #tpu.memory_space<vmem>>, vector<128x512xbf16>
      %cst_74 = arith.constant dense<0.000000e+00> : vector<8x512xf32>
      %163 = tpu.matmul %161, %162, %cst_74 {dimension_numbers = #tpu.dot_dimension_numbers<[1], [0], [0], [1], [0, 0, 1, 1], [], []>} : vector<8x128xbf16>, vector<128x512xbf16>, vector<8x512xf32> -> vector<8x512xf32>
      %164 = arith.addf %159, %163 : vector<8x512xf32>
      %165 = vector.extract_strided_slice %143 {offsets = [24, 0], sizes = [8, 128], strides = [1, 1]} : vector<160x128xf32> to vector<8x128xf32>
      %166 = arith.truncf %165 : vector<8x128xf32> to vector<8x128xbf16>
      %c384 = arith.constant 384 : index
      %c0_75 = arith.constant 0 : index
      %167 = vector.load %arg14[%c384, %c0_75] : memref<2560x512xbf16, #tpu.memory_space<vmem>>, vector<128x512xbf16>
      %cst_76 = arith.constant dense<0.000000e+00> : vector<8x512xf32>
      %168 = tpu.matmul %166, %167, %cst_76 {dimension_numbers = #tpu.dot_dimension_numbers<[1], [0], [0], [1], [0, 0, 1, 1], [], []>} : vector<8x128xbf16>, vector<128x512xbf16>, vector<8x512xf32> -> vector<8x512xf32>
      %169 = arith.addf %164, %168 : vector<8x512xf32>
      %170 = vector.extract_strided_slice %143 {offsets = [32, 0], sizes = [8, 128], strides = [1, 1]} : vector<160x128xf32> to vector<8x128xf32>
      %171 = arith.truncf %170 : vector<8x128xf32> to vector<8x128xbf16>
      %c512 = arith.constant 512 : index
      %c0_77 = arith.constant 0 : index
      %172 = vector.load %arg14[%c512, %c0_77] : memref<2560x512xbf16, #tpu.memory_space<vmem>>, vector<128x512xbf16>
      %cst_78 = arith.constant dense<0.000000e+00> : vector<8x512xf32>
      %173 = tpu.matmul %171, %172, %cst_78 {dimension_numbers = #tpu.dot_dimension_numbers<[1], [0], [0], [1], [0, 0, 1, 1], [], []>} : vector<8x128xbf16>, vector<128x512xbf16>, vector<8x512xf32> -> vector<8x512xf32>
      %174 = arith.addf %169, %173 : vector<8x512xf32>
      %175 = vector.extract_strided_slice %143 {offsets = [40, 0], sizes = [8, 128], strides = [1, 1]} : vector<160x128xf32> to vector<8x128xf32>
      %176 = arith.truncf %175 : vector<8x128xf32> to vector<8x128xbf16>
      %c640 = arith.constant 640 : index
      %c0_79 = arith.constant 0 : index
      %177 = vector.load %arg14[%c640, %c0_79] : memref<2560x512xbf16, #tpu.memory_space<vmem>>, vector<128x512xbf16>
      %cst_80 = arith.constant dense<0.000000e+00> : vector<8x512xf32>
      %178 = tpu.matmul %176, %177, %cst_80 {dimension_numbers = #tpu.dot_dimension_numbers<[1], [0], [0], [1], [0, 0, 1, 1], [], []>} : vector<8x128xbf16>, vector<128x512xbf16>, vector<8x512xf32> -> vector<8x512xf32>
      %179 = arith.addf %174, %178 : vector<8x512xf32>
      %180 = vector.extract_strided_slice %143 {offsets = [48, 0], sizes = [8, 128], strides = [1, 1]} : vector<160x128xf32> to vector<8x128xf32>
      %181 = arith.truncf %180 : vector<8x128xf32> to vector<8x128xbf16>
      %c768 = arith.constant 768 : index
      %c0_81 = arith.constant 0 : index
      %182 = vector.load %arg14[%c768, %c0_81] : memref<2560x512xbf16, #tpu.memory_space<vmem>>, vector<128x512xbf16>
      %cst_82 = arith.constant dense<0.000000e+00> : vector<8x512xf32>
      %183 = tpu.matmul %181, %182, %cst_82 {dimension_numbers = #tpu.dot_dimension_numbers<[1], [0], [0], [1], [0, 0, 1, 1], [], []>} : vector<8x128xbf16>, vector<128x512xbf16>, vector<8x512xf32> -> vector<8x512xf32>
      %184 = arith.addf %179, %183 : vector<8x512xf32>
      %185 = vector.extract_strided_slice %143 {offsets = [56, 0], sizes = [8, 128], strides = [1, 1]} : vector<160x128xf32> to vector<8x128xf32>
      %186 = arith.truncf %185 : vector<8x128xf32> to vector<8x128xbf16>
      %c896 = arith.constant 896 : index
      %c0_83 = arith.constant 0 : index
      %187 = vector.load %arg14[%c896, %c0_83] : memref<2560x512xbf16, #tpu.memory_space<vmem>>, vector<128x512xbf16>
      %cst_84 = arith.constant dense<0.000000e+00> : vector<8x512xf32>
      %188 = tpu.matmul %186, %187, %cst_84 {dimension_numbers = #tpu.dot_dimension_numbers<[1], [0], [0], [1], [0, 0, 1, 1], [], []>} : vector<8x128xbf16>, vector<128x512xbf16>, vector<8x512xf32> -> vector<8x512xf32>
      %189 = arith.addf %184, %188 : vector<8x512xf32>
      %190 = vector.extract_strided_slice %143 {offsets = [64, 0], sizes = [8, 128], strides = [1, 1]} : vector<160x128xf32> to vector<8x128xf32>
      %191 = arith.truncf %190 : vector<8x128xf32> to vector<8x128xbf16>
      %c1024 = arith.constant 1024 : index
      %c0_85 = arith.constant 0 : index
      %192 = vector.load %arg14[%c1024, %c0_85] : memref<2560x512xbf16, #tpu.memory_space<vmem>>, vector<128x512xbf16>
      %cst_86 = arith.constant dense<0.000000e+00> : vector<8x512xf32>
      %193 = tpu.matmul %191, %192, %cst_86 {dimension_numbers = #tpu.dot_dimension_numbers<[1], [0], [0], [1], [0, 0, 1, 1], [], []>} : vector<8x128xbf16>, vector<128x512xbf16>, vector<8x512xf32> -> vector<8x512xf32>
      %194 = arith.addf %189, %193 : vector<8x512xf32>
      %195 = vector.extract_strided_slice %143 {offsets = [72, 0], sizes = [8, 128], strides = [1, 1]} : vector<160x128xf32> to vector<8x128xf32>
      %196 = arith.truncf %195 : vector<8x128xf32> to vector<8x128xbf16>
      %c1152 = arith.constant 1152 : index
      %c0_87 = arith.constant 0 : index
      %197 = vector.load %arg14[%c1152, %c0_87] : memref<2560x512xbf16, #tpu.memory_space<vmem>>, vector<128x512xbf16>
      %cst_88 = arith.constant dense<0.000000e+00> : vector<8x512xf32>
      %198 = tpu.matmul %196, %197, %cst_88 {dimension_numbers = #tpu.dot_dimension_numbers<[1], [0], [0], [1], [0, 0, 1, 1], [], []>} : vector<8x128xbf16>, vector<128x512xbf16>, vector<8x512xf32> -> vector<8x512xf32>
      %199 = arith.addf %194, %198 : vector<8x512xf32>
      %200 = vector.extract_strided_slice %143 {offsets = [80, 0], sizes = [8, 128], strides = [1, 1]} : vector<160x128xf32> to vector<8x128xf32>
      %201 = arith.truncf %200 : vector<8x128xf32> to vector<8x128xbf16>
      %c1280 = arith.constant 1280 : index
      %c0_89 = arith.constant 0 : index
      %202 = vector.load %arg14[%c1280, %c0_89] : memref<2560x512xbf16, #tpu.memory_space<vmem>>, vector<128x512xbf16>
      %cst_90 = arith.constant dense<0.000000e+00> : vector<8x512xf32>
      %203 = tpu.matmul %201, %202, %cst_90 {dimension_numbers = #tpu.dot_dimension_numbers<[1], [0], [0], [1], [0, 0, 1, 1], [], []>} : vector<8x128xbf16>, vector<128x512xbf16>, vector<8x512xf32> -> vector<8x512xf32>
      %204 = arith.addf %199, %203 : vector<8x512xf32>
      %205 = vector.extract_strided_slice %143 {offsets = [88, 0], sizes = [8, 128], strides = [1, 1]} : vector<160x128xf32> to vector<8x128xf32>
      %206 = arith.truncf %205 : vector<8x128xf32> to vector<8x128xbf16>
      %c1408 = arith.constant 1408 : index
      %c0_91 = arith.constant 0 : index
      %207 = vector.load %arg14[%c1408, %c0_91] : memref<2560x512xbf16, #tpu.memory_space<vmem>>, vector<128x512xbf16>
      %cst_92 = arith.constant dense<0.000000e+00> : vector<8x512xf32>
      %208 = tpu.matmul %206, %207, %cst_92 {dimension_numbers = #tpu.dot_dimension_numbers<[1], [0], [0], [1], [0, 0, 1, 1], [], []>} : vector<8x128xbf16>, vector<128x512xbf16>, vector<8x512xf32> -> vector<8x512xf32>
      %209 = arith.addf %204, %208 : vector<8x512xf32>
      %210 = vector.extract_strided_slice %143 {offsets = [96, 0], sizes = [8, 128], strides = [1, 1]} : vector<160x128xf32> to vector<8x128xf32>
      %211 = arith.truncf %210 : vector<8x128xf32> to vector<8x128xbf16>
      %c1536 = arith.constant 1536 : index
      %c0_93 = arith.constant 0 : index
      %212 = vector.load %arg14[%c1536, %c0_93] : memref<2560x512xbf16, #tpu.memory_space<vmem>>, vector<128x512xbf16>
      %cst_94 = arith.constant dense<0.000000e+00> : vector<8x512xf32>
      %213 = tpu.matmul %211, %212, %cst_94 {dimension_numbers = #tpu.dot_dimension_numbers<[1], [0], [0], [1], [0, 0, 1, 1], [], []>} : vector<8x128xbf16>, vector<128x512xbf16>, vector<8x512xf32> -> vector<8x512xf32>
      %214 = arith.addf %209, %213 : vector<8x512xf32>
      %215 = vector.extract_strided_slice %143 {offsets = [104, 0], sizes = [8, 128], strides = [1, 1]} : vector<160x128xf32> to vector<8x128xf32>
      %216 = arith.truncf %215 : vector<8x128xf32> to vector<8x128xbf16>
      %c1664 = arith.constant 1664 : index
      %c0_95 = arith.constant 0 : index
      %217 = vector.load %arg14[%c1664, %c0_95] : memref<2560x512xbf16, #tpu.memory_space<vmem>>, vector<128x512xbf16>
      %cst_96 = arith.constant dense<0.000000e+00> : vector<8x512xf32>
      %218 = tpu.matmul %216, %217, %cst_96 {dimension_numbers = #tpu.dot_dimension_numbers<[1], [0], [0], [1], [0, 0, 1, 1], [], []>} : vector<8x128xbf16>, vector<128x512xbf16>, vector<8x512xf32> -> vector<8x512xf32>
      %219 = arith.addf %214, %218 : vector<8x512xf32>
      %220 = vector.extract_strided_slice %143 {offsets = [112, 0], sizes = [8, 128], strides = [1, 1]} : vector<160x128xf32> to vector<8x128xf32>
      %221 = arith.truncf %220 : vector<8x128xf32> to vector<8x128xbf16>
      %c1792 = arith.constant 1792 : index
      %c0_97 = arith.constant 0 : index
      %222 = vector.load %arg14[%c1792, %c0_97] : memref<2560x512xbf16, #tpu.memory_space<vmem>>, vector<128x512xbf16>
      %cst_98 = arith.constant dense<0.000000e+00> : vector<8x512xf32>
      %223 = tpu.matmul %221, %222, %cst_98 {dimension_numbers = #tpu.dot_dimension_numbers<[1], [0], [0], [1], [0, 0, 1, 1], [], []>} : vector<8x128xbf16>, vector<128x512xbf16>, vector<8x512xf32> -> vector<8x512xf32>
      %224 = arith.addf %219, %223 : vector<8x512xf32>
      %225 = vector.extract_strided_slice %143 {offsets = [120, 0], sizes = [8, 128], strides = [1, 1]} : vector<160x128xf32> to vector<8x128xf32>
      %226 = arith.truncf %225 : vector<8x128xf32> to vector<8x128xbf16>
      %c1920 = arith.constant 1920 : index
      %c0_99 = arith.constant 0 : index
      %227 = vector.load %arg14[%c1920, %c0_99] : memref<2560x512xbf16, #tpu.memory_space<vmem>>, vector<128x512xbf16>
      %cst_100 = arith.constant dense<0.000000e+00> : vector<8x512xf32>
      %228 = tpu.matmul %226, %227, %cst_100 {dimension_numbers = #tpu.dot_dimension_numbers<[1], [0], [0], [1], [0, 0, 1, 1], [], []>} : vector<8x128xbf16>, vector<128x512xbf16>, vector<8x512xf32> -> vector<8x512xf32>
      %229 = arith.addf %224, %228 : vector<8x512xf32>
      %230 = vector.extract_strided_slice %143 {offsets = [128, 0], sizes = [8, 128], strides = [1, 1]} : vector<160x128xf32> to vector<8x128xf32>
      %231 = arith.truncf %230 : vector<8x128xf32> to vector<8x128xbf16>
      %c2048 = arith.constant 2048 : index
      %c0_101 = arith.constant 0 : index
      %232 = vector.load %arg14[%c2048, %c0_101] : memref<2560x512xbf16, #tpu.memory_space<vmem>>, vector<128x512xbf16>
      %cst_102 = arith.constant dense<0.000000e+00> : vector<8x512xf32>
      %233 = tpu.matmul %231, %232, %cst_102 {dimension_numbers = #tpu.dot_dimension_numbers<[1], [0], [0], [1], [0, 0, 1, 1], [], []>} : vector<8x128xbf16>, vector<128x512xbf16>, vector<8x512xf32> -> vector<8x512xf32>
      %234 = arith.addf %229, %233 : vector<8x512xf32>
      %235 = vector.extract_strided_slice %143 {offsets = [136, 0], sizes = [8, 128], strides = [1, 1]} : vector<160x128xf32> to vector<8x128xf32>
      %236 = arith.truncf %235 : vector<8x128xf32> to vector<8x128xbf16>
      %c2176 = arith.constant 2176 : index
      %c0_103 = arith.constant 0 : index
      %237 = vector.load %arg14[%c2176, %c0_103] : memref<2560x512xbf16, #tpu.memory_space<vmem>>, vector<128x512xbf16>
      %cst_104 = arith.constant dense<0.000000e+00> : vector<8x512xf32>
      %238 = tpu.matmul %236, %237, %cst_104 {dimension_numbers = #tpu.dot_dimension_numbers<[1], [0], [0], [1], [0, 0, 1, 1], [], []>} : vector<8x128xbf16>, vector<128x512xbf16>, vector<8x512xf32> -> vector<8x512xf32>
      %239 = arith.addf %234, %238 : vector<8x512xf32>
      %240 = vector.extract_strided_slice %143 {offsets = [144, 0], sizes = [8, 128], strides = [1, 1]} : vector<160x128xf32> to vector<8x128xf32>
      %241 = arith.truncf %240 : vector<8x128xf32> to vector<8x128xbf16>
      %c2304 = arith.constant 2304 : index
      %c0_105 = arith.constant 0 : index
      %242 = vector.load %arg14[%c2304, %c0_105] : memref<2560x512xbf16, #tpu.memory_space<vmem>>, vector<128x512xbf16>
      %cst_106 = arith.constant dense<0.000000e+00> : vector<8x512xf32>
      %243 = tpu.matmul %241, %242, %cst_106 {dimension_numbers = #tpu.dot_dimension_numbers<[1], [0], [0], [1], [0, 0, 1, 1], [], []>} : vector<8x128xbf16>, vector<128x512xbf16>, vector<8x512xf32> -> vector<8x512xf32>
      %244 = arith.addf %239, %243 : vector<8x512xf32>
      %245 = vector.extract_strided_slice %143 {offsets = [152, 0], sizes = [8, 128], strides = [1, 1]} : vector<160x128xf32> to vector<8x128xf32>
      %246 = arith.truncf %245 : vector<8x128xf32> to vector<8x128xbf16>
      %c2432 = arith.constant 2432 : index
      %c0_107 = arith.constant 0 : index
      %247 = vector.load %arg14[%c2432, %c0_107] : memref<2560x512xbf16, #tpu.memory_space<vmem>>, vector<128x512xbf16>
      %cst_108 = arith.constant dense<0.000000e+00> : vector<8x512xf32>
      %248 = tpu.matmul %246, %247, %cst_108 {dimension_numbers = #tpu.dot_dimension_numbers<[1], [0], [0], [1], [0, 0, 1, 1], [], []>} : vector<8x128xbf16>, vector<128x512xbf16>, vector<8x512xf32> -> vector<8x512xf32>
      %249 = arith.addf %244, %248 : vector<8x512xf32>
      %c0_109 = arith.constant 0 : index
      %c0_110 = arith.constant 0 : index
      %250 = vector.load %arg15[%c0_109, %c0_110] : memref<1x512xf32, #tpu.memory_space<vmem>>, vector<1x512xf32>
      %251 = vector.broadcast %250 : vector<1x512xf32> to vector<8x512xf32>
      %252 = arith.addf %249, %251 : vector<8x512xf32>
      %253 = arith.truncf %252 : vector<8x512xf32> to vector<8x512xbf16>
      %c0_111 = arith.constant 0 : index
      %c0_112 = arith.constant 0 : index
      %254 = vector.load %arg16[%c0_111, %c0_112] : memref<512x128xbf16, #tpu.memory_space<vmem>>, vector<512x128xbf16>
      %cst_113 = arith.constant dense<0.000000e+00> : vector<8x128xf32>
      %255 = tpu.matmul %253, %254, %cst_113 {dimension_numbers = #tpu.dot_dimension_numbers<[1], [0], [0], [1], [0, 0, 1, 1], [], []>} : vector<8x512xbf16>, vector<512x128xbf16>, vector<8x128xf32> -> vector<8x128xf32>
      %c0_114 = arith.constant 0 : index
      %c0_115 = arith.constant 0 : index
      %256 = vector.load %arg17[%c0_114, %c0_115] : memref<1x128xf32, #tpu.memory_space<vmem>>, vector<1x128xf32>
      %257 = vector.broadcast %256 : vector<1x128xf32> to vector<8x128xf32>
      %258 = arith.addf %255, %257 : vector<8x128xf32>
      %259 = tpu.iota {dimensions = array<i32: 1>} : vector<1x128xi32>
      %c3_i32 = arith.constant 3 : i32
      %260 = vector.broadcast %c3_i32 : i32 to vector<1x128xi32>
      %261 = arith.cmpi slt, %259, %260 : vector<1x128xi32>
      %cst_116 = arith.constant -1.000000e+30 : f32
      %262 = vector.shape_cast %261 : vector<1x128xi1> to vector<1x128xi1>
      %263 = vector.broadcast %262 : vector<1x128xi1> to vector<8x128xi1>
      %264 = vector.broadcast %cst_116 : f32 to vector<8x128xf32>
      %265 = arith.select %263, %258, %264 : vector<8x128xi1>, vector<8x128xf32>
      %cst_117 = arith.constant dense<0xFF800000> : vector<8xf32>
      %266 = vector.multi_reduction <maximumf>, %265, %cst_117 [1] : vector<8x128xf32> to vector<8xf32>
      %267 = vector.shape_cast %266 : vector<8xf32> to vector<8x1xf32>
      %268 = vector.broadcast %267 : vector<8x1xf32> to vector<8x128xf32>
      %269 = arith.subf %265, %268 : vector<8x128xf32>
      %270 = math.exp %269 : vector<8x128xf32>
      %cst_118 = arith.constant dense<0.000000e+00> : vector<8xf32>
      %271 = vector.multi_reduction <add>, %270, %cst_118 [1] : vector<8x128xf32> to vector<8xf32>
      %272 = vector.shape_cast %271 : vector<8xf32> to vector<8x1xf32>
      %273 = tpu.reciprocal %272 {approx = true} : vector<8x1xf32> -> vector<8x1xf32>
      %274 = vector.broadcast %273 : vector<8x1xf32> to vector<8x128xf32>
      %275 = arith.mulf %270, %274 : vector<8x128xf32>
      %c0_119 = arith.constant 0 : index
      %c0_120 = arith.constant 0 : index
      %276 = vector.load %arg18[%c0_119, %c0_120] : memref<8x128xf32, #tpu.memory_space<vmem>>, vector<8x128xf32>
      tpu.vector_store %arg18[%c0_119, %c0_120], %275 {strides = array<i32>} : memref<8x128xf32, #tpu.memory_space<vmem>>, vector<8x128xf32>,
    } else {
    }
    return
  }
  func.func @transform_0(%arg0: i32) -> (i32, i32, i32) {
    %c0_i32 = arith.constant 0 : i32
    %c0_i32_0 = arith.constant 0 : i32
    %c0_i32_1 = arith.constant 0 : i32
    %c0_i32_2 = arith.constant 0 : i32
    return %c0_i32, %c0_i32_0, %c0_i32_1 : i32, i32, i32
  }
  func.func @transform_1(%arg0: i32) -> (i32, i32, i32) {
    %c0_i32 = arith.constant 0 : i32
    %c0_i32_0 = arith.constant 0 : i32
    %c0_i32_1 = arith.constant 0 : i32
    return %arg0, %c0_i32, %c0_i32_0 : i32, i32, i32
  }
  func.func @transform_2(%arg0: i32) -> (i32, i32, i32) {
    %c0_i32 = arith.constant 0 : i32
    %c0_i32_0 = arith.constant 0 : i32
    %c0_i32_1 = arith.constant 0 : i32
    return %arg0, %c0_i32, %c0_i32_0 : i32, i32, i32
  }
  func.func @transform_3(%arg0: i32) -> (i32, i32, i32) {
    %c0_i32 = arith.constant 0 : i32
    %c0_i32_0 = arith.constant 0 : i32
    %c0_i32_1 = arith.constant 0 : i32
    return %arg0, %c0_i32, %c0_i32_0 : i32, i32, i32
  }
  func.func @transform_4(%arg0: i32) -> (i32, i32, i32) {
    %c0_i32 = arith.constant 0 : i32
    %c0_i32_0 = arith.constant 0 : i32
    %c0_i32_1 = arith.constant 0 : i32
    return %arg0, %c0_i32, %c0_i32_0 : i32, i32, i32
  }
  func.func @transform_5(%arg0: i32) -> (i32, i32, i32) {
    %c0_i32 = arith.constant 0 : i32
    %c0_i32_0 = arith.constant 0 : i32
    %c0_i32_1 = arith.constant 0 : i32
    return %arg0, %c0_i32, %c0_i32_0 : i32, i32, i32
  }
  func.func @transform_6(%arg0: i32) -> (i32, i32, i32) {
    %c0_i32 = arith.constant 0 : i32
    %c0_i32_0 = arith.constant 0 : i32
    %c0_i32_1 = arith.constant 0 : i32
    return %arg0, %c0_i32, %c0_i32_0 : i32, i32, i32
  }
  func.func @transform_7(%arg0: i32) -> (i32, i32, i32) {
    %c0_i32 = arith.constant 0 : i32
    %c0_i32_0 = arith.constant 0 : i32
    %c0_i32_1 = arith.constant 0 : i32
    return %arg0, %c0_i32, %c0_i32_0 : i32, i32, i32
  }
  func.func @transform_8(%arg0: i32) -> (i32, i32, i32) {
    %c0_i32 = arith.constant 0 : i32
    %c0_i32_0 = arith.constant 0 : i32
    %c0_i32_1 = arith.constant 0 : i32
    return %arg0, %c0_i32, %c0_i32_0 : i32, i32, i32
  }
  func.func @transform_9(%arg0: i32) -> (i32, i32, i32) {
    %c0_i32 = arith.constant 0 : i32
    %c0_i32_0 = arith.constant 0 : i32
    %c0_i32_1 = arith.constant 0 : i32
    return %arg0, %c0_i32, %c0_i32_0 : i32, i32, i32
  }
  func.func @transform_10(%arg0: i32) -> (i32, i32, i32) {
    %c0_i32 = arith.constant 0 : i32
    %c0_i32_0 = arith.constant 0 : i32
    %c0_i32_1 = arith.constant 0 : i32
    return %arg0, %c0_i32, %c0_i32_0 : i32, i32, i32
  }
  func.func @transform_11(%arg0: i32) -> (i32, i32, i32) {
    %c0_i32 = arith.constant 0 : i32
    %c0_i32_0 = arith.constant 0 : i32
    %c0_i32_1 = arith.constant 0 : i32
    return %arg0, %c0_i32, %c0_i32_0 : i32, i32, i32
  }
  func.func @transform_12(%arg0: i32) -> (i32, i32, i32) {
    %c0_i32 = arith.constant 0 : i32
    %c0_i32_0 = arith.constant 0 : i32
    %c0_i32_1 = arith.constant 0 : i32
    return %arg0, %c0_i32, %c0_i32_0 : i32, i32, i32
  }
  func.func @transform_13(%arg0: i32) -> (i32, i32) {
    %c0_i32 = arith.constant 0 : i32
    %c0_i32_0 = arith.constant 0 : i32
    %c0_i32_1 = arith.constant 0 : i32
    return %c0_i32, %c0_i32_0 : i32, i32
  }
  func.func @transform_14(%arg0: i32) -> (i32, i32) {
    %c0_i32 = arith.constant 0 : i32
    %c0_i32_0 = arith.constant 0 : i32
    %c0_i32_1 = arith.constant 0 : i32
    return %c0_i32, %c0_i32_0 : i32, i32
  }
  func.func @transform_15(%arg0: i32) -> (i32, i32) {
    %c0_i32 = arith.constant 0 : i32
    %c0_i32_0 = arith.constant 0 : i32
    %c0_i32_1 = arith.constant 0 : i32
    return %c0_i32, %c0_i32_0 : i32, i32
  }
  func.func @transform_16(%arg0: i32) -> (i32, i32) {
    %c0_i32 = arith.constant 0 : i32
    %c0_i32_0 = arith.constant 0 : i32
    %c0_i32_1 = arith.constant 0 : i32
    return %c0_i32, %c0_i32_0 : i32, i32
  }
  func.func @transform_17(%arg0: i32) -> (i32, i32) {
    %c0_i32 = arith.constant 0 : i32
    %c0_i32_0 = arith.constant 0 : i32
    %c0_i32_1 = arith.constant 0 : i32
    return %c0_i32, %c0_i32_0 : i32, i32
  }
}

</mosaic_0001>

<bundles_post_ra>
// kernel: trans_forward.1
= control target key start
LH: loop header
LB: loop body
LE: loop exit
PB: predicated region body
PF: predicated region fallthrough
CT: control target
= control target key end

     0   :  { %s25296_s0 = inlined_call_operand.vmem [shape: f32[20,8,128], index: 0, kind: input, shape index: {}]   ;;  %s25297_s1 = inlined_call_operand.hbm [shape: bf16[6,128,384], index: 1, kind: input, shape index: {}]   ;;  %s25298_s2 = inlined_call_operand.hbm [shape: f32[6,1,384], index: 2, kind: input, shape index: {}]   ;;  %s25299_s3 = inlined_call_operand.hbm [shape: bf16[6,128,128], index: 3, kind: input, shape index: {}]   ;;  %s25300_s4 = inlined_call_operand.hbm [shape: f32[6,1,128], index: 4, kind: input, shape index: {}]   ;;  %s25301_s5 = inlined_call_operand.hbm [shape: f32[6,1,128], index: 5, kind: input, shape index: {}]   ;;  %s25302_s6 = inlined_call_operand.hbm [shape: f32[6,1,128], index: 6, kind: input, shape index: {}]   ;;  %s25303_s7 = inlined_call_operand.hbm [shape: bf16[6,128,1024], index: 7, kind: input, shape index: {}]   ;;  %s25304_s8 = inlined_call_operand.hbm [shape: f32[6,1,1024], index: 8, kind: input, shape index: {}]   ;;  %s25305_s9 = inlined_call_operand.hbm [shape: bf16[6,1024,128], index: 9, kind: input, shape index: {}]   ;;  %s25306_s10 = inlined_call_operand.hbm [shape: f32[6,1,128], index: 10, kind: input, shape index: {}]   ;;  %s25307_s11 = inlined_call_operand.hbm [shape: f32[6,1,128], index: 11, kind: input, shape index: {}]   ;;  %s25308_s12 = inlined_call_operand.hbm [shape: f32[6,1,128], index: 12, kind: input, shape index: {}]   ;;  %s25309_s13 = inlined_call_operand.hbm [shape: bf16[2560,512], index: 13, kind: input, shape index: {}]   ;;  %s25310_s14 = inlined_call_operand.hbm [shape: f32[1,512], index: 14, kind: input, shape index: {}]   ;;  %s25311_s15 = inlined_call_operand.hbm [shape: bf16[512,128], index: 15, kind: input, shape index: {}]   ;;  %s25312_s16 = inlined_call_operand.hbm [shape: f32[1,128], index: 16, kind: input, shape index: {}]   ;;  %s25313_s17 = inlined_call_operand.vmem [shape: f32[8,128], index: 17, kind: output, shape index: {}]  }
   0x1   :  { %25396 = sst [smem:[#allocation79_spill]] %s25296_s0 }
   0x2   :  { %25397 = sst [smem:[#allocation80_spill]] %s25297_s1 }
   0x3   :  { %25398 = sst [smem:[#allocation81_spill]] %s25298_s2 }
   0x4   :  { %25399 = sst [smem:[#allocation82_spill]] %s25300_s4 }
   0x5   :  { %25400 = sst [smem:[#allocation83_spill]] %s25302_s6 }
   0x6   :  { %25401 = sst [smem:[#allocation84_spill]] %s25303_s7 }
   0x7   :  { %25402 = sst [smem:[#allocation85_spill]] %s25305_s9 }
   0x8   :  { %25403 = sst [smem:[#allocation86_spill]] %s25307_s11 }
   0x9   :  { %25404 = sst [smem:[#allocation87_spill]] %s25308_s12 }
   0xa   :  { %25405 = sst [smem:[#allocation88_spill]] %s25313_s17 }
   0xb   :  { %22 = vsyncpa [#allocation4], 0 }
   0xc   :  { %24 = vsyncpa [#allocation4 + $0x1], 0 }
   0xd   :  { %25 = vsyncpa [#allocation6], 0 }
   0xe   :  { %27 = vsyncpa [#allocation6 + $0x1], 0 }
   0xf   :  { %28 = vsyncpa [#allocation9], 0 }
  0x10   :  { %30 = vsyncpa [#allocation9 + $0x1], 0 }
  0x11   :  { %31 = vsyncpa [#allocation12], 0 }
  0x12   :  { %33 = vsyncpa [#allocation12 + $0x1], 0 }
  0x13   :  { %34 = vsyncpa [#allocation15], 0 }
  0x14   :  { %36 = vsyncpa [#allocation15 + $0x1], 0 }
  0x15   :  { %37 = vsyncpa [#allocation18], 0 }
  0x16   :  { %39 = vsyncpa [#allocation18 + $0x1], 0 }
  0x17   :  { %40 = vsyncpa [#allocation21], 0 }
  0x18   :  { %42 = vsyncpa [#allocation21 + $0x1], 0 }
  0x19   :  { %43 = vsyncpa [#allocation24], 0 }
  0x1a   :  { %44 = vsyncpa [#allocation27], 0  ;;  %s21742_s24 = smov 0   ;;  %s21744_s25 = smov 0  }
  0x1b   :  { %s21746_s26 = smov 0   ;;  %s21748_s27 = smov 0  }
  0x1c LB: > { %25406 = sst [smem:[#allocation38_spill]] %s21613_s25  ;;  %s21761_s28 = sadd.s32 4294967295, %s21621_s27   ;;  %s21621_s27 = sphi %s21748_s27, %s25568_s27   ;;  %s21617_s26 = sphi %s21746_s26, %s25571_s26   ;;  %s21613_s25 = sphi %s21744_s25, %s25570_s25   ;;  %s21609_s24 = sphi %s21742_s24, %s25569_s24  }
  0x1d   : > { %25407 = sst [smem:[#allocation39_spill]] %s21617_s26  ;;  %s21764_s29 = sadd.s32 1, %s21621_s27  }
  0x1e   : > { %25408 = sst [smem:[#allocation40_spill]] %s21761_s28  ;;  %s75_s0 = ssub.s32 %s21621_s27, %s21764_s29 }
  0x1f   : > { %25409 = sst [smem:[#allocation41_spill]] %s21764_s29  ;;  %s78_s30 = sadd.s32 1, %s21617_s26 }
  0x20   : > { %p76_p0 = scmp.eq.s32.totalorder %s75_s0, 0  ;;  %p85_p1 = scmp.ne.s32.totalorder %s21617_s26, %s21613_s25 }
  0x21   : > { %p86_p2 = scmp.eq.s32.totalorder %s21621_s27, 0  ;;  %p91_p3 = scmp.ne.s32.totalorder %s21613_s25, %s21609_s24 }
  0x22   : > { %s21774_s18 = scalar_select %p76_p0, %s21617_s26, %s78_s30  }
  0x23   : > { %p21776_p4 = por %p86_p2, %p85_p1  ;;  %p25321_p5 = scmp.eq.s32.totalorder %s21761_s28, 0 }
  0x24   : > { %25410 = sst [smem:[#allocation42_spill]] %s21774_s18  ;;  %p17480_p6 = scmp.ge.s32.totalorder %s21621_s27, 1 }
  0x25   : > { %p493_p7 = scmp.lt.s32.totalorder %s21621_s27, 7  ;;  %p21785_p8 = por %p25321_p5, %p91_p3 }
  0x26   : > { %s21623_s21 = smov [#allocation22]   ;;  %p19615_p13 = scmp.lt.s32.totalorder %s21621_s27, 6 }
  0x27   : > { %s25412_s1 = scalar_select %p21785_p8, 1, 0 }
  0x28   : > { %p21790_p10 = pnand %p17480_p6, %p493_p7  ;;  %s508_s22 = sshll.u32 %s21623_s21, 4  ;;  %s509_s22 = int_to_ptr.vmem [resolvable:$true] %s508_s22 }
  0x29   : > { %25413 = sst [smem:[#allocation43_spill]] %s25412_s1  ;;  %s21804_s24 = sand.u32 1, %s21617_s26  }
  0x2a   : > { %s25414_s20 = scalar_select %p21790_p10, 1, 0 }
  0x2b   : > { %p19561_p11 = pneg %p21790_p10  ;;  %p21808_p0 = pnand %p19615_p13, %p21776_p4 }
  0x2c   : > { %25415 = sst [smem:[#allocation44_spill]] %s25414_s20  ;;  %s21079_s21 = scalar_lea.hbm %s25309_s13, 81920 }
  0x2d   : > { %p21798_p12 = pnand %p19561_p11, %p25321_p5  ;;  %p21080_p1 = scmp.ne.s32.totalorder %s25309_s13, %s21079_s21 }
  0x2e   : > { %s25417_s0 = scalar_select %p21808_p0, 1, 0 }
  0x2f   : > { %s25416_s23 = scalar_select %p21798_p12, 1, 0 }
  0x30   : > { %p21820_p2 = pneg %p21798_p12  ;;  %p21086_p6 = scmp.lt.u32.totalorder %s21079_s21, %s25309_s13 }
  0x32   : > { %s25418_s28 = scalar_select %p21820_p2, 1, 0 }
  0x33   : > { %p21082_p3 = pnand %p21820_p2, %p21080_p1 }
  0x35   : > { %p21083_p4 = pneg %p21082_p3 }
  0x37   : > { %p21088_p7 = pnand %p21086_p6, %p21083_p4 }
  0x39   : > { %21091 = shalt.err (!%p21088_p7)
}
  0x3a   : > { %s21092_s18 = scalar_lea.vmem %s509_s22, 81920  ;;  %p21100_p5 = scmp.lt.s32.totalorder %s509_s22, %s509_s22 }
  0x3b   : > { %p21093_p11 = scmp.ne.s32.totalorder %s509_s22, %s21092_s18  ;;  %p21101_p8 = scmp.lt.s32.totalorder %s21092_s18, %s21092_s18 }
  0x3d   : > { %p21095_p13 = pnand %p21093_p11, %p21820_p2  ;;  %p21102_p10 = por %p21101_p8, %p21100_p5 }
  0x3f   : > { %p21096_p9 = pneg %p21095_p13 }
  0x41   : > { %p21103_p0 = pnand %p21102_p10, %p21096_p9 }
  0x43   : > { %21106 = shalt.err (!%p21103_p0)
}
  0x44   : > { %s21624_s17 = smov 256   ;;  %s21625_s29 = smov 16  }
  0x45   : > { %19564 = dma.hbm_to_vmem [thread:$0]  (!%p21798_p12), %s25309_s13, 81920, %s509_s22, [#allocation21], %s21624_s17, %s21624_s17, %s21625_s29  }
  0x46   : > { %s21626_s21 = smov [#allocation23]   ;;  %s21837_s1 = sand.u32 1, %s21621_s27  }
  0x47   : > { %s522_s19 = sshll.u32 %s21626_s21, 4  ;;  %s21107_s20 = scalar_lea.hbm %s25310_s14, 64  ;;  %s523_s19 = int_to_ptr.vmem [resolvable:$true] %s522_s19 }
  0x48   : > { %p21108_p5 = scmp.ne.s32.totalorder %s25310_s14, %s21107_s20  ;;  %p21114_p10 = scmp.lt.u32.totalorder %s21107_s20, %s25310_s14 }
  0x4a   : > { %p21110_p8 = pnand %p21108_p5, %p21820_p2 }
  0x4c   : > { %p21111_p9 = pneg %p21110_p8 }
  0x4e   : > { %p21116_p0 = pnand %p21114_p10, %p21111_p9 }
  0x50   : > { %21119 = shalt.err (!%p21116_p0)
}
  0x51   : > { %s21120_s22 = scalar_lea.vmem %s523_s19, 64  ;;  %p21128_p6 = scmp.lt.s32.totalorder %s523_s19, %s523_s19 }
  0x52   : > { %p21121_p1 = scmp.ne.s32.totalorder %s523_s19, %s21120_s22  ;;  %p21129_p7 = scmp.lt.s32.totalorder %s21120_s22, %s21120_s22 }
  0x54   : > { %p21123_p3 = pnand %p21121_p1, %p21820_p2  ;;  %p21130_p11 = por %p21129_p7, %p21128_p6 }
  0x56   : > { %p21124_p4 = pneg %p21123_p3 }
  0x58   : > { %p21131_p13 = pnand %p21130_p11, %p21124_p4 }
  0x5a   : > { %21134 = shalt.err (!%p21131_p13)
}
  0x5b   : > { %19567 = dma.hbm_to_vmem [thread:$0]  (!%p21798_p12), %s25310_s14, 64, %s523_s19, [#allocation24]  }
  0x5c   : > { %s19517_s7 = smul.u32 3, %s21804_s24  ;;  %s25419_s2 = sld [smem:[#allocation81_spill]] }
  0x5d   : > { %s19518_s9 = smul.u32 48, %s21621_s27  ;;  %s21867_s30 = sshll.u32 %s21621_s27, 4 }
  0x5e   : > { %s582_s29 = scalar_lea.vmem [#allocation5], %s19517_s7  ;;  %s25337_s21 = scalar_lea.sflag [#allocation6], %s21837_s1 }
  0x5f   : > { %s590_s26 = sshll.u32 %s582_s29, 4  ;;  %p25420_p8 = scmp.ne.s32.totalorder %s25417_s0, 0  ;;  %s21864_s26 = int_to_ptr.vmem [resolvable:$true] %s590_s26 }
  0x61   : > { %p21874_p9 = pneg %p25420_p8 }
  0x62   : > { %s21862_s17 = scalar_lea.hbm %s25419_s2, %s19518_s9  ;;  %s21140_s12 = scalar_lea.hbm %s25419_s2, 288 }
  0x63   : > { %s21135_s18 = scalar_lea.hbm %s21862_s17, 48  ;;  %p21141_p1 = scmp.lt.u32.totalorder %s21862_s17, %s25419_s2 }
  0x64   : > { %p21136_p5 = scmp.ne.s32.totalorder %s21862_s17, %s21135_s18  ;;  %p21142_p3 = scmp.lt.u32.totalorder %s21140_s12, %s21135_s18 }
  0x65   : > { %s25421_s19 = scalar_select %p21874_p9, 1, 0 }
  0x66   : > { %p21138_p10 = pnand %p21874_p9, %p21136_p5  ;;  %p21143_p4 = por %p21142_p3, %p21141_p1 }
  0x67   : > { %p21144_p6 = scmp.lt.u32.totalorder %s21135_s18, %s21862_s17 }
  0x68   : > { %p21139_p0 = pneg %p21138_p10 }
  0x69   : > { %p21145_p7 = por %p21144_p6, %p21143_p4 }
  0x6b   : > { %p21146_p11 = pnand %p21145_p7, %p21139_p0 }
  0x6d   : > { %21149 = shalt.err (!%p21146_p11)
}
  0x6e   : > { %s21150_s25 = scalar_lea.vmem %s21864_s26, 48  ;;  %s21627_s20 = smov [#allocation5]  }
  0x6f   : > { %p21151_p13 = scmp.ne.s32.totalorder %s21864_s26, %s21150_s25  ;;  %s21155_s29 = sshll.u32 %s21627_s20, 4  ;;  %s21156_s29 = int_to_ptr.vmem [resolvable:$false] %s21155_s29 }
  0x70   : > { %s21157_s22 = scalar_lea.vmem %s21156_s29, 96  ;;  %p21158_p12 = scmp.lt.s32.totalorder %s21864_s26, %s21156_s29 }
  0x71   : > { %p21153_p5 = pnand %p21151_p13, %p21874_p9  ;;  %p21159_p2 = scmp.lt.s32.totalorder %s21157_s22, %s21150_s25 }
  0x73   : > { %p21154_p10 = pneg %p21153_p5  ;;  %p21160_p1 = por %p21159_p2, %p21158_p12 }
  0x75   : > { %p21161_p3 = pnand %p21160_p1, %p21154_p10 }
  0x77   : > { %21164 = shalt.err (!%p21161_p3)
}
  0x78   : > { %19580 = dma.hbm_to_vmem [thread:$0]  (!%p25420_p8), %s21862_s17, 48, %s21864_s26, %s25337_s21  }
  0x79   : > { %s25422_s4 = sld [smem:[#allocation82_spill]]  ;;  %s621_s7 = scalar_lea.vmem [#allocation8], %s21804_s24 }
  0x7a   : > { %s628_s9 = sshll.u32 %s621_s7, 4  ;;  %s25339_s25 = scalar_lea.sflag [#allocation9], %s21837_s1  ;;  %s629_s9 = int_to_ptr.vmem [resolvable:$true] %s628_s9 }
  0x7f   : > { %s21903_s12 = scalar_lea.hbm %s25422_s4, %s21867_s30  ;;  %s21170_s26 = scalar_lea.hbm %s25422_s4, 96 }
  0x80   : > { %s21165_s20 = scalar_lea.hbm %s21903_s12, 16  ;;  %p21171_p4 = scmp.lt.u32.totalorder %s21903_s12, %s25422_s4 }
  0x81   : > { %p21166_p12 = scmp.ne.s32.totalorder %s21903_s12, %s21165_s20  ;;  %p21172_p6 = scmp.lt.u32.totalorder %s21170_s26, %s21165_s20 }
  0x82   : > { %p21174_p11 = scmp.lt.u32.totalorder %s21165_s20, %s21903_s12 }
  0x83   : > { %p21168_p2 = pnand %p21166_p12, %p21874_p9  ;;  %p21173_p7 = por %p21172_p6, %p21171_p4 }
  0x85   : > { %p21169_p0 = pneg %p21168_p2  ;;  %p21175_p13 = por %p21174_p11, %p21173_p7 }
  0x87   : > { %p21176_p5 = pnand %p21175_p13, %p21169_p0 }
  0x89   : > { %21179 = shalt.err (!%p21176_p5)
}
  0x8a   : > { %s21180_s11 = scalar_lea.vmem %s629_s9, 16  ;;  %s21628_s7 = smov [#allocation8]  }
  0x8b   : > { %p21181_p10 = scmp.ne.s32.totalorder %s629_s9, %s21180_s11  ;;  %s21185_s21 = sshll.u32 %s21628_s7, 4  ;;  %s21186_s21 = int_to_ptr.vmem [resolvable:$false] %s21185_s21 }
  0x8c   : > { %s21187_s29 = scalar_lea.vmem %s21186_s21, 32  ;;  %p21188_p12 = scmp.lt.s32.totalorder %s629_s9, %s21186_s21 }
  0x8d   : > { %p21183_p1 = pnand %p21181_p10, %p21874_p9  ;;  %p21189_p2 = scmp.lt.s32.totalorder %s21187_s29, %s21180_s11 }
  0x8f   : > { %p21184_p3 = pneg %p21183_p1  ;;  %p21190_p8 = por %p21189_p2, %p21188_p12 }
  0x91   : > { %p21191_p4 = pnand %p21190_p8, %p21184_p3 }
  0x93   : > { %21194 = shalt.err (!%p21191_p4)
}
  0x94   : > { %p25423_p6 = scmp.ne.s32.totalorder %s25417_s0, 0  ;;  %s25424_s6 = sld [smem:[#allocation83_spill]] }
  0x95   : > { %s655_s21 = scalar_lea.vmem [#allocation11], %s21804_s24  ;;  %s17497_s18 = sshll.u32 %s21804_s24, 3 }
  0x96   : > { %19586 = dma.hbm_to_vmem [thread:$0]  (!%p25423_p6), %s21903_s12, 16, %s629_s9, %s25339_s25  }
  0x97   : > { %s662_s22 = sshll.u32 %s655_s21, 4  ;;  %s25340_s11 = scalar_lea.sflag [#allocation12], %s21837_s1  ;;  %s21933_s22 = int_to_ptr.vmem [resolvable:$true] %s662_s22 }
  0x9a   : > { %s21930_s26 = scalar_lea.hbm %s25424_s6, %s21867_s30  ;;  %s21200_s29 = scalar_lea.hbm %s25424_s6, 96 }
  0x9b   : > { %s21195_s7 = scalar_lea.hbm %s21930_s26, 16  ;;  %p21201_p11 = scmp.lt.u32.totalorder %s21930_s26, %s25424_s6 }
  0x9c   : > { %p21196_p8 = scmp.ne.s32.totalorder %s21930_s26, %s21195_s7  ;;  %p21202_p13 = scmp.lt.u32.totalorder %s21200_s29, %s21195_s7 }
  0x9d   : > { %p21204_p10 = scmp.lt.u32.totalorder %s21195_s7, %s21930_s26 }
  0x9e   : > { %p21198_p0 = pnand %p21196_p8, %p21874_p9  ;;  %p21203_p5 = por %p21202_p13, %p21201_p11 }
  0xa0   : > { %p21199_p7 = pneg %p21198_p0  ;;  %p21205_p1 = por %p21204_p10, %p21203_p5 }
  0xa2   : > { %p21206_p3 = pnand %p21205_p1, %p21199_p7 }
  0xa4   : > { %21209 = shalt.err (!%p21206_p3)
}
  0xa5   : > { %s21210_s21 = scalar_lea.vmem %s21933_s22, 16  ;;  %s21629_s12 = smov [#allocation11]  }
  0xa6   : > { %p21211_p12 = scmp.ne.s32.totalorder %s21933_s22, %s21210_s21  ;;  %s21215_s9 = sshll.u32 %s21629_s12, 4  ;;  %s21216_s9 = int_to_ptr.vmem [resolvable:$false] %s21215_s9 }
  0xa7   : > { %s21217_s20 = scalar_lea.vmem %s21216_s9, 32  ;;  %p21218_p8 = scmp.lt.s32.totalorder %s21933_s22, %s21216_s9 }
  0xa8   : > { %p21213_p2 = pnand %p21211_p12, %p21874_p9  ;;  %p21219_p0 = scmp.lt.s32.totalorder %s21217_s20, %s21210_s21 }
  0xaa   : > { %p21214_p4 = pneg %p21213_p2  ;;  %p21220_p11 = por %p21219_p0, %p21218_p8 }
  0xac   : > { %p21221_p13 = pnand %p21220_p11, %p21214_p4 }
  0xae   : > { %21224 = shalt.err (!%p21221_p13)
}
  0xaf   : > { %19592 = dma.hbm_to_vmem [thread:$0]  (!%p25423_p6), %s21930_s26, 16, %s21933_s22, %s25340_s11  }
  0xb0   : > { %s18481_s7 = sshll.u32 %s21621_s27, 7  ;;  %s694_s21 = scalar_lea.vmem [#allocation14], %s17497_s18 }
  0xb1   : > { %s21964_s12 = scalar_lea.hbm %s25304_s8, %s18481_s7  ;;  %s702_s9 = sshll.u32 %s694_s21, 4  ;;  %s703_s9 = int_to_ptr.vmem [resolvable:$true] %s702_s9 }
  0xb2   : > { %s25342_s20 = scalar_lea.sflag [#allocation15], %s21837_s1  ;;  %s21225_s25 = scalar_lea.hbm %s21964_s12, 128 }
  0xb3   : > { %p21226_p7 = scmp.ne.s32.totalorder %s21964_s12, %s21225_s25  ;;  %s21230_s29 = scalar_lea.hbm %s25304_s8, 768 }
  0xb4   : > { %p21231_p1 = scmp.lt.u32.totalorder %s21964_s12, %s25304_s8  ;;  %p21232_p3 = scmp.lt.u32.totalorder %s21230_s29, %s21225_s25 }
  0xb5   : > { %p21228_p5 = pnand %p21226_p7, %p21874_p9  ;;  %p21234_p2 = scmp.lt.u32.totalorder %s21225_s25, %s21964_s12 }
  0xb6   : > { %p21233_p12 = por %p21232_p3, %p21231_p1 }
  0xb7   : > { %p21229_p10 = pneg %p21228_p5 }
  0xb8   : > { %p21235_p4 = por %p21234_p2, %p21233_p12 }
  0xba   : > { %p21236_p8 = pnand %p21235_p4, %p21229_p10 }
  0xbc   : > { %21239 = shalt.err (!%p21236_p8)
}
  0xbd   : > { %s21240_s18 = scalar_lea.vmem %s703_s9, 128  ;;  %s21630_s21 = smov [#allocation14]  }
  0xbe   : > { %p21241_p0 = scmp.ne.s32.totalorder %s703_s9, %s21240_s18  ;;  %s21245_s11 = sshll.u32 %s21630_s21, 4  ;;  %s21246_s11 = int_to_ptr.vmem [resolvable:$false] %s21245_s11 }
  0xbf   : > { %s21247_s26 = scalar_lea.vmem %s21246_s11, 256  ;;  %p21248_p7 = scmp.lt.s32.totalorder %s703_s9, %s21246_s11 }
  0xc0   : > { %p21243_p11 = pnand %p21241_p0, %p21874_p9  ;;  %p21249_p5 = scmp.lt.s32.totalorder %s21247_s26, %s21240_s18 }
  0xc2   : > { %p21244_p13 = pneg %p21243_p11  ;;  %p21250_p6 = por %p21249_p5, %p21248_p7 }
  0xc4   : > { %p21251_p1 = pnand %p21250_p6, %p21244_p13 }
  0xc6   : > { %21254 = shalt.err (!%p21251_p1)
}
  0xc7   : > { %p25425_p3 = scmp.ne.s32.totalorder %s25417_s0, 0  ;;  %s21992_s29 = scalar_lea.hbm %s25306_s10, %s21867_s30 }
  0xc8   : > { %s733_s11 = scalar_lea.vmem [#allocation17], %s21804_s24  ;;  %s21631_s17 = smov [#allocation25]  }
  0xc9   : > { %19598 = dma.hbm_to_vmem [thread:$0]  (!%p25425_p3), %s21964_s12, 128, %s703_s9, %s25342_s20  }
  0xca   : > { %s740_s7 = sshll.u32 %s733_s11, 4  ;;  %s21997_s18 = sshll.u32 %s21631_s17, 4  ;;  %s21995_s7 = int_to_ptr.vmem [resolvable:$true] %s740_s7  ;;  %s533_s18 = int_to_ptr.vmem [resolvable:$true] %s21997_s18 }
  0xcb   : > { %s25344_s21 = scalar_lea.sflag [#allocation18], %s21837_s1  ;;  %s21255_s26 = scalar_lea.hbm %s21992_s29, 16 }
  0xcc   : > { %p21256_p6 = scmp.ne.s32.totalorder %s21992_s29, %s21255_s26  ;;  %s21260_s25 = scalar_lea.hbm %s25306_s10, 96 }
  0xcd   : > { %p21261_p2 = scmp.lt.u32.totalorder %s21992_s29, %s25306_s10  ;;  %p21262_p4 = scmp.lt.u32.totalorder %s21260_s25, %s21255_s26 }
  0xce   : > { %p21258_p10 = pnand %p21256_p6, %p21874_p9  ;;  %p21264_p0 = scmp.lt.u32.totalorder %s21255_s26, %s21992_s29 }
  0xcf   : > { %p21263_p8 = por %p21262_p4, %p21261_p2 }
  0xd0   : > { %p21259_p12 = pneg %p21258_p10 }
  0xd1   : > { %p21265_p11 = por %p21264_p0, %p21263_p8 }
  0xd3   : > { %p21266_p13 = pnand %p21265_p11, %p21259_p12 }
  0xd5   : > { %21269 = shalt.err (!%p21266_p13)
}
  0xd6   : > { %s21270_s11 = scalar_lea.vmem %s21995_s7, 16  ;;  %s21632_s17 = smov [#allocation17]  }
  0xd7   : > { %p21271_p7 = scmp.ne.s32.totalorder %s21995_s7, %s21270_s11  ;;  %s21275_s12 = sshll.u32 %s21632_s17, 4  ;;  %s21276_s12 = int_to_ptr.vmem [resolvable:$false] %s21275_s12 }
  0xd8   : > { %s21277_s20 = scalar_lea.vmem %s21276_s12, 32  ;;  %p21278_p6 = scmp.lt.s32.totalorder %s21995_s7, %s21276_s12 }
  0xd9   : > { %p21273_p5 = pnand %p21271_p7, %p21874_p9  ;;  %p21279_p10 = scmp.lt.s32.totalorder %s21277_s20, %s21270_s11 }
  0xdb   : > { %p21274_p1 = pneg %p21273_p5  ;;  %p21280_p2 = por %p21279_p10, %p21278_p6 }
  0xdd   : > { %p21281_p4 = pnand %p21280_p2, %p21274_p1 }
  0xdf   : > { %21284 = shalt.err (!%p21281_p4)
}
  0xe0   : > { %19604 = dma.hbm_to_vmem [thread:$0]  (!%p25425_p3), %s21992_s29, 16, %s21995_s7, %s25344_s21  }
  0xe1   : > { %s21285_s25 = scalar_lea.hbm %s25311_s15, 4096  ;;  %p25426_p8 = scmp.ne.s32.totalorder %s25418_s28, 0 }
  0xe2   : > { %p21286_p12 = scmp.ne.s32.totalorder %s25311_s15, %s21285_s25  ;;  %p21292_p13 = scmp.lt.u32.totalorder %s21285_s25, %s25311_s15 }
  0xe4   : > { %p21288_p0 = pnand %p21286_p12, %p25426_p8 }
  0xe6   : > { %p21289_p11 = pneg %p21288_p0 }
  0xe8   : > { %p21294_p7 = pnand %p21292_p13, %p21289_p11 }
  0xea   : > { %21297 = shalt.err (!%p21294_p7)
}
  0xeb   : > { %s21298_s20 = scalar_lea.vmem %s533_s18, 4096  ;;  %p21306_p10 = scmp.lt.s32.totalorder %s533_s18, %s533_s18 }
  0xec   : > { %p21299_p5 = scmp.ne.s32.totalorder %s533_s18, %s21298_s20  ;;  %p21307_p2 = scmp.lt.s32.totalorder %s21298_s20, %s21298_s20 }
  0xee   : > { %p21301_p1 = pnand %p21299_p5, %p25426_p8  ;;  %p21308_p4 = por %p21307_p2, %p21306_p10 }
  0xf0   : > { %p21302_p6 = pneg %p21301_p1 }
  0xf2   : > { %p21309_p3 = pnand %p21308_p4, %p21302_p6 }
  0xf4   : > { %21312 = shalt.err (!%p21309_p3)
}
  0xf5   : > { %s25348_s29 = smov 64   ;;  %s21634_s7 = smov 4  }
  0xf6   : > { %p25427_p12 = scmp.ne.s32.totalorder %s25416_s23, 0  ;;  %s21635_s25 = smov [#allocation26]  }
  0xf7   : > { %s546_s22 = sshll.u32 %s21635_s25, 4  ;;  %s19515_s17 = smul.u32 192, %s21804_s24  ;;  %s547_s22 = int_to_ptr.vmem [resolvable:$true] %s546_s22 }
  0xf8   : > { %19570 = dma.hbm_to_vmem [thread:$0]  (!%p25427_p12), %s25311_s15, 4096, %s533_s18, [#allocation24], %s25348_s29, %s25348_s29, %s21634_s7  }
  0xf9   : > { %s21313_s20 = scalar_lea.hbm %s25312_s16, 16 }
  0xfa   : > { %p21314_p3 = scmp.ne.s32.totalorder %s25312_s16, %s21313_s20  ;;  %p21320_p13 = scmp.lt.u32.totalorder %s21313_s20, %s25312_s16 }
  0xfc   : > { %p21316_p0 = pnand %p21314_p3, %p25426_p8 }
  0xfe   : > { %p21317_p11 = pneg %p21316_p0 }
 0x100   : > { %p21322_p7 = pnand %p21320_p13, %p21317_p11 }
 0x102   : > { %21325 = shalt.err (!%p21322_p7)
}
 0x103   : > { %s21326_s18 = scalar_lea.vmem %s547_s22, 16  ;;  %s21333_s26 = scalar_lea.vmem %s547_s22, 32 }
 0x104   : > { %p21327_p5 = scmp.ne.s32.totalorder %s547_s22, %s21326_s18  ;;  %p21334_p10 = scmp.lt.s32.totalorder %s547_s22, %s547_s22 }
 0x105   : > { %p21335_p2 = scmp.lt.s32.totalorder %s21333_s26, %s21326_s18 }
 0x106   : > { %p21329_p1 = pnand %p21327_p5, %p25426_p8 }
 0x107   : > { %p21336_p4 = por %p21335_p2, %p21334_p10 }
 0x108   : > { %p21330_p6 = pneg %p21329_p1 }
 0x10a   : > { %p21337_p9 = pnand %p21336_p4, %p21330_p6 }
 0x10c   : > { %21340 = shalt.err (!%p21337_p9)
}
 0x10d   : > { %19573 = dma.hbm_to_vmem [thread:$0]  (!%p25427_p12), %s25312_s16, 16, %s547_s22, [#allocation27]  }
 0x10e   : > { %s19516_s4 = smul.u32 3072, %s21621_s27  ;;  %s561_s6 = scalar_lea.vmem [#allocation3], %s19515_s17 }
 0x10f   : > { %s568_s28 = sshll.u32 %s561_s6, 4  ;;  %s25428_s11 = sld [smem:[#allocation80_spill]]  ;;  %s22070_s28 = int_to_ptr.vmem [resolvable:$true] %s568_s28 }
 0x110   : > { %s17488_s23 = sshll.u32 %s21804_s24, 6  ;;  %s558_s20 = scalar_lea.sflag [#allocation4], %s21804_s24 }
 0x111   : > { %p25429_p8 = scmp.ne.s32.totalorder %s25421_s19, 0 }
 0x115   : > { %s22068_s12 = scalar_lea.hbm %s25428_s11, %s19516_s4  ;;  %s21346_s26 = scalar_lea.hbm %s25428_s11, 18432 }
 0x116   : > { %s21341_s18 = scalar_lea.hbm %s22068_s12, 3072  ;;  %p21347_p0 = scmp.lt.u32.totalorder %s22068_s12, %s25428_s11 }
 0x117   : > { %p21342_p9 = scmp.ne.s32.totalorder %s22068_s12, %s21341_s18  ;;  %p21348_p11 = scmp.lt.u32.totalorder %s21346_s26, %s21341_s18 }
 0x118   : > { %p21350_p7 = scmp.lt.u32.totalorder %s21341_s18, %s22068_s12 }
 0x119   : > { %p21344_p12 = pnand %p21342_p9, %p25429_p8  ;;  %p21349_p13 = por %p21348_p11, %p21347_p0 }
 0x11b   : > { %p21345_p3 = pneg %p21344_p12  ;;  %p21351_p5 = por %p21350_p7, %p21349_p13 }
 0x11d   : > { %p21352_p1 = pnand %p21351_p5, %p21345_p3 }
 0x11f   : > { %21355 = shalt.err (!%p21352_p1)
}
 0x120   : > { %s21356_s4 = scalar_lea.vmem %s22070_s28, 3072  ;;  %s21636_s6 = smov [#allocation3]  }
 0x121   : > { %p21357_p6 = scmp.ne.s32.totalorder %s22070_s28, %s21356_s4  ;;  %s21361_s9 = sshll.u32 %s21636_s6, 4  ;;  %s21362_s9 = int_to_ptr.vmem [resolvable:$false] %s21361_s9 }
 0x122   : > { %s21363_s25 = scalar_lea.vmem %s21362_s9, 6144  ;;  %p21364_p4 = scmp.lt.s32.totalorder %s22070_s28, %s21362_s9 }
 0x123   : > { %p21359_p10 = pnand %p21357_p6, %p25429_p8  ;;  %p21365_p9 = scmp.lt.s32.totalorder %s21363_s25, %s21356_s4 }
 0x125   : > { %p21360_p2 = pneg %p21359_p10  ;;  %p21366_p12 = por %p21365_p9, %p21364_p4 }
 0x127   : > { %p21367_p0 = pnand %p21366_p12, %p21360_p2 }
 0x129   : > { %21370 = shalt.err (!%p21367_p0)
}
 0x12a   : > { %s21637_s18 = smov 192   ;;  %s21638_s22 = smov 12  }
 0x12b   : > { %p25430_p3 = scmp.ne.s32.totalorder %s25417_s0, 0  ;;  %s18479_s17 = sshll.u32 %s21621_s27, 10 }
 0x12c   : > { %s22101_s21 = scalar_lea.hbm %s25299_s3, %s18479_s17  ;;  %s601_s4 = scalar_lea.vmem [#allocation7], %s17488_s23 }
 0x12d   : > { %19577 = dma.hbm_to_vmem [thread:$0]  (!%p25430_p3), %s22068_s12, 3072, %s22070_s28, %s558_s20, %s21637_s18, %s21637_s18, %s21638_s22  }
 0x12e   : > { %s608_s6 = sshll.u32 %s601_s4, 4  ;;  %s21371_s9 = scalar_lea.hbm %s22101_s21, 1024  ;;  %s22105_s6 = int_to_ptr.vmem [resolvable:$true] %s608_s6 }
 0x12f   : > { %p21372_p11 = scmp.ne.s32.totalorder %s22101_s21, %s21371_s9  ;;  %s21376_s20 = scalar_lea.hbm %s25299_s3, 6144 }
 0x130   : > { %p21377_p5 = scmp.lt.u32.totalorder %s22101_s21, %s25299_s3  ;;  %p21378_p1 = scmp.lt.u32.totalorder %s21376_s20, %s21371_s9 }
 0x131   : > { %p21374_p13 = pnand %p21372_p11, %p25429_p8  ;;  %p21380_p10 = scmp.lt.u32.totalorder %s21371_s9, %s22101_s21 }
 0x132   : > { %p21379_p6 = por %p21378_p1, %p21377_p5 }
 0x133   : > { %p21375_p7 = pneg %p21374_p13 }
 0x134   : > { %p21381_p2 = por %p21380_p10, %p21379_p6 }
 0x136   : > { %p21382_p4 = pnand %p21381_p2, %p21375_p7 }
 0x138   : > { %21385 = shalt.err (!%p21382_p4)
}
 0x139   : > { %s21386_s23 = scalar_lea.vmem %s22105_s6, 1024  ;;  %s21639_s22 = smov [#allocation7]  }
 0x13a   : > { %p21387_p9 = scmp.ne.s32.totalorder %s22105_s6, %s21386_s23  ;;  %s21391_s17 = sshll.u32 %s21639_s22, 4  ;;  %s21392_s17 = int_to_ptr.vmem [resolvable:$false] %s21391_s17 }
 0x13b   : > { %s21393_s26 = scalar_lea.vmem %s21392_s17, 2048  ;;  %p21394_p11 = scmp.lt.s32.totalorder %s22105_s6, %s21392_s17 }
 0x13c   : > { %p21389_p12 = pnand %p21387_p9, %p25429_p8  ;;  %p21395_p13 = scmp.lt.s32.totalorder %s21393_s26, %s21386_s23 }
 0x13e   : > { %p21390_p0 = pneg %p21389_p12  ;;  %p21396_p5 = por %p21395_p13, %p21394_p11 }
 0x140   : > { %p21397_p1 = pnand %p21396_p5, %p21390_p0 }
 0x142   : > { %21400 = shalt.err (!%p21397_p1)
}
 0x143   : > { %s25431_s2 = scalar_lea.sflag [#allocation6], %s21837_s1  ;;  %s22137_s28 = scalar_lea.hbm %s25301_s5, %s21867_s30 }
 0x144   : > { %19583 = dma.hbm_to_vmem [thread:$0]  (!%p25430_p3), %s22101_s21, 1024, %s22105_s6, %s25431_s2, %s25348_s29, %s25348_s29, %s21634_s7  }
 0x145   : > { %s638_s12 = scalar_lea.vmem [#allocation10], %s21804_s24  ;;  %s17494_s25 = sshll.u32 %s21804_s24, 9 }
 0x146   : > { %s645_s20 = sshll.u32 %s638_s12, 4  ;;  %s21401_s18 = scalar_lea.hbm %s22137_s28, 16  ;;  %s646_s20 = int_to_ptr.vmem [resolvable:$true] %s645_s20 }
 0x147   : > { %p21402_p7 = scmp.ne.s32.totalorder %s22137_s28, %s21401_s18  ;;  %s21406_s6 = scalar_lea.hbm %s25301_s5, 96 }
 0x148   : > { %p21407_p2 = scmp.lt.u32.totalorder %s22137_s28, %s25301_s5  ;;  %p21408_p4 = scmp.lt.u32.totalorder %s21406_s6, %s21401_s18 }
 0x149   : > { %p21404_p6 = pnand %p21402_p7, %p25429_p8  ;;  %p21410_p12 = scmp.lt.u32.totalorder %s21401_s18, %s22137_s28 }
 0x14a   : > { %p21409_p9 = por %p21408_p4, %p21407_p2 }
 0x14b   : > { %p21405_p10 = pneg %p21404_p6 }
 0x14c   : > { %p21411_p0 = por %p21410_p12, %p21409_p9 }
 0x14e   : > { %p21412_p11 = pnand %p21411_p0, %p21405_p10 }
 0x150   : > { %21415 = shalt.err (!%p21412_p11)
}
 0x151   : > { %s21416_s26 = scalar_lea.vmem %s646_s20, 16  ;;  %s21640_s2 = smov [#allocation10]  }
 0x152   : > { %p21417_p13 = scmp.ne.s32.totalorder %s646_s20, %s21416_s26  ;;  %s21421_s4 = sshll.u32 %s21640_s2, 4  ;;  %s21422_s4 = int_to_ptr.vmem [resolvable:$false] %s21421_s4 }
 0x153   : > { %s21423_s9 = scalar_lea.vmem %s21422_s4, 32  ;;  %p21424_p7 = scmp.lt.s32.totalorder %s646_s20, %s21422_s4 }
 0x154   : > { %p21419_p5 = pnand %p21417_p13, %p25429_p8  ;;  %p21425_p6 = scmp.lt.s32.totalorder %s21423_s9, %s21416_s26 }
 0x156   : > { %p21420_p1 = pneg %p21419_p5  ;;  %p21426_p3 = por %p21425_p6, %p21424_p7 }
 0x158   : > { %p21427_p2 = pnand %p21426_p3, %p21420_p1 }
 0x15a   : > { %21430 = shalt.err (!%p21427_p2)
}
 0x15b   : > { %p25432_p4 = scmp.ne.s32.totalorder %s25417_s0, 0  ;;  %s25433_s12 = scalar_lea.sflag [#allocation9], %s21837_s1 }
 0x15c   : > { %s18480_s18 = sshll.u32 %s21621_s27, 13  ;;  %s25434_s6 = sld [smem:[#allocation84_spill]] }
 0x15d   : > { %19589 = dma.hbm_to_vmem [thread:$0]  (!%p25432_p4), %s22137_s28, 16, %s646_s20, %s25433_s12  }
 0x15e   : > { %s673_s17 = scalar_lea.vmem [#allocation13], %s17494_s25 }
 0x15f   : > { %s680_s26 = sshll.u32 %s673_s17, 4  ;;  %s22170_s26 = int_to_ptr.vmem [resolvable:$true] %s680_s26 }
 0x162   : > { %s22166_s22 = scalar_lea.hbm %s25434_s6, %s18480_s18  ;;  %s21436_s4 = scalar_lea.hbm %s25434_s6, 49152 }
 0x163   : > { %s21431_s2 = scalar_lea.hbm %s22166_s22, 8192  ;;  %p21437_p12 = scmp.lt.u32.totalorder %s22166_s22, %s25434_s6 }
 0x164   : > { %p21432_p3 = scmp.ne.s32.totalorder %s22166_s22, %s21431_s2  ;;  %p21438_p0 = scmp.lt.u32.totalorder %s21436_s4, %s21431_s2 }
 0x165   : > { %p21440_p13 = scmp.lt.u32.totalorder %s21431_s2, %s22166_s22 }
 0x166   : > { %p21434_p10 = pnand %p21432_p3, %p25429_p8  ;;  %p21439_p11 = por %p21438_p0, %p21437_p12 }
 0x168   : > { %p21435_p9 = pneg %p21434_p10  ;;  %p21441_p5 = por %p21440_p13, %p21439_p11 }
 0x16a   : > { %p21442_p1 = pnand %p21441_p5, %p21435_p9 }
 0x16c   : > { %21445 = shalt.err (!%p21442_p1)
}
 0x16d   : > { %s21446_s23 = scalar_lea.vmem %s22170_s26, 8192  ;;  %s21641_s21 = smov [#allocation13]  }
 0x16e   : > { %p21447_p7 = scmp.ne.s32.totalorder %s22170_s26, %s21446_s23  ;;  %s21451_s17 = sshll.u32 %s21641_s21, 4  ;;  %s21452_s17 = int_to_ptr.vmem [resolvable:$false] %s21451_s17 }
 0x16f   : > { %s21453_s28 = scalar_lea.vmem %s21452_s17, 16384  ;;  %p21454_p3 = scmp.lt.s32.totalorder %s22170_s26, %s21452_s17 }
 0x170   : > { %p21449_p6 = pnand %p21447_p7, %p25429_p8  ;;  %p21455_p10 = scmp.lt.s32.totalorder %s21453_s28, %s21446_s23 }
 0x172   : > { %p21450_p2 = pneg %p21449_p6  ;;  %p21456_p12 = por %p21455_p10, %p21454_p3 }
 0x174   : > { %p21457_p0 = pnand %p21456_p12, %p21450_p2 }
 0x176   : > { %21460 = shalt.err (!%p21457_p0)
}
 0x177   : > { %s21642_s2 = smov 512   ;;  %s21643_s20 = smov 32  }
 0x178   : > { %s25435_s4 = scalar_lea.sflag [#allocation12], %s21837_s1  ;;  %s25436_s21 = sld [smem:[#allocation85_spill]] }
 0x179   : > { %19595 = dma.hbm_to_vmem [thread:$0]  (!%p25432_p4), %s22166_s22, 8192, %s22170_s26, %s25435_s4, %s21642_s2, %s21642_s2, %s21643_s20  }
 0x17a   : > { %s713_s17 = scalar_lea.vmem [#allocation16], %s17494_s25 }
 0x17b   : > { %s720_s28 = sshll.u32 %s713_s17, 4  ;;  %s22204_s28 = int_to_ptr.vmem [resolvable:$true] %s720_s28 }
 0x17e   : > { %s22200_s23 = scalar_lea.hbm %s25436_s21, %s18480_s18  ;;  %s21466_s26 = scalar_lea.hbm %s25436_s21, 49152 }
 0x17f   : > { %s21461_s29 = scalar_lea.hbm %s22200_s23, 8192  ;;  %p21467_p5 = scmp.lt.u32.totalorder %s22200_s23, %s25436_s21 }
 0x180   : > { %p21462_p9 = scmp.ne.s32.totalorder %s22200_s23, %s21461_s29  ;;  %p21468_p1 = scmp.lt.u32.totalorder %s21466_s26, %s21461_s29 }
 0x181   : > { %p21470_p6 = scmp.lt.u32.totalorder %s21461_s29, %s22200_s23 }
 0x182   : > { %p21464_p11 = pnand %p21462_p9, %p25429_p8  ;;  %p21469_p7 = por %p21468_p1, %p21467_p5 }
 0x184   : > { %p21465_p13 = pneg %p21464_p11  ;;  %p21471_p2 = por %p21470_p6, %p21469_p7 }
 0x186   : > { %p21472_p3 = pnand %p21471_p2, %p21465_p13 }
 0x188   : > { %21475 = shalt.err (!%p21472_p3)
}
 0x189   : > { %s21476_s25 = scalar_lea.vmem %s22204_s28, 8192  ;;  %s21644_s20 = smov [#allocation16]  }
 0x18a   : > { %p21477_p10 = scmp.ne.s32.totalorder %s22204_s28, %s21476_s25  ;;  %s21481_s4 = sshll.u32 %s21644_s20, 4  ;;  %s21482_s4 = int_to_ptr.vmem [resolvable:$false] %s21481_s4 }
 0x18b   : > { %s21483_s9 = scalar_lea.vmem %s21482_s4, 16384  ;;  %p21484_p9 = scmp.lt.s32.totalorder %s22204_s28, %s21482_s4 }
 0x18c   : > { %p21479_p12 = pnand %p21477_p10, %p25429_p8  ;;  %p21485_p11 = scmp.lt.s32.totalorder %s21483_s9, %s21476_s25 }
 0x18e   : > { %p21480_p0 = pneg %p21479_p12  ;;  %p21486_p5 = por %p21485_p11, %p21484_p9 }
 0x190   : > { %p21487_p1 = pnand %p21486_p5, %p21480_p0 }
 0x192   : > { %21490 = shalt.err (!%p21487_p1)
}
 0x193   : > { %s25437_s29 = smov 64   ;;  %s25438_s12 = scalar_lea.sflag [#allocation15], %s21837_s1 }
 0x194   : > { %19601 = dma.hbm_to_vmem [thread:$0]  (!%p25432_p4), %s22200_s23, 8192, %s22204_s28, %s25438_s12, %s25437_s29, %s25437_s29, %s21634_s7  }
 0x195   : > { %s25439_s22 = sld [smem:[#allocation86_spill]]  ;;  %s750_s18 = scalar_lea.vmem [#allocation19], %s21804_s24 }
 0x196   : > { %s757_s2 = sshll.u32 %s750_s18, 4  ;;  %s758_s2 = int_to_ptr.vmem [resolvable:$true] %s757_s2 }
 0x19b   : > { %s22236_s26 = scalar_lea.hbm %s25439_s22, %s21867_s30  ;;  %s21496_s7 = scalar_lea.hbm %s25439_s22, 96 }
 0x19c   : > { %s21491_s25 = scalar_lea.hbm %s22236_s26, 16  ;;  %p21497_p2 = scmp.lt.u32.totalorder %s22236_s26, %s25439_s22 }
 0x19d   : > { %p21492_p13 = scmp.ne.s32.totalorder %s22236_s26, %s21491_s25  ;;  %p21498_p3 = scmp.lt.u32.totalorder %s21496_s7, %s21491_s25 }
 0x19e   : > { %p21500_p12 = scmp.lt.u32.totalorder %s21491_s25, %s22236_s26 }
 0x19f   : > { %p21494_p7 = pnand %p21492_p13, %p25429_p8  ;;  %p21499_p10 = por %p21498_p3, %p21497_p2 }
 0x1a1   : > { %p21495_p6 = pneg %p21494_p7  ;;  %p21501_p0 = por %p21500_p12, %p21499_p10 }
 0x1a3   : > { %p21502_p9 = pnand %p21501_p0, %p21495_p6 }
 0x1a5   : > { %21505 = shalt.err (!%p21502_p9)
}
 0x1a6   : > { %s21506_s9 = scalar_lea.vmem %s758_s2, 16  ;;  %s21645_s29 = smov [#allocation19]  }
 0x1a7   : > { %p21507_p11 = scmp.ne.s32.totalorder %s758_s2, %s21506_s9  ;;  %s21511_s12 = sshll.u32 %s21645_s29, 4  ;;  %s21512_s12 = int_to_ptr.vmem [resolvable:$false] %s21511_s12 }
 0x1a8   : > { %s21513_s17 = scalar_lea.vmem %s21512_s12, 32  ;;  %p21514_p13 = scmp.lt.s32.totalorder %s758_s2, %s21512_s12 }
 0x1a9   : > { %p21509_p5 = pnand %p21507_p11, %p25429_p8  ;;  %p21515_p7 = scmp.lt.s32.totalorder %s21513_s17, %s21506_s9 }
 0x1ab   : > { %p21510_p1 = pneg %p21509_p5  ;;  %p21516_p4 = por %p21515_p7, %p21514_p13 }
 0x1ad   : > { %p21517_p2 = pnand %p21516_p4, %p21510_p1 }
 0x1af   : > { %21520 = shalt.err (!%p21517_p2)
}
 0x1b0   : > { %p25440_p3 = scmp.ne.s32.totalorder %s25417_s0, 0  ;;  %s25441_s27 = scalar_lea.sflag [#allocation18], %s21837_s1 }
 0x1b1   : > { %s25442_s20 = sld [smem:[#allocation87_spill]]  ;;  %s767_s7 = scalar_lea.vmem [#allocation20], %s21804_s24 }
 0x1b2   : > { %19607 = dma.hbm_to_vmem [thread:$0]  (!%p25440_p3), %s22236_s26, 16, %s758_s2, %s25441_s27  }
 0x1b3   : > { %s774_s23 = sshll.u32 %s767_s7, 4  ;;  %s765_s28 = scalar_lea.sflag [#allocation21], %s21837_s1  ;;  %s775_s23 = int_to_ptr.vmem [resolvable:$true] %s774_s23 }
 0x1b7   : > { %s22262_s4 = scalar_lea.hbm %s25442_s20, %s21867_s30  ;;  %s21526_s2 = scalar_lea.hbm %s25442_s20, 96 }
 0x1b8   : > { %s21521_s9 = scalar_lea.hbm %s22262_s4, 16  ;;  %p21527_p12 = scmp.lt.u32.totalorder %s22262_s4, %s25442_s20 }
 0x1b9   : > { %p21522_p4 = scmp.ne.s32.totalorder %s22262_s4, %s21521_s9  ;;  %p21528_p0 = scmp.lt.u32.totalorder %s21526_s2, %s21521_s9 }
 0x1ba   : > { %p21530_p11 = scmp.lt.u32.totalorder %s21521_s9, %s22262_s4 }
 0x1bb   : > { %p21524_p6 = pnand %p21522_p4, %p25429_p8  ;;  %p21529_p9 = por %p21528_p0, %p21527_p12 }
 0x1bd   : > { %p21525_p10 = pneg %p21524_p6  ;;  %p21531_p5 = por %p21530_p11, %p21529_p9 }
 0x1bf   : > { %p21532_p1 = pnand %p21531_p5, %p21525_p10 }
 0x1c1   : > { %21535 = shalt.err (!%p21532_p1)
}
 0x1c2   : > { %s21536_s1 = scalar_lea.vmem %s775_s23, 16  ;;  %s21646_s24 = smov [#allocation20]  }
 0x1c3   : > { %p21537_p13 = scmp.ne.s32.totalorder %s775_s23, %s21536_s1  ;;  %s21541_s17 = sshll.u32 %s21646_s24, 4  ;;  %s21542_s17 = int_to_ptr.vmem [resolvable:$false] %s21541_s17 }
 0x1c4   : > { %s21543_s27 = scalar_lea.vmem %s21542_s17, 32  ;;  %p21544_p4 = scmp.lt.s32.totalorder %s775_s23, %s21542_s17 }
 0x1c5   : > { %p21539_p7 = pnand %p21537_p13, %p25429_p8  ;;  %p21545_p6 = scmp.lt.s32.totalorder %s21543_s27, %s21536_s1 }
 0x1c7   : > { %p21540_p2 = pneg %p21539_p7  ;;  %p21546_p3 = por %p21545_p6, %p21544_p4 }
 0x1c9   : > { %p21547_p0 = pnand %p21546_p3, %p21540_p2 }
 0x1cb   : > { %21550 = shalt.err (!%p21547_p0)
}
 0x1cc   : > { %p25443_p12 = scmp.ne.s32.totalorder %s25417_s0, 0  ;;  %s25444_s18 = sld [smem:[#allocation44_spill]] }
 0x1ce   : > { %19610 = dma.hbm_to_vmem [thread:$0]  (!%p25443_p12), %s22262_s4, 16, %s775_s23, %s765_s28  }
 0x1d2   : > { %p25445_p10 = scmp.ne.s32.totalorder %s25444_s18, 0 }
 0x1d4   : > { %783 = sbr.rel (%p25445_p10) target bundleno = 5287 (0x14a7), region = 88 }
 0x1db   : > { %s25446_s25 = sld [smem:[#allocation38_spill]]  ;;  %s25447_s19 = sld [smem:[#allocation43_spill]] }
 0x1e1   : > { %s22286_s7 = sand.u32 1, %s25446_s25   ;;  %p25448_p8 = scmp.ne.s32.totalorder %s25447_s19, 0 }
 0x1e2   : > { %s19519_s9 = smul.u32 192, %s22286_s7  ;;  %s786_s29 = scalar_lea.sflag [#allocation4], %s22286_s7 }
 0x1e4   : > { %s22290_s26 = scalar_lea.vmem [#allocation3], %s19519_s9 }
 0x1e5   : > { %21568 = dma.done.wait (%p25448_p8), %s786_s29, 3072  }
 0x1e6   : > { %21570 = vsyncadd (%p25448_p8), %s786_s29, 4294964224  ;;  %s25449_s0 = sld [smem:[#allocation40_spill]]  ;;  %s19520_s23 = smul.u32 3, %s22286_s7 }
 0x1e8   : > { %s22301_s2 = scalar_lea.vmem [#allocation5], %s19520_s23 }
 0x1ec   : > { %s22297_s4 = sand.u32 1, %s25449_s0  }
 0x1ed   : > { %s795_s28 = scalar_lea.sflag [#allocation6], %s22297_s4 }
 0x1ee   : > { %21572 = dma.done.wait (%p25448_p8), %s795_s28, 1072  }
 0x1ef   : > { %21574 = vsyncadd (%p25448_p8), %s795_s28, 4294966224  ;;  %s17507_s12 = sshll.u32 %s22286_s7, 6  ;;  %s813_s1 = scalar_lea.sflag [#allocation9], %s22297_s4 }
 0x1f0   : > { %s22308_s30 = scalar_lea.vmem [#allocation7], %s17507_s12 }
 0x1f1   : > { %21576 = dma.done.wait (%p25448_p8), %s813_s1, 32  }
 0x1f2   : > { %21578 = vsyncadd (%p25448_p8), %s813_s1, 4294967264  ;;  %s829_s27 = scalar_lea.sflag [#allocation12], %s22297_s4 }
 0x1f3   : > { %21580 = dma.done.wait (%p25448_p8), %s829_s27, 8208  }
 0x1f4   : > { %21582 = vsyncadd (%p25448_p8), %s829_s27, 4294959088  ;;  %s17508_s25 = sshll.u32 %s22286_s7, 9  ;;  %s17509_s9 = sshll.u32 %s22286_s7, 3 }
 0x1f5   : > { %s22325_s29 = scalar_lea.vmem [#allocation13], %s17508_s25  ;;  %s846_s23 = scalar_lea.sflag [#allocation15], %s22297_s4 }
 0x1f6   : > { %s22328_s28 = scalar_lea.vmem [#allocation14], %s17509_s9 }
 0x1f7   : > { %21584 = dma.done.wait (%p25448_p8), %s846_s23, 8320  }
 0x1f8   : > { %21586 = vsyncadd (%p25448_p8), %s846_s23, 4294958976  ;;  %s22334_s12 = scalar_lea.vmem [#allocation16], %s17508_s25  ;;  %s864_s1 = scalar_lea.sflag [#allocation18], %s22297_s4 }
 0x1f9   : > { %21588 = dma.done.wait (%p25448_p8), %s864_s1, 32  }
 0x1fa   : > { %21590 = vsyncadd (%p25448_p8), %s864_s1, 4294967264  ;;  %s880_s18 = scalar_lea.sflag [#allocation21], %s22297_s4 }
 0x1fb   : > { %21592 = dma.done.wait (%p25448_p8), %s880_s18, 16  }
 0x1fc   : > { %21594 = vsyncadd (%p25448_p8), %s880_s18, 4294967280  ;;  %p25450_p3 = scmp.eq.s32.totalorder %s25449_s0, 0 }
 0x1fe   : > { %21596 = dma.done.wait (%p25450_p3), [#allocation21], 81920   ;;  %p25451_p9 = pmov %p25450_p3 }
 0x1ff   : > { %p25452_p11 = pmov %p25450_p3 }
 0x200   : > { %21598 = vsyncadd (%p25451_p9), [#allocation21], 4294885376 }
 0x201   : > { %21600 = dma.done.wait (%p25452_p11), [#allocation24], 4160   ;;  %p25453_p5 = pmov %p25450_p3 }
 0x202   : > { %p25454_p1 = pmov %p25450_p3 }
 0x203   : > { %21602 = vsyncadd (%p25453_p5), [#allocation24], 4294963136 }
 0x204   : > { %21604 = dma.done.wait (%p25454_p1), [#allocation27], 16   ;;  %p25455_p13 = pmov %p25454_p1 }
 0x205   : > { %p25456_p7 = scmp.ne.s32.totalorder %s25449_s0, 0 }
 0x206   : > { %21606 = vsyncadd (%p25455_p13), [#allocation27], 4294967280  ;;  %s25457_s18 = sld [smem:[#allocation79_spill]] (!%p25456_p7) }
 0x207   : > { %997 = sbr.rel (%p25456_p7) target bundleno = 535 (0x217), region = 156 }
 0x20c   : > { %v998_v0 = vld [vmem:[%s25457_s18] sm:$0xff] (!%p25456_p7)  ;;  %v999_v1 = vld [vmem:[%s25457_s18 + $0x8] sm:$0xff] (!%p25456_p7)  ;;  %v1000_v2 = vld [vmem:[%s25457_s18 + $0x10] sm:$0xff] (!%p25456_p7) }
 0x20d   : > { %1018 = vst [vmem:[#allocation2] sm:$0xff] (!%p25456_p7), %v998_v0  ;;  %1019 = vst [vmem:[#allocation2 + $0x8] sm:$0xff] (!%p25456_p7), %v999_v1  ;;  %v1001_v3 = vld [vmem:[%s25457_s18 + $0x18] sm:$0xff] (!%p25456_p7)  ;;  %v1002_v4 = vld [vmem:[%s25457_s18 + $0x20] sm:$0xff] (!%p25456_p7) }
 0x20e   : > { %1020 = vst [vmem:[#allocation2 + $0x10] sm:$0xff] %v1000_v2  ;;  %v1003_v5 = vld [vmem:[%s25457_s18 + $0x28] sm:$0xff]  ;;  %1021 = vst [vmem:[#allocation2 + $0x18] sm:$0xff] %v1001_v3  ;;  %v1004_v6 = vld [vmem:[%s25457_s18 + $0x30] sm:$0xff] }
 0x20f   : > { %1022 = vst [vmem:[#allocation2 + $0x20] sm:$0xff] %v1002_v4  ;;  %1023 = vst [vmem:[#allocation2 + $0x28] sm:$0xff] %v1003_v5  ;;  %v1005_v7 = vld [vmem:[%s25457_s18 + $0x38] sm:$0xff]  ;;  %v1006_v8 = vld [vmem:[%s25457_s18 + $0x40] sm:$0xff] }
 0x210   : > { %1024 = vst [vmem:[#allocation2 + $0x30] sm:$0xff] %v1004_v6  ;;  %1025 = vst [vmem:[#allocation2 + $0x38] sm:$0xff] %v1005_v7  ;;  %v1007_v9 = vld [vmem:[%s25457_s18 + $0x48] sm:$0xff]  ;;  %v1008_v10 = vld [vmem:[%s25457_s18 + $0x50] sm:$0xff] }
 0x211   : > { %1026 = vst [vmem:[#allocation2 + $0x40] sm:$0xff] %v1006_v8  ;;  %v1009_v11 = vld [vmem:[%s25457_s18 + $0x58] sm:$0xff]  ;;  %1027 = vst [vmem:[#allocation2 + $0x48] sm:$0xff] %v1007_v9  ;;  %v1010_v12 = vld [vmem:[%s25457_s18 + $0x60] sm:$0xff] }
 0x212   : > { %1028 = vst [vmem:[#allocation2 + $0x50] sm:$0xff] %v1008_v10  ;;  %1029 = vst [vmem:[#allocation2 + $0x58] sm:$0xff] %v1009_v11  ;;  %v1011_v13 = vld [vmem:[%s25457_s18 + $0x68] sm:$0xff]  ;;  %v1012_v14 = vld [vmem:[%s25457_s18 + $0x70] sm:$0xff] }
 0x213   : > { %1030 = vst [vmem:[#allocation2 + $0x60] sm:$0xff] %v1010_v12  ;;  %1031 = vst [vmem:[#allocation2 + $0x68] sm:$0xff] %v1011_v13  ;;  %v1013_v15 = vld [vmem:[%s25457_s18 + $0x78] sm:$0xff]  ;;  %v1014_v16 = vld [vmem:[%s25457_s18 + $0x80] sm:$0xff] }
 0x214   : > { %1032 = vst [vmem:[#allocation2 + $0x70] sm:$0xff] %v1012_v14  ;;  %v1015_v17 = vld [vmem:[%s25457_s18 + $0x88] sm:$0xff]  ;;  %1033 = vst [vmem:[#allocation2 + $0x78] sm:$0xff] %v1013_v15  ;;  %v1016_v18 = vld [vmem:[%s25457_s18 + $0x90] sm:$0xff] }
 0x215   : > { %1034 = vst [vmem:[#allocation2 + $0x80] sm:$0xff] %v1014_v16  ;;  %1035 = vst [vmem:[#allocation2 + $0x88] sm:$0xff] %v1015_v17  ;;  %v1017_v19 = vld [vmem:[%s25457_s18 + $0x98] sm:$0xff] }
 0x216   : > { %1036 = vst [vmem:[#allocation2 + $0x90] sm:$0xff] %v1016_v18  ;;  %1037 = vst [vmem:[#allocation2 + $0x98] sm:$0xff] %v1017_v19 }
 0x217 PF: > { %v19719_v20 = vld [vmem:[%s22290_s26 + $0x4] ss:$12 sps:$4 sm:$0xff]   ;;  %v19721_v21 = vld [vmem:[%s22290_s26] ss:$12 sps:$4 sm:$0xff]   ;;  %v25351_v22 = vmov 0   ;;  %v1045_v55 = vld [vmem:[#allocation2 + $0x38] sm:$0xff]  ;;  %v25350_v12 = vlaneseq }
 0x218   : > { %1282 = vmatprep.mubr.bf16.mxu0 %v25351_v22  ;;  %1250 = vmatprep.subr.bf16.mxu0 %v19719_v20  ;;  %v19722_v23 = vld [vmem:[%s22290_s26 + $0x1c] ss:$12 sps:$4 sm:$0xff]   ;;  %v19724_v24 = vld [vmem:[%s22290_s26 + $0x18] ss:$12 sps:$4 sm:$0xff]   ;;  %v19725_v25 = vld [vmem:[%s22290_s26 + $0x34] ss:$12 sps:$4 sm:$0xff]  }
 0x219   : > { %1251 = vmatpush1.bf16.msra.mxu0 %v19721_v21  ;;  %v19727_v26 = vld [vmem:[%s22290_s26 + $0x30] ss:$12 sps:$4 sm:$0xff]   ;;  %v19728_v27 = vld [vmem:[%s22290_s26 + $0x4c] ss:$12 sps:$4 sm:$0xff]   ;;  %v19730_v29 = vld [vmem:[%s22290_s26 + $0x48] ss:$12 sps:$4 sm:$0xff]  }
 0x21a   : > { %1252 = vmatprep.subr.bf16.mxu0 %v19722_v23  ;;  %v19731_v31 = vld [vmem:[%s22290_s26 + $0x64] ss:$12 sps:$4 sm:$0xff]   ;;  %v19733_v33 = vld [vmem:[%s22290_s26 + $0x60] ss:$12 sps:$4 sm:$0xff]   ;;  %v19734_v34 = vld [vmem:[%s22290_s26 + $0x7c] ss:$12 sps:$4 sm:$0xff]  }
 0x21b   : > { %v19736_v35 = vld [vmem:[%s22290_s26 + $0x78] ss:$12 sps:$4 sm:$0xff]   ;;  %v19743_v36 = vld [vmem:[%s22290_s26 + $0x8] ss:$12 sps:$4 sm:$0xff]   ;;  %v19744_v37 = vld [vmem:[%s22290_s26 + $0x20] ss:$12 sps:$4 sm:$0xff]  }
 0x21c   : > { %v19737_v38 = vld [vmem:[%s22290_s26 + $0x94] ss:$12 sps:$4 sm:$0xff]   ;;  %19027 = vmatprep.subr.bf16.mxu1 %v19743_v36  ;;  %v19745_v39 = vld [vmem:[%s22290_s26 + $0x38] ss:$12 sps:$4 sm:$0xff]   ;;  %v19739_v40 = vld [vmem:[%s22290_s26 + $0x90] ss:$12 sps:$4 sm:$0xff]  }
 0x21d   : > { %1253 = vmatpush1.bf16.msra.mxu0 %v19724_v24  ;;  %v1038_v28 = vld [vmem:[#allocation2] sm:$0xff]  ;;  %v1039_v30 = vld [vmem:[#allocation2 + $0x8] sm:$0xff]  ;;  %19028 = vmatpush3.bf16.msra.mxu1 %v19743_v36  ;;  %v19746_v43 = vld [vmem:[%s22290_s26 + $0x50] ss:$12 sps:$4 sm:$0xff]   ;;  %v25365_v11 = vmov 0.0   ;;  %vm21649_vm0 = vmmov 0  }
 0x21e   : > { %1254 = vmatprep.subr.bf16.mxu0 %v19725_v25  ;;  %v1063_v32 = vpack.c.bf16 %v1039_v30, %v1038_v28  ;;  %19029 = vmatprep.subr.bf16.mxu1 %v19744_v37  ;;  %v19740_v41 = vld [vmem:[%s22290_s26 + $0xac] ss:$12 sps:$4 sm:$0xff]   ;;  %v19742_v42 = vld [vmem:[%s22290_s26 + $0xa8] ss:$12 sps:$4 sm:$0xff]   ;;  %v19750_v50 = vld [vmem:[%s22290_s26 + $0xb0] ss:$12 sps:$4 sm:$0xff]  }
 0x21f   : > { %v19747_v44 = vld [vmem:[%s22290_s26 + $0x68] ss:$12 sps:$4 sm:$0xff]   ;;  %v19748_v45 = vld [vmem:[%s22290_s26 + $0x80] ss:$12 sps:$4 sm:$0xff]   ;;  %v1041_v47 = vld [vmem:[#allocation2 + $0x18] sm:$0xff]  ;;  %v22464_v13 = vshrl.u32 %v25350_v12, 7 }
 0x220   : > { %19043 = vmatprep.mubr.bf16.mxu1 %v1063_v32  ;;  %v1040_v46 = vld [vmem:[#allocation2 + $0x10] sm:$0xff]  ;;  %v19749_v48 = vld [vmem:[%s22290_s26 + $0x98] ss:$12 sps:$4 sm:$0xff]   ;;  %v1043_v52 = vld [vmem:[#allocation2 + $0x28] sm:$0xff]  ;;  %vm1496_vm1 = vcmask 523264   ;;  %vm3037_vm2 = vcmask 64512  }
 0x221   : > { %1255 = vmatpush1.bf16.msra.mxu0 %v19727_v26  ;;  %19030 = vmatpush3.bf16.msra.mxu1 %v19744_v37  ;;  %v1064_v49 = vpack.c.bf16 %v1041_v47, %v1040_v46  ;;  %v1042_v51 = vld [vmem:[#allocation2 + $0x20] sm:$0xff]  ;;  %v1044_v54 = vld [vmem:[#allocation2 + $0x30] sm:$0xff]  ;;  %v1047_v58 = vld [vmem:[#allocation2 + $0x48] sm:$0xff]  ;;  %25458 = vst [vmem:[#allocation45_spill] sm:$0xff] %v22464_v13  ;;  %v22467_v14 = vsub.s32 1, %v22464_v13  ;;  %v22471_v16 = vsub.s32 0, %v22464_v13 }
 0x222   : > { %1256 = vmatprep.subr.bf16.mxu0 %v19728_v27  ;;  %19031 = vmatprep.subr.bf16.mxu1 %v19745_v39  ;;  %v1065_v53 = vpack.c.bf16 %v1043_v52, %v1042_v51  ;;  %v1066_v56 = vpack.c.bf16 %v1045_v55, %v1044_v54  ;;  %v1046_v57 = vld [vmem:[#allocation2 + $0x40] sm:$0xff]  ;;  %v1048_v60 = vld [vmem:[#allocation2 + $0x50] sm:$0xff]  ;;  %v1049_v61 = vld [vmem:[#allocation2 + $0x58] sm:$0xff]  ;;  %s21650_s26 = smov 64   ;;  %s25544_s19 = scalar_lea.vmem [#allocation11], %s22286_s7 }
 0x223   : > { %v1067_v59 = vpack.c.bf16 %v1047_v58, %v1046_v57  ;;  %v1050_v62 = vld [vmem:[#allocation2 + $0x60] sm:$0xff]  ;;  %v1051_v63 = vld [vmem:[#allocation2 + $0x68] sm:$0xff]  ;;  %v1068_v0 = vpack.c.bf16 %v1049_v61, %v1048_v60  ;;  %v1052_v2 = vld [vmem:[#allocation2 + $0x70] sm:$0xff]  ;;  %25459 = vst [vmem:[#allocation46_spill] sm:$0xff] %v22467_v14 }
 0x224   : > { %v1069_v1 = vpack.c.bf16 %v1051_v63, %v1050_v62  ;;  %v1053_v3 = vld [vmem:[#allocation2 + $0x78] sm:$0xff]  ;;  %v1054_v4 = vld [vmem:[#allocation2 + $0x80] sm:$0xff]  ;;  %v1055_v5 = vld [vmem:[#allocation2 + $0x88] sm:$0xff]  ;;  %25460 = vst [vmem:[#allocation47_spill] sm:$0xff] %v22471_v16 }
 0x225   : > { %1257 = vmatpush1.bf16.msra.mxu0 %v19730_v29  ;;  %19032 = vmatpush3.bf16.msra.mxu1 %v19745_v39  ;;  %v1070_v6 = vpack.c.bf16 %v1053_v3, %v1052_v2  ;;  %v1071_v7 = vpack.c.bf16 %v1055_v5, %v1054_v4  ;;  %v1056_v8 = vld [vmem:[#allocation2 + $0x90] sm:$0xff]  ;;  %v1057_v9 = vld [vmem:[#allocation2 + $0x98] sm:$0xff]  ;;  %v1105_v15 = vld [vmem:[%s22301_s2] sm:$0x7]  ;;  %s25542_s2 = scalar_lea.vmem [#allocation8], %s22286_s7 }
 0x226   : > { %1258 = vmatprep.subr.bf16.mxu0 %v19731_v31  ;;  %19033 = vmatprep.subr.bf16.mxu1 %v19746_v43  ;;  %v1072_v10 = vpack.c.bf16 %v1057_v9, %v1056_v8  ;;  %v22474_v17 = vrot.slane %v1105_v15, %v22467_v14  ;;  %v22477_v19 = vrot.slane %v1105_v15, %v22471_v16 }
 0x229   : > { %1259 = vmatpush1.bf16.msra.mxu0 %v19733_v33  ;;  %19034 = vmatpush3.bf16.msra.mxu1 %v19746_v43  ;;  %v22507_v33 = vsub.s32 2, %v22464_v13 }
 0x22a   : > { %1260 = vmatprep.subr.bf16.mxu0 %v19734_v34  ;;  %19035 = vmatprep.subr.bf16.mxu1 %v19747_v44 }
 0x22b   : > { %25461 = vst [vmem:[#allocation48_spill] sm:$0xff] %v22507_v33  ;;  %v22523_v36 = vrot.slane %v1105_v15, %v22507_v33 }
 0x22d   : > { %1261 = vmatpush1.bf16.msra.mxu0 %v19736_v35  ;;  %19036 = vmatpush3.bf16.msra.mxu1 %v19747_v44 }
 0x22e   : > { %1262 = vmatprep.subr.bf16.mxu0 %v19737_v38  ;;  %19037 = vmatprep.subr.bf16.mxu1 %v19748_v45 }
 0x231   : > { %1263 = vmatpush1.bf16.msra.mxu0 %v19739_v40  ;;  %19038 = vmatpush3.bf16.msra.mxu1 %v19748_v45 }
 0x232   : > { %1264 = vmatprep.subr.bf16.mxu0 %v19740_v41  ;;  %19039 = vmatprep.subr.bf16.mxu1 %v19749_v48 }
 0x235   : > { %1265 = vmatpush1.bf16.msra.mxu0 %v19742_v42  ;;  %19040 = vmatpush3.bf16.msra.mxu1 %v19749_v48 }
 0x236   : > { %19041 = vmatprep.subr.bf16.mxu1 %v19750_v50  ;;  %19123 = vmatprep.subr.mxu0 %v25365_v11 }
 0x238   : > { %1283 = vmatmul.mubr.bf16.vlgmr.msra.gmra.mrb[0].mxu0 %v1063_v32 }
 0x239   : > { %1292 = vmatprep.mubr.bf16.mxu0 %v25351_v22  ;;  %19042 = vmatpush3.bf16.msra.mxu1 %v19750_v50 }
 0x23a   : > { %19063 = vmatprep.subr.mxu1 %v25365_v11 }
 0x23c   : > { %19044 = vmatmul.mubr.bf16.vlgmr.msra.gmra.mrb[0].mxu1 %v1064_v49 }
 0x23d   : > { %19047 = vmatprep.mubr.bf16.mxu1 %v1065_v53 }
 0x240   : > { %1293 = vmatmul.mubr.bf16.gmra.mrb[4].mxu0 %v1064_v49 }
 0x241   : > { %1302 = vmatprep.mubr.bf16.mxu0 %v25351_v22 }
 0x244   : > { %19048 = vmatmul.mubr.bf16.gmra.mrb[4].mxu1 %v1066_v56 }
 0x245   : > { %19051 = vmatprep.mubr.bf16.mxu1 %v1067_v59 }
 0x248   : > { %1303 = vmatmul.mubr.bf16.gmra.mrb[8].mxu0 %v1065_v53 }
 0x249   : > { %1312 = vmatprep.mubr.bf16.mxu0 %v25351_v22 }
 0x24c   : > { %19052 = vmatmul.mubr.bf16.gmra.mrb[8].mxu1 %v1068_v0 }
 0x24d   : > { %19055 = vmatprep.mubr.bf16.mxu1 %v1069_v1 }
 0x250   : > { %1313 = vmatmul.mubr.bf16.gmra.mrb[12].mxu0 %v1066_v56 }
 0x251   : > { %1322 = vmatprep.mubr.bf16.mxu0 %v25351_v22 }
 0x254   : > { %19056 = vmatmul.mubr.bf16.gmra.mrb[12].mxu1 %v1070_v6 }
 0x255   : > { %19059 = vmatprep.mubr.bf16.mxu1 %v1071_v7 }
 0x258   : > { %1323 = vmatmul.mubr.bf16.gmra.mrb[16].mxu0 %v1067_v59 }
 0x259   : > { %1332 = vmatprep.mubr.bf16.mxu0 %v25351_v22 }
 0x25c   : > { %19060 = vmatmul.mubr.bf16.gmra.mrb[16].mxu1 %v1072_v10 }
 0x25d   : > { %19065 = vmatprep.mubr.msk.f32.mxu1 %vm21649_vm0, %v25365_v11 }
 0x260   : > { %1333 = vmatmul.mubr.bf16.gmra.mrb[20].mxu0 %v1068_v0 }
 0x261   : > { %1342 = vmatprep.mubr.bf16.mxu0 %v25351_v22 }
 0x268   : > { %1343 = vmatmul.mubr.bf16.gmra.mrb[24].mxu0 %v1069_v1 }
 0x269   : > { %1352 = vmatprep.mubr.bf16.mxu0 %v25351_v22 }
 0x270   : > { %1353 = vmatmul.mubr.bf16.gmra.mrb[28].mxu0 %v1070_v6 }
 0x271   : > { %1362 = vmatprep.mubr.bf16.mxu0 %v25351_v22 }
 0x278   : > { %1363 = vmatmul.mubr.bf16.gmra.mrb[32].mxu0 %v1071_v7 }
 0x279   : > { %1372 = vmatprep.mubr.bf16.mxu0 %v25351_v22 }
 0x280   : > { %1373 = vmatmul.mubr.bf16.gmra.mrb[36].mxu0 %v1072_v10 }
 0x281   : > { %19125 = vmatprep.mubr.msk.f32.mxu0 %vm21649_vm0, %v25365_v11 }
 0x30b   : > { %v1284_v18 = vpop.f32.mrb[0].mxu0 }
 0x30c   : > { %v1286_v20 = vpop.f32.mrb[1].mxu0  ;;  %v22485_v25 = vadd.f32 %v1284_v18, %v22477_v19 }
 0x30d   : > { %v22480_v21 = vadd.f32 %v1286_v20, %v22474_v17  ;;  %v1288_v23 = vpop.f32.mrb[2].mxu0 }
 0x30e   : > { %v1290_v24 = vpop.f32.mrb[3].mxu0  ;;  %v22498_v28 = vadd.f32 %v1288_v23, %v22477_v19 }
 0x30f   : > { %19064 = vmatpush3.xpose.msk.msra.mxu1 %vm1496_vm1, %v22480_v21  ;;  %v22489_v26 = vadd.f32 %v1290_v24, %v22474_v17  ;;  %v19045_v42 = vpop.f32.mrb[0].mxu1 }
 0x310   : > { %19068 = vmatprep.subr.mxu1 %v25365_v11  ;;  %v22539_v44 = vadd.f32 %v19045_v42, %v22523_v36  ;;  %v22541_v45 = vpop.f32.mrb[1].mxu1 }
 0x311   : > { %v19046_v46 = vpop.f32.mrb[2].mxu1 }
 0x312   : > { %19066 = vmatmul.mubr.msk.f32.vlgmr.msra.gmra.mrb[20].mxu1 %vm1496_vm1, %v22485_v25  ;;  %v22552_v48 = vadd.f32 %v19046_v46, %v22523_v36  ;;  %v22554_v49 = vpop.f32.mrb[3].mxu1 }
 0x313   : > { %v1294_v27 = vpop.f32.mrb[4].mxu0  ;;  %19069 = vmatpush3.xpose.msk.msra.mxu1 %vm1496_vm1, %v22489_v26  ;;  %19070 = vmatprep.mubr.msk.f32.mxu1 %vm21649_vm0, %v25365_v11 }
 0x314   : > { %v1296_v29 = vpop.f32.mrb[5].mxu0  ;;  %19073 = vmatprep.subr.mxu1 %v25365_v11  ;;  %v22514_v34 = vadd.f32 %v1294_v27, %v22477_v19 }
 0x315   : > { %v22502_v30 = vadd.f32 %v1296_v29, %v22474_v17  ;;  %v1298_v31 = vpop.f32.mrb[6].mxu0 }
 0x316   : > { %19071 = vmatmul.mubr.msk.f32.vlgmr.msra.gmra.mrb[22].mxu1 %vm1496_vm1, %v22498_v28  ;;  %v1300_v32 = vpop.f32.mrb[7].mxu0  ;;  %v22530_v38 = vadd.f32 %v1298_v31, %v22477_v19 }
 0x317   : > { %19074 = vmatpush3.xpose.msk.msra.mxu1 %vm1496_vm1, %v22502_v30  ;;  %19075 = vmatprep.mubr.msk.f32.mxu1 %vm21649_vm0, %v25365_v11  ;;  %v22518_v35 = vadd.f32 %v1300_v32, %v22474_v17  ;;  %v19049_v56 = vpop.f32.mrb[4].mxu1 }
 0x318   : > { %19078 = vmatprep.subr.mxu1 %v25365_v11  ;;  %v22575_v58 = vadd.f32 %v19049_v56, %v22523_v36  ;;  %v1433_v59 = vpop.f32.mrb[5].mxu1 }
 0x319   : > { %v22582_v60 = vadd.f32 %v1433_v59, %v22523_v36  ;;  %v19050_v61 = vpop.f32.mrb[6].mxu1 }
 0x31a   : > { %19076 = vmatmul.mubr.msk.f32.vlgmr.msra.gmra.mrb[24].mxu1 %vm1496_vm1, %v22514_v34  ;;  %v22589_v63 = vadd.f32 %v19050_v61, %v22523_v36  ;;  %v1436_v0 = vpop.f32.mrb[7].mxu1 }
 0x31b   : > { %v1304_v37 = vpop.f32.mrb[8].mxu0  ;;  %19079 = vmatpush3.xpose.msk.msra.mxu1 %vm1496_vm1, %v22518_v35  ;;  %19080 = vmatprep.mubr.msk.f32.mxu1 %vm21649_vm0, %v25365_v11  ;;  %v22595_v2 = vadd.f32 %v1436_v0, %v22523_v36 }
 0x31c   : > { %v1306_v39 = vpop.f32.mrb[9].mxu0  ;;  %19083 = vmatprep.subr.mxu1 %v25365_v11  ;;  %v22548_v47 = vadd.f32 %v1304_v37, %v22477_v19 }
 0x31d   : > { %v22534_v40 = vadd.f32 %v1306_v39, %v22474_v17  ;;  %v1308_v41 = vpop.f32.mrb[10].mxu0 }
 0x31e   : > { %19081 = vmatmul.mubr.msk.f32.vlgmr.msra.gmra.mrb[26].mxu1 %vm1496_vm1, %v22530_v38  ;;  %v1310_v43 = vpop.f32.mrb[11].mxu0  ;;  %v22566_v52 = vadd.f32 %v1308_v41, %v22477_v19 }
 0x31f   : > { %19084 = vmatpush3.xpose.msk.msra.mxu1 %vm1496_vm1, %v22534_v40  ;;  %19085 = vmatprep.mubr.msk.f32.mxu1 %vm21649_vm0, %v25365_v11  ;;  %v22557_v50 = vadd.f32 %v1310_v43, %v22474_v17  ;;  %v19053_v8 = vpop.f32.mrb[8].mxu1 }
 0x320   : > { %19088 = vmatprep.subr.mxu1 %v25365_v11  ;;  %25463 = vst [vmem:[#allocation50_spill] sm:$0xff] %v22566_v52  ;;  %v22613_v10 = vadd.f32 %v19053_v8, %v22523_v36  ;;  %v1449_v15 = vpop.f32.mrb[9].mxu1 }
 0x321   : > { %25462 = vst [vmem:[#allocation49_spill] sm:$0xff] %v22557_v50  ;;  %v22620_v18 = vadd.f32 %v1449_v15, %v22523_v36  ;;  %v19054_v20 = vpop.f32.mrb[10].mxu1 }
 0x322   : > { %19086 = vmatmul.mubr.msk.f32.vlgmr.msra.gmra.mrb[28].mxu1 %vm1496_vm1, %v22548_v47  ;;  %v22627_v24 = vadd.f32 %v19054_v20, %v22523_v36  ;;  %v1452_v27 = vpop.f32.mrb[11].mxu1 }
 0x323   : > { %v1314_v51 = vpop.f32.mrb[12].mxu0  ;;  %19089 = vmatpush3.xpose.msk.msra.mxu1 %vm1496_vm1, %v22557_v50  ;;  %19090 = vmatprep.mubr.msk.f32.mxu1 %vm21649_vm0, %v25365_v11  ;;  %v22633_v31 = vadd.f32 %v1452_v27, %v22523_v36 }
 0x324   : > { %v1316_v53 = vpop.f32.mrb[13].mxu0  ;;  %19093 = vmatprep.subr.mxu1 %v25365_v11  ;;  %v22585_v62 = vadd.f32 %v1314_v51, %v22477_v19 }
 0x325   : > { %v22570_v54 = vadd.f32 %v1316_v53, %v22474_v17  ;;  %v1318_v55 = vpop.f32.mrb[14].mxu0 }
 0x326   : > { %19091 = vmatmul.mubr.msk.f32.vlgmr.msra.gmra.mrb[30].mxu1 %vm1496_vm1, %v22566_v52  ;;  %v1320_v57 = vpop.f32.mrb[15].mxu0  ;;  %v22604_v4 = vadd.f32 %v1318_v55, %v22477_v19 }
 0x327   : > { %19094 = vmatpush3.xpose.msk.msra.mxu1 %vm1496_vm1, %v22570_v54  ;;  %19095 = vmatprep.mubr.msk.f32.mxu1 %vm21649_vm0, %v25365_v11  ;;  %v22592_v1 = vadd.f32 %v1320_v57, %v22474_v17  ;;  %v19057_v43 = vpop.f32.mrb[12].mxu1 }
 0x328   : > { %19098 = vmatprep.subr.mxu1 %v25365_v11  ;;  %25465 = vst [vmem:[#allocation52_spill] sm:$0xff] %v22604_v4  ;;  %v22651_v51 = vadd.f32 %v19057_v43, %v22523_v36  ;;  %v1465_v53 = vpop.f32.mrb[13].mxu1 }
 0x329   : > { %25464 = vst [vmem:[#allocation51_spill] sm:$0xff] %v22592_v1  ;;  %v22658_v55 = vadd.f32 %v1465_v53, %v22523_v36  ;;  %v19058_v56 = vpop.f32.mrb[14].mxu1 }
 0x32a   : > { %19096 = vmatmul.mubr.msk.f32.vlgmr.msra.gmra.mrb[32].mxu1 %vm1496_vm1, %v22585_v62  ;;  %25468 = vst [vmem:[#allocation55_spill] sm:$0xff] %v22651_v51  ;;  %v22665_v59 = vadd.f32 %v19058_v56, %v22523_v36  ;;  %v1468_v61 = vpop.f32.mrb[15].mxu1 }
 0x32b   : > { %v1324_v3 = vpop.f32.mrb[16].mxu0  ;;  %19099 = vmatpush3.xpose.msk.msra.mxu1 %vm1496_vm1, %v22592_v1  ;;  %19100 = vmatprep.mubr.msk.f32.mxu1 %vm21649_vm0, %v25365_v11  ;;  %25469 = vst [vmem:[#allocation56_spill] sm:$0xff] %v22658_v55 }
 0x32c   : > { %v1326_v5 = vpop.f32.mrb[17].mxu0  ;;  %19103 = vmatprep.subr.mxu1 %v25365_v11  ;;  %v22623_v23 = vadd.f32 %v1324_v3, %v22477_v19  ;;  %25470 = vst [vmem:[#allocation57_spill] sm:$0xff] %v22665_v59  ;;  %v22671_v3 = vadd.f32 %v1468_v61, %v22523_v36 }
 0x32d   : > { %v22608_v6 = vadd.f32 %v1326_v5, %v22474_v17  ;;  %v1328_v7 = vpop.f32.mrb[18].mxu0 }
 0x32e   : > { %19101 = vmatmul.mubr.msk.f32.vlgmr.msra.gmra.mrb[34].mxu1 %vm1496_vm1, %v22604_v4  ;;  %v1330_v9 = vpop.f32.mrb[19].mxu0  ;;  %v22642_v37 = vadd.f32 %v1328_v7, %v22477_v19  ;;  %25472 = vst [vmem:[#allocation59_spill] sm:$0xff] %v22671_v3 }
 0x32f   : > { %19104 = vmatpush3.xpose.msk.msra.mxu1 %vm1496_vm1, %v22608_v6  ;;  %19105 = vmatprep.mubr.msk.f32.mxu1 %vm21649_vm0, %v25365_v11  ;;  %v22630_v29 = vadd.f32 %v1330_v9, %v22474_v17  ;;  %v19061_v20 = vpop.f32.mrb[16].mxu1 }
 0x330   : > { %19108 = vmatprep.subr.mxu1 %v25365_v11  ;;  %25467 = vst [vmem:[#allocation54_spill] sm:$0xff] %v22642_v37 }
 0x331   : > { %25466 = vst [vmem:[#allocation53_spill] sm:$0xff] %v22630_v29 }
 0x332   : > { %19106 = vmatmul.mubr.msk.f32.vlgmr.msra.gmra.mrb[36].mxu1 %vm1496_vm1, %v22623_v23 }
 0x333   : > { %v1334_v32 = vpop.f32.mrb[20].mxu0  ;;  %19109 = vmatpush3.xpose.msk.msra.mxu1 %vm1496_vm1, %v22630_v29  ;;  %19110 = vmatprep.mubr.msk.f32.mxu1 %vm21649_vm0, %v25365_v11 }
 0x334   : > { %v1336_v39 = vpop.f32.mrb[21].mxu0  ;;  %19113 = vmatprep.subr.mxu1 %v25365_v11  ;;  %v22661_v57 = vadd.f32 %v1334_v32, %v22477_v19  ;;  %v22689_v32 = vadd.f32 %v19061_v20, %v22523_v36 }
 0x335   : > { %v22646_v41 = vadd.f32 %v1336_v39, %v22474_v17  ;;  %v1338_v42 = vpop.f32.mrb[22].mxu0  ;;  %v1481_v39 = vpop.f32.mrb[17].mxu1 }
 0x336   : > { %19111 = vmatmul.mubr.msk.f32.vlgmr.msra.gmra.mrb[38].mxu1 %vm1496_vm1, %v22642_v37  ;;  %v1340_v46 = vpop.f32.mrb[23].mxu0  ;;  %v22680_v7 = vadd.f32 %v1338_v42, %v22477_v19  ;;  %25474 = vst [vmem:[#allocation61_spill] sm:$0xff] %v22689_v32  ;;  %v22699_v42 = vadd.f32 %v1481_v39, %v22523_v36 }
 0x337   : > { %19114 = vmatpush3.xpose.msk.msra.mxu1 %vm1496_vm1, %v22646_v41  ;;  %19115 = vmatprep.mubr.msk.f32.mxu1 %vm21649_vm0, %v25365_v11  ;;  %v22668_v0 = vadd.f32 %v1340_v46, %v22474_v17  ;;  %v19062_v46 = vpop.f32.mrb[18].mxu1 }
 0x338   : > { %19118 = vmatprep.subr.mxu1 %v25365_v11  ;;  %25473 = vst [vmem:[#allocation60_spill] sm:$0xff] %v22680_v7  ;;  %25476 = vst [vmem:[#allocation63_spill] sm:$0xff] %v22699_v42  ;;  %v22706_v56 = vadd.f32 %v19062_v46, %v22523_v36  ;;  %v1484_v61 = vpop.f32.mrb[19].mxu1 }
 0x339   : > { %25471 = vst [vmem:[#allocation58_spill] sm:$0xff] %v22668_v0 }
 0x33a   : > { %19116 = vmatmul.mubr.msk.f32.vlgmr.msra.gmra.mrb[40].mxu1 %vm1496_vm1, %v22661_v57  ;;  %25477 = vst [vmem:[#allocation64_spill] sm:$0xff] %v22706_v56 }
 0x33b   : > { %v1344_v5 = vpop.f32.mrb[24].mxu0  ;;  %19119 = vmatpush3.xpose.msk.msra.mxu1 %vm1496_vm1, %v22668_v0  ;;  %19120 = vmatprep.mubr.msk.f32.mxu1 %vm21649_vm0, %v25365_v11 }
 0x33c   : > { %v1346_v8 = vpop.f32.mrb[25].mxu0  ;;  %19128 = vmatprep.subr.mxu1 %v25365_v11  ;;  %v22702_v53 = vadd.f32 %v1344_v5, %v22477_v19 }
 0x33d   : > { %v22684_v9 = vadd.f32 %v1346_v8, %v22474_v17  ;;  %v1348_v15 = vpop.f32.mrb[26].mxu0  ;;  %v22711_v8 = vadd.f32 %v1484_v61, %v22523_v36 }
 0x33e   : > { %v1350_v27 = vpop.f32.mrb[27].mxu0  ;;  %19121 = vmatmul.mubr.msk.f32.vlgmr.msra.gmra.mrb[42].mxu1 %vm1496_vm1, %v22680_v7  ;;  %v22714_v20 = vadd.f32 %v1348_v15, %v22477_v19 }
 0x33f   : > { %v22692_v43 = vadd.f32 %v1350_v27, %v22474_v17  ;;  %19124 = vmatpush3.xpose.msk.msra.mxu0 %vm1496_vm1, %v22684_v9  ;;  %19130 = vmatprep.mubr.msk.f32.mxu1 %vm21649_vm0, %v25365_v11  ;;  %25478 = vst [vmem:[#allocation65_spill] sm:$0xff] %v22711_v8 }
 0x340   : > { %19133 = vmatprep.subr.mxu0 %v25365_v11  ;;  %25479 = vst [vmem:[#allocation66_spill] sm:$0xff] %v22714_v20 }
 0x341   : > { %25475 = vst [vmem:[#allocation62_spill] sm:$0xff] %v22692_v43  ;;  %19129 = vmatpush3.xpose.msk.msra.mxu1 %vm1496_vm1, %v22692_v43 }
 0x342   : > { %19126 = vmatmul.mubr.msk.f32.vlgmr.msra.gmra.mrb[40].mxu0 %vm1496_vm1, %v22702_v53  ;;  %19138 = vmatprep.subr.mxu1 %v25365_v11 }
 0x343   : > { %v1354_v5 = vpop.f32.mrb[28].mxu0  ;;  %19135 = vmatprep.mubr.msk.f32.mxu0 %vm21649_vm0, %v25365_v11 }
 0x344   : > { %v1356_v27 = vpop.f32.mrb[29].mxu0  ;;  %19131 = vmatmul.mubr.msk.f32.vlgmr.msra.gmra.mrb[44].mxu1 %vm1496_vm1, %v22714_v20  ;;  %v22734_v12 = vadd.f32 %v1354_v5, %v22477_v19 }
 0x345   : > { %v22724_v39 = vadd.f32 %v1356_v27, %v22474_v17  ;;  %v1358_v46 = vpop.f32.mrb[30].mxu0  ;;  %19140 = vmatprep.mubr.msk.f32.mxu1 %vm21649_vm0, %v25365_v11 }
 0x346   : > { %v1360_v15 = vpop.f32.mrb[31].mxu0  ;;  %v22740_v27 = vadd.f32 %v1358_v46, %v22477_v19 }
 0x347   : > { %v22729_v61 = vadd.f32 %v1360_v15, %v22474_v17  ;;  %19134 = vmatpush3.xpose.msk.msra.mxu0 %vm1496_vm1, %v22724_v39 }
 0x348   : > { %19143 = vmatprep.subr.mxu0 %v25365_v11  ;;  %25481 = vst [vmem:[#allocation68_spill] sm:$0xff] %v22740_v27 }
 0x349   : > { %25480 = vst [vmem:[#allocation67_spill] sm:$0xff] %v22729_v61  ;;  %19139 = vmatpush3.xpose.msk.msra.mxu1 %vm1496_vm1, %v22729_v61 }
 0x34a   : > { %19136 = vmatmul.mubr.msk.f32.vlgmr.msra.gmra.mrb[42].mxu0 %vm1496_vm1, %v22734_v12  ;;  %19148 = vmatprep.subr.mxu1 %v25365_v11 }
 0x34b   : > { %v1364_v15 = vpop.f32.mrb[32].mxu0  ;;  %19145 = vmatprep.mubr.msk.f32.mxu0 %vm21649_vm0, %v25365_v11 }
 0x34c   : > { %v1366_v22 = vpop.f32.mrb[33].mxu0  ;;  %19141 = vmatmul.mubr.msk.f32.vlgmr.msra.gmra.mrb[46].mxu1 %vm1496_vm1, %v22740_v27  ;;  %v22755_v46 = vadd.f32 %v1364_v15, %v22477_v19 }
 0x34d   : > { %v22750_v5 = vadd.f32 %v1366_v22, %v22474_v17  ;;  %v1368_v14 = vpop.f32.mrb[34].mxu0  ;;  %19150 = vmatprep.mubr.msk.f32.mxu1 %vm21649_vm0, %v25365_v11 }
 0x34e   : > { %25483 = vst [vmem:[#allocation70_spill] sm:$0xff] %v22755_v46  ;;  %v1370_v33 = vpop.f32.mrb[35].mxu0  ;;  %v22763_v13 = vadd.f32 %v1368_v14, %v22477_v19 }
 0x34f   : > { %25482 = vst [vmem:[#allocation69_spill] sm:$0xff] %v22750_v5  ;;  %v22758_v16 = vadd.f32 %v1370_v33, %v22474_v17  ;;  %19144 = vmatpush3.xpose.msk.msra.mxu0 %vm1496_vm1, %v22750_v5 }
 0x350   : > { %25485 = vst [vmem:[#allocation72_spill] sm:$0xff] %v22763_v13  ;;  %19153 = vmatprep.subr.mxu0 %v25365_v11 }
 0x351   : > { %25484 = vst [vmem:[#allocation71_spill] sm:$0xff] %v22758_v16  ;;  %19149 = vmatpush3.xpose.msk.msra.mxu1 %vm1496_vm1, %v22758_v16 }
 0x352   : > { %19146 = vmatmul.mubr.msk.f32.vlgmr.msra.gmra.mrb[44].mxu0 %vm1496_vm1, %v22755_v46  ;;  %19158 = vmatprep.subr.mxu1 %v25365_v11 }
 0x353   : > { %v1374_v22 = vpop.f32.mrb[36].mxu0  ;;  %19155 = vmatprep.mubr.msk.f32.mxu0 %vm21649_vm0, %v25365_v11 }
 0x354   : > { %v1376_v33 = vpop.f32.mrb[37].mxu0  ;;  %19151 = vmatmul.mubr.msk.f32.vlgmr.msra.gmra.mrb[48].mxu1 %vm1496_vm1, %v22763_v13  ;;  %v22781_v56 = vadd.f32 %v1374_v22, %v22477_v19  ;;  %v22790_v13 = vadd.f32 %v22541_v45, %v22523_v36  ;;  %v22800_v22 = vadd.f32 %v22554_v49, %v22523_v36 }
 0x355   : > { %v22776_v14 = vadd.f32 %v1376_v33, %v22474_v17  ;;  %v1378_v15 = vpop.f32.mrb[38].mxu0  ;;  %19160 = vmatprep.mubr.msk.f32.mxu1 %vm21649_vm0, %v25365_v11 }
 0x356   : > { %25487 = vst [vmem:[#allocation74_spill] sm:$0xff] %v22781_v56  ;;  %v1380_v16 = vpop.f32.mrb[39].mxu0  ;;  %25489 = vst [vmem:[#allocation76_spill] sm:$0xff] %v22790_v13  ;;  %v22793_v33 = vadd.f32 %v1378_v15, %v22477_v19 }
 0x357   : > { %25486 = vst [vmem:[#allocation73_spill] sm:$0xff] %v22776_v14  ;;  %v22784_v27 = vadd.f32 %v1380_v16, %v22474_v17  ;;  %19154 = vmatpush3.xpose.msk.msra.mxu0 %vm1496_vm1, %v22776_v14  ;;  %25491 = vst [vmem:[#allocation78_spill] sm:$0xff] %v22800_v22 }
 0x358   : > { %25490 = vst [vmem:[#allocation77_spill] sm:$0xff] %v22793_v33  ;;  %19163 = vmatprep.subr.mxu0 %v25365_v11 }
 0x359   : > { %25488 = vst [vmem:[#allocation75_spill] sm:$0xff] %v22784_v27  ;;  %19159 = vmatpush3.xpose.msk.msra.mxu1 %vm1496_vm1, %v22784_v27 }
 0x35a   : > { %19156 = vmatmul.mubr.msk.f32.vlgmr.msra.gmra.mrb[46].mxu0 %vm1496_vm1, %v22781_v56  ;;  %19168 = vmatprep.subr.mxu1 %v25365_v11 }
 0x35b   : > { %19164 = vmatpush3.msra.mxu0 %v22790_v13  ;;  %19165 = vmatprep.mubr.msk.f32.mxu0 %vm21649_vm0, %v25365_v11 }
 0x35c   : > { %19161 = vmatmul.mubr.msk.f32.vlgmr.msra.gmra.mrb[50].mxu1 %vm1496_vm1, %v22793_v33  ;;  %19173 = vmatprep.subr.mxu0 %v25365_v11 }
 0x35d   : > { %19169 = vmatpush3.msra.mxu1 %v22800_v22  ;;  %19170 = vmatprep.mubr.msk.f32.mxu1 %vm21649_vm0, %v25365_v11 }
 0x35e   : > { %19178 = vmatprep.subr.mxu1 %v25365_v11 }
 0x3e5   : > { %v1569_v16 = vpop.f32.mrb[20].mxu1 }
 0x3e6   : > { %v19067_v17 = vpop.f32.mrb[21].mxu1  ;;  %v22815_v19 = vmul.f32 0.14142136, %v1569_v16 }
 0x3e8   : > { %v3038_v36 = vsel %vm3037_vm2, %v22815_v19, -inf }
 0x3e9   : > { %3039 = vmax.xlane.f32.xlu0 %v3038_v36  ;;  %v1645_v45 = vpop.f32.mrb[22].mxu1 }
 0x3ea   : > { %v19072_v49 = vpop.f32.mrb[23].mxu1  ;;  %v22819_v15 = vmul.f32 0.14142136, %v1645_v45 }
 0x3ec   : > { %v3041_v22 = vsel %vm3037_vm2, %v22819_v15, -inf }
 0x3ed   : > { %3042 = vmax.xlane.f32.xlu0 %v3041_v22  ;;  %v1721_v33 = vpop.f32.mrb[24].mxu1 }
 0x3ee   : > { %v22823_v27 = vmul.f32 0.14142136, %v1721_v33  ;;  %v19077_v11 = vpop.f32.mrb[25].mxu1 }
 0x3f0   : > { %v3044_v16 = vsel %vm3037_vm2, %v22823_v27, -inf }
 0x3f1   : > { %3045 = vmax.xlane.f32.xlu1 %v3044_v16  ;;  %v1797_v17 = vpop.f32.mrb[26].mxu1 }
 0x3f2   : > { %v22827_v61 = vmul.f32 0.14142136, %v1797_v17  ;;  %v19082_v36 = vpop.f32.mrb[27].mxu1 }
 0x3f4   : > { %v3047_v45 = vsel %vm3037_vm2, %v22827_v61, -inf }
 0x3f5   : > { %3048 = vmax.xlane.f32.xlu1 %v3047_v45  ;;  %v1873_v49 = vpop.f32.mrb[28].mxu1 }
 0x3f6   : > { %v22831_v20 = vmul.f32 0.14142136, %v1873_v49  ;;  %v19087_v22 = vpop.f32.mrb[29].mxu1 }
 0x3f8   : > { %v3050_v33 = vsel %vm3037_vm2, %v22831_v20, -inf }
 0x3f9   : > { %3051 = vmax.xlane.f32.xlu0 %v3050_v33  ;;  %v1949_v11 = vpop.f32.mrb[30].mxu1 }
 0x3fa   : > { %v22835_v43 = vmul.f32 0.14142136, %v1949_v11  ;;  %v19092_v16 = vpop.f32.mrb[31].mxu1 }
 0x3fc   : > { %v3053_v17 = vsel %vm3037_vm2, %v22835_v43, -inf }
 0x3fd   : > { %3054 = vmax.xlane.f32.xlu1 %v3053_v17  ;;  %v2025_v36 = vpop.f32.mrb[32].mxu1 }
 0x3fe   : > { %v22839_v7 = vmul.f32 0.14142136, %v2025_v36  ;;  %v19097_v45 = vpop.f32.mrb[33].mxu1 }
 0x400   : > { %v3056_v49 = vsel %vm3037_vm2, %v22839_v7, -inf }
 0x401   : > { %3057 = vmax.xlane.f32.xlu0 %v3056_v49  ;;  %v2101_v22 = vpop.f32.mrb[34].mxu1 }
 0x402   : > { %v22843_v32 = vmul.f32 0.14142136, %v2101_v22  ;;  %v19102_v33 = vpop.f32.mrb[35].mxu1 }
 0x404   : > { %v3059_v11 = vsel %vm3037_vm2, %v22843_v32, -inf }
 0x405   : > { %3060 = vmax.xlane.f32.xlu1 %v3059_v11  ;;  %v2177_v16 = vpop.f32.mrb[36].mxu1 }
 0x406   : > { %v22847_v0 = vmul.f32 0.14142136, %v2177_v16  ;;  %v19107_v17 = vpop.f32.mrb[37].mxu1 }
 0x408   : > { %v3062_v36 = vsel %vm3037_vm2, %v22847_v0, -inf }
 0x409   : > { %3063 = vmax.xlane.f32.xlu0 %v3062_v36  ;;  %v2253_v45 = vpop.f32.mrb[38].mxu1 }
 0x40a   : > { %v22851_v8 = vmul.f32 0.14142136, %v2253_v45  ;;  %v19112_v49 = vpop.f32.mrb[39].mxu1 }
 0x40c   : > { %v3065_v22 = vsel %vm3037_vm2, %v22851_v8, -inf }
 0x40d   : > { %3066 = vmax.xlane.f32.xlu1 %v3065_v22  ;;  %v2329_v33 = vpop.f32.mrb[40].mxu1 }
 0x40e   : > { %v22855_v37 = vmul.f32 0.14142136, %v2329_v33  ;;  %v19117_v11 = vpop.f32.mrb[41].mxu1 }
 0x410   : > { %v3068_v16 = vsel %vm3037_vm2, %v22855_v37, -inf }
 0x411   : > { %3069 = vmax.xlane.f32.xlu0 %v3068_v16  ;;  %v2405_v17 = vpop.f32.mrb[42].mxu1 }
 0x412   : > { %v22859_v42 = vmul.f32 0.14142136, %v2405_v17  ;;  %v19122_v36 = vpop.f32.mrb[43].mxu1 }
 0x414   : > { %v3071_v45 = vsel %vm3037_vm2, %v22859_v42, -inf }
 0x415   : > { %v2481_v49 = vpop.f32.mrb[40].mxu0  ;;  %3072 = vmax.xlane.f32.xlu1 %v3071_v45 }
 0x416   : > { %v22863_v13 = vmul.f32 0.14142136, %v2481_v49  ;;  %v19127_v22 = vpop.f32.mrb[41].mxu0 }
 0x417   : > { %v2557_v29 = vpop.f32.mrb[44].mxu1 }
 0x418   : > { %v22865_v33 = vmul.f32 0.14142136, %v2557_v29  ;;  %v3074_v11 = vsel %vm3037_vm2, %v22863_v13, -inf  ;;  %v19132_v56 = vpop.f32.mrb[45].mxu1 }
 0x419   : > { %3075 = vmax.xlane.f32.xlu0 %v3074_v11 }
 0x41a   : > { %v3077_v16 = vsel %vm3037_vm2, %v22865_v33, -inf }
 0x41b   : > { %3078 = vmax.xlane.f32.xlu1 %v3077_v16 }
 0x41d   : > { %v2633_v17 = vpop.f32.mrb[42].mxu0 }
 0x41e   : > { %v22871_v36 = vmul.f32 0.14142136, %v2633_v17  ;;  %v19137_v59 = vpop.f32.mrb[43].mxu0 }
 0x41f   : > { %v2709_v45 = vpop.f32.mrb[46].mxu1 }
 0x420   : > { %v22873_v49 = vmul.f32 0.14142136, %v2709_v45  ;;  %v3080_v29 = vsel %vm3037_vm2, %v22871_v36, -inf  ;;  %v19142_v22 = vpop.f32.mrb[47].mxu1 }
 0x421   : > { %3081 = vmax.xlane.f32.xlu0 %v3080_v29 }
 0x422   : > { %v3083_v56 = vsel %vm3037_vm2, %v22873_v49, -inf }
 0x423   : > { %3084 = vmax.xlane.f32.xlu1 %v3083_v56 }
 0x425   : > { %v2785_v11 = vpop.f32.mrb[44].mxu0 }
 0x426   : > { %v22879_v4 = vmul.f32 0.14142136, %v2785_v11  ;;  %v19147_v16 = vpop.f32.mrb[45].mxu0 }
 0x427   : > { %v2861_v51 = vpop.f32.mrb[48].mxu1 }
 0x428   : > { %v22881_v17 = vmul.f32 0.14142136, %v2861_v51  ;;  %v3086_v59 = vsel %vm3037_vm2, %v22879_v4, -inf  ;;  %v19152_v45 = vpop.f32.mrb[49].mxu1 }
 0x429   : > { %3087 = vmax.xlane.f32.xlu0 %v3086_v59 }
 0x42a   : > { %v3089_v22 = vsel %vm3037_vm2, %v22881_v17, -inf }
 0x42b   : > { %3090 = vmax.xlane.f32.xlu1 %v3089_v22 }
 0x42d   : > { %v2937_v29 = vpop.f32.mrb[46].mxu0 }
 0x42e   : > { %v22887_v14 = vmul.f32 0.14142136, %v2937_v29  ;;  %v19157_v56 = vpop.f32.mrb[47].mxu0 }
 0x42f   : > { %v3013_v1 = vpop.f32.mrb[50].mxu1 }
 0x430   : > { %v22889_v11 = vmul.f32 0.14142136, %v3013_v1  ;;  %v3092_v51 = vsel %vm3037_vm2, %v22887_v14, -inf  ;;  %v19162_v16 = vpop.f32.mrb[51].mxu1 }
 0x431   : > { %3093 = vmax.xlane.f32.xlu0 %v3092_v51 }
 0x432   : > { %v3095_v45 = vsel %vm3037_vm2, %v22889_v11, -inf }
 0x433   : > { %3096 = vmax.xlane.f32.xlu1 %v3095_v45 }
 0x476   : > { %v3040_v59 = vpop.xlane.xlu0 %3039 }
 0x477   : > { %v3098_v3 = vsub.f32 %v22815_v19, %v3040_v59 }
 0x479   : > { %v3118_v22 = vmul.f32 1.442695, %v3098_v3 }
 0x47a   : > { %v3043_v46 = vpop.xlane.xlu0 %3042 }
 0x47b   : > { %19823 = vpow2.f32 %v3118_v22  ;;  %v3099_v29 = vsub.f32 %v22819_v15, %v3043_v46 }
 0x47d   : > { %v3120_v56 = vmul.f32 1.442695, %v3099_v29 }
 0x47e   : > { %v3046_v1 = vpop.xlane.xlu1 %3045 }
 0x47f   : > { %19825 = vpow2.f32 %v3120_v56  ;;  %v3100_v52 = vsub.f32 %v22823_v27, %v3046_v1 }
 0x481   : > { %v3122_v55 = vmul.f32 1.442695, %v3100_v52 }
 0x482   : > { %v3049_v16 = vpop.xlane.xlu1 %3048 }
 0x483   : > { %19827 = vpow2.f32 %v3122_v55  ;;  %v3101_v51 = vsub.f32 %v22827_v61, %v3049_v16 }
 0x485   : > { %v22899_v5 = vpop.eup %19823  ;;  %v3124_v45 = vmul.f32 1.442695, %v3101_v51 }
 0x486   : > { %v3052_v50 = vpop.xlane.xlu0 %3051  ;;  %v3158_v3 = vsel %vm3037_vm2, %v22899_v5, 0.0 }
 0x487   : > { %19829 = vpow2.f32 %v3124_v45  ;;  %v3102_v46 = vsub.f32 %v22831_v20, %v3052_v50  ;;  %3159 = vadd.xlane.f32.xlu0 %v3158_v3 }
 0x489   : > { %v22904_v19 = vpop.eup %19825  ;;  %v3126_v15 = vmul.f32 1.442695, %v3102_v46 }
 0x48a   : > { %v3055_v27 = vpop.xlane.xlu1 %3054  ;;  %v3161_v52 = vsel %vm3037_vm2, %v22904_v19, 0.0 }
 0x48b   : > { %19831 = vpow2.f32 %v3126_v15  ;;  %v3103_v55 = vsub.f32 %v22835_v43, %v3055_v27  ;;  %3162 = vadd.xlane.f32.xlu1 %v3161_v52 }
 0x48d   : > { %v22909_v61 = vpop.eup %19827  ;;  %v3128_v59 = vmul.f32 1.442695, %v3103_v55 }
 0x48e   : > { %v3058_v22 = vpop.xlane.xlu0 %3057  ;;  %v3164_v29 = vsel %vm3037_vm2, %v22909_v61, 0.0 }
 0x48f   : > { %19833 = vpow2.f32 %v3128_v59  ;;  %v3104_v50 = vsub.f32 %v22839_v7, %v3058_v22  ;;  %3165 = vadd.xlane.f32.xlu0 %v3164_v29 }
 0x491   : > { %v22914_v20 = vpop.eup %19829  ;;  %v3130_v56 = vmul.f32 1.442695, %v3104_v50 }
 0x492   : > { %v3061_v1 = vpop.xlane.xlu1 %3060  ;;  %v3167_v16 = vsel %vm3037_vm2, %v22914_v20, 0.0 }
 0x493   : > { %19835 = vpow2.f32 %v3130_v56  ;;  %v3105_v43 = vsub.f32 %v22843_v32, %v3061_v1  ;;  %3168 = vadd.xlane.f32.xlu1 %v3167_v16 }
 0x495   : > { %v22919_v51 = vpop.eup %19831  ;;  %v3132_v45 = vmul.f32 1.442695, %v3105_v43 }
 0x496   : > { %v3064_v3 = vpop.xlane.xlu0 %3063  ;;  %v3170_v46 = vsel %vm3037_vm2, %v22919_v51, 0.0 }
 0x497   : > { %19837 = vpow2.f32 %v3132_v45  ;;  %v3106_v7 = vsub.f32 %v22847_v0, %v3064_v3  ;;  %3171 = vadd.xlane.f32.xlu0 %v3170_v46 }
 0x499   : > { %v22924_v15 = vpop.eup %19833  ;;  %v3134_v27 = vmul.f32 1.442695, %v3106_v7 }
 0x49a   : > { %v3067_v52 = vpop.xlane.xlu1 %3066  ;;  %v3173_v55 = vsel %vm3037_vm2, %v22924_v15, 0.0 }
 0x49b   : > { %19839 = vpow2.f32 %v3134_v27  ;;  %v3107_v32 = vsub.f32 %v22851_v8, %v3067_v52  ;;  %3174 = vadd.xlane.f32.xlu1 %v3173_v55 }
 0x49d   : > { %v22929_v59 = vpop.eup %19835  ;;  %v3136_v22 = vmul.f32 1.442695, %v3107_v32 }
 0x49e   : > { %v3070_v29 = vpop.xlane.xlu0 %3069  ;;  %v3176_v50 = vsel %vm3037_vm2, %v22929_v59, 0.0 }
 0x49f   : > { %19841 = vpow2.f32 %v3136_v22  ;;  %v3108_v0 = vsub.f32 %v22855_v37, %v3070_v29  ;;  %3177 = vadd.xlane.f32.xlu0 %v3176_v50 }
 0x4a1   : > { %v22934_v56 = vpop.eup %19837  ;;  %v3138_v1 = vmul.f32 1.442695, %v3108_v0 }
 0x4a2   : > { %v3073_v16 = vpop.xlane.xlu1 %3072  ;;  %v3179_v43 = vsel %vm3037_vm2, %v22934_v56, 0.0 }
 0x4a3   : > { %19843 = vpow2.f32 %v3138_v1  ;;  %v3109_v8 = vsub.f32 %v22859_v42, %v3073_v16  ;;  %3180 = vadd.xlane.f32.xlu1 %v3179_v43 }
 0x4a5   : > { %v22939_v45 = vpop.eup %19839  ;;  %v3140_v3 = vmul.f32 1.442695, %v3109_v8 }
 0x4a6   : > { %v3076_v46 = vpop.xlane.xlu0 %3075  ;;  %v3182_v7 = vsel %vm3037_vm2, %v22939_v45, 0.0 }
 0x4a7   : > { %19845 = vpow2.f32 %v3140_v3  ;;  %v3110_v37 = vsub.f32 %v22863_v13, %v3076_v46  ;;  %3183 = vadd.xlane.f32.xlu0 %v3182_v7 }
 0x4a8   : > { %v3079_v27 = vpop.xlane.xlu1 %3078 }
 0x4a9   : > { %v22944_v52 = vpop.eup %19841  ;;  %v3142_v55 = vmul.f32 1.442695, %v3110_v37  ;;  %v3111_v32 = vsub.f32 %v22865_v33, %v3079_v27 }
 0x4aa   : > { %v3185_v42 = vsel %vm3037_vm2, %v22944_v52, 0.0 }
 0x4ab   : > { %19847 = vpow2.f32 %v3142_v55  ;;  %v3144_v22 = vmul.f32 1.442695, %v3111_v32  ;;  %3186 = vadd.xlane.f32.xlu1 %v3185_v42 }
 0x4ad   : > { %v22949_v29 = vpop.eup %19843  ;;  %19849 = vpow2.f32 %v3144_v22 }
 0x4ae   : > { %v3082_v50 = vpop.xlane.xlu0 %3081  ;;  %v3188_v13 = vsel %vm3037_vm2, %v22949_v29, 0.0 }
 0x4af   : > { %v3112_v0 = vsub.f32 %v22871_v36, %v3082_v50  ;;  %3189 = vadd.xlane.f32.xlu0 %v3188_v13 }
 0x4b0   : > { %v3085_v1 = vpop.xlane.xlu1 %3084 }
 0x4b1   : > { %v22954_v16 = vpop.eup %19845  ;;  %v3146_v33 = vmul.f32 1.442695, %v3112_v0  ;;  %v3113_v43 = vsub.f32 %v22873_v49, %v3085_v1 }
 0x4b2   : > { %v3191_v8 = vsel %vm3037_vm2, %v22954_v16, 0.0 }
 0x4b3   : > { %19851 = vpow2.f32 %v3146_v33  ;;  %v3148_v3 = vmul.f32 1.442695, %v3113_v43  ;;  %3192 = vadd.xlane.f32.xlu1 %v3191_v8 }
 0x4b5   : > { %v22959_v46 = vpop.eup %19847  ;;  %19853 = vpow2.f32 %v3148_v3 }
 0x4b6   : > { %v3088_v7 = vpop.xlane.xlu0 %3087  ;;  %v3194_v36 = vsel %vm3037_vm2, %v22959_v46, 0.0 }
 0x4b7   : > { %v22963_v37 = vpop.eup %19849  ;;  %v3114_v27 = vsub.f32 %v22879_v4, %v3088_v7  ;;  %3195 = vadd.xlane.f32.xlu0 %v3194_v36 }
 0x4b8   : > { %v3197_v49 = vsel %vm3037_vm2, %v22963_v37, 0.0  ;;  %v3091_v1 = vpop.xlane.xlu1 %3090 }
 0x4b9   : > { %v3150_v55 = vmul.f32 1.442695, %v3114_v27  ;;  %3198 = vadd.xlane.f32.xlu1 %v3197_v49  ;;  %v3115_v43 = vsub.f32 %v22881_v17, %v3091_v1 }
 0x4bb   : > { %19855 = vpow2.f32 %v3150_v55  ;;  %v3152_v3 = vmul.f32 1.442695, %v3115_v43 }
 0x4bd   : > { %v22968_v32 = vpop.eup %19851 }
 0x4be   : > { %v3200_v42 = vsel %vm3037_vm2, %v22968_v32, 0.0  ;;  %v3094_v0 = vpop.xlane.xlu0 %3093 }
 0x4bf   : > { %v22972_v22 = vpop.eup %19853  ;;  %3201 = vadd.xlane.f32.xlu0 %v3200_v42  ;;  %v3116_v33 = vsub.f32 %v22887_v14, %v3094_v0 }
 0x4c0   : > { %v3203_v50 = vsel %vm3037_vm2, %v22972_v22, 0.0 }
 0x4c1   : > { %3204 = vadd.xlane.f32.xlu1 %v3203_v50  ;;  %v3154_v8 = vmul.f32 1.442695, %v3116_v33 }
 0x4c3   : > { %19857 = vpow2.f32 %v3154_v8 }
 0x4c4   : > { %19859 = vpow2.f32 %v3152_v3 }
 0x4c5   : > { %v22976_v4 = vpop.eup %19855 }
 0x4c6   : > { %v3206_v13 = vsel %vm3037_vm2, %v22976_v4, 0.0 }
 0x4c7   : > { %3207 = vadd.xlane.f32.xlu0 %v3206_v13 }
 0x4d2   : > { %4798 = vrot.lane.b32.xlu1 %v22489_v26, %s21650_s26  ;;  %v22990_v26 = vpop.eup %19857 }
 0x4d3   : > { %v22992_v7 = vpop.eup %19859 }
 0x4d6   : > { %4718 = vrot.lane.b32.xlu1 %v22485_v25, %s21650_s26  ;;  %v3212_v25 = vsel %vm3037_vm2, %v22990_v26, 0.0 }
 0x4da   : > { %4796 = vrot.lane.b32.xlu1 %v22498_v28, %s21650_s26  ;;  %v3097_v28 = vpop.xlane.xlu1 %3096 }
 0x4db   : > { %v3117_v36 = vsub.f32 %v22889_v11, %v3097_v28  ;;  %v25495_v28 = vld [vmem:[#allocation56_spill] sm:$0xff] }
 0x4dd   : > { %4720 = vrot.lane.b32.xlu0 %v22480_v21, %s21650_s26  ;;  %v3209_v21 = vsel %vm3037_vm2, %v22992_v7, 0.0 }
 0x4fc   : > { %3213 = vadd.xlane.f32.xlu0 %v3212_v25 }
 0x4fe   : > { %3210 = vadd.xlane.f32.xlu1 %v3209_v21  ;;  %v25494_v21 = vld [vmem:[#allocation69_spill] sm:$0xff] }
 0x50f   : > { %4954 = vrot.lane.b32.xlu1 %v22518_v35, %s21650_s26 }
 0x512   : > { %4876 = vrot.lane.b32.xlu0 %v22502_v30, %s21650_s26  ;;  %v3156_v30 = vmul.f32 1.442695, %v3117_v36 }
 0x514   : > { %v3160_v14 = vpop.xlane.xlu0 %3159 }
 0x515   : > { %19861 = vrcp.f32 %v3160_v14 }
 0x516   : > { %4874 = vrot.lane.b32.xlu0 %v22514_v34, %s21650_s26 }
 0x518   : > { %v3163_v17 = vpop.xlane.xlu1 %3162 }
 0x519   : > { %19863 = vrcp.f32 %v3163_v17  ;;  %v25496_v17 = vld [vmem:[#allocation50_spill] sm:$0xff] }
 0x51a   : > { %5032 = vrot.lane.b32.xlu0 %v22534_v40, %s21650_s26  ;;  %v25492_v40 = vmov 0.0  }
 0x51c   : > { %v3166_v27 = vpop.xlane.xlu0 %3165 }
 0x51d   : > { %19865 = vrcp.f32 %v3166_v27 }
 0x51e   : > { %5030 = vrot.lane.b32.xlu0 %v22548_v47, %s21650_s26 }
 0x51f   : > { %v19862_v35 = vpop.eup %19861 }
 0x520   : > { %v3169_v49 = vpop.xlane.xlu1 %3168  ;;  %v3238_v55 = vmul.f32 %v19862_v35, %v22899_v5 }
 0x521   : > { %19867 = vrcp.f32 %v3169_v49  ;;  %v25499_v49 = vld [vmem:[#allocation51_spill] sm:$0xff] }
 0x522   : > { %5188 = vrot.lane.b32.xlu0 %v22570_v54, %s21650_s26  ;;  %19166 = vmatmul.mubr.msk.f32.vlgmr.msra.gmra.mrb[48].mxu0 %vm3037_vm2, %v3238_v55  ;;  %19869 = vpow2.f32 %v3156_v30  ;;  %v25498_v30 = vld [vmem:[#allocation59_spill] sm:$0xff] }
 0x523   : > { %v19864_v34 = vpop.eup %19863  ;;  %19174 = vmatpush3.msra.mxu0 %v22539_v44  ;;  %19175 = vmatprep.mubr.msk.f32.mxu0 %vm21649_vm0, %v25492_v40 }
 0x524   : > { %v3172_v11 = vpop.xlane.xlu0 %3171  ;;  %v3239_v47 = vmul.f32 %v19864_v34, %v22904_v19  ;;  %19183 = vmatprep.subr.mxu0 %v25492_v40  ;;  %v25500_v34 = vld [vmem:[#allocation73_spill] sm:$0xff] }
 0x525   : > { %19871 = vrcp.f32 %v3172_v11 }
 0x526   : > { %5186 = vrot.lane.b32.xlu0 %v22585_v62, %s21650_s26  ;;  %19171 = vmatmul.mubr.msk.f32.vlgmr.msra.gmra.mrb[52].mxu1 %vm3037_vm2, %v3239_v47  ;;  %v25501_v47 = vld [vmem:[#allocation55_spill] sm:$0xff] }
 0x527   : > { %v19866_v54 = vpop.eup %19865  ;;  %19179 = vmatpush3.msra.mxu1 %v22552_v48  ;;  %19180 = vmatprep.mubr.msk.f32.mxu1 %vm21649_vm0, %v25492_v40 }
 0x528   : > { %v3175_v5 = vpop.xlane.xlu1 %3174  ;;  %v3240_v42 = vmul.f32 %v19866_v54, %v22909_v61  ;;  %19188 = vmatprep.subr.mxu1 %v25492_v40 }
 0x529   : > { %19873 = vrcp.f32 %v3175_v5  ;;  %v25502_v5 = vld [vmem:[#allocation52_spill] sm:$0xff] }
 0x52a   : > { %5344 = vrot.lane.b32.xlu0 %v22608_v6, %s21650_s26  ;;  %19176 = vmatmul.mubr.msk.f32.vlgmr.msra.gmra.mrb[50].mxu0 %vm3037_vm2, %v3240_v42  ;;  %v25504_v42 = vld [vmem:[#allocation74_spill] sm:$0xff] }
 0x52b   : > { %v19868_v62 = vpop.eup %19867  ;;  %19184 = vmatpush3.msra.mxu0 %v22582_v60  ;;  %19185 = vmatprep.mubr.msk.f32.mxu0 %vm21649_vm0, %v25492_v40 }
 0x52c   : > { %v3178_v19 = vpop.xlane.xlu0 %3177  ;;  %v3241_v50 = vmul.f32 %v19868_v62, %v22914_v20  ;;  %19193 = vmatprep.subr.mxu0 %v25492_v40  ;;  %v23034_v61 = vpop.eup %19869  ;;  %v25505_v62 = vld [vmem:[#allocation53_spill] sm:$0xff] }
 0x52d   : > { %19875 = vrcp.f32 %v3178_v19 }
 0x52e   : > { %5342 = vrot.lane.b32.xlu0 %v22623_v23, %s21650_s26  ;;  %19181 = vmatmul.mubr.msk.f32.vlgmr.msra.gmra.mrb[54].mxu1 %vm3037_vm2, %v3241_v50  ;;  %v3215_v23 = vsel %vm3037_vm2, %v23034_v61, 0.0 }
 0x52f   : > { %v19872_v6 = vpop.eup %19871  ;;  %19189 = vmatpush3.msra.mxu1 %v22595_v2  ;;  %19190 = vmatprep.mubr.msk.f32.mxu1 %vm21649_vm0, %v25492_v40 }
 0x530   : > { %v3181_v13 = vpop.xlane.xlu1 %3180  ;;  %v3242_v0 = vmul.f32 %v19872_v6, %v22919_v51  ;;  %19198 = vmatprep.subr.mxu1 %v25492_v40  ;;  %v25506_v6 = vld [vmem:[#allocation76_spill] sm:$0xff] }
 0x531   : > { %19877 = vrcp.f32 %v3181_v13 }
 0x532   : > { %5500 = vrot.lane.b32.xlu0 %v22646_v41, %s21650_s26  ;;  %19186 = vmatmul.mubr.msk.f32.vlgmr.msra.gmra.mrb[52].mxu0 %vm3037_vm2, %v3242_v0  ;;  %v25507_v0 = vld [vmem:[#allocation63_spill] sm:$0xff] }
 0x533   : > { %v19874_v20 = vpop.eup %19873  ;;  %19194 = vmatpush3.msra.mxu0 %v22575_v58  ;;  %3216 = vadd.xlane.f32.xlu1 %v3215_v23  ;;  %v25508_v23 = vld [vmem:[#allocation54_spill] sm:$0xff] }
 0x534   : > { %v3184_v1 = vpop.xlane.xlu0 %3183  ;;  %v3243_v33 = vmul.f32 %v19874_v20, %v22924_v15  ;;  %19195 = vmatprep.mubr.msk.f32.mxu0 %vm21649_vm0, %v25492_v40  ;;  %19203 = vmatprep.subr.mxu0 %v25492_v40  ;;  %v25509_v20 = vld [vmem:[#allocation65_spill] sm:$0xff] }
 0x535   : > { %19879 = vrcp.f32 %v3184_v1 }
 0x536   : > { %5498 = vrot.lane.b32.xlu0 %v22661_v57, %s21650_s26  ;;  %19191 = vmatmul.mubr.msk.f32.vlgmr.msra.gmra.mrb[56].mxu1 %vm3037_vm2, %v3243_v33  ;;  %v25511_v33 = vld [vmem:[#allocation61_spill] sm:$0xff] }
 0x537   : > { %v19876_v41 = vpop.eup %19875  ;;  %19199 = vmatpush3.msra.mxu1 %v22589_v63  ;;  %19200 = vmatprep.mubr.msk.f32.mxu1 %vm21649_vm0, %v25492_v40 }
 0x538   : > { %v3187_v51 = vpop.xlane.xlu1 %3186  ;;  %v3244_v15 = vmul.f32 %v19876_v41, %v22929_v59  ;;  %19208 = vmatprep.subr.mxu1 %v25492_v40  ;;  %v25513_v41 = vld [vmem:[#allocation62_spill] sm:$0xff] }
 0x539   : > { %19881 = vrcp.f32 %v3187_v51  ;;  %v25516_v51 = vld [vmem:[#allocation68_spill] sm:$0xff] }
 0x53a   : > { %5656 = vrot.lane.b32.xlu0 %v22684_v9, %s21650_s26  ;;  %19196 = vmatmul.mubr.msk.f32.vlgmr.msra.gmra.mrb[54].mxu0 %vm3037_vm2, %v3244_v15  ;;  %v25517_v15 = vld [vmem:[#allocation71_spill] sm:$0xff] }
 0x53b   : > { %v19878_v57 = vpop.eup %19877  ;;  %19204 = vmatpush3.msra.mxu0 %v22620_v18  ;;  %19205 = vmatprep.mubr.msk.f32.mxu0 %vm21649_vm0, %v25492_v40 }
 0x53c   : > { %v3190_v43 = vpop.xlane.xlu0 %3189  ;;  %v3245_v8 = vmul.f32 %v19878_v57, %v22934_v56  ;;  %19213 = vmatprep.subr.mxu0 %v25492_v40 }
 0x53d   : > { %19883 = vrcp.f32 %v3190_v43  ;;  %v25518_v43 = vld [vmem:[#allocation72_spill] sm:$0xff] }
 0x53e   : > { %5654 = vrot.lane.b32.xlu0 %v22702_v53, %s21650_s26  ;;  %19201 = vmatmul.mubr.msk.f32.vlgmr.msra.gmra.mrb[58].mxu1 %vm3037_vm2, %v3245_v8  ;;  %v25519_v8 = vld [vmem:[#allocation75_spill] sm:$0xff] }
 0x53f   : > { %v19880_v9 = vpop.eup %19879  ;;  %19209 = vmatpush3.msra.mxu1 %v22633_v31  ;;  %19210 = vmatprep.mubr.msk.f32.mxu1 %vm21649_vm0, %v25492_v40 }
 0x540   : > { %v3193_v59 = vpop.xlane.xlu1 %3192  ;;  %v3246_v3 = vmul.f32 %v19880_v9, %v22939_v45  ;;  %19218 = vmatprep.subr.mxu1 %v25492_v40 }
 0x541   : > { %19885 = vrcp.f32 %v3193_v59  ;;  %v25520_v59 = vld [vmem:[#allocation77_spill] sm:$0xff] }
 0x542   : > { %5812 = vrot.lane.b32.xlu0 %v22724_v39, %s21650_s26  ;;  %19206 = vmatmul.mubr.msk.f32.vlgmr.msra.gmra.mrb[56].mxu0 %vm3037_vm2, %v3246_v3 }
 0x543   : > { %v19882_v53 = vpop.eup %19881  ;;  %19214 = vmatpush3.msra.mxu0 %v22613_v10  ;;  %19215 = vmatprep.mubr.msk.f32.mxu0 %vm21649_vm0, %v25492_v40 }
 0x544   : > { %v3196_v56 = vpop.xlane.xlu0 %3195  ;;  %4952 = vrot.lane.b32.xlu1 %v22530_v38, %s21650_s26  ;;  %v3247_v45 = vmul.f32 %v19882_v53, %v22944_v52  ;;  %19223 = vmatprep.subr.mxu0 %v25492_v40  ;;  %v25493_v38 = vld [vmem:[#allocation49_spill] sm:$0xff] }
 0x545   : > { %19887 = vrcp.f32 %v3196_v56  ;;  %v25521_v56 = vld [vmem:[#allocation78_spill] sm:$0xff] }
 0x546   : > { %5810 = vrot.lane.b32.xlu0 %v22734_v12, %s21650_s26  ;;  %19211 = vmatmul.mubr.msk.f32.vlgmr.msra.gmra.mrb[60].mxu1 %vm3037_vm2, %v3247_v45  ;;  %v3199_v39 = vpop.xlane.xlu1 %3198 }
 0x547   : > { %v19884_v25 = vpop.eup %19883  ;;  %19219 = vmatpush3.msra.mxu1 %v22627_v24  ;;  %19889 = vrcp.f32 %v3199_v39  ;;  %19220 = vmatprep.mubr.msk.f32.mxu1 %vm21649_vm0, %v25492_v40 }
 0x548   : > { %5110 = vrot.lane.b32.xlu1 %v25493_v38, %s21650_s26  ;;  %v3248_v52 = vmul.f32 %v19884_v25, %v22949_v29  ;;  %19228 = vmatprep.subr.mxu1 %v25492_v40  ;;  %v25497_v29 = vld [vmem:[#allocation70_spill] sm:$0xff] }
 0x54a   : > { %5968 = vrot.lane.b32.xlu0 %v25494_v21, %s21650_s26  ;;  %19216 = vmatmul.mubr.msk.f32.vlgmr.msra.gmra.mrb[58].mxu0 %vm3037_vm2, %v3248_v52 }
 0x54b   : > { %v19886_v12 = vpop.eup %19885  ;;  %19224 = vmatpush3.msra.mxu0 %v25495_v28  ;;  %19225 = vmatprep.mubr.msk.f32.mxu0 %vm21649_vm0, %v25492_v40 }
 0x54c   : > { %v3202_v14 = vpop.xlane.xlu0 %3201  ;;  %5108 = vrot.lane.b32.xlu1 %v25496_v17, %s21650_s26  ;;  %v3249_v36 = vmul.f32 %v19886_v12, %v22954_v16  ;;  %19233 = vmatprep.subr.mxu0 %v25492_v40 }
 0x54d   : > { %19891 = vrcp.f32 %v3202_v14 }
 0x54e   : > { %5966 = vrot.lane.b32.xlu0 %v25497_v29, %s21650_s26  ;;  %19221 = vmatmul.mubr.msk.f32.vlgmr.msra.gmra.mrb[62].mxu1 %vm3037_vm2, %v3249_v36  ;;  %v3205_v27 = vpop.xlane.xlu1 %3204 }
 0x54f   : > { %v19888_v35 = vpop.eup %19887  ;;  %19229 = vmatpush3.msra.mxu1 %v25498_v30  ;;  %19893 = vrcp.f32 %v3205_v27  ;;  %19230 = vmatprep.mubr.msk.f32.mxu1 %vm21649_vm0, %v25492_v40 }
 0x550   : > { %5266 = vrot.lane.b32.xlu1 %v25499_v49, %s21650_s26  ;;  %v3250_v16 = vmul.f32 %v19888_v35, %v22959_v46  ;;  %19238 = vmatprep.subr.mxu1 %v25492_v40  ;;  %v25503_v46 = vld [vmem:[#allocation57_spill] sm:$0xff] }
 0x551   : > { %v19890_v55 = vpop.eup %19889 }
 0x552   : > { %6124 = vrot.lane.b32.xlu0 %v25500_v34, %s21650_s26  ;;  %19226 = vmatmul.mubr.msk.f32.vlgmr.msra.gmra.mrb[60].mxu0 %vm3037_vm2, %v3250_v16  ;;  %v3251_v11 = vmul.f32 %v19890_v55, %v22963_v37  ;;  %v23177_v57 = vpop.permute.xlu1 %4798 }
 0x553   : > { %19234 = vmatpush3.msra.mxu0 %v25501_v47  ;;  %19235 = vmatprep.mubr.msk.f32.mxu0 %vm21649_vm0, %v25492_v40 }
 0x554   : > { %v3208_v54 = vpop.xlane.xlu0 %3207  ;;  %5264 = vrot.lane.b32.xlu1 %v25502_v5, %s21650_s26  ;;  %19231 = vmatmul.mubr.msk.f32.vlgmr.msra.gmra.mrb[64].mxu1 %vm3037_vm2, %v3251_v11 }
 0x555   : > { %19895 = vrcp.f32 %v3208_v54  ;;  %19239 = vmatpush3.msra.mxu1 %v25503_v46  ;;  %19243 = vmatprep.subr.mxu0 %v25492_v40 }
 0x556   : > { %6122 = vrot.lane.b32.xlu0 %v25504_v42, %s21650_s26  ;;  %19240 = vmatprep.mubr.msk.f32.mxu1 %vm21649_vm0, %v25492_v40  ;;  %v4719_v9 = vpop.permute.xlu1 %4718 }
 0x557   : > { %v19892_v37 = vpop.eup %19891  ;;  %19248 = vmatprep.subr.mxu1 %v25492_v40 }
 0x558   : > { %5422 = vrot.lane.b32.xlu1 %v25505_v62, %s21650_s26  ;;  %v3252_v19 = vmul.f32 %v19892_v37, %v22968_v32  ;;  %v4721_v3 = vpop.permute.xlu0 %4720 }
 0x559   : > { %v19894_v50 = vpop.eup %19893 }
 0x55a   : > { %6519 = vrot.lane.b32.xlu0 %v25506_v6, %s21650_s26  ;;  %19236 = vmatmul.mubr.msk.f32.vlgmr.msra.gmra.mrb[62].mxu0 %vm3037_vm2, %v3252_v19  ;;  %v3253_v13 = vmul.f32 %v19894_v50, %v22972_v22  ;;  %v25510_v22 = vld [vmem:[#allocation58_spill] sm:$0xff]  ;;  %v23185_v53 = vpop.permute.xlu1 %4796 }
 0x55b   : > { %19244 = vmatpush3.msra.mxu0 %v25507_v0  ;;  %19245 = vmatprep.mubr.msk.f32.mxu0 %vm21649_vm0, %v25492_v40 }
 0x55c   : > { %5420 = vrot.lane.b32.xlu1 %v25508_v23, %s21650_s26  ;;  %19241 = vmatmul.mubr.msk.f32.vlgmr.msra.gmra.mrb[66].mxu1 %vm3037_vm2, %v3253_v13 }
 0x55d   : > { %19249 = vmatpush3.msra.mxu1 %v25509_v20  ;;  %19253 = vmatprep.subr.mxu0 %v25492_v40 }
 0x55e   : > { %6827 = vrot.lane.b32.xlu0 %v22582_v60, %s21650_s26  ;;  %19250 = vmatprep.mubr.msk.f32.mxu1 %vm21649_vm0, %v25492_v40  ;;  %v25512_v60 = vld [vmem:[#allocation60_spill] sm:$0xff] }
 0x55f   : > { %v19896_v32 = vpop.eup %19895  ;;  %19258 = vmatprep.subr.mxu1 %v25492_v40 }
 0x560   : > { %5578 = vrot.lane.b32.xlu1 %v25510_v22, %s21650_s26  ;;  %v3254_v1 = vmul.f32 %v19896_v32, %v22976_v4  ;;  %v25514_v4 = vld [vmem:[#allocation66_spill] sm:$0xff] }
 0x562   : > { %7135 = vrot.lane.b32.xlu0 %v22620_v18, %s21650_s26  ;;  %19246 = vmatmul.mubr.msk.f32.vlgmr.msra.gmra.mrb[64].mxu0 %vm3037_vm2, %v3254_v1  ;;  %v25515_v18 = vld [vmem:[#allocation67_spill] sm:$0xff] }
 0x563   : > { %19254 = vmatpush3.msra.mxu0 %v25511_v33  ;;  %19255 = vmatprep.mubr.msk.f32.mxu0 %vm21649_vm0, %v25492_v40 }
 0x564   : > { %5576 = vrot.lane.b32.xlu1 %v25512_v60, %s21650_s26  ;;  %19263 = vmatprep.subr.mxu0 %v25492_v40 }
 0x568   : > { %5734 = vrot.lane.b32.xlu1 %v25513_v41, %s21650_s26 }
 0x56c   : > { %5732 = vrot.lane.b32.xlu1 %v25514_v4, %s21650_s26 }
 0x570   : > { %5890 = vrot.lane.b32.xlu1 %v25515_v18, %s21650_s26 }
 0x574   : > { %5888 = vrot.lane.b32.xlu1 %v25516_v51, %s21650_s26 }
 0x578   : > { %6046 = vrot.lane.b32.xlu1 %v25517_v15, %s21650_s26 }
 0x57c   : > { %6044 = vrot.lane.b32.xlu1 %v25518_v43, %s21650_s26 }
 0x580   : > { %6202 = vrot.lane.b32.xlu1 %v25519_v8, %s21650_s26 }
 0x584   : > { %6200 = vrot.lane.b32.xlu1 %v25520_v59, %s21650_s26 }
 0x588   : > { %6596 = vrot.lane.b32.xlu1 %v25521_v56, %s21650_s26 }
 0x589   : > { %v3214_v45 = vpop.xlane.xlu0 %3213 }
 0x58a   : > { %19897 = vrcp.f32 %v3214_v45 }
 0x58b   : > { %v3211_v39 = vpop.xlane.xlu1 %3210 }
 0x58c   : > { %19899 = vrcp.f32 %v3211_v39  ;;  %6673 = vrot.lane.b32.xlu1 %v22539_v44, %s21650_s26 }
 0x58d   : > { %v4877_v25 = vpop.permute.xlu0 %4876 }
 0x58f   : > { %v4955_v36 = vpop.permute.xlu1 %4954 }
 0x590   : > { %6750 = vrot.lane.b32.xlu1 %v22552_v48, %s21650_s26  ;;  %v25522_v48 = vld [vmem:[#allocation64_spill] sm:$0xff] }
 0x591   : > { %v4875_v38 = vpop.permute.xlu0 %4874 }
 0x594   : > { %v19898_v52 = vpop.eup %19897  ;;  %6904 = vrot.lane.b32.xlu1 %v22595_v2, %s21650_s26 }
 0x595   : > { %v5033_v21 = vpop.permute.xlu0 %5032  ;;  %v3256_v12 = vmul.f32 %v19898_v52, %v22990_v26 }
 0x596   : > { %v19900_v14 = vpop.eup %19899 }
 0x597   : > { %19256 = vmatmul.mubr.msk.f32.vlgmr.msra.gmra.mrb[66].mxu0 %vm3037_vm2, %v3256_v12  ;;  %v3255_v17 = vmul.f32 %v19900_v14, %v22992_v7 }
 0x598   : > { %19264 = vmatpush3.xpose.msk.msra.mxu0 %vm1496_vm1, %v4721_v3  ;;  %6981 = vrot.lane.b32.xlu1 %v22575_v58, %s21650_s26 }
 0x599   : > { %v5031_v44 = vpop.permute.xlu0 %5030  ;;  %19251 = vmatmul.mubr.msk.f32.vlgmr.msra.gmra.mrb[68].mxu1 %vm3037_vm2, %v3255_v17  ;;  %19265 = vmatprep.mubr.msk.f32.mxu0 %vm21649_vm0, %v25492_v40 }
 0x59a   : > { %19259 = vmatpush3.msra.mxu1 %v25522_v48  ;;  %19273 = vmatprep.subr.mxu0 %v25492_v40 }
 0x59b   : > { %19266 = vmatmul.mubr.msk.f32.vlgmr.msra.gmra.mrb[68].mxu0 %vm1496_vm1, %v4719_v9  ;;  %19260 = vmatprep.mubr.msk.f32.mxu1 %vm21649_vm0, %v25492_v40 }
 0x59c   : > { %19274 = vmatpush3.xpose.msk.msra.mxu0 %vm1496_vm1, %v4877_v25  ;;  %7058 = vrot.lane.b32.xlu1 %v22589_v63, %s21650_s26 }
 0x59d   : > { %v5189_v58 = vpop.permute.xlu0 %5188  ;;  %19275 = vmatprep.mubr.msk.f32.mxu0 %vm21649_vm0, %v25492_v40  ;;  %19283 = vmatprep.subr.mxu0 %v25492_v40 }
 0x59e   : > { %19268 = vmatprep.subr.mxu1 %v25492_v40 }
 0x59f   : > { %19276 = vmatmul.mubr.msk.f32.vlgmr.msra.gmra.mrb[70].mxu0 %vm1496_vm1, %v4875_v38 }
 0x5a0   : > { %19284 = vmatpush3.xpose.msk.msra.mxu0 %vm1496_vm1, %v5033_v21  ;;  %7212 = vrot.lane.b32.xlu1 %v22633_v31, %s21650_s26 }
 0x5a1   : > { %v5187_v2 = vpop.permute.xlu0 %5186  ;;  %19285 = vmatprep.mubr.msk.f32.mxu0 %vm21649_vm0, %v25492_v40  ;;  %19293 = vmatprep.subr.mxu0 %v25492_v40 }
 0x5a3   : > { %19286 = vmatmul.mubr.msk.f32.vlgmr.msra.gmra.mrb[72].mxu0 %vm1496_vm1, %v5031_v44 }
 0x5a4   : > { %19294 = vmatpush3.xpose.msk.msra.mxu0 %vm1496_vm1, %v5189_v58  ;;  %7289 = vrot.lane.b32.xlu1 %v22613_v10, %s21650_s26 }
 0x5a5   : > { %v5345_v63 = vpop.permute.xlu0 %5344  ;;  %19295 = vmatprep.mubr.msk.f32.mxu0 %vm21649_vm0, %v25492_v40  ;;  %19303 = vmatprep.subr.mxu0 %v25492_v40 }
 0x5a7   : > { %19296 = vmatmul.mubr.msk.f32.vlgmr.msra.gmra.mrb[74].mxu0 %vm1496_vm1, %v5187_v2 }
 0x5a8   : > { %19304 = vmatpush3.xpose.msk.msra.mxu0 %vm1496_vm1, %v5345_v63  ;;  %7366 = vrot.lane.b32.xlu1 %v22627_v24, %s21650_s26 }
 0x5a9   : > { %v5343_v31 = vpop.permute.xlu0 %5342  ;;  %19305 = vmatprep.mubr.msk.f32.mxu0 %vm21649_vm0, %v25492_v40  ;;  %19313 = vmatprep.subr.mxu0 %v25492_v40 }
 0x5ab   : > { %19306 = vmatmul.mubr.msk.f32.vlgmr.msra.gmra.mrb[76].mxu0 %vm1496_vm1, %v5343_v31 }
 0x5ac   : > { %19315 = vmatprep.mubr.msk.f32.mxu0 %vm21649_vm0, %v25492_v40 }
 0x5ad   : > { %v5501_v10 = vpop.permute.xlu0 %5500 }
 0x5ae   : > { %19314 = vmatpush3.xpose.msk.msra.mxu0 %vm1496_vm1, %v5501_v10 }
 0x5af   : > { %19323 = vmatprep.subr.mxu0 %v25492_v40 }
 0x5b1   : > { %v5499_v26 = vpop.permute.xlu0 %5498 }
 0x5b2   : > { %19316 = vmatmul.mubr.msk.f32.vlgmr.msra.gmra.mrb[78].mxu0 %vm1496_vm1, %v5499_v26 }
 0x5b3   : > { %19325 = vmatprep.mubr.msk.f32.mxu0 %vm21649_vm0, %v25492_v40 }
 0x5b5   : > { %v5657_v24 = vpop.permute.xlu0 %5656 }
 0x5b6   : > { %19324 = vmatpush3.xpose.msk.msra.mxu0 %vm1496_vm1, %v5657_v24 }
 0x5b7   : > { %19333 = vmatprep.subr.mxu0 %v25492_v40 }
 0x5b9   : > { %v5655_v7 = vpop.permute.xlu0 %5654 }
 0x5ba   : > { %19326 = vmatmul.mubr.msk.f32.vlgmr.msra.gmra.mrb[80].mxu0 %vm1496_vm1, %v5655_v7 }
 0x5bb   : > { %19335 = vmatprep.mubr.msk.f32.mxu0 %vm21649_vm0, %v25492_v40 }
 0x5bd   : > { %v5813_v29 = vpop.permute.xlu0 %5812 }
 0x5be   : > { %19334 = vmatpush3.xpose.msk.msra.mxu0 %vm1496_vm1, %v5813_v29 }
 0x5bf   : > { %19343 = vmatprep.subr.mxu0 %v25492_v40 }
 0x5c0   : > { %v3217_v27 = vpop.xlane.xlu1 %3216 }
 0x5c1   : > { %19901 = vrcp.f32 %v3217_v27  ;;  %v5811_v35 = vpop.permute.xlu0 %5810 }
 0x5c2   : > { %19336 = vmatmul.mubr.msk.f32.vlgmr.msra.gmra.mrb[82].mxu0 %vm1496_vm1, %v5811_v35 }
 0x5c3   : > { %19345 = vmatprep.mubr.msk.f32.mxu0 %vm21649_vm0, %v25492_v40 }
 0x5c4   : > { %v4953_v49 = vpop.permute.xlu1 %4952 }
 0x5c5   : > { %v5969_v16 = vpop.permute.xlu0 %5968 }
 0x5c6   : > { %19344 = vmatpush3.xpose.msk.msra.mxu0 %vm1496_vm1, %v5969_v16 }
 0x5c7   : > { %19353 = vmatprep.subr.mxu0 %v25492_v40 }
 0x5c8   : > { %v5111_v55 = vpop.permute.xlu1 %5110 }
 0x5c9   : > { %v5967_v34 = vpop.permute.xlu0 %5966 }
 0x5ca   : > { %19346 = vmatmul.mubr.msk.f32.vlgmr.msra.gmra.mrb[84].mxu0 %vm1496_vm1, %v5967_v34 }
 0x5cb   : > { %v19902_v11 = vpop.eup %19901  ;;  %19355 = vmatprep.mubr.msk.f32.mxu0 %vm21649_vm0, %v25492_v40 }
 0x5cc   : > { %v5109_v54 = vpop.permute.xlu1 %5108  ;;  %v3257_v5 = vmul.f32 %v19902_v11, %v23034_v61 }
 0x5cd   : > { %v6125_v42 = vpop.permute.xlu0 %6124 }
 0x5ce   : > { %19261 = vmatmul.mubr.msk.f32.vlgmr.msra.gmra.mrb[70].mxu1 %vm3037_vm2, %v3257_v5  ;;  %19354 = vmatpush3.xpose.msk.msra.mxu0 %vm1496_vm1, %v6125_v42 }
 0x5cf   : > { %19269 = vmatpush3.xpose.msk.msra.mxu1 %vm1496_vm1, %v23177_v57  ;;  %19270 = vmatprep.mubr.msk.f32.mxu1 %vm21649_vm0, %v25492_v40 }
 0x5d0   : > { %v5267_v37 = vpop.permute.xlu1 %5266  ;;  %19278 = vmatprep.subr.mxu1 %v25492_v40  ;;  %19363 = vmatprep.subr.mxu0 %v25492_v40 }
 0x5d1   : > { %v6123_v62 = vpop.permute.xlu0 %6122 }
 0x5d2   : > { %19271 = vmatmul.mubr.msk.f32.vlgmr.msra.gmra.mrb[72].mxu1 %vm1496_vm1, %v23185_v53  ;;  %19356 = vmatmul.mubr.msk.f32.vlgmr.msra.gmra.mrb[86].mxu0 %vm1496_vm1, %v6123_v62 }
 0x5d3   : > { %19279 = vmatpush3.xpose.msk.msra.mxu1 %vm1496_vm1, %v4955_v36  ;;  %19280 = vmatprep.mubr.msk.f32.mxu1 %vm21649_vm0, %v25492_v40 }
 0x5d4   : > { %v5265_v61 = vpop.permute.xlu1 %5264  ;;  %19288 = vmatprep.subr.mxu1 %v25492_v40  ;;  %19365 = vmatprep.mubr.msk.f32.mxu0 %vm21649_vm0, %v25492_v40 }
 0x5d5   : > { %v6520_v19 = vpop.permute.xlu0 %6519 }
 0x5d6   : > { %19281 = vmatmul.mubr.msk.f32.vlgmr.msra.gmra.mrb[74].mxu1 %vm1496_vm1, %v4953_v49  ;;  %19364 = vmatpush3.msra.mxu0 %v6520_v19 }
 0x5d7   : > { %19289 = vmatpush3.xpose.msk.msra.mxu1 %vm1496_vm1, %v5111_v55  ;;  %19290 = vmatprep.mubr.msk.f32.mxu1 %vm21649_vm0, %v25492_v40 }
 0x5d8   : > { %v5423_v50 = vpop.permute.xlu1 %5422  ;;  %19298 = vmatprep.subr.mxu1 %v25492_v40  ;;  %19373 = vmatprep.subr.mxu0 %v25492_v40 }
 0x5da   : > { %19291 = vmatmul.mubr.msk.f32.vlgmr.msra.gmra.mrb[76].mxu1 %vm1496_vm1, %v5109_v54 }
 0x5db   : > { %19299 = vmatpush3.xpose.msk.msra.mxu1 %vm1496_vm1, %v5267_v37  ;;  %19300 = vmatprep.mubr.msk.f32.mxu1 %vm21649_vm0, %v25492_v40 }
 0x5dc   : > { %v5421_v6 = vpop.permute.xlu1 %5420  ;;  %19308 = vmatprep.subr.mxu1 %v25492_v40 }
 0x5de   : > { %19301 = vmatmul.mubr.msk.f32.vlgmr.msra.gmra.mrb[78].mxu1 %vm1496_vm1, %v5265_v61 }
 0x5df   : > { %19309 = vmatpush3.xpose.msk.msra.mxu1 %vm1496_vm1, %v5423_v50  ;;  %19310 = vmatprep.mubr.msk.f32.mxu1 %vm21649_vm0, %v25492_v40 }
 0x5e0   : > { %v5579_v13 = vpop.permute.xlu1 %5578  ;;  %19318 = vmatprep.subr.mxu1 %v25492_v40 }
 0x5e2   : > { %19311 = vmatmul.mubr.msk.f32.vlgmr.msra.gmra.mrb[80].mxu1 %vm1496_vm1, %v5421_v6 }
 0x5e3   : > { %19319 = vmatpush3.xpose.msk.msra.mxu1 %vm1496_vm1, %v5579_v13  ;;  %19320 = vmatprep.mubr.msk.f32.mxu1 %vm21649_vm0, %v25492_v40 }
 0x5e4   : > { %v5577_v23 = vpop.permute.xlu1 %5576  ;;  %19328 = vmatprep.subr.mxu1 %v25492_v40 }
 0x5e6   : > { %19321 = vmatmul.mubr.msk.f32.vlgmr.msra.gmra.mrb[82].mxu1 %vm1496_vm1, %v5577_v23 }
 0x5e7   : > { %19330 = vmatprep.mubr.msk.f32.mxu1 %vm21649_vm0, %v25492_v40 }
 0x5e8   : > { %v5735_v32 = vpop.permute.xlu1 %5734 }
 0x5e9   : > { %19329 = vmatpush3.xpose.msk.msra.mxu1 %vm1496_vm1, %v5735_v32 }
 0x5ea   : > { %19338 = vmatprep.subr.mxu1 %v25492_v40 }
 0x5ec   : > { %v5733_v22 = vpop.permute.xlu1 %5732 }
 0x5ed   : > { %19331 = vmatmul.mubr.msk.f32.vlgmr.msra.gmra.mrb[84].mxu1 %vm1496_vm1, %v5733_v22 }
 0x5ee   : > { %19340 = vmatprep.mubr.msk.f32.mxu1 %vm21649_vm0, %v25492_v40 }
 0x5f0   : > { %v5891_v1 = vpop.permute.xlu1 %5890 }
 0x5f1   : > { %19339 = vmatpush3.xpose.msk.msra.mxu1 %vm1496_vm1, %v5891_v1 }
 0x5f2   : > { %19348 = vmatprep.subr.mxu1 %v25492_v40 }
 0x5f4   : > { %v5889_v60 = vpop.permute.xlu1 %5888 }
 0x5f5   : > { %v23309_v41 = vpop.f32.mrb[48].mxu0  ;;  %19341 = vmatmul.mubr.msk.f32.vlgmr.msra.gmra.mrb[86].mxu1 %vm1496_vm1, %v5889_v60 }
 0x5f6   : > { %v19167_v4 = vpop.f32.mrb[49].mxu0  ;;  %19350 = vmatprep.mubr.msk.f32.mxu1 %vm21649_vm0, %v25492_v40 }
 0x5f8   : > { %v6047_v18 = vpop.permute.xlu1 %6046 }
 0x5f9   : > { %v23314_v51 = vpop.f32.mrb[52].mxu1  ;;  %19349 = vmatpush3.xpose.msk.msra.mxu1 %vm1496_vm1, %v6047_v18 }
 0x5fa   : > { %v19172_v15 = vpop.f32.mrb[53].mxu1  ;;  %19358 = vmatprep.subr.mxu1 %v25492_v40 }
 0x5fc   : > { %v6045_v57 = vpop.permute.xlu1 %6044 }
 0x5fd   : > { %v23318_v43 = vpop.f32.mrb[50].mxu0  ;;  %19351 = vmatmul.mubr.msk.f32.vlgmr.msra.gmra.mrb[88].mxu1 %vm1496_vm1, %v6045_v57 }
 0x5fe   : > { %v19177_v8 = vpop.f32.mrb[51].mxu0  ;;  %19360 = vmatprep.mubr.msk.f32.mxu1 %vm21649_vm0, %v25492_v40 }
 0x600   : > { %v6203_v9 = vpop.permute.xlu1 %6202 }
 0x601   : > { %v23323_v59 = vpop.f32.mrb[54].mxu1  ;;  %19359 = vmatpush3.xpose.msk.msra.mxu1 %vm1496_vm1, %v6203_v9 }
 0x602   : > { %v19182_v3 = vpop.f32.mrb[55].mxu1  ;;  %19368 = vmatprep.subr.mxu1 %v25492_v40 }
 0x604   : > { %v6201_v53 = vpop.permute.xlu1 %6200 }
 0x605   : > { %v23327_v56 = vpop.f32.mrb[52].mxu0  ;;  %19361 = vmatmul.mubr.msk.f32.vlgmr.msra.gmra.mrb[90].mxu1 %vm1496_vm1, %v6201_v53 }
 0x606   : > { %v19187_v45 = vpop.f32.mrb[53].mxu0  ;;  %19370 = vmatprep.mubr.msk.f32.mxu1 %vm21649_vm0, %v25492_v40 }
 0x608   : > { %v6597_v39 = vpop.permute.xlu1 %6596 }
 0x609   : > { %v23332_v25 = vpop.f32.mrb[56].mxu1  ;;  %19369 = vmatpush3.msra.mxu1 %v6597_v39 }
 0x60a   : > { %v19192_v38 = vpop.f32.mrb[57].mxu1  ;;  %19378 = vmatprep.subr.mxu1 %v25492_v40 }
 0x60d   : > { %v23335_v52 = vpop.f32.mrb[54].mxu0 }
 0x60e   : > { %v19197_v21 = vpop.f32.mrb[55].mxu0 }
 0x611   : > { %v23337_v12 = vpop.f32.mrb[58].mxu1 }
 0x612   : > { %v19202_v14 = vpop.f32.mrb[59].mxu1 }
 0x615   : > { %v23339_v17 = vpop.f32.mrb[56].mxu0 }
 0x616   : > { %v19207_v44 = vpop.f32.mrb[57].mxu0 }
 0x619   : > { %v23341_v58 = vpop.f32.mrb[60].mxu1 }
 0x61a   : > { %v19212_v2 = vpop.f32.mrb[61].mxu1 }
 0x61d   : > { %v23343_v63 = vpop.f32.mrb[58].mxu0 }
 0x61e   : > { %v19217_v31 = vpop.f32.mrb[59].mxu0 }
 0x621   : > { %v23345_v10 = vpop.f32.mrb[62].mxu1 }
 0x622   : > { %v19222_v26 = vpop.f32.mrb[63].mxu1 }
 0x625   : > { %v23347_v24 = vpop.f32.mrb[60].mxu0 }
 0x626   : > { %25523 = vst [vmem:[#allocation49_spill] sm:$0xff] %v23347_v24  ;;  %v19227_v7 = vpop.f32.mrb[61].mxu0 }
 0x627   : > { %v23349_v36 = vpop.f32.mrb[64].mxu1 }
 0x628   : > { %25524 = vst [vmem:[#allocation69_spill] sm:$0xff] %v23349_v36  ;;  %v19232_v29 = vpop.f32.mrb[65].mxu1 }
 0x62d   : > { %v23351_v27 = vpop.f32.mrb[62].mxu0 }
 0x62e   : > { %25525 = vst [vmem:[#allocation56_spill] sm:$0xff] %v23351_v27  ;;  %v19237_v35 = vpop.f32.mrb[63].mxu0 }
 0x62f   : > { %v23353_v49 = vpop.f32.mrb[66].mxu1 }
 0x630   : > { %25526 = vst [vmem:[#allocation50_spill] sm:$0xff] %v23353_v49  ;;  %v19242_v16 = vpop.f32.mrb[67].mxu1 }
 0x635   : > { %v23355_v55 = vpop.f32.mrb[64].mxu0 }
 0x636   : > { %25527 = vst [vmem:[#allocation70_spill] sm:$0xff] %v23355_v55  ;;  %v19247_v34 = vpop.f32.mrb[65].mxu0 }
 0x66a   : > { %v23357_v11 = vpop.f32.mrb[66].mxu0 }
 0x66b   : > { %25528 = vst [vmem:[#allocation59_spill] sm:$0xff] %v23357_v11  ;;  %v19257_v54 = vpop.f32.mrb[67].mxu0 }
 0x66c   : > { %v23359_v5 = vpop.f32.mrb[68].mxu1 }
 0x66d   : > { %25529 = vst [vmem:[#allocation51_spill] sm:$0xff] %v23359_v5  ;;  %v19252_v42 = vpop.f32.mrb[69].mxu1 }
 0x66e   : > { %v4792_v37 = vpop.f32.mrb[68].mxu0 }
 0x66f   : > { %v23361_v62 = vmul.f32 0.14142136, %v4792_v37  ;;  %v19267_v61 = vpop.f32.mrb[69].mxu0 }
 0x671   : > { %v6298_v19 = vsel %vm3037_vm2, %v23361_v62, -inf }
 0x672   : > { %6299 = vmax.xlane.f32.xlu0 %v6298_v19  ;;  %v4948_v50 = vpop.f32.mrb[70].mxu0 }
 0x673   : > { %v23365_v6 = vmul.f32 0.14142136, %v4948_v50  ;;  %v19277_v13 = vpop.f32.mrb[71].mxu0 }
 0x675   : > { %v6304_v23 = vsel %vm3037_vm2, %v23365_v6, -inf }
 0x676   : > { %6305 = vmax.xlane.f32.xlu0 %v6304_v23  ;;  %v5104_v32 = vpop.f32.mrb[72].mxu0 }
 0x677   : > { %v19287_v22 = vpop.f32.mrb[73].mxu0  ;;  %v23381_v34 = vmul.f32 0.14142136, %v5104_v32 }
 0x679   : > { %v6310_v50 = vsel %vm3037_vm2, %v23381_v34, -inf }
 0x67a   : > { %v5260_v1 = vpop.f32.mrb[74].mxu0 }
 0x67b   : > { %v19297_v60 = vpop.f32.mrb[75].mxu0  ;;  %v23387_v19 = vmul.f32 0.14142136, %v5260_v1 }
 0x67d   : > { %v6316_v22 = vsel %vm3037_vm2, %v23387_v19, -inf }
 0x67e   : > { %v5416_v4 = vpop.f32.mrb[76].mxu0 }
 0x67f   : > { %v19307_v18 = vpop.f32.mrb[77].mxu0 }
 0x685   : > { %v5572_v15 = vpop.f32.mrb[78].mxu0 }
 0x686   : > { %v19317_v57 = vpop.f32.mrb[79].mxu0 }
 0x68d   : > { %v5728_v8 = vpop.f32.mrb[80].mxu0 }
 0x68e   : > { %v19327_v9 = vpop.f32.mrb[81].mxu0 }
 0x695   : > { %v5884_v3 = vpop.f32.mrb[82].mxu0 }
 0x696   : > { %v19337_v53 = vpop.f32.mrb[83].mxu0 }
 0x69d   : > { %v23369_v45 = vpop.f32.mrb[84].mxu0 }
 0x69e   : > { %v19347_v39 = vpop.f32.mrb[85].mxu0 }
 0x6a1   : > { %v23371_v38 = vpop.f32.mrb[70].mxu1 }
 0x6a2   : > { %25530 = vst [vmem:[#allocation73_spill] sm:$0xff] %v23371_v38  ;;  %v19262_v21 = vpop.f32.mrb[71].mxu1 }
 0x6a5   : > { %v4870_v14 = vpop.f32.mrb[72].mxu1  ;;  %v23373_v44 = vpop.f32.mrb[86].mxu0 }
 0x6a6   : > { %v23375_v2 = vmul.f32 0.14142136, %v4870_v14  ;;  %v19272_v31 = vpop.f32.mrb[73].mxu1  ;;  %v19357_v26 = vpop.f32.mrb[87].mxu0 }
 0x6a8   : > { %v6301_v7 = vsel %vm3037_vm2, %v23375_v2, -inf }
 0x6a9   : > { %6302 = vmax.xlane.f32.xlu1 %v6301_v7  ;;  %v5026_v29 = vpop.f32.mrb[74].mxu1 }
 0x6aa   : > { %v23379_v35 = vmul.f32 0.14142136, %v5026_v29  ;;  %v19282_v16 = vpop.f32.mrb[75].mxu1  ;;  %v23401_v29 = vmul.f32 0.14142136, %v5416_v4 }
 0x6ac   : > { %v6307_v54 = vsel %vm3037_vm2, %v23379_v35, -inf }
 0x6ad   : > { %6308 = vmax.xlane.f32.xlu0 %v6307_v54  ;;  %v5182_v42 = vpop.f32.mrb[76].mxu1  ;;  %v23405_v54 = vmul.f32 0.14142136, %v5572_v15 }
 0x6ae   : > { %v23385_v37 = vmul.f32 0.14142136, %v5182_v42  ;;  %v19292_v61 = vpop.f32.mrb[77].mxu1 }
 0x6af   : > { %v6328_v4 = vsel %vm3037_vm2, %v23405_v54, -inf }
 0x6b0   : > { %v6313_v13 = vsel %vm3037_vm2, %v23385_v37, -inf }
 0x6b1   : > { %6311 = vmax.xlane.f32.xlu0 %v6310_v50  ;;  %6314 = vmax.xlane.f32.xlu1 %v6313_v13  ;;  %v5338_v23 = vpop.f32.mrb[78].mxu1  ;;  %v23421_v50 = vmul.f32 0.14142136, %v5884_v3 }
 0x6b2   : > { %v19302_v32 = vpop.f32.mrb[79].mxu1  ;;  %v23403_v16 = vmul.f32 0.14142136, %v5338_v23 }
 0x6b3   : > { %v23429_v32 = vpop.permute.xlu0 %6827  ;;  %v6340_v3 = vsel %vm3037_vm2, %v23421_v50, -inf }
 0x6b5   : > { %6317 = vmax.xlane.f32.xlu0 %v6316_v22  ;;  %v5494_v60 = vpop.f32.mrb[80].mxu1  ;;  %v23432_v22 = vmul.f32 0.14142136, %v23369_v45 }
 0x6b6   : > { %v19312_v18 = vpop.f32.mrb[81].mxu1  ;;  %v23407_v42 = vmul.f32 0.14142136, %v5494_v60 }
 0x6b8   : > { %v6325_v15 = vsel %vm3037_vm2, %v23407_v42, -inf }
 0x6b9   : > { %v5650_v57 = vpop.f32.mrb[82].mxu1 }
 0x6ba   : > { %v19322_v9 = vpop.f32.mrb[83].mxu1  ;;  %v23415_v61 = vmul.f32 0.14142136, %v5650_v57  ;;  %v23441_v57 = vmul.f32 0.14142136, %v23373_v44 }
 0x6c0   : > { %v5806_v1 = vpop.f32.mrb[84].mxu1 }
 0x6c1   : > { %v19332_v53 = vpop.f32.mrb[85].mxu1  ;;  %v23423_v13 = vmul.f32 0.14142136, %v5806_v1  ;;  %v6346_v1 = vsel %vm3037_vm2, %v23432_v22, -inf }
 0x6c2   : > { %7520 = vrot.lane.b32.xlu1 %v25498_v30, %s21650_s26  ;;  %v6322_v30 = vsel %vm3037_vm2, %v23401_v29, -inf  ;;  %v23449_v53 = vpop.permute.xlu0 %7135 }
 0x6c3   : > { %v6337_v18 = vsel %vm3037_vm2, %v23423_v13, -inf }
 0x6c6   : > { %7597 = vrot.lane.b32.xlu1 %v25501_v47, %s21650_s26  ;;  %v6319_v47 = vsel %vm3037_vm2, %v23403_v16, -inf }
 0x6c8   : > { %v5962_v39 = vpop.f32.mrb[86].mxu1 }
 0x6c9   : > { %v19342_v21 = vpop.f32.mrb[87].mxu1  ;;  %v23434_v60 = vmul.f32 0.14142136, %v5962_v39 }
 0x6ca   : > { %v6352_v21 = vsel %vm3037_vm2, %v23441_v57, -inf }
 0x6cb   : > { %7443 = vrot.lane.b32.xlu0 %v25495_v28, %s21650_s26  ;;  %v23413_v28 = vmul.f32 0.14142136, %v5728_v8  ;;  %v6331_v8 = vsel %vm3037_vm2, %v23415_v61, -inf  ;;  %v6343_v45 = vsel %vm3037_vm2, %v23434_v60, -inf }
 0x6cd   : > { %v6334_v23 = vsel %vm3037_vm2, %v23413_v28, -inf }
 0x6d0   : > { %v6118_v14 = vpop.f32.mrb[88].mxu1 }
 0x6d1   : > { %v19352_v31 = vpop.f32.mrb[89].mxu1  ;;  %v23443_v9 = vmul.f32 0.14142136, %v6118_v14 }
 0x6d3   : > { %v6349_v44 = vsel %vm3037_vm2, %v23443_v9, -inf }
 0x6d8   : > { %v6274_v26 = vpop.f32.mrb[90].mxu1 }
 0x6d9   : > { %v19362_v7 = vpop.f32.mrb[91].mxu1  ;;  %v23451_v39 = vmul.f32 0.14142136, %v6274_v26 }
 0x6db   : > { %v6355_v7 = vsel %vm3037_vm2, %v23451_v39, -inf }
 0x6ea   : > { %6323 = vmax.xlane.f32.xlu0 %v6322_v30  ;;  %6320 = vmax.xlane.f32.xlu1 %v6319_v47 }
 0x6ee   : > { %6329 = vmax.xlane.f32.xlu0 %v6328_v4  ;;  %6326 = vmax.xlane.f32.xlu1 %v6325_v15  ;;  %v23461_v15 = vpop.permute.xlu1 %6673 }
 0x6f2   : > { %6335 = vmax.xlane.f32.xlu0 %v6334_v23  ;;  %6332 = vmax.xlane.f32.xlu1 %v6331_v8  ;;  %v23465_v8 = vpop.permute.xlu1 %6750 }
 0x6f6   : > { %6341 = vmax.xlane.f32.xlu0 %v6340_v3  ;;  %6338 = vmax.xlane.f32.xlu1 %v6337_v18  ;;  %v23475_v18 = vpop.permute.xlu1 %6904 }
 0x6fa   : > { %6347 = vmax.xlane.f32.xlu0 %v6346_v1  ;;  %6344 = vmax.xlane.f32.xlu1 %v6343_v45  ;;  %v23477_v1 = vpop.permute.xlu1 %6981 }
 0x6fe   : > { %6353 = vmax.xlane.f32.xlu0 %v6352_v21  ;;  %6350 = vmax.xlane.f32.xlu1 %v6349_v44  ;;  %v23479_v45 = vpop.permute.xlu1 %7058 }
 0x6ff   : > { %v6300_v14 = vpop.xlane.xlu0 %6299 }
 0x700   : > { %v6358_v31 = vsub.f32 %v23361_v62, %v6300_v14 }
 0x702   : > { %v6378_v30 = vmul.f32 1.442695, %v6358_v31  ;;  %6356 = vmax.xlane.f32.xlu1 %v6355_v7  ;;  %v23481_v21 = vpop.permute.xlu1 %7212 }
 0x703   : > { %v6306_v47 = vpop.xlane.xlu0 %6305 }
 0x704   : > { %19903 = vpow2.f32 %v6378_v30  ;;  %v6360_v26 = vsub.f32 %v23365_v6, %v6306_v47 }
 0x706   : > { %v6382_v4 = vmul.f32 1.442695, %v6360_v26  ;;  %v23483_v44 = vpop.permute.xlu1 %7289 }
 0x708   : > { %19905 = vpow2.f32 %v6382_v4 }
 0x70a   : > { %v23485_v14 = vpop.permute.xlu1 %7366 }
 0x70e   : > { %v23463_v23 = vpop.eup %19903 }
 0x70f   : > { %v6418_v62 = vsel %vm3037_vm2, %v23463_v23, 0.0 }
 0x710   : > { %6419 = vadd.xlane.f32.xlu0 %v6418_v62 }
 0x712   : > { %v23469_v3 = vpop.eup %19905 }
 0x713   : > { %7674 = vrot.lane.b32.xlu1 %v25503_v46, %s21650_s26  ;;  %v6424_v6 = vsel %vm3037_vm2, %v23469_v3, 0.0 }
 0x714   : > { %6425 = vadd.xlane.f32.xlu0 %v6424_v6 }
 0x736   : > { %v6303_v31 = vpop.xlane.xlu1 %6302 }
 0x737   : > { %v6359_v7 = vsub.f32 %v23375_v2, %v6303_v31 }
 0x739   : > { %v6380_v46 = vmul.f32 1.442695, %v6359_v7 }
 0x73a   : > { %v6309_v30 = vpop.xlane.xlu0 %6308 }
 0x73b   : > { %19907 = vpow2.f32 %v6380_v46  ;;  %v6361_v47 = vsub.f32 %v23379_v35, %v6309_v30 }
 0x73d   : > { %v6384_v26 = vmul.f32 1.442695, %v6361_v47 }
 0x73e   : > { %v6312_v4 = vpop.xlane.xlu0 %6311  ;;  %v6315_v62 = vpop.xlane.xlu1 %6314 }
 0x73f   : > { %19909 = vpow2.f32 %v6384_v26  ;;  %v6362_v6 = vsub.f32 %v23381_v34, %v6312_v4  ;;  %v6363_v38 = vsub.f32 %v23385_v37, %v6315_v62 }
 0x741   : > { %v6386_v11 = vmul.f32 1.442695, %v6362_v6  ;;  %v6388_v5 = vmul.f32 1.442695, %v6363_v38 }
 0x742   : > { %v6318_v55 = vpop.xlane.xlu0 %6317 }
 0x743   : > { %19911 = vpow2.f32 %v6386_v11  ;;  %v6364_v49 = vsub.f32 %v23387_v19, %v6318_v55  ;;  %v23512_v19 = vpop.permute.xlu1 %7520 }
 0x744   : > { %19913 = vpow2.f32 %v6388_v5 }
 0x745   : > { %v23492_v2 = vpop.eup %19907  ;;  %v6390_v31 = vmul.f32 1.442695, %v6364_v49 }
 0x746   : > { %v6421_v35 = vsel %vm3037_vm2, %v23492_v2, 0.0  ;;  %v23514_v46 = vpop.permute.xlu0 %7443 }
 0x747   : > { %19915 = vpow2.f32 %v6390_v31  ;;  %6422 = vadd.xlane.f32.xlu1 %v6421_v35  ;;  %v23516_v30 = vpop.permute.xlu1 %7597 }
 0x749   : > { %v23496_v7 = vpop.eup %19909 }
 0x74a   : > { %v6427_v34 = vsel %vm3037_vm2, %v23496_v7, 0.0 }
 0x74b   : > { %6428 = vadd.xlane.f32.xlu1 %v6427_v34 }
 0x74d   : > { %v23500_v38 = vpop.eup %19911 }
 0x74e   : > { %v23502_v11 = vpop.eup %19913  ;;  %v6430_v55 = vsel %vm3037_vm2, %v23500_v38, 0.0 }
 0x74f   : > { %6431 = vadd.xlane.f32.xlu0 %v6430_v55  ;;  %v6433_v49 = vsel %vm3037_vm2, %v23502_v11, 0.0 }
 0x750   : > { %6434 = vadd.xlane.f32.xlu1 %v6433_v49 }
 0x751   : > { %v23508_v5 = vpop.eup %19915 }
 0x752   : > { %v6436_v37 = vsel %vm3037_vm2, %v23508_v5, 0.0 }
 0x753   : > { %6437 = vadd.xlane.f32.xlu0 %v6436_v37 }
 0x777   : > { %v6324_v47 = vpop.xlane.xlu0 %6323  ;;  %v6321_v26 = vpop.xlane.xlu1 %6320 }
 0x778   : > { %v6366_v4 = vsub.f32 %v23401_v29, %v6324_v47  ;;  %v6365_v62 = vsub.f32 %v23403_v16, %v6321_v26 }
 0x77a   : > { %v6394_v6 = vmul.f32 1.442695, %v6366_v4  ;;  %v6392_v31 = vmul.f32 1.442695, %v6365_v62 }
 0x77b   : > { %v6330_v35 = vpop.xlane.xlu0 %6329  ;;  %v6327_v34 = vpop.xlane.xlu1 %6326 }
 0x77c   : > { %19917 = vpow2.f32 %v6394_v6  ;;  %v6368_v55 = vsub.f32 %v23405_v54, %v6330_v35  ;;  %v6367_v49 = vsub.f32 %v23407_v42, %v6327_v34 }
 0x77d   : > { %19919 = vpow2.f32 %v6392_v31 }
 0x77e   : > { %v6398_v37 = vmul.f32 1.442695, %v6368_v55  ;;  %v6396_v27 = vmul.f32 1.442695, %v6367_v49 }
 0x77f   : > { %v6333_v36 = vpop.xlane.xlu1 %6332  ;;  %v6336_v54 = vpop.xlane.xlu0 %6335 }
 0x780   : > { %19921 = vpow2.f32 %v6398_v37  ;;  %v6369_v24 = vsub.f32 %v23415_v61, %v6333_v36 }
 0x781   : > { %19923 = vpow2.f32 %v6396_v27 }
 0x782   : > { %v6400_v29 = vmul.f32 1.442695, %v6369_v24 }
 0x783   : > { %v6339_v47 = vpop.xlane.xlu1 %6338 }
 0x784   : > { %v6371_v16 = vsub.f32 %v23423_v13, %v6339_v47  ;;  %19925 = vpow2.f32 %v6400_v29  ;;  %v6342_v13 = vpop.xlane.xlu0 %6341 }
 0x786   : > { %v23524_v26 = vpop.eup %19917  ;;  %v6404_v4 = vmul.f32 1.442695, %v6371_v16 }
 0x787   : > { %v23526_v62 = vpop.eup %19919  ;;  %v6442_v42 = vsel %vm3037_vm2, %v23524_v26, 0.0 }
 0x788   : > { %6443 = vadd.xlane.f32.xlu0 %v6442_v42  ;;  %v6439_v6 = vsel %vm3037_vm2, %v23526_v62, 0.0  ;;  %19927 = vpow2.f32 %v6404_v4  ;;  %v6348_v55 = vpop.xlane.xlu0 %6347  ;;  %v6345_v42 = vpop.xlane.xlu1 %6344 }
 0x789   : > { %6440 = vadd.xlane.f32.xlu1 %v6439_v6 }
 0x78a   : > { %v23532_v24 = vpop.eup %19921 }
 0x78b   : > { %v23534_v36 = vpop.eup %19923  ;;  %v6448_v27 = vsel %vm3037_vm2, %v23532_v24, 0.0 }
 0x78c   : > { %6449 = vadd.xlane.f32.xlu0 %v6448_v27  ;;  %v6445_v61 = vsel %vm3037_vm2, %v23534_v36, 0.0  ;;  %v6354_v37 = vpop.xlane.xlu0 %6353 }
 0x78d   : > { %6446 = vadd.xlane.f32.xlu1 %v6445_v61 }
 0x78e   : > { %v23540_v31 = vpop.eup %19925 }
 0x78f   : > { %v6451_v35 = vsel %vm3037_vm2, %v23540_v31, 0.0 }
 0x790   : > { %6452 = vadd.xlane.f32.xlu0 %v6451_v35 }
 0x792   : > { %v23544_v34 = vpop.eup %19927 }
 0x793   : > { %v6457_v49 = vsel %vm3037_vm2, %v23544_v34, 0.0 }
 0x794   : > { %6458 = vadd.xlane.f32.xlu1 %v6457_v49 }
 0x79d   : > { %v6420_v29 = vpop.xlane.xlu0 %6419 }
 0x79e   : > { %19929 = vrcp.f32 %v6420_v29  ;;  %v6376_v29 = vsub.f32 %v23441_v57, %v6354_v37 }
 0x7a1   : > { %v6426_v47 = vpop.xlane.xlu0 %6425 }
 0x7a2   : > { %19931 = vrcp.f32 %v6426_v47 }
 0x7a5   : > { %7828 = vrot.lane.b32.xlu1 %v25509_v20, %s21650_s26  ;;  %v6351_v20 = vpop.xlane.xlu1 %6350 }
 0x7a6   : > { %7751 = vrot.lane.b32.xlu0 %v25507_v0, %s21650_s26  ;;  %v6370_v0 = vsub.f32 %v23413_v28, %v6336_v54  ;;  %v6375_v61 = vsub.f32 %v23443_v9, %v6351_v20  ;;  %v6374_v28 = vsub.f32 %v23432_v22, %v6348_v55 }
 0x7a8   : > { %v19930_v16 = vpop.eup %19929  ;;  %v6412_v49 = vmul.f32 1.442695, %v6375_v61  ;;  %v6410_v54 = vmul.f32 1.442695, %v6374_v28 }
 0x7a9   : > { %v6498_v4 = vmul.f32 %v19930_v16, %v23463_v23  ;;  %v6402_v23 = vmul.f32 1.442695, %v6370_v0  ;;  %v6357_v47 = vpop.xlane.xlu1 %6356 }
 0x7aa   : > { %v6377_v9 = vsub.f32 %v23451_v39, %v6357_v47 }
 0x7ab   : > { %19366 = vmatmul.mubr.msk.f32.vlgmr.msra.gmra.mrb[88].mxu0 %vm3037_vm2, %v6498_v4  ;;  %19933 = vpow2.f32 %v6402_v23 }
 0x7ac   : > { %v19932_v6 = vpop.eup %19931  ;;  %19374 = vmatpush3.msra.mxu0 %v23461_v15  ;;  %19375 = vmatprep.mubr.msk.f32.mxu0 %vm21649_vm0, %v25492_v40  ;;  %v6372_v15 = vsub.f32 %v23421_v50, %v6342_v13  ;;  %v6414_v50 = vmul.f32 1.442695, %v6376_v29  ;;  %v6416_v22 = vmul.f32 1.442695, %v6377_v9 }
 0x7ad   : > { %19383 = vmatprep.subr.mxu0 %v25492_v40  ;;  %v6500_v27 = vmul.f32 %v19932_v6, %v23469_v3  ;;  %v6373_v3 = vsub.f32 %v23434_v60, %v6345_v42  ;;  %v23589_v6 = vpop.permute.xlu1 %7674 }
 0x7ae   : > { %v6406_v35 = vmul.f32 1.442695, %v6372_v15 }
 0x7af   : > { %19376 = vmatmul.mubr.msk.f32.vlgmr.msra.gmra.mrb[90].mxu0 %vm3037_vm2, %v6500_v27 }
 0x7b0   : > { %19384 = vmatpush3.msra.mxu0 %v23429_v32  ;;  %19385 = vmatprep.mubr.msk.f32.mxu0 %vm21649_vm0, %v25492_v40  ;;  %19935 = vpow2.f32 %v6406_v35  ;;  %v6408_v32 = vmul.f32 1.442695, %v6373_v3 }
 0x7b1   : > { %19393 = vmatprep.subr.mxu0 %v25492_v40  ;;  %19937 = vpow2.f32 %v6412_v49 }
 0x7b2   : > { %19939 = vpow2.f32 %v6408_v32 }
 0x7b3   : > { %19941 = vpow2.f32 %v6410_v54 }
 0x7b4   : > { %19943 = vpow2.f32 %v6414_v50 }
 0x7b5   : > { %v23570_v16 = vpop.eup %19933  ;;  %19945 = vpow2.f32 %v6416_v22 }
 0x7b6   : > { %v6454_v60 = vsel %vm3037_vm2, %v23570_v16, 0.0 }
 0x7ba   : > { %v23573_v13 = vpop.eup %19935 }
 0x7bb   : > { %v23577_v4 = vpop.eup %19937  ;;  %v6460_v57 = vsel %vm3037_vm2, %v23573_v13, 0.0 }
 0x7bc   : > { %v6469_v55 = vsel %vm3037_vm2, %v23577_v4, 0.0  ;;  %v23583_v37 = vpop.eup %19939 }
 0x7bd   : > { %v6463_v39 = vsel %vm3037_vm2, %v23583_v37, 0.0  ;;  %v23587_v42 = vpop.eup %19941 }
 0x7be   : > { %v6466_v27 = vsel %vm3037_vm2, %v23587_v42, 0.0  ;;  %v23593_v0 = vpop.eup %19943 }
 0x7bf   : > { %v6472_v15 = vsel %vm3037_vm2, %v23593_v0, 0.0  ;;  %v23597_v23 = vpop.eup %19945 }
 0x7c0   : > { %v6475_v35 = vsel %vm3037_vm2, %v23597_v23, 0.0 }
 0x7c5   : > { %6455 = vadd.xlane.f32.xlu0 %v6454_v60 }
 0x7c9   : > { %6461 = vadd.xlane.f32.xlu0 %v6460_v57  ;;  %6470 = vadd.xlane.f32.xlu1 %v6469_v55 }
 0x7cd   : > { %6464 = vadd.xlane.f32.xlu0 %v6463_v39 }
 0x7d1   : > { %6467 = vadd.xlane.f32.xlu0 %v6466_v27 }
 0x7d4   : > { %v6423_v20 = vpop.xlane.xlu1 %6422 }
 0x7d5   : > { %19947 = vrcp.f32 %v6423_v20  ;;  %6473 = vadd.xlane.f32.xlu0 %v6472_v15 }
 0x7d8   : > { %v6429_v61 = vpop.xlane.xlu1 %6428 }
 0x7d9   : > { %19949 = vrcp.f32 %v6429_v61  ;;  %6476 = vadd.xlane.f32.xlu0 %v6475_v35 }
 0x7da   : > { %7982 = vrot.lane.b32.xlu1 %v25522_v48, %s21650_s26 }
 0x7dc   : > { %v6432_v3 = vpop.xlane.xlu0 %6431 }
 0x7dd   : > { %19951 = vrcp.f32 %v6432_v3  ;;  %v6435_v49 = vpop.xlane.xlu1 %6434 }
 0x7de   : > { %19953 = vrcp.f32 %v6435_v49 }
 0x7df   : > { %v19948_v28 = vpop.eup %19947 }
 0x7e0   : > { %v6438_v32 = vpop.xlane.xlu0 %6437  ;;  %v6499_v54 = vmul.f32 %v19948_v28, %v23492_v2 }
 0x7e1   : > { %19955 = vrcp.f32 %v6438_v32 }
 0x7e2   : > { %19371 = vmatmul.mubr.msk.f32.vlgmr.msra.gmra.mrb[92].mxu1 %vm3037_vm2, %v6499_v54 }
 0x7e3   : > { %v19950_v29 = vpop.eup %19949  ;;  %19379 = vmatpush3.msra.mxu1 %v23465_v8  ;;  %19380 = vmatprep.mubr.msk.f32.mxu1 %vm21649_vm0, %v25492_v40 }
 0x7e4   : > { %19388 = vmatprep.subr.mxu1 %v25492_v40  ;;  %v6501_v48 = vmul.f32 %v19950_v29, %v23496_v7 }
 0x7e6   : > { %19381 = vmatmul.mubr.msk.f32.vlgmr.msra.gmra.mrb[94].mxu1 %vm3037_vm2, %v6501_v48 }
 0x7e7   : > { %v19952_v47 = vpop.eup %19951  ;;  %19389 = vmatpush3.msra.mxu1 %v23475_v18  ;;  %19390 = vmatprep.mubr.msk.f32.mxu1 %vm21649_vm0, %v25492_v40 }
 0x7e8   : > { %v19954_v2 = vpop.eup %19953  ;;  %19398 = vmatprep.subr.mxu1 %v25492_v40  ;;  %v6502_v8 = vmul.f32 %v19952_v47, %v23500_v38  ;;  %v25531_v47 = vmov 0  }
 0x7e9   : > { %v6503_v50 = vmul.f32 %v19954_v2, %v23502_v11 }
 0x7ea   : > { %19386 = vmatmul.mubr.msk.f32.vlgmr.msra.gmra.mrb[92].mxu0 %vm3037_vm2, %v6502_v8 }
 0x7eb   : > { %v19956_v9 = vpop.eup %19955  ;;  %19391 = vmatmul.mubr.msk.f32.vlgmr.msra.gmra.mrb[96].mxu1 %vm3037_vm2, %v6503_v50  ;;  %19394 = vmatpush3.msra.mxu0 %v23477_v1 }
 0x7ec   : > { %19399 = vmatpush3.msra.mxu1 %v23479_v45  ;;  %19395 = vmatprep.mubr.msk.f32.mxu0 %vm21649_vm0, %v25492_v40  ;;  %v6504_v18 = vmul.f32 %v19956_v9, %v23508_v5  ;;  %v19751_v9 = vld [vmem:[%s22308_s30] sm:$0xff]  }
 0x7ed   : > { %19403 = vmatprep.subr.mxu0 %v25492_v40  ;;  %19400 = vmatprep.mubr.msk.f32.mxu1 %vm21649_vm0, %v25492_v40 }
 0x7ee   : > { %19396 = vmatmul.mubr.msk.f32.vlgmr.msra.gmra.mrb[94].mxu0 %vm3037_vm2, %v6504_v18  ;;  %19408 = vmatprep.subr.mxu1 %v25492_v40  ;;  %v19752_v18 = vld [vmem:[%s22308_s30 + $0x8] sm:$0xff]  }
 0x7ef   : > { %19404 = vmatpush3.msra.mxu0 %v23449_v53  ;;  %19405 = vmatprep.mubr.msk.f32.mxu0 %vm21649_vm0, %v25492_v40 }
 0x7f0   : > { %7905 = vrot.lane.b32.xlu0 %v25511_v33, %s21650_s26  ;;  %19413 = vmatprep.subr.mxu0 %v25492_v40 }
 0x815   : > { %v6444_v1 = vpop.xlane.xlu0 %6443 }
 0x816   : > { %19957 = vrcp.f32 %v6444_v1  ;;  %v6441_v45 = vpop.xlane.xlu1 %6440  ;;  %v19753_v1 = vld [vmem:[%s22308_s30 + $0x10] sm:$0xff]  }
 0x817   : > { %19959 = vrcp.f32 %v6441_v45  ;;  %v19755_v45 = vld [vmem:[%s22308_s30 + $0x20] sm:$0xff]  }
 0x819   : > { %v6450_v7 = vpop.xlane.xlu0 %6449 }
 0x81a   : > { %19961 = vrcp.f32 %v6450_v7  ;;  %v6447_v38 = vpop.xlane.xlu1 %6446  ;;  %v19756_v7 = vld [vmem:[%s22308_s30 + $0x28] sm:$0xff]  }
 0x81b   : > { %19963 = vrcp.f32 %v6447_v38  ;;  %v19757_v38 = vld [vmem:[%s22308_s30 + $0x30] sm:$0xff]  }
 0x81d   : > { %v6453_v11 = vpop.xlane.xlu0 %6452 }
 0x81e   : > { %19965 = vrcp.f32 %v6453_v11  ;;  %v19758_v11 = vld [vmem:[%s22308_s30 + $0x38] sm:$0xff]  }
 0x820   : > { %v19958_v5 = vpop.eup %19957 }
 0x821   : > { %v19960_v53 = vpop.eup %19959  ;;  %v6506_v60 = vmul.f32 %v19958_v5, %v23524_v26  ;;  %v6459_v22 = vpop.xlane.xlu1 %6458 }
 0x822   : > { %v6505_v57 = vmul.f32 %v19960_v53, %v23526_v62  ;;  %19967 = vrcp.f32 %v6459_v22 }
 0x823   : > { %19406 = vmatmul.mubr.msk.f32.vlgmr.msra.gmra.mrb[96].mxu0 %vm3037_vm2, %v6506_v60 }
 0x824   : > { %v19962_v33 = vpop.eup %19961  ;;  %19401 = vmatmul.mubr.msk.f32.vlgmr.msra.gmra.mrb[98].mxu1 %vm3037_vm2, %v6505_v57  ;;  %19414 = vmatpush3.msra.mxu0 %v23483_v44 }
 0x825   : > { %v19964_v55 = vpop.eup %19963  ;;  %19409 = vmatpush3.msra.mxu1 %v23481_v21  ;;  %19410 = vmatprep.mubr.msk.f32.mxu1 %vm21649_vm0, %v25492_v40  ;;  %v6508_v39 = vmul.f32 %v19962_v33, %v23532_v24 }
 0x826   : > { %v6507_v26 = vmul.f32 %v19964_v55, %v23534_v36  ;;  %19415 = vmatprep.mubr.msk.f32.mxu0 %vm21649_vm0, %v25492_v40  ;;  %19418 = vmatprep.subr.mxu1 %v25492_v40 }
 0x827   : > { %19423 = vmatprep.subr.mxu0 %v25492_v40  ;;  %19416 = vmatmul.mubr.msk.f32.vlgmr.msra.gmra.mrb[98].mxu0 %vm3037_vm2, %v6508_v39 }
 0x828   : > { %19411 = vmatmul.mubr.msk.f32.vlgmr.msra.gmra.mrb[100].mxu1 %vm3037_vm2, %v6507_v26  ;;  %19424 = vmatpush3.msra.mxu0 %v23514_v46  ;;  %v19966_v21 = vpop.eup %19965  ;;  %v7752_v46 = vpop.permute.xlu0 %7751 }
 0x829   : > { %19419 = vmatpush3.msra.mxu1 %v23485_v14  ;;  %19420 = vmatprep.mubr.msk.f32.mxu1 %vm21649_vm0, %v25492_v40  ;;  %v6509_v44 = vmul.f32 %v19966_v21, %v23540_v31 }
 0x82a   : > { %19428 = vmatprep.subr.mxu1 %v25492_v40  ;;  %19425 = vmatprep.mubr.msk.f32.mxu0 %vm21649_vm0, %v25492_v40 }
 0x82b   : > { %19433 = vmatprep.subr.mxu0 %v25492_v40 }
 0x82c   : > { %19421 = vmatmul.mubr.msk.f32.vlgmr.msra.gmra.mrb[102].mxu1 %vm3037_vm2, %v6509_v44  ;;  %v19968_v62 = vpop.eup %19967 }
 0x82d   : > { %19429 = vmatpush3.msra.mxu1 %v23512_v19  ;;  %19430 = vmatprep.mubr.msk.f32.mxu1 %vm21649_vm0, %v25492_v40  ;;  %v6511_v14 = vmul.f32 %v19968_v62, %v23544_v34  ;;  %v7829_v19 = vpop.permute.xlu1 %7828 }
 0x82e   : > { %19438 = vmatprep.subr.mxu1 %v25492_v40 }
 0x830   : > { %19431 = vmatmul.mubr.msk.f32.vlgmr.msra.gmra.mrb[104].mxu1 %vm3037_vm2, %v6511_v14 }
 0x831   : > { %19439 = vmatpush3.msra.mxu1 %v23589_v6  ;;  %19440 = vmatprep.mubr.msk.f32.mxu1 %vm21649_vm0, %v25492_v40 }
 0x832   : > { %19448 = vmatprep.subr.mxu1 %v25492_v40 }
 0x852   : > { %v6456_v24 = vpop.xlane.xlu0 %6455 }
 0x853   : > { %19969 = vrcp.f32 %v6456_v24 }
 0x856   : > { %v6462_v36 = vpop.xlane.xlu0 %6461  ;;  %v6471_v31 = vpop.xlane.xlu1 %6470 }
 0x857   : > { %19971 = vrcp.f32 %v6462_v36 }
 0x85a   : > { %v6465_v27 = vpop.xlane.xlu0 %6464  ;;  %v7983_v29 = vpop.permute.xlu1 %7982 }
 0x85b   : > { %19973 = vrcp.f32 %v6465_v27 }
 0x85c   : > { %19975 = vrcp.f32 %v6471_v31 }
 0x85d   : > { %v19970_v34 = vpop.eup %19969 }
 0x85e   : > { %v6468_v20 = vpop.xlane.xlu0 %6467  ;;  %v6510_v15 = vmul.f32 %v19970_v34, %v23570_v16 }
 0x85f   : > { %19977 = vrcp.f32 %v6468_v20 }
 0x860   : > { %19426 = vmatmul.mubr.msk.f32.vlgmr.msra.gmra.mrb[100].mxu0 %vm3037_vm2, %v6510_v15 }
 0x861   : > { %v19972_v6 = vpop.eup %19971  ;;  %19434 = vmatpush3.msra.mxu0 %v23516_v30  ;;  %19435 = vmatprep.mubr.msk.f32.mxu0 %vm21649_vm0, %v25492_v40 }
 0x862   : > { %v6474_v61 = vpop.xlane.xlu0 %6473  ;;  %19443 = vmatprep.subr.mxu0 %v25492_v40  ;;  %v6512_v35 = vmul.f32 %v19972_v6, %v23573_v13 }
 0x863   : > { %19979 = vrcp.f32 %v6474_v61 }
 0x864   : > { %19436 = vmatmul.mubr.msk.f32.vlgmr.msra.gmra.mrb[102].mxu0 %vm3037_vm2, %v6512_v35 }
 0x865   : > { %v19974_v3 = vpop.eup %19973  ;;  %19444 = vmatpush3.msra.mxu0 %v7752_v46  ;;  %19445 = vmatprep.mubr.msk.f32.mxu0 %vm21649_vm0, %v25492_v40 }
 0x866   : > { %v6477_v16 = vpop.xlane.xlu0 %6476  ;;  %v6513_v49 = vmul.f32 %v19974_v3, %v23583_v37  ;;  %19453 = vmatprep.subr.mxu0 %v25492_v40  ;;  %v19976_v30 = vpop.eup %19975 }
 0x867   : > { %19981 = vrcp.f32 %v6477_v16  ;;  %v6515_v13 = vmul.f32 %v19976_v30, %v23577_v4 }
 0x868   : > { %19441 = vmatmul.mubr.msk.f32.vlgmr.msra.gmra.mrb[106].mxu1 %vm3037_vm2, %v6513_v49 }
 0x869   : > { %v19978_v28 = vpop.eup %19977  ;;  %19449 = vmatpush3.msra.mxu1 %v7829_v19  ;;  %19450 = vmatprep.mubr.msk.f32.mxu1 %vm21649_vm0, %v25492_v40 }
 0x86a   : > { %v7906_v32 = vpop.permute.xlu0 %7905  ;;  %19458 = vmatprep.subr.mxu1 %v25492_v40  ;;  %v6514_v54 = vmul.f32 %v19978_v28, %v23587_v42 }
 0x86c   : > { %19446 = vmatmul.mubr.msk.f32.vlgmr.msra.gmra.mrb[104].mxu0 %vm3037_vm2, %v6514_v54  ;;  %19451 = vmatmul.mubr.msk.f32.vlgmr.msra.gmra.mrb[108].mxu1 %vm3037_vm2, %v6515_v13 }
 0x86d   : > { %v19980_v37 = vpop.eup %19979  ;;  %19454 = vmatpush3.msra.mxu0 %v7906_v32  ;;  %19459 = vmatpush3.msra.mxu1 %v7983_v29 }
 0x86e   : > { %v6516_v48 = vmul.f32 %v19980_v37, %v23593_v0  ;;  %19455 = vmatprep.mubr.msk.f32.mxu0 %vm21649_vm0, %v25492_v40  ;;  %19460 = vmatprep.mubr.msk.f32.mxu1 %vm21649_vm0, %v25492_v40 }
 0x86f   : > { %19463 = vmatprep.subr.bf16.mxu0 %v19751_v9 }
 0x870   : > { %19456 = vmatmul.mubr.msk.f32.vlgmr.msra.gmra.mrb[106].mxu0 %vm3037_vm2, %v6516_v48 }
 0x871   : > { %v19982_v4 = vpop.eup %19981  ;;  %19464 = vmatpush3.bf16.msra.mxu0 %v19751_v9 }
 0x872   : > { %v6517_v42 = vmul.f32 %v19982_v4, %v23597_v23  ;;  %19465 = vmatprep.subr.bf16.mxu0 %v19752_v18  ;;  %v19754_v23 = vld [vmem:[%s22308_s30 + $0x18] sm:$0xff]   ;;  %s25543_s30 = scalar_lea.vmem [#allocation10], %s22286_s7 }
 0x874   : > { %19461 = vmatmul.mubr.msk.f32.vlgmr.msra.gmra.mrb[110].mxu1 %vm3037_vm2, %v6517_v42 }
 0x875   : > { %9154 = vmatprep.mubr.bf16.mxu1 %v25531_v47  ;;  %19466 = vmatpush3.bf16.msra.mxu0 %v19752_v18 }
 0x876   : > { %19467 = vmatprep.subr.bf16.mxu0 %v19753_v1 }
 0x879   : > { %19468 = vmatpush3.bf16.msra.mxu0 %v19753_v1 }
 0x87a   : > { %19469 = vmatprep.subr.bf16.mxu0 %v19754_v23 }
 0x87d   : > { %19470 = vmatpush3.bf16.msra.mxu0 %v19754_v23 }
 0x87e   : > { %v6591_v2 = vpop.f32.mrb[88].mxu0  ;;  %19471 = vmatprep.subr.bf16.mxu0 %v19755_v45 }
 0x87f   : > { %v19367_v0 = vpop.f32.mrb[89].mxu0 }
 0x881   : > { %19472 = vmatpush3.bf16.msra.mxu0 %v19755_v45 }
 0x882   : > { %v6745_v8 = vpop.f32.mrb[90].mxu0  ;;  %19473 = vmatprep.subr.bf16.mxu0 %v19756_v7 }
 0x883   : > { %v19377_v50 = vpop.f32.mrb[91].mxu0 }
 0x885   : > { %19474 = vmatpush3.bf16.msra.mxu0 %v19756_v7 }
 0x886   : > { %19475 = vmatprep.subr.bf16.mxu0 %v19757_v38 }
 0x889   : > { %19476 = vmatpush3.bf16.msra.mxu0 %v19757_v38 }
 0x88a   : > { %19477 = vmatprep.subr.bf16.mxu0 %v19758_v11 }
 0x88d   : > { %19478 = vmatpush3.bf16.msra.mxu0 %v19758_v11 }
 0x8b5   : > { %v6668_v5 = vpop.f32.mrb[92].mxu1 }
 0x8b6   : > { %v19669_v53 = vpack.i.bf16 %v6668_v5, %v6591_v2  ;;  %v19372_v60 = vpop.f32.mrb[93].mxu1 }
 0x8b8   : > { %19670 = vrot.lane.b32.xlu0 %v19669_v53, %s21650_s26 }
 0x8b9   : > { %v6822_v22 = vpop.f32.mrb[94].mxu1 }
 0x8ba   : > { %v19674_v57 = vpack.i.bf16 %v6822_v22, %v6745_v8  ;;  %v19382_v33 = vpop.f32.mrb[95].mxu1 }
 0x8bc   : > { %19675 = vrot.lane.b32.xlu1 %v19674_v57, %s21650_s26 }
 0x8bd   : > { %v6899_v55 = vpop.f32.mrb[92].mxu0 }
 0x8be   : > { %v6976_v39 = vpop.f32.mrb[96].mxu1  ;;  %v19387_v26 = vpop.f32.mrb[93].mxu0 }
 0x8bf   : > { %v19679_v21 = vpack.i.bf16 %v6976_v39, %v6899_v55  ;;  %v19392_v44 = vpop.f32.mrb[97].mxu1 }
 0x8c1   : > { %19680 = vrot.lane.b32.xlu0 %v19679_v21, %s21650_s26  ;;  %v7053_v62 = vpop.f32.mrb[94].mxu0 }
 0x8c2   : > { %v19397_v14 = vpop.f32.mrb[95].mxu0 }
 0x8f6   : > { %v7207_v46 = vpop.f32.mrb[96].mxu0 }
 0x8f7   : > { %v7130_v24 = vpop.f32.mrb[98].mxu1  ;;  %v19407_v19 = vpop.f32.mrb[97].mxu0 }
 0x8f8   : > { %v19684_v36 = vpack.i.bf16 %v7130_v24, %v7053_v62  ;;  %v19402_v31 = vpop.f32.mrb[99].mxu1 }
 0x8fa   : > { %19685 = vrot.lane.b32.xlu1 %v19684_v36, %s21650_s26  ;;  %v7361_v27 = vpop.f32.mrb[98].mxu0 }
 0x8fb   : > { %v7284_v34 = vpop.f32.mrb[100].mxu1  ;;  %v19417_v20 = vpop.f32.mrb[99].mxu0 }
 0x8fc   : > { %v19689_v15 = vpack.i.bf16 %v7284_v34, %v7207_v46  ;;  %v19412_v6 = vpop.f32.mrb[101].mxu1 }
 0x8fe   : > { %19690 = vrot.lane.b32.xlu0 %v19689_v15, %s21650_s26 }
 0x8ff   : > { %v7438_v61 = vpop.f32.mrb[102].mxu1 }
 0x900   : > { %v19694_v35 = vpack.i.bf16 %v7438_v61, %v7361_v27  ;;  %v19422_v3 = vpop.f32.mrb[103].mxu1 }
 0x902   : > { %19695 = vrot.lane.b32.xlu1 %v19694_v35, %s21650_s26 }
 0x903   : > { %v7592_v16 = vpop.f32.mrb[104].mxu1 }
 0x904   : > { %v19432_v49 = vpop.f32.mrb[105].mxu1 }
 0x92a   : > { %v19671_v30 = vpop.permute.xlu0 %19670 }
 0x92b   : > { %v19673_v28 = vunpack.i.h.bf16 %v19671_v30  ;;  %v19672_v13 = vunpack.i.l.bf16 %v19671_v30 }
 0x92d   : > { %v8138_v32 = vsel %vm1496_vm1, %v23309_v41, %v19672_v13  ;;  %v8139_v54 = vsel %vm1496_vm1, %v23314_v51, %v19673_v28 }
 0x92e   : > { %v19676_v29 = vpop.permute.xlu1 %19675  ;;  %v8158_v37 = vpack.c.bf16 %v8139_v54, %v8138_v32 }
 0x92f   : > { %v19678_v48 = vunpack.i.h.bf16 %v19676_v29  ;;  %v19677_v4 = vunpack.i.l.bf16 %v19676_v29 }
 0x930   : > { %19479 = vmatprep.mubr.bf16.mxu0 %v8158_v37 }
 0x931   : > { %v8141_v42 = vsel %vm1496_vm1, %v23323_v59, %v19678_v48  ;;  %v8140_v2 = vsel %vm1496_vm1, %v23318_v43, %v19677_v4 }
 0x932   : > { %v8159_v0 = vpack.c.bf16 %v8141_v42, %v8140_v2 }
 0x933   : > { %v19681_v8 = vpop.permute.xlu0 %19680  ;;  %v7515_v18 = vpop.f32.mrb[100].mxu0 }
 0x934   : > { %v19683_v50 = vunpack.i.h.bf16 %v19681_v8  ;;  %v19682_v9 = vunpack.i.l.bf16 %v19681_v8  ;;  %19480 = vmatmul.mubr.bf16.vlgmr.msra.gmra.mrb[108].mxu0 %v8159_v0  ;;  %v19699_v41 = vpack.i.bf16 %v7592_v16, %v7515_v18  ;;  %v19427_v1 = vpop.f32.mrb[101].mxu0  ;;  %v25536_v0 = vld [vmem:[#allocation70_spill] sm:$0xff] }
 0x936   : > { %v8142_v51 = vsel %vm1496_vm1, %v23327_v56, %v19682_v9  ;;  %v8143_v23 = vsel %vm1496_vm1, %v23332_v25, %v19683_v50  ;;  %19700 = vrot.lane.b32.xlu0 %v19699_v41, %s21650_s26  ;;  %v25537_v50 = vld [vmem:[#allocation51_spill] sm:$0xff] }
 0x937   : > { %v8160_v59 = vpack.c.bf16 %v8143_v23, %v8142_v51  ;;  %v7669_v45 = vpop.f32.mrb[102].mxu0  ;;  %v25538_v23 = vld [vmem:[#allocation59_spill] sm:$0xff] }
 0x938   : > { %v19437_v7 = vpop.f32.mrb[103].mxu0 }
 0x939   : > { %19483 = vmatprep.mubr.bf16.mxu0 %v8160_v59 }
 0x93b   : > { %v7746_v43 = vpop.f32.mrb[106].mxu1 }
 0x93c   : > { %v19704_v38 = vpack.i.bf16 %v7746_v43, %v7669_v45  ;;  %v19442_v11 = vpop.f32.mrb[107].mxu1  ;;  %v25539_v45 = vld [vmem:[#allocation73_spill] sm:$0xff] }
 0x93e   : > { %19705 = vrot.lane.b32.xlu1 %v19704_v38, %s21650_s26  ;;  %v25540_v38 = vlaneseq }
 0x93f   : > { %v7823_v5 = vpop.f32.mrb[104].mxu0  ;;  %v7900_v53 = vpop.f32.mrb[108].mxu1 }
 0x940   : > { %v19709_v60 = vpack.i.bf16 %v7900_v53, %v7823_v5  ;;  %v19447_v22 = vpop.f32.mrb[105].mxu0  ;;  %v19452_v57 = vpop.f32.mrb[109].mxu1  ;;  %v23760_v11 = vand.u32 127, %v25540_v38  ;;  %v23764_v5 = vld [vmem:[%s25542_s2] ss:$0 sm:$0xff] }
 0x942   : > { %19710 = vrot.lane.b32.xlu0 %v19709_v60, %s21650_s26  ;;  %25541 = vst [vmem:[#allocation55_spill] sm:$0xff] %v23760_v11  ;;  %vm1060_vm3 = vcmp.lt.s32.totalorder %v23760_v11, 100 }
 0x943   : > { %v7977_v56 = vpop.f32.mrb[106].mxu0 }
 0x944   : > { %v19457_v25 = vpop.f32.mrb[107].mxu0 }
 0x945   : > { %v23770_v25 = vsel %vm1060_vm3, 1.0, %v25492_v40 }
 0x947   : > { %v8054_v33 = vpop.f32.mrb[110].mxu1 }
 0x948   : > { %v19714_v55 = vpack.i.bf16 %v8054_v33, %v7977_v56  ;;  %v19462_v39 = vpop.f32.mrb[111].mxu1 }
 0x94a   : > { %19715 = vrot.lane.b32.xlu1 %v19714_v55, %s21650_s26  ;;  %v20063_v55 = vld [vmem:[#allocation2] sm:$0xff] }
 0x96c   : > { %v19686_v26 = vpop.permute.xlu1 %19685 }
 0x96d   : > { %v19688_v21 = vunpack.i.h.bf16 %v19686_v26  ;;  %v19687_v44 = vunpack.i.l.bf16 %v19686_v26 }
 0x96f   : > { %v8144_v62 = vsel %vm1496_vm1, %v23335_v52, %v19687_v44  ;;  %v8145_v14 = vsel %vm1496_vm1, %v23337_v12, %v19688_v21  ;;  %v20064_v21 = vld [vmem:[#allocation2 + $0x10] sm:$0xff] }
 0x970   : > { %v19691_v46 = vpop.permute.xlu0 %19690  ;;  %v8161_v24 = vpack.c.bf16 %v8145_v14, %v8144_v62  ;;  %v20065_v14 = vld [vmem:[#allocation2 + $0x8] sm:$0xff] }
 0x971   : > { %v19693_v19 = vunpack.i.h.bf16 %v19691_v46  ;;  %v19692_v36 = vunpack.i.l.bf16 %v19691_v46 }
 0x972   : > { %19484 = vmatmul.mubr.bf16.gmra.mrb[112].mxu0 %v8161_v24 }
 0x973   : > { %v8146_v31 = vsel %vm1496_vm1, %v23339_v17, %v19692_v36  ;;  %v8147_v27 = vsel %vm1496_vm1, %v23341_v58, %v19693_v19  ;;  %v25532_v17 = vld [vmem:[#allocation49_spill] sm:$0xff]  ;;  %v20066_v19 = vld [vmem:[#allocation2 + $0x18] sm:$0xff] }
 0x974   : > { %v19696_v34 = vpop.permute.xlu1 %19695  ;;  %v8162_v20 = vpack.c.bf16 %v8147_v27, %v8146_v31  ;;  %v25533_v58 = vld [vmem:[#allocation69_spill] sm:$0xff] }
 0x975   : > { %v19698_v15 = vunpack.i.h.bf16 %v19696_v34  ;;  %v19697_v6 = vunpack.i.l.bf16 %v19696_v34 }
 0x976   : > { %19487 = vmatprep.mubr.bf16.mxu0 %v8162_v20 }
 0x977   : > { %v8148_v52 = vsel %vm1496_vm1, %v23343_v63, %v19697_v6  ;;  %v8149_v12 = vsel %vm1496_vm1, %v23345_v10, %v19698_v15  ;;  %v25534_v63 = vld [vmem:[#allocation56_spill] sm:$0xff]  ;;  %v25535_v10 = vld [vmem:[#allocation50_spill] sm:$0xff] }
 0x978   : > { %v8163_v61 = vpack.c.bf16 %v8149_v12, %v8148_v52 }
 0x97a   : > { %19488 = vmatmul.mubr.bf16.gmra.mrb[116].mxu0 %v8163_v61  ;;  %v20067_v61 = vld [vmem:[#allocation2 + $0x20] sm:$0xff] }
 0x9a8   : > { %v19701_v35 = vpop.permute.xlu0 %19700 }
 0x9a9   : > { %v19703_v3 = vunpack.i.h.bf16 %v19701_v35  ;;  %v19702_v16 = vunpack.i.l.bf16 %v19701_v35 }
 0x9ab   : > { %v8150_v49 = vsel %vm1496_vm1, %v25532_v17, %v19702_v16  ;;  %v8151_v30 = vsel %vm1496_vm1, %v25533_v58, %v19703_v3  ;;  %v20068_v17 = vld [vmem:[#allocation2 + $0x30] sm:$0xff]  ;;  %v20069_v58 = vld [vmem:[#allocation2 + $0x28] sm:$0xff] }
 0x9ac   : > { %v8164_v28 = vpack.c.bf16 %v8151_v30, %v8150_v49 }
 0x9ae   : > { %19491 = vmatprep.mubr.bf16.mxu0 %v8164_v28 }
 0x9b0   : > { %v19706_v13 = vpop.permute.xlu1 %19705 }
 0x9b1   : > { %v19708_v32 = vunpack.i.h.bf16 %v19706_v13  ;;  %v19707_v54 = vunpack.i.l.bf16 %v19706_v13  ;;  %v20070_v13 = vld [vmem:[#allocation2 + $0x38] sm:$0xff] }
 0x9b3   : > { %v8152_v29 = vsel %vm1496_vm1, %v25534_v63, %v19707_v54  ;;  %v8153_v37 = vsel %vm1496_vm1, %v25535_v10, %v19708_v32 }
 0x9b4   : > { %v19711_v48 = vpop.permute.xlu0 %19710  ;;  %v8165_v4 = vpack.c.bf16 %v8153_v37, %v8152_v29 }
 0x9b5   : > { %v19713_v42 = vunpack.i.h.bf16 %v19711_v48  ;;  %v19712_v2 = vunpack.i.l.bf16 %v19711_v48 }
 0x9b6   : > { %19492 = vmatmul.mubr.bf16.gmra.mrb[120].mxu0 %v8165_v4 }
 0x9b7   : > { %v8154_v8 = vsel %vm1496_vm1, %v25536_v0, %v19712_v2  ;;  %v8155_v9 = vsel %vm1496_vm1, %v25537_v50, %v19713_v42  ;;  %v20071_v2 = vld [vmem:[#allocation2 + $0x40] sm:$0xff] }
 0x9b8   : > { %v8166_v18 = vpack.c.bf16 %v8155_v9, %v8154_v8 }
 0x9ba   : > { %19495 = vmatprep.mubr.bf16.mxu0 %v8166_v18  ;;  %v20072_v18 = vld [vmem:[#allocation2 + $0x50] sm:$0xff] }
 0x9bc   : > { %v19716_v41 = vpop.permute.xlu1 %19715 }
 0x9bd   : > { %v19718_v1 = vunpack.i.h.bf16 %v19716_v41  ;;  %v19717_v51 = vunpack.i.l.bf16 %v19716_v41 }
 0x9bf   : > { %v8156_v59 = vsel %vm1496_vm1, %v25538_v23, %v19717_v51  ;;  %v8157_v7 = vsel %vm1496_vm1, %v25539_v45, %v19718_v1  ;;  %v20073_v1 = vld [vmem:[#allocation2 + $0x48] sm:$0xff] }
 0x9c0   : > { %v8167_v43 = vpack.c.bf16 %v8157_v7, %v8156_v59  ;;  %v20074_v59 = vld [vmem:[#allocation2 + $0x58] sm:$0xff] }
 0x9c2   : > { %19496 = vmatmul.mubr.bf16.gmra.mrb[124].mxu0 %v8167_v43 }
 0x9c3   : > { %9287 = vmatprep.mubr.bf16.mxu0 %v25531_v47 }
 0xa07   : > { %v19481_v53 = vpop.f32.mrb[108].mxu0 }
 0xa08   : > { %v8273_v60 = vpop.f32.mrb[109].mxu0  ;;  %v8282_v22 = vadd.f32 %v19481_v53, %v23764_v5 }
 0xa09   : > { %v8274_v57 = vadd.f32 %v23764_v5, %v8273_v60  ;;  %v19482_v56 = vpop.f32.mrb[110].mxu0 }
 0xa0a   : > { %v8276_v33 = vpop.f32.mrb[111].mxu0  ;;  %v23775_v44 = vadd.f32 %v20064_v21, %v8282_v22  ;;  %v8285_v62 = vadd.f32 %v19482_v56, %v23764_v5 }
 0xa0b   : > { %v23772_v39 = vadd.f32 %v20063_v55, %v8274_v57  ;;  %v8277_v26 = vadd.f32 %v23764_v5, %v8276_v33  ;;  %v20075_v55 = vld [vmem:[#allocation2 + $0x60] sm:$0xff] }
 0xa0c   : > { %v23784_v36 = vadd.f32 %v20066_v19, %v8285_v62  ;;  %v8376_v31 = vmul.f32 %v23770_v25, %v23775_v44 }
 0xa0d   : > { %v23778_v46 = vadd.f32 %v20065_v14, %v8277_v26  ;;  %v8374_v24 = vmul.f32 %v23770_v25, %v23772_v39  ;;  %v20076_v14 = vld [vmem:[#allocation2 + $0x70] sm:$0xff] }
 0xa0e   : > { %v8377_v27 = vmul.f32 %v23770_v25, %v23784_v36 }
 0xa0f   : > { %8394 = vadd.xlane.f32.xlu0 %v8374_v24  ;;  %v8375_v40 = vmul.f32 %v23770_v25, %v23778_v46 }
 0xa11   : > { %8396 = vadd.xlane.f32.xlu1 %v8375_v40  ;;  %v20077_v40 = vld [vmem:[#allocation2 + $0x68] sm:$0xff] }
 0xa13   : > { %8398 = vadd.xlane.f32.xlu0 %v8376_v31 }
 0xa17   : > { %8400 = vadd.xlane.f32.xlu0 %v8377_v27  ;;  %v20078_v27 = vld [vmem:[#allocation2 + $0x78] sm:$0xff] }
 0xa45   : > { %v19485_v34 = vpop.f32.mrb[112].mxu0 }
 0xa46   : > { %v8289_v20 = vpop.f32.mrb[113].mxu0  ;;  %v8298_v15 = vadd.f32 %v19485_v34, %v23764_v5 }
 0xa47   : > { %v8290_v6 = vadd.f32 %v23764_v5, %v8289_v20  ;;  %v19486_v52 = vpop.f32.mrb[114].mxu0 }
 0xa48   : > { %v8292_v12 = vpop.f32.mrb[115].mxu0  ;;  %v8301_v3 = vadd.f32 %v19486_v52, %v23764_v5  ;;  %v23796_v49 = vadd.f32 %v20068_v17, %v8298_v15 }
 0xa49   : > { %v23792_v35 = vadd.f32 %v20067_v61, %v8290_v6  ;;  %v8293_v16 = vadd.f32 %v23764_v5, %v8292_v12 }
 0xa4a   : > { %v23802_v32 = vadd.f32 %v20070_v13, %v8301_v3  ;;  %v8380_v4 = vmul.f32 %v23770_v25, %v23796_v49 }
 0xa4b   : > { %v23798_v30 = vadd.f32 %v20069_v58, %v8293_v16  ;;  %v8378_v28 = vmul.f32 %v23770_v25, %v23792_v35  ;;  %v20079_v58 = vld [vmem:[#allocation2 + $0x80] sm:$0xff] }
 0xa4c   : > { %v8381_v9 = vmul.f32 %v23770_v25, %v23802_v32 }
 0xa4d   : > { %v19489_v54 = vpop.f32.mrb[116].mxu0  ;;  %8402 = vadd.xlane.f32.xlu0 %v8378_v28  ;;  %v8379_v63 = vmul.f32 %v23770_v25, %v23798_v30 }
 0xa4e   : > { %v8305_v29 = vpop.f32.mrb[117].mxu0  ;;  %v8314_v10 = vadd.f32 %v19489_v54, %v23764_v5 }
 0xa4f   : > { %v8306_v37 = vadd.f32 %v23764_v5, %v8305_v29  ;;  %v19490_v48 = vpop.f32.mrb[118].mxu0  ;;  %8404 = vadd.xlane.f32.xlu1 %v8379_v63  ;;  %v20080_v63 = vld [vmem:[#allocation2 + $0x90] sm:$0xff] }
 0xa50   : > { %v8308_v42 = vpop.f32.mrb[119].mxu0  ;;  %v8317_v8 = vadd.f32 %v19490_v48, %v23764_v5  ;;  %v23816_v41 = vadd.f32 %v20072_v18, %v8314_v10  ;;  %v20081_v10 = vld [vmem:[#allocation2 + $0x88] sm:$0xff] }
 0xa51   : > { %v23810_v0 = vadd.f32 %v20071_v2, %v8306_v37  ;;  %v8309_v50 = vadd.f32 %v23764_v5, %v8308_v42  ;;  %8406 = vadd.xlane.f32.xlu0 %v8380_v4  ;;  %v20082_v2 = vld [vmem:[#allocation2 + $0x98] sm:$0xff] }
 0xa52   : > { %v23822_v45 = vadd.f32 %v20074_v59, %v8317_v8  ;;  %v8384_v43 = vmul.f32 %v23770_v25, %v23816_v41 }
 0xa53   : > { %v23818_v51 = vadd.f32 %v20073_v1, %v8309_v50  ;;  %8408 = vadd.xlane.f32.xlu1 %v8381_v9  ;;  %v8382_v23 = vmul.f32 %v23770_v25, %v23810_v0 }
 0xa54   : > { %v8385_v38 = vmul.f32 %v23770_v25, %v23822_v45 }
 0xa55   : > { %8410 = vadd.xlane.f32.xlu0 %v8382_v23  ;;  %v8383_v7 = vmul.f32 %v23770_v25, %v23818_v51 }
 0xa57   : > { %8412 = vadd.xlane.f32.xlu1 %v8383_v7 }
 0xa59   : > { %8414 = vadd.xlane.f32.xlu0 %v8384_v43 }
 0xa5b   : > { %8416 = vadd.xlane.f32.xlu1 %v8385_v38 }
 0xa89   : > { %v19493_v53 = vpop.f32.mrb[120].mxu0 }
 0xa8a   : > { %v8321_v60 = vpop.f32.mrb[121].mxu0  ;;  %v8330_v22 = vadd.f32 %v19493_v53, %v23764_v5 }
 0xa8b   : > { %v8322_v57 = vadd.f32 %v23764_v5, %v8321_v60  ;;  %v19494_v56 = vpop.f32.mrb[122].mxu0 }
 0xa8c   : > { %v8324_v33 = vpop.f32.mrb[123].mxu0  ;;  %v8333_v21 = vadd.f32 %v19494_v56, %v23764_v5  ;;  %v23836_v24 = vadd.f32 %v20076_v14, %v8330_v22  ;;  %v8700_v14 = vld [vmem:[%s22325_s29 + $0x20] sm:$0xff] }
 0xa8d   : > { %v23832_v26 = vadd.f32 %v20075_v55, %v8322_v57  ;;  %v8325_v62 = vadd.f32 %v23764_v5, %v8324_v33 }
 0xa8e   : > { %v23842_v34 = vadd.f32 %v20078_v27, %v8333_v21  ;;  %v8388_v15 = vmul.f32 %v23770_v25, %v23836_v24 }
 0xa8f   : > { %v23838_v19 = vadd.f32 %v20077_v40, %v8325_v62  ;;  %v8386_v31 = vmul.f32 %v23770_v25, %v23832_v26  ;;  %v8696_v62 = vld [vmem:[%s22325_s29] sm:$0xff]  ;;  %v8697_v40 = vld [vmem:[%s22325_s29 + $0x8] sm:$0xff] }
 0xa90   : > { %v8389_v52 = vmul.f32 %v23770_v25, %v23842_v34  ;;  %v17672_v27 = vcombine.low %v8696_v62, %v8700_v14 }
 0xa91   : > { %8418 = vadd.xlane.f32.xlu0 %v8386_v31  ;;  %v8387_v20 = vmul.f32 %v23770_v25, %v23838_v19  ;;  %v17673_v31 = vcombine.high %v8696_v62, %v8700_v14  ;;  %v8740_v62 = vld [vmem:[%s22325_s29 + $0x160] sm:$0xff]  ;;  %v8737_v14 = vld [vmem:[%s22325_s29 + $0x148] sm:$0xff] }
 0xa93   : > { %8420 = vadd.xlane.f32.xlu1 %v8387_v20  ;;  %9122 = vmatprep.subr.bf16.mxu1 %v17673_v31  ;;  %v8741_v31 = vld [vmem:[%s22325_s29 + $0x168] sm:$0xff] }
 0xa94   : > { %9123 = vmatpush1.bf16.msra.mxu1 %v17672_v27  ;;  %v17714_v27 = vcombine.low %v8737_v14, %v8741_v31 }
 0xa95   : > { %8422 = vadd.xlane.f32.xlu0 %v8388_v15  ;;  %v19497_v6 = vpop.f32.mrb[124].mxu0 }
 0xa96   : > { %v8337_v12 = vpop.f32.mrb[125].mxu0  ;;  %v8346_v61 = vadd.f32 %v19497_v6, %v23764_v5  ;;  %v8704_v6 = vld [vmem:[%s22325_s29 + $0x40] sm:$0xff] }
 0xa97   : > { %v8338_v3 = vadd.f32 %v23764_v5, %v8337_v12  ;;  %8424 = vadd.xlane.f32.xlu1 %v8389_v52  ;;  %v19498_v16 = vpop.f32.mrb[126].mxu0  ;;  %v8708_v52 = vld [vmem:[%s22325_s29 + $0x60] sm:$0xff]  ;;  %v8705_v12 = vld [vmem:[%s22325_s29 + $0x48] sm:$0xff] }
 0xa98   : > { %v8340_v17 = vpop.f32.mrb[127].mxu0  ;;  %v8349_v13 = vadd.f32 %v19498_v16, %v23764_v5  ;;  %v23856_v29 = vadd.f32 %v20080_v63, %v8346_v61  ;;  %v17681_v61 = vcombine.high %v8704_v6, %v8708_v52  ;;  %v17680_v16 = vcombine.low %v8704_v6, %v8708_v52  ;;  %v8713_v63 = vld [vmem:[%s22325_s29 + $0x88] sm:$0xff]  ;;  %v8748_v6 = vld [vmem:[%s22325_s29 + $0x1a0] sm:$0xff] }
 0xa99   : > { %v23852_v28 = vadd.f32 %v20079_v58, %v8338_v3  ;;  %v8341_v54 = vadd.f32 %v23764_v5, %v8340_v17  ;;  %v8709_v3 = vld [vmem:[%s22325_s29 + $0x68] sm:$0xff] }
 0xa9a   : > { %v23862_v8 = vadd.f32 %v20082_v2, %v8349_v13  ;;  %v8392_v23 = vmul.f32 %v23770_v25, %v23856_v29  ;;  %v17682_v17 = vcombine.low %v8705_v12, %v8709_v3  ;;  %v17683_v58 = vcombine.high %v8705_v12, %v8709_v3  ;;  %9124 = vmatprep.subr.bf16.mxu1 %v17681_v61  ;;  %v8712_v13 = vld [vmem:[%s22325_s29 + $0x80] sm:$0xff]  ;;  %v8745_v52 = vld [vmem:[%s22325_s29 + $0x188] sm:$0xff] }
 0xa9b   : > { %v23858_v37 = vadd.f32 %v20081_v10, %v8341_v54  ;;  %v8390_v4 = vmul.f32 %v23770_v25, %v23852_v28  ;;  %9125 = vmatpush1.bf16.msra.mxu1 %v17680_v16  ;;  %v8716_v54 = vld [vmem:[%s22325_s29 + $0xa0] sm:$0xff]  ;;  %v8749_v61 = vld [vmem:[%s22325_s29 + $0x1a8] sm:$0xff] }
 0xa9c   : > { %v8395_v48 = vpop.xlane.xlu0 %8394  ;;  %v8393_v38 = vmul.f32 %v23770_v25, %v23862_v8  ;;  %v17689_v10 = vcombine.high %v8712_v13, %v8716_v54  ;;  %v17722_v16 = vcombine.low %v8745_v52, %v8749_v61 }
 0xa9d   : > { %v8434_v42 = vmul.f32 0.01, %v8395_v48  ;;  %8426 = vadd.xlane.f32.xlu0 %v8390_v4  ;;  %v8391_v9 = vmul.f32 %v23770_v25, %v23858_v37  ;;  %v8717_v48 = vld [vmem:[%s22325_s29 + $0xa8] sm:$0xff]  ;;  %v17688_v4 = vcombine.low %v8712_v13, %v8716_v54  ;;  %v8756_v13 = vld [vmem:[%s22325_s29 + $0x1e0] sm:$0xff] }
 0xa9e   : > { %v8397_v50 = vpop.xlane.xlu1 %8396  ;;  %v17691_v2 = vcombine.high %v8713_v63, %v8717_v48  ;;  %9126 = vmatprep.subr.bf16.mxu1 %v17689_v10  ;;  %v8753_v54 = vld [vmem:[%s22325_s29 + $0x1c8] sm:$0xff] }
 0xa9f   : > { %v8454_v5 = vsub.f32 %v23772_v39, %v8434_v42  ;;  %v8435_v18 = vmul.f32 0.01, %v8397_v50  ;;  %8428 = vadd.xlane.f32.xlu1 %v8391_v9  ;;  %v17690_v42 = vcombine.low %v8713_v63, %v8717_v48  ;;  %9127 = vmatpush1.bf16.msra.mxu1 %v17688_v4  ;;  %v8720_v50 = vld [vmem:[%s22325_s29 + $0xc0] sm:$0xff]  ;;  %v8757_v10 = vld [vmem:[%s22325_s29 + $0x1e8] sm:$0xff] }
 0xaa0   : > { %v8399_v1 = vpop.xlane.xlu0 %8398  ;;  %v8724_v9 = vld [vmem:[%s22325_s29 + $0xe0] sm:$0xff]  ;;  %v17730_v4 = vcombine.low %v8753_v54, %v8757_v10 }
 0xaa1   : > { %v23870_v59 = vmul.f32 %v23770_v25, %v8454_v5  ;;  %v8455_v7 = vsub.f32 %v23778_v46, %v8435_v18  ;;  %v8436_v43 = vmul.f32 0.01, %v8399_v1  ;;  %8430 = vadd.xlane.f32.xlu0 %v8392_v23  ;;  %v8721_v5 = vld [vmem:[%s22325_s29 + $0xc8] sm:$0xff]  ;;  %v17697_v18 = vcombine.high %v8720_v50, %v8724_v9 }
 0xaa2   : > { %v8725_v1 = vld [vmem:[%s22325_s29 + $0xe8] sm:$0xff]  ;;  %v17696_v23 = vcombine.low %v8720_v50, %v8724_v9 }
 0xaa3   : > { %v23876_v53 = vmul.f32 %v23770_v25, %v8455_v7  ;;  %v8456_v39 = vsub.f32 %v23775_v44, %v8436_v43  ;;  %v8494_v60 = vmul.f32 %v23870_v59, %v23870_v59  ;;  %8432 = vadd.xlane.f32.xlu1 %v8393_v38  ;;  %v17698_v7 = vcombine.low %v8721_v5, %v8725_v1  ;;  %v8728_v38 = vld [vmem:[%s22325_s29 + $0x100] sm:$0xff] }
 0xaa4   : > { %v8401_v22 = vpop.xlane.xlu0 %8400  ;;  %v17699_v43 = vcombine.high %v8721_v5, %v8725_v1  ;;  %9128 = vmatprep.subr.bf16.mxu1 %v17697_v18 }
 0xaa5   : > { %v23882_v46 = vmul.f32 %v23770_v25, %v8456_v39  ;;  %v8437_v57 = vmul.f32 0.01, %v8401_v22  ;;  %v8495_v56 = vmul.f32 %v23876_v53, %v23876_v53  ;;  %8514 = vadd.xlane.f32.xlu0 %v8494_v60  ;;  %9129 = vmatpush1.bf16.msra.mxu1 %v17696_v23  ;;  %v8732_v39 = vld [vmem:[%s22325_s29 + $0x120] sm:$0xff]  ;;  %v8729_v60 = vld [vmem:[%s22325_s29 + $0x108] sm:$0xff] }
 0xaa6   : > { %v17705_v22 = vcombine.high %v8728_v38, %v8732_v39 }
 0xaa7   : > { %v8457_v33 = vsub.f32 %v23784_v36, %v8437_v57  ;;  %v8496_v44 = vmul.f32 %v23882_v46, %v23882_v46  ;;  %8516 = vadd.xlane.f32.xlu1 %v8495_v56  ;;  %v8701_v36 = vld [vmem:[%s22325_s29 + $0x28] sm:$0xff]  ;;  %v17704_v56 = vcombine.low %v8728_v38, %v8732_v39 }
 0xaa8   : > { %v17674_v20 = vcombine.low %v8697_v40, %v8701_v36  ;;  %v17675_v15 = vcombine.high %v8697_v40, %v8701_v36  ;;  %v8733_v57 = vld [vmem:[%s22325_s29 + $0x128] sm:$0xff]  ;;  %9130 = vmatprep.subr.bf16.mxu1 %v17705_v22 }
 0xaa9   : > { %v23890_v55 = vmul.f32 %v23770_v25, %v8457_v33  ;;  %8518 = vadd.xlane.f32.xlu0 %v8496_v44  ;;  %v17706_v33 = vcombine.low %v8729_v60, %v8733_v57  ;;  %v17707_v44 = vcombine.high %v8729_v60, %v8733_v57  ;;  %9131 = vmatpush1.bf16.msra.mxu1 %v17704_v56 }
 0xaaa   : > { %9255 = vmatprep.subr.bf16.mxu0 %v17675_v15  ;;  %v8744_v15 = vld [vmem:[%s22325_s29 + $0x180] sm:$0xff] }
 0xaab   : > { %v8497_v21 = vmul.f32 %v23890_v55, %v23890_v55  ;;  %9256 = vmatpush1.bf16.msra.mxu0 %v17674_v20  ;;  %v17715_v20 = vcombine.high %v8737_v14, %v8741_v31  ;;  %v17721_v12 = vcombine.high %v8744_v15, %v8748_v6  ;;  %v17720_v3 = vcombine.low %v8744_v15, %v8748_v6 }
 0xaac   : > { %9257 = vmatprep.subr.bf16.mxu0 %v17683_v58  ;;  %v8752_v58 = vld [vmem:[%s22325_s29 + $0x1c0] sm:$0xff] }
 0xaad   : > { %8520 = vadd.xlane.f32.xlu1 %v8497_v21  ;;  %v8736_v21 = vld [vmem:[%s22325_s29 + $0x140] sm:$0xff]  ;;  %v17729_v63 = vcombine.high %v8752_v58, %v8756_v13  ;;  %v17728_v48 = vcombine.low %v8752_v58, %v8756_v13 }
 0xaae   : > { %v17713_v40 = vcombine.high %v8736_v21, %v8740_v62  ;;  %v17712_v36 = vcombine.low %v8736_v21, %v8740_v62 }
 0xaaf   : > { %9258 = vmatpush1.bf16.msra.mxu0 %v17682_v17  ;;  %v17723_v17 = vcombine.high %v8745_v52, %v8749_v61 }
 0xab0   : > { %9259 = vmatprep.subr.bf16.mxu0 %v17691_v2  ;;  %9132 = vmatprep.subr.bf16.mxu1 %v17713_v40 }
 0xab1   : > { %9133 = vmatpush1.bf16.msra.mxu1 %v17712_v36 }
 0xab2   : > { %9134 = vmatprep.subr.bf16.mxu1 %v17721_v12 }
 0xab3   : > { %9260 = vmatpush1.bf16.msra.mxu0 %v17690_v42  ;;  %v17731_v42 = vcombine.high %v8753_v54, %v8757_v10 }
 0xab4   : > { %9261 = vmatprep.subr.bf16.mxu0 %v17699_v43 }
 0xab5   : > { %9135 = vmatpush1.bf16.msra.mxu1 %v17720_v3 }
 0xab6   : > { %9136 = vmatprep.subr.bf16.mxu1 %v17729_v63 }
 0xab7   : > { %9262 = vmatpush1.bf16.msra.mxu0 %v17698_v7 }
 0xab8   : > { %9263 = vmatprep.subr.bf16.mxu0 %v17707_v44 }
 0xab9   : > { %9137 = vmatpush1.bf16.msra.mxu1 %v17728_v48 }
 0xabb   : > { %9264 = vmatpush1.bf16.msra.mxu0 %v17706_v33 }
 0xabc   : > { %9265 = vmatprep.subr.bf16.mxu0 %v17715_v20 }
 0xabf   : > { %9266 = vmatpush1.bf16.msra.mxu0 %v17714_v27 }
 0xac0   : > { %9267 = vmatprep.subr.bf16.mxu0 %v17723_v17 }
 0xac3   : > { %9268 = vmatpush1.bf16.msra.mxu0 %v17722_v16 }
 0xac4   : > { %9269 = vmatprep.subr.bf16.mxu0 %v17731_v42 }
 0xac7   : > { %9270 = vmatpush1.bf16.msra.mxu0 %v17730_v4 }
 0xada   : > { %v8403_v2 = vpop.xlane.xlu0 %8402 }
 0xadb   : > { %v8438_v50 = vmul.f32 0.01, %v8403_v2 }
 0xadc   : > { %v8405_v9 = vpop.xlane.xlu1 %8404 }
 0xadd   : > { %v8458_v5 = vsub.f32 %v23792_v35, %v8438_v50  ;;  %v8439_v18 = vmul.f32 0.01, %v8405_v9 }
 0xade   : > { %v8407_v1 = vpop.xlane.xlu0 %8406 }
 0xadf   : > { %v23928_v23 = vmul.f32 %v23770_v25, %v8458_v5  ;;  %v8459_v7 = vsub.f32 %v23798_v30, %v8439_v18  ;;  %v8440_v43 = vmul.f32 0.01, %v8407_v1 }
 0xae0   : > { %v8409_v38 = vpop.xlane.xlu1 %8408 }
 0xae1   : > { %v23932_v39 = vmul.f32 %v23770_v25, %v8459_v7  ;;  %v8460_v60 = vsub.f32 %v23796_v49, %v8440_v43  ;;  %v8441_v22 = vmul.f32 0.01, %v8409_v38  ;;  %v8498_v57 = vmul.f32 %v23928_v23, %v23928_v23 }
 0xae2   : > { %v8411_v56 = vpop.xlane.xlu0 %8410 }
 0xae3   : > { %v23938_v35 = vmul.f32 %v23770_v25, %v8460_v60  ;;  %v8461_v33 = vsub.f32 %v23802_v32, %v8441_v22  ;;  %v8442_v44 = vmul.f32 0.01, %v8411_v56  ;;  %8522 = vadd.xlane.f32.xlu0 %v8498_v57  ;;  %v8499_v30 = vmul.f32 %v23932_v39, %v23932_v39 }
 0xae4   : > { %v8413_v21 = vpop.xlane.xlu1 %8412 }
 0xae5   : > { %v23944_v62 = vmul.f32 %v23770_v25, %v8461_v33  ;;  %v8462_v49 = vsub.f32 %v23810_v0, %v8442_v44  ;;  %v8443_v14 = vmul.f32 0.01, %v8413_v21  ;;  %8524 = vadd.xlane.f32.xlu1 %v8499_v30  ;;  %v8500_v40 = vmul.f32 %v23938_v35, %v23938_v35 }
 0xae6   : > { %v8415_v31 = vpop.xlane.xlu0 %8414 }
 0xae7   : > { %v23950_v36 = vmul.f32 %v23770_v25, %v8462_v49  ;;  %v8463_v32 = vsub.f32 %v23818_v51, %v8443_v14  ;;  %v8444_v27 = vmul.f32 0.01, %v8415_v31  ;;  %8526 = vadd.xlane.f32.xlu0 %v8500_v40  ;;  %v8501_v20 = vmul.f32 %v23944_v62, %v23944_v62 }
 0xae8   : > { %v8417_v15 = vpop.xlane.xlu1 %8416 }
 0xae9   : > { %v23956_v6 = vmul.f32 %v23770_v25, %v8463_v32  ;;  %v8464_v0 = vsub.f32 %v23816_v41, %v8444_v27  ;;  %v8445_v52 = vmul.f32 0.01, %v8417_v15  ;;  %8528 = vadd.xlane.f32.xlu1 %v8501_v20  ;;  %v8502_v12 = vmul.f32 %v23950_v36, %v23950_v36 }
 0xaeb   : > { %v23962_v61 = vmul.f32 %v23770_v25, %v8464_v0  ;;  %v8465_v51 = vsub.f32 %v23822_v45, %v8445_v52  ;;  %8530 = vadd.xlane.f32.xlu0 %v8502_v12  ;;  %v8503_v3 = vmul.f32 %v23956_v6, %v23956_v6 }
 0xaed   : > { %v23968_v16 = vmul.f32 %v23770_v25, %v8465_v51  ;;  %8532 = vadd.xlane.f32.xlu1 %v8503_v3  ;;  %v8504_v41 = vmul.f32 %v23962_v61, %v23962_v61 }
 0xaef   : > { %8534 = vadd.xlane.f32.xlu0 %v8504_v41  ;;  %v8505_v17 = vmul.f32 %v23968_v16, %v23968_v16 }
 0xaf1   : > { %8536 = vadd.xlane.f32.xlu1 %v8505_v17 }
 0xb1e   : > { %v8419_v58 = vpop.xlane.xlu0 %8418 }
 0xb1f   : > { %v8446_v13 = vmul.f32 0.01, %v8419_v58 }
 0xb20   : > { %v8421_v54 = vpop.xlane.xlu1 %8420 }
 0xb21   : > { %v8466_v45 = vsub.f32 %v23832_v26, %v8446_v13  ;;  %v8447_v63 = vmul.f32 0.01, %v8421_v54 }
 0xb22   : > { %v8423_v10 = vpop.xlane.xlu0 %8422 }
 0xb23   : > { %v23976_v48 = vmul.f32 %v23770_v25, %v8466_v45  ;;  %v8467_v4 = vsub.f32 %v23838_v19, %v8447_v63  ;;  %v8448_v42 = vmul.f32 0.01, %v8423_v10  ;;  %v24024_v63 = vld [vmem:[%s25543_s30] ss:$0 sm:$0xff] }
 0xb24   : > { %v8425_v2 = vpop.xlane.xlu1 %8424 }
 0xb25   : > { %v23980_v50 = vmul.f32 %v23770_v25, %v8467_v4  ;;  %v8468_v9 = vsub.f32 %v23836_v24, %v8448_v42  ;;  %v8449_v5 = vmul.f32 0.01, %v8425_v2  ;;  %v8506_v18 = vmul.f32 %v23976_v48, %v23976_v48 }
 0xb27   : > { %v23986_v26 = vmul.f32 %v23770_v25, %v8468_v9  ;;  %v8469_v1 = vsub.f32 %v23842_v34, %v8449_v5  ;;  %8538 = vadd.xlane.f32.xlu0 %v8506_v18  ;;  %v8507_v19 = vmul.f32 %v23980_v50, %v23980_v50  ;;  %v24031_v5 = vld [vmem:[%s25544_s19] ss:$0 sm:$0xff] }
 0xb29   : > { %v23992_v7 = vmul.f32 %v23770_v25, %v8469_v1  ;;  %8540 = vadd.xlane.f32.xlu1 %v8507_v19  ;;  %v8508_v24 = vmul.f32 %v23986_v26, %v23986_v26 }
 0xb2a   : > { %v8427_v43 = vpop.xlane.xlu0 %8426 }
 0xb2b   : > { %v8450_v38 = vmul.f32 0.01, %v8427_v43  ;;  %8542 = vadd.xlane.f32.xlu0 %v8508_v24  ;;  %v8509_v60 = vmul.f32 %v23992_v7, %v23992_v7 }
 0xb2c   : > { %v8429_v22 = vpop.xlane.xlu1 %8428 }
 0xb2d   : > { %v8470_v34 = vsub.f32 %v23852_v28, %v8450_v38  ;;  %v8451_v57 = vmul.f32 0.01, %v8429_v22  ;;  %8544 = vadd.xlane.f32.xlu1 %v8509_v60  ;;  %v8698_v38 = vld [vmem:[%s22325_s29 + $0x10] sm:$0xff] }
 0xb2e   : > { %v8431_v56 = vpop.xlane.xlu0 %8430  ;;  %v8702_v60 = vld [vmem:[%s22325_s29 + $0x30] sm:$0xff] }
 0xb2f   : > { %v24000_v33 = vmul.f32 %v23770_v25, %v8470_v34  ;;  %v8471_v44 = vsub.f32 %v23858_v37, %v8451_v57  ;;  %v8452_v30 = vmul.f32 0.01, %v8431_v56  ;;  %v17676_v34 = vcombine.low %v8698_v38, %v8702_v60  ;;  %v8703_v56 = vld [vmem:[%s22325_s29 + $0x38] sm:$0xff] }
 0xb30   : > { %v8433_v21 = vpop.xlane.xlu1 %8432  ;;  %v17677_v57 = vcombine.high %v8698_v38, %v8702_v60  ;;  %v8735_v60 = vld [vmem:[%s22325_s29 + $0x138] sm:$0xff] }
 0xb31   : > { %v24004_v49 = vmul.f32 %v23770_v25, %v8471_v44  ;;  %v8472_v14 = vsub.f32 %v23856_v29, %v8452_v30  ;;  %v8453_v40 = vmul.f32 0.01, %v8433_v21  ;;  %v8510_v31 = vmul.f32 %v24000_v33, %v24000_v33 }
 0xb32   : > { %v8515_v28 = vpop.xlane.xlu0 %8514  ;;  %9388 = vmatprep.subr.bf16.mxu1 %v17677_v57  ;;  %v8738_v57 = vld [vmem:[%s22325_s29 + $0x150] sm:$0xff] }
 0xb33   : > { %v24010_v32 = vmul.f32 %v23770_v25, %v8472_v14  ;;  %v8473_v27 = vsub.f32 %v23862_v8, %v8453_v40  ;;  %v8554_v20 = vmul.f32 0.01, %v8515_v28  ;;  %8546 = vadd.xlane.f32.xlu0 %v8510_v31  ;;  %v8511_v37 = vmul.f32 %v24004_v49, %v24004_v49  ;;  %v8706_v40 = vld [vmem:[%s22325_s29 + $0x50] sm:$0xff]  ;;  %v8707_v28 = vld [vmem:[%s22325_s29 + $0x58] sm:$0xff] }
 0xb34   : > { %v8517_v15 = vpop.xlane.xlu1 %8516  ;;  %v8710_v31 = vld [vmem:[%s22325_s29 + $0x70] sm:$0xff] }
 0xb35   : > { %v24016_v0 = vmul.f32 %v23770_v25, %v8473_v27  ;;  %v8574_v29 = vadd.f32 1e-05, %v8554_v20  ;;  %v8555_v52 = vmul.f32 0.01, %v8517_v15  ;;  %8548 = vadd.xlane.f32.xlu1 %v8511_v37  ;;  %v8512_v12 = vmul.f32 %v24010_v32, %v24010_v32  ;;  %v8711_v20 = vld [vmem:[%s22325_s29 + $0x78] sm:$0xff] }
 0xb36   : > { %v8519_v51 = vpop.xlane.xlu0 %8518  ;;  %v17685_v27 = vcombine.high %v8706_v40, %v8710_v31  ;;  %v17684_v15 = vcombine.low %v8706_v40, %v8710_v31 }
 0xb37   : > { %19983 = vrsqrt.f32 %v8574_v29  ;;  %v8575_v3 = vadd.f32 1e-05, %v8555_v52  ;;  %v8556_v8 = vmul.f32 0.01, %v8519_v51  ;;  %8550 = vadd.xlane.f32.xlu0 %v8512_v12  ;;  %v8513_v41 = vmul.f32 %v24016_v0, %v24016_v0  ;;  %v8714_v12 = vld [vmem:[%s22325_s29 + $0x90] sm:$0xff] }
 0xb38   : > { %v17687_v29 = vcombine.high %v8707_v28, %v8711_v20  ;;  %v17686_v52 = vcombine.low %v8707_v28, %v8711_v20  ;;  %v8718_v51 = vld [vmem:[%s22325_s29 + $0xb0] sm:$0xff] }
 0xb39   : > { %19985 = vrsqrt.f32 %v8575_v3  ;;  %v8576_v17 = vadd.f32 1e-05, %v8556_v8  ;;  %8552 = vadd.xlane.f32.xlu1 %v8513_v41  ;;  %v8715_v3 = vld [vmem:[%s22325_s29 + $0x98] sm:$0xff]  ;;  %v17693_v8 = vcombine.high %v8714_v12, %v8718_v51  ;;  %v8750_v20 = vld [vmem:[%s22325_s29 + $0x1b0] sm:$0xff] }
 0xb3a   : > { %v8521_v58 = vpop.xlane.xlu1 %8520  ;;  %v8719_v41 = vld [vmem:[%s22325_s29 + $0xb8] sm:$0xff] }
 0xb3b   : > { %v8557_v13 = vmul.f32 0.01, %v8521_v58  ;;  %19987 = vrsqrt.f32 %v8576_v17  ;;  %v17692_v17 = vcombine.low %v8714_v12, %v8718_v51  ;;  %v17695_v58 = vcombine.high %v8715_v3, %v8719_v41 }
 0xb3d   : > { %v8577_v54 = vadd.f32 1e-05, %v8557_v13  ;;  %v8722_v13 = vld [vmem:[%s22325_s29 + $0xd0] sm:$0xff] }
 0xb3f   : > { %19989 = vrsqrt.f32 %v8577_v54  ;;  %v8726_v54 = vld [vmem:[%s22325_s29 + $0xf0] sm:$0xff] }
 0xb41   : > { %v19984_v45 = vpop.eup %19983 }
 0xb42   : > { %v8614_v10 = vmul.f32 %v19984_v45, %v23870_v59  ;;  %v8723_v45 = vld [vmem:[%s22325_s29 + $0xd8] sm:$0xff] }
 0xb43   : > { %v19986_v4 = vpop.eup %19985 }
 0xb44   : > { %v8615_v42 = vmul.f32 %v19986_v4, %v23876_v53  ;;  %v8640_v2 = vmul.f32 %v24024_v63, %v8614_v10  ;;  %v17694_v10 = vcombine.low %v8715_v3, %v8719_v41  ;;  %v17701_v4 = vcombine.high %v8722_v13, %v8726_v54  ;;  %v8754_v3 = vld [vmem:[%s22325_s29 + $0x1d0] sm:$0xff]  ;;  %v8755_v41 = vld [vmem:[%s22325_s29 + $0x1d8] sm:$0xff] }
 0xb45   : > { %v19988_v9 = vpop.eup %19987 }
 0xb46   : > { %v8641_v18 = vmul.f32 %v24024_v63, %v8615_v42  ;;  %v8616_v19 = vmul.f32 %v19988_v9, %v23882_v46  ;;  %v24036_v24 = vadd.f32 %v24031_v5, %v8640_v2  ;;  %v8727_v42 = vld [vmem:[%s22325_s29 + $0xf8] sm:$0xff]  ;;  %v17700_v9 = vcombine.low %v8722_v13, %v8726_v54 }
 0xb47   : > { %v17703_v2 = vcombine.high %v8723_v45, %v8727_v42  ;;  %v8759_v13 = vld [vmem:[%s22325_s29 + $0x1f8] sm:$0xff] }
 0xb48   : > { %v24039_v59 = vadd.f32 %v24031_v5, %v8641_v18  ;;  %v8642_v46 = vmul.f32 %v24024_v63, %v8616_v19  ;;  %v17702_v18 = vcombine.low %v8723_v45, %v8727_v42  ;;  %v8734_v19 = vld [vmem:[%s22325_s29 + $0x130] sm:$0xff]  ;;  %v17735_v54 = vcombine.high %v8755_v41, %v8759_v13 }
 0xb49   : > { %v19990_v1 = vpop.eup %19989 }
 0xb4a   : > { %v8617_v53 = vmul.f32 %v19990_v1, %v23890_v55  ;;  %v24044_v43 = vpack.c.bf16 %v24039_v59, %v24036_v24  ;;  %v8699_v55 = vld [vmem:[%s22325_s29 + $0x18] sm:$0xff]  ;;  %v24060_v14 = vadd.f32 %v24031_v5, %v8642_v46  ;;  %v8730_v1 = vld [vmem:[%s22325_s29 + $0x110] sm:$0xff] }
 0xb4b   : > { %v17679_v44 = vcombine.high %v8699_v55, %v8703_v56  ;;  %v17678_v21 = vcombine.low %v8699_v55, %v8703_v56  ;;  %v17709_v38 = vcombine.high %v8730_v1, %v8734_v19  ;;  %v8742_v46 = vld [vmem:[%s22325_s29 + $0x170] sm:$0xff]  ;;  %v8739_v55 = vld [vmem:[%s22325_s29 + $0x158] sm:$0xff] }
 0xb4c   : > { %v8643_v22 = vmul.f32 %v24024_v63, %v8617_v53  ;;  %9155 = vmatmul.mubr.bf16.vlgmr.msra.gmra.mrb[112].mxu1 %v24044_v43  ;;  %9288 = vmatmul.mubr.bf16.vlgmr.msra.gmra.mrb[128].mxu0 %v24044_v43  ;;  %v8731_v53 = vld [vmem:[%s22325_s29 + $0x118] sm:$0xff]  ;;  %v17716_v31 = vcombine.low %v8738_v57, %v8742_v46 }
 0xb4d   : > { %9164 = vmatprep.mubr.bf16.mxu1 %v25531_v47  ;;  %9297 = vmatprep.mubr.bf16.mxu0 %v25531_v47  ;;  %v17710_v56 = vcombine.low %v8731_v53, %v8735_v60 }
 0xb4e   : > { %v24057_v30 = vadd.f32 %v24031_v5, %v8643_v22  ;;  %9389 = vmatpush1.bf16.msra.mxu1 %v17676_v34  ;;  %9521 = vmatprep.subr.bf16.mxu0 %v17679_v44  ;;  %v17708_v22 = vcombine.low %v8730_v1, %v8734_v19  ;;  %v17711_v34 = vcombine.high %v8731_v53, %v8735_v60 }
 0xb4f   : > { %9522 = vmatpush1.bf16.msra.mxu0 %v17678_v21  ;;  %9390 = vmatprep.subr.bf16.mxu1 %v17685_v27  ;;  %v17717_v44 = vcombine.high %v8738_v57, %v8742_v46  ;;  %v8743_v21 = vld [vmem:[%s22325_s29 + $0x178] sm:$0xff]  ;;  %v8746_v27 = vld [vmem:[%s22325_s29 + $0x190] sm:$0xff] }
 0xb50   : > { %v24068_v37 = vpack.c.bf16 %v24057_v30, %v24060_v14  ;;  %9523 = vmatprep.subr.bf16.mxu0 %v17687_v29  ;;  %v17719_v40 = vcombine.high %v8739_v55, %v8743_v21  ;;  %v17718_v28 = vcombine.low %v8739_v55, %v8743_v21  ;;  %v17725_v29 = vcombine.high %v8746_v27, %v8750_v20 }
 0xb51   : > { %v17724_v12 = vcombine.low %v8746_v27, %v8750_v20 }
 0xb52   : > { %9391 = vmatpush1.bf16.msra.mxu1 %v17684_v15  ;;  %v8747_v15 = vld [vmem:[%s22325_s29 + $0x198] sm:$0xff] }
 0xb53   : > { %9392 = vmatprep.subr.bf16.mxu1 %v17693_v8  ;;  %9524 = vmatpush1.bf16.msra.mxu0 %v17686_v52  ;;  %v8751_v52 = vld [vmem:[%s22325_s29 + $0x1b8] sm:$0xff]  ;;  %v8758_v8 = vld [vmem:[%s22325_s29 + $0x1f0] sm:$0xff]  ;;  %s25553_s29 = scalar_lea.vmem [#allocation17], %s22286_s7 }
 0xb54   : > { %9165 = vmatmul.mubr.bf16.gmra.mrb[116].mxu1 %v24068_v37  ;;  %9298 = vmatmul.mubr.bf16.gmra.mrb[132].mxu0 %v24068_v37  ;;  %v17727_v51 = vcombine.high %v8747_v15, %v8751_v52  ;;  %v17732_v45 = vcombine.low %v8754_v3, %v8758_v8 }
 0xb55   : > { %9174 = vmatprep.mubr.bf16.mxu1 %v25531_v47  ;;  %9307 = vmatprep.mubr.bf16.mxu0 %v25531_v47 }
 0xb56   : > { %9525 = vmatprep.subr.bf16.mxu0 %v17695_v58  ;;  %9393 = vmatpush1.bf16.msra.mxu1 %v17692_v17  ;;  %v17726_v17 = vcombine.low %v8747_v15, %v8751_v52  ;;  %v17733_v58 = vcombine.high %v8754_v3, %v8758_v8 }
 0xb57   : > { %9526 = vmatpush1.bf16.msra.mxu0 %v17694_v10  ;;  %9394 = vmatprep.subr.bf16.mxu1 %v17701_v4  ;;  %v17734_v10 = vcombine.low %v8755_v41, %v8759_v13 }
 0xb58   : > { %9527 = vmatprep.subr.bf16.mxu0 %v17703_v2 }
 0xb5a   : > { %9395 = vmatpush1.bf16.msra.mxu1 %v17700_v9 }
 0xb5b   : > { %9528 = vmatpush1.bf16.msra.mxu0 %v17702_v18  ;;  %9396 = vmatprep.subr.bf16.mxu1 %v17709_v38 }
 0xb5c   : > { %9529 = vmatprep.subr.bf16.mxu0 %v17711_v34 }
 0xb5e   : > { %9397 = vmatpush1.bf16.msra.mxu1 %v17708_v22 }
 0xb5f   : > { %9530 = vmatpush1.bf16.msra.mxu0 %v17710_v56  ;;  %9398 = vmatprep.subr.bf16.mxu1 %v17717_v44 }
 0xb60   : > { %9531 = vmatprep.subr.bf16.mxu0 %v17719_v40 }
 0xb62   : > { %9399 = vmatpush1.bf16.msra.mxu1 %v17716_v31 }
 0xb63   : > { %9532 = vmatpush1.bf16.msra.mxu0 %v17718_v28  ;;  %9400 = vmatprep.subr.bf16.mxu1 %v17725_v29 }
 0xb64   : > { %9533 = vmatprep.subr.bf16.mxu0 %v17727_v51 }
 0xb66   : > { %9401 = vmatpush1.bf16.msra.mxu1 %v17724_v12 }
 0xb67   : > { %9534 = vmatpush1.bf16.msra.mxu0 %v17726_v17  ;;  %9402 = vmatprep.subr.bf16.mxu1 %v17733_v58 }
 0xb68   : > { %9535 = vmatprep.subr.bf16.mxu0 %v17735_v54 }
 0xb6a   : > { %9403 = vmatpush1.bf16.msra.mxu1 %v17732_v45 }
 0xb6b   : > { %9536 = vmatpush1.bf16.msra.mxu0 %v17734_v10 }
 0xb70   : > { %v8523_v4 = vpop.xlane.xlu0 %8522 }
 0xb71   : > { %v8558_v42 = vmul.f32 0.01, %v8523_v4 }
 0xb72   : > { %v8525_v2 = vpop.xlane.xlu1 %8524 }
 0xb73   : > { %v8578_v9 = vadd.f32 1e-05, %v8558_v42  ;;  %v8559_v18 = vmul.f32 0.01, %v8525_v2 }
 0xb74   : > { %v8527_v1 = vpop.xlane.xlu0 %8526 }
 0xb75   : > { %19991 = vrsqrt.f32 %v8578_v9  ;;  %v8579_v19 = vadd.f32 1e-05, %v8559_v18  ;;  %v8560_v53 = vmul.f32 0.01, %v8527_v1 }
 0xb76   : > { %v8529_v38 = vpop.xlane.xlu1 %8528 }
 0xb77   : > { %19993 = vrsqrt.f32 %v8579_v19  ;;  %v8580_v60 = vadd.f32 1e-05, %v8560_v53  ;;  %v8561_v22 = vmul.f32 0.01, %v8529_v38 }
 0xb78   : > { %v8531_v34 = vpop.xlane.xlu0 %8530 }
 0xb79   : > { %19995 = vrsqrt.f32 %v8580_v60  ;;  %v8581_v57 = vadd.f32 1e-05, %v8561_v22  ;;  %v8562_v46 = vmul.f32 0.01, %v8531_v34 }
 0xb7a   : > { %v8533_v55 = vpop.xlane.xlu1 %8532 }
 0xb7b   : > { %19997 = vrsqrt.f32 %v8581_v57  ;;  %v8563_v56 = vmul.f32 0.01, %v8533_v55  ;;  %v8582_v44 = vadd.f32 1e-05, %v8562_v46  ;;  %v19759_v55 = vld [vmem:[%s22334_s12 + $0x40] sm:$0xff]  }
 0xb7c   : > { %v8535_v40 = vpop.xlane.xlu0 %8534  ;;  %18679 = vmatprep.subr.bf16.mxu1 %v19759_v55 }
 0xb7d   : > { %v8583_v21 = vadd.f32 1e-05, %v8563_v56  ;;  %v8564_v29 = vmul.f32 0.01, %v8535_v40  ;;  %v19760_v56 = vld [vmem:[%s22334_s12 + $0xc0] sm:$0xff]  }
 0xb7e   : > { %v8537_v31 = vpop.xlane.xlu1 %8536  ;;  %18755 = vmatprep.subr.bf16.mxu0 %v19760_v56 }
 0xb7f   : > { %v19992_v28 = vpop.eup %19991  ;;  %19999 = vrsqrt.f32 %v8583_v21  ;;  %v8565_v27 = vmul.f32 0.01, %v8537_v31  ;;  %v8584_v17 = vadd.f32 1e-05, %v8564_v29 }
 0xb80   : > { %v8618_v20 = vmul.f32 %v19992_v28, %v23928_v23  ;;  %20001 = vrsqrt.f32 %v8582_v44 }
 0xb81   : > { %v19994_v15 = vpop.eup %19993  ;;  %v8585_v3 = vadd.f32 1e-05, %v8565_v27 }
 0xb82   : > { %v8619_v52 = vmul.f32 %v19994_v15, %v23932_v39  ;;  %v8644_v12 = vmul.f32 %v24024_v63, %v8618_v20 }
 0xb83   : > { %v19996_v51 = vpop.eup %19995  ;;  %20003 = vrsqrt.f32 %v8585_v3 }
 0xb84   : > { %v8645_v8 = vmul.f32 %v24024_v63, %v8619_v52  ;;  %v8620_v58 = vmul.f32 %v19996_v51, %v23938_v35  ;;  %v24105_v54 = vadd.f32 %v24031_v5, %v8644_v12  ;;  %20005 = vrsqrt.f32 %v8584_v17 }
 0xb85   : > { %v19998_v41 = vpop.eup %19997 }
 0xb86   : > { %v8621_v13 = vmul.f32 %v19998_v41, %v23944_v62  ;;  %v24108_v23 = vadd.f32 %v24031_v5, %v8645_v8  ;;  %v8646_v35 = vmul.f32 %v24024_v63, %v8620_v58 }
 0xb88   : > { %v24112_v39 = vpack.c.bf16 %v24108_v23, %v24105_v54  ;;  %v8647_v45 = vmul.f32 %v24024_v63, %v8621_v13  ;;  %v24126_v9 = vadd.f32 %v24031_v5, %v8646_v35 }
 0xb89   : > { %v20000_v10 = vpop.eup %19999 }
 0xb8a   : > { %9175 = vmatmul.mubr.bf16.gmra.mrb[120].mxu1 %v24112_v39  ;;  %9308 = vmatmul.mubr.bf16.gmra.mrb[136].mxu0 %v24112_v39  ;;  %v20002_v62 = vpop.eup %20001  ;;  %v8623_v4 = vmul.f32 %v20000_v10, %v23956_v6  ;;  %v24122_v42 = vadd.f32 %v24031_v5, %v8647_v45 }
 0xb8b   : > { %9184 = vmatprep.mubr.bf16.mxu1 %v25531_v47  ;;  %9317 = vmatprep.mubr.bf16.mxu0 %v25531_v47  ;;  %v8622_v2 = vmul.f32 %v20002_v62, %v23950_v36 }
 0xb8c   : > { %v24130_v18 = vpack.c.bf16 %v24122_v42, %v24126_v9  ;;  %v8649_v1 = vmul.f32 %v24024_v63, %v8623_v4 }
 0xb8d   : > { %v20004_v19 = vpop.eup %20003  ;;  %v8648_v6 = vmul.f32 %v24024_v63, %v8622_v2 }
 0xb8e   : > { %v20006_v53 = vpop.eup %20005  ;;  %v8625_v36 = vmul.f32 %v20004_v19, %v23968_v16  ;;  %v24140_v38 = vadd.f32 %v24031_v5, %v8649_v1 }
 0xb8f   : > { %v8624_v60 = vmul.f32 %v20006_v53, %v23962_v61  ;;  %v24144_v22 = vadd.f32 %v24031_v5, %v8648_v6 }
 0xb90   : > { %v8651_v57 = vmul.f32 %v24024_v63, %v8625_v36 }
 0xb91   : > { %v24148_v34 = vpack.c.bf16 %v24140_v38, %v24144_v22  ;;  %v8650_v16 = vmul.f32 %v24024_v63, %v8624_v60 }
 0xb92   : > { %9185 = vmatmul.mubr.bf16.gmra.mrb[124].mxu1 %v24130_v18  ;;  %9318 = vmatmul.mubr.bf16.gmra.mrb[140].mxu0 %v24130_v18  ;;  %v24157_v61 = vadd.f32 %v24031_v5, %v8651_v57 }
 0xb93   : > { %9194 = vmatprep.mubr.bf16.mxu1 %v25531_v47  ;;  %9327 = vmatprep.mubr.bf16.mxu0 %v25531_v47  ;;  %v24160_v46 = vadd.f32 %v24031_v5, %v8650_v16 }
 0xb95   : > { %v24166_v44 = vpack.c.bf16 %v24157_v61, %v24160_v46 }
 0xb9a   : > { %9195 = vmatmul.mubr.bf16.gmra.mrb[128].mxu1 %v24148_v34  ;;  %9328 = vmatmul.mubr.bf16.gmra.mrb[144].mxu0 %v24148_v34 }
 0xb9b   : > { %9204 = vmatprep.mubr.bf16.mxu1 %v25531_v47  ;;  %9337 = vmatprep.mubr.bf16.mxu0 %v25531_v47 }
 0xba2   : > { %9205 = vmatmul.mubr.bf16.gmra.mrb[132].mxu1 %v24166_v44  ;;  %9338 = vmatmul.mubr.bf16.gmra.mrb[148].mxu0 %v24166_v44 }
 0xba3   : > { %9214 = vmatprep.mubr.bf16.mxu1 %v25531_v47  ;;  %9347 = vmatprep.mubr.bf16.mxu0 %v25531_v47 }
 0xbb4   : > { %v8539_v21 = vpop.xlane.xlu0 %8538 }
 0xbb5   : > { %v8566_v40 = vmul.f32 0.01, %v8539_v21 }
 0xbb6   : > { %v8541_v31 = vpop.xlane.xlu1 %8540 }
 0xbb7   : > { %v8586_v28 = vadd.f32 1e-05, %v8566_v40  ;;  %v8567_v27 = vmul.f32 0.01, %v8541_v31 }
 0xbb8   : > { %v8543_v20 = vpop.xlane.xlu0 %8542 }
 0xbb9   : > { %20007 = vrsqrt.f32 %v8586_v28  ;;  %v8587_v15 = vadd.f32 1e-05, %v8567_v27  ;;  %v8568_v29 = vmul.f32 0.01, %v8543_v20 }
 0xbba   : > { %v8545_v52 = vpop.xlane.xlu1 %8544 }
 0xbbb   : > { %20009 = vrsqrt.f32 %v8587_v15  ;;  %v8588_v12 = vadd.f32 1e-05, %v8568_v29  ;;  %v8569_v51 = vmul.f32 0.01, %v8545_v52 }
 0xbbd   : > { %20011 = vrsqrt.f32 %v8588_v12  ;;  %v8589_v3 = vadd.f32 1e-05, %v8569_v51 }
 0xbbf   : > { %20013 = vrsqrt.f32 %v8589_v3 }
 0xbc0   : > { %v8547_v8 = vpop.xlane.xlu0 %8546 }
 0xbc1   : > { %v8570_v41 = vmul.f32 0.01, %v8547_v8 }
 0xbc2   : > { %v8549_v17 = vpop.xlane.xlu1 %8548 }
 0xbc3   : > { %v20008_v58 = vpop.eup %20007  ;;  %v8590_v13 = vadd.f32 1e-05, %v8570_v41  ;;  %v8571_v45 = vmul.f32 0.01, %v8549_v17 }
 0xbc4   : > { %v8626_v10 = vmul.f32 %v20008_v58, %v23976_v48  ;;  %v8551_v35 = vpop.xlane.xlu0 %8550 }
 0xbc5   : > { %v20010_v62 = vpop.eup %20009  ;;  %20015 = vrsqrt.f32 %v8590_v13  ;;  %v8591_v4 = vadd.f32 1e-05, %v8571_v45  ;;  %v8572_v2 = vmul.f32 0.01, %v8551_v35  ;;  %v19762_v35 = vld [vmem:[%s22334_s12 + $0x80] sm:$0xff]  }
 0xbc6   : > { %v8627_v1 = vmul.f32 %v20010_v62, %v23980_v50  ;;  %v8553_v19 = vpop.xlane.xlu1 %8552  ;;  %v8652_v6 = vmul.f32 %v24024_v63, %v8626_v10  ;;  %v19764_v62 = vld [vmem:[%s22334_s12 + $0xc8] sm:$0xff]  }
 0xbc7   : > { %v20012_v53 = vpop.eup %20011  ;;  %20017 = vrsqrt.f32 %v8591_v4  ;;  %v8573_v36 = vmul.f32 0.01, %v8553_v19  ;;  %v8592_v16 = vadd.f32 1e-05, %v8572_v2  ;;  %v19765_v4 = vld [vmem:[%s22334_s12 + $0x8] sm:$0xff]   ;;  %v19768_v19 = vld [vmem:[%s22334_s12 + $0xd0] sm:$0xff]  }
 0xbc8   : > { %v8653_v60 = vmul.f32 %v24024_v63, %v8627_v1  ;;  %v8628_v48 = vmul.f32 %v20012_v53, %v23986_v26  ;;  %v24179_v21 = vadd.f32 %v24031_v5, %v8652_v6  ;;  %v19766_v2 = vld [vmem:[%s22334_s12 + $0x88] sm:$0xff]   ;;  %v19767_v1 = vld [vmem:[%s22334_s12 + $0x50] sm:$0xff]   ;;  %v19771_v53 = vld [vmem:[%s22334_s12 + $0x58] sm:$0xff]  }
 0xbc9   : > { %v20014_v57 = vpop.eup %20013  ;;  %v8593_v55 = vadd.f32 1e-05, %v8573_v36  ;;  %v19769_v6 = vld [vmem:[%s22334_s12 + $0x10] sm:$0xff]   ;;  %v19772_v36 = vld [vmem:[%s22334_s12 + $0xd8] sm:$0xff]  }
 0xbca   : > { %v8629_v56 = vmul.f32 %v20014_v57, %v23992_v7  ;;  %v24182_v50 = vadd.f32 %v24031_v5, %v8653_v60  ;;  %v8654_v26 = vmul.f32 %v24024_v63, %v8628_v48  ;;  %v19773_v60 = vld [vmem:[%s22334_s12 + $0x18] sm:$0xff]   ;;  %v19777_v48 = vld [vmem:[%s22334_s12 + $0x20] sm:$0xff]  }
 0xbcb   : > { %20019 = vrsqrt.f32 %v8593_v55  ;;  %v19774_v57 = vld [vmem:[%s22334_s12 + $0x98] sm:$0xff]   ;;  %v19776_v55 = vld [vmem:[%s22334_s12 + $0xe0] sm:$0xff]  }
 0xbcc   : > { %v24186_v40 = vpack.c.bf16 %v24182_v50, %v24179_v21  ;;  %v8655_v31 = vmul.f32 %v24024_v63, %v8629_v56  ;;  %20021 = vrsqrt.f32 %v8592_v16  ;;  %v24200_v29 = vadd.f32 %v24031_v5, %v8654_v26  ;;  %v19775_v16 = vld [vmem:[%s22334_s12 + $0x60] sm:$0xff]   ;;  %v19779_v56 = vld [vmem:[%s22334_s12 + $0x68] sm:$0xff]  }
 0xbcd   : > { %v19781_v26 = vld [vmem:[%s22334_s12 + $0x28] sm:$0xff]  }
 0xbce   : > { %9215 = vmatmul.mubr.bf16.gmra.mrb[136].mxu1 %v24186_v40  ;;  %9348 = vmatmul.mubr.bf16.gmra.mrb[152].mxu0 %v24186_v40  ;;  %v24195_v28 = vadd.f32 %v24031_v5, %v8655_v31  ;;  %v19780_v31 = vld [vmem:[%s22334_s12 + $0xe8] sm:$0xff]  }
 0xbcf   : > { %v20016_v7 = vpop.eup %20015  ;;  %9224 = vmatprep.mubr.bf16.mxu1 %v25531_v47  ;;  %9357 = vmatprep.mubr.bf16.mxu0 %v25531_v47 }
 0xbd0   : > { %v8630_v20 = vmul.f32 %v20016_v7, %v24000_v33  ;;  %v24204_v52 = vpack.c.bf16 %v24195_v28, %v24200_v29  ;;  %v19782_v7 = vld [vmem:[%s22334_s12 + $0xa8] sm:$0xff]  }
 0xbd1   : > { %v20018_v27 = vpop.eup %20017 }
 0xbd2   : > { %v8631_v15 = vmul.f32 %v20018_v27, %v24004_v49  ;;  %v8656_v3 = vmul.f32 %v24024_v63, %v8630_v20  ;;  %v19783_v27 = vld [vmem:[%s22334_s12 + $0x70] sm:$0xff]  }
 0xbd3   : > { %v19784_v20 = vld [vmem:[%s22334_s12 + $0xf0] sm:$0xff]  }
 0xbd4   : > { %v8657_v12 = vmul.f32 %v24024_v63, %v8631_v15  ;;  %v24218_v17 = vadd.f32 %v24031_v5, %v8656_v3  ;;  %v19785_v15 = vld [vmem:[%s22334_s12 + $0x30] sm:$0xff]   ;;  %v19789_v3 = vld [vmem:[%s22334_s12 + $0x38] sm:$0xff]  }
 0xbd5   : > { %v20020_v51 = vpop.eup %20019 }
 0xbd6   : > { %9225 = vmatmul.mubr.bf16.gmra.mrb[140].mxu1 %v24204_v52  ;;  %9358 = vmatmul.mubr.bf16.gmra.mrb[156].mxu0 %v24204_v52  ;;  %v20022_v8 = vpop.eup %20021  ;;  %v8633_v33 = vmul.f32 %v20020_v51, %v24016_v0  ;;  %v24214_v49 = vadd.f32 %v24031_v5, %v8657_v12  ;;  %25546 = vst [vmem:[#allocation57_spill] sm:$0xff] %v24218_v17  ;;  %v19787_v12 = vld [vmem:[%s22334_s12 + $0x78] sm:$0xff]  }
 0xbd7   : > { %9234 = vmatprep.mubr.bf16.mxu1 %v25531_v47  ;;  %9367 = vmatprep.mubr.bf16.mxu0 %v25531_v47  ;;  %v8632_v41 = vmul.f32 %v20022_v8, %v24010_v32  ;;  %v19788_v51 = vld [vmem:[%s22334_s12 + $0xf8] sm:$0xff]  }
 0xbd8   : > { %25545 = vst [vmem:[#allocation52_spill] sm:$0xff] %v24214_v49  ;;  %v24222_v58 = vpack.c.bf16 %v24214_v49, %v24218_v17  ;;  %v8659_v13 = vmul.f32 %v24024_v63, %v8633_v33  ;;  %v19790_v8 = vld [vmem:[%s22334_s12 + $0xb8] sm:$0xff]   ;;  %v19791_v33 = vld [vmem:[%s22334_s12 + $0x140] sm:$0xff]  }
 0xbd9   : > { %v8658_v0 = vmul.f32 %v24024_v63, %v8632_v41  ;;  %v19761_v63 = vld [vmem:[%s22334_s12] sm:$0xff]   ;;  %v25549_v41 = vld [vmem:[#allocation45_spill] sm:$0xff] }
 0xbda   : > { %v24231_v32 = vadd.f32 %v24031_v5, %v8659_v13  ;;  %v25390_v13 = vsub.s32 3, %v25549_v41 }
 0xbdb   : > { %v24234_v45 = vadd.f32 %v24031_v5, %v8658_v0  ;;  %v19763_v5 = vld [vmem:[%s22334_s12 + $0x48] sm:$0xff]   ;;  %v25550_v0 = vld [vmem:[#allocation47_spill] sm:$0xff] }
 0xbdc   : > { %25547 = vst [vmem:[#allocation74_spill] sm:$0xff] %v24231_v32 }
 0xbdd   : > { %25548 = vst [vmem:[#allocation53_spill] sm:$0xff] %v24234_v45  ;;  %v24238_v10 = vpack.c.bf16 %v24231_v32, %v24234_v45 }
 0xbde   : > { %9235 = vmatmul.mubr.bf16.gmra.mrb[144].mxu1 %v24222_v58  ;;  %9368 = vmatmul.mubr.bf16.gmra.mrb[160].mxu0 %v24222_v58 }
 0xbdf   : > { %9244 = vmatprep.mubr.bf16.mxu1 %v25531_v47  ;;  %9377 = vmatprep.mubr.bf16.mxu0 %v25531_v47 }
 0xbe6   : > { %9245 = vmatmul.mubr.bf16.gmra.mrb[148].mxu1 %v24238_v10  ;;  %9378 = vmatmul.mubr.bf16.gmra.mrb[164].mxu0 %v24238_v10 }
 0xbe7   : > { %9420 = vmatprep.mubr.bf16.mxu1 %v25531_v47  ;;  %9553 = vmatprep.mubr.bf16.mxu0 %v25531_v47 }
 0xbee   : > { %9421 = vmatmul.mubr.bf16.vlgmr.msra.gmra.mrb[152].mxu1 %v24044_v43  ;;  %9554 = vmatmul.mubr.bf16.vlgmr.msra.gmra.mrb[168].mxu0 %v24044_v43  ;;  %v19770_v43 = vld [vmem:[%s22334_s12 + $0x90] sm:$0xff]  }
 0xbef   : > { %9430 = vmatprep.mubr.bf16.mxu1 %v25531_v47  ;;  %9563 = vmatprep.mubr.bf16.mxu0 %v25531_v47 }
 0xbf0   : > { %18680 = vmatpush3.bf16.msra.mxu1 %v19761_v63  ;;  %18756 = vmatpush3.bf16.msra.mxu0 %v19762_v35 }
 0xbf1   : > { %18681 = vmatprep.subr.bf16.mxu1 %v19763_v5  ;;  %18757 = vmatprep.subr.bf16.mxu0 %v19764_v62  ;;  %v25552_v5 = vld [vmem:[#allocation46_spill] sm:$0xff] }
 0xbf4   : > { %18682 = vmatpush3.bf16.msra.mxu1 %v19765_v4  ;;  %18758 = vmatpush3.bf16.msra.mxu0 %v19766_v2 }
 0xbf5   : > { %18683 = vmatprep.subr.bf16.mxu1 %v19767_v1  ;;  %18759 = vmatprep.subr.bf16.mxu0 %v19768_v19 }
 0xbf6   : > { %9431 = vmatmul.mubr.bf16.gmra.mrb[156].mxu1 %v24068_v37  ;;  %9564 = vmatmul.mubr.bf16.gmra.mrb[172].mxu0 %v24068_v37  ;;  %v19778_v37 = vld [vmem:[%s22334_s12 + $0xa0] sm:$0xff]  }
 0xbf7   : > { %9440 = vmatprep.mubr.bf16.mxu1 %v25531_v47  ;;  %9573 = vmatprep.mubr.bf16.mxu0 %v25531_v47 }
 0xbf8   : > { %18684 = vmatpush3.bf16.msra.mxu1 %v19769_v6  ;;  %18760 = vmatpush3.bf16.msra.mxu0 %v19770_v43 }
 0xbf9   : > { %18685 = vmatprep.subr.bf16.mxu1 %v19771_v53  ;;  %18761 = vmatprep.subr.bf16.mxu0 %v19772_v36 }
 0xbfc   : > { %18686 = vmatpush3.bf16.msra.mxu1 %v19773_v60  ;;  %18762 = vmatpush3.bf16.msra.mxu0 %v19774_v57 }
 0xbfd   : > { %18687 = vmatprep.subr.bf16.mxu1 %v19775_v16  ;;  %18763 = vmatprep.subr.bf16.mxu0 %v19776_v55 }
 0xbfe   : > { %9441 = vmatmul.mubr.bf16.gmra.mrb[160].mxu1 %v24112_v39  ;;  %9574 = vmatmul.mubr.bf16.gmra.mrb[176].mxu0 %v24112_v39  ;;  %v19786_v39 = vld [vmem:[%s22334_s12 + $0xb0] sm:$0xff]  }
 0xbff   : > { %9450 = vmatprep.mubr.bf16.mxu1 %v25531_v47  ;;  %9583 = vmatprep.mubr.bf16.mxu0 %v25531_v47 }
 0xc00   : > { %18688 = vmatpush3.bf16.msra.mxu1 %v19777_v48  ;;  %18764 = vmatpush3.bf16.msra.mxu0 %v19778_v37 }
 0xc01   : > { %18689 = vmatprep.subr.bf16.mxu1 %v19779_v56  ;;  %18765 = vmatprep.subr.bf16.mxu0 %v19780_v31 }
 0xc04   : > { %18690 = vmatpush3.bf16.msra.mxu1 %v19781_v26  ;;  %18766 = vmatpush3.bf16.msra.mxu0 %v19782_v7 }
 0xc05   : > { %18691 = vmatprep.subr.bf16.mxu1 %v19783_v27  ;;  %18767 = vmatprep.subr.bf16.mxu0 %v19784_v20 }
 0xc06   : > { %9451 = vmatmul.mubr.bf16.gmra.mrb[164].mxu1 %v24130_v18  ;;  %9584 = vmatmul.mubr.bf16.gmra.mrb[180].mxu0 %v24130_v18  ;;  %v24300_v18 = vld [vmem:[%s22328_s28] sm:$0xff]  ;;  %s25558_s28 = scalar_lea.vmem [#allocation19], %s22286_s7 }
 0xc07   : > { %9460 = vmatprep.mubr.bf16.mxu1 %v25531_v47  ;;  %9593 = vmatprep.mubr.bf16.mxu0 %v25531_v47  ;;  %v24305_v63 = vrot.slane %v24300_v18, %v25550_v0  ;;  %v24313_v62 = vrot.slane %v24300_v18, %v25552_v5 }
 0xc08   : > { %18692 = vmatpush3.bf16.msra.mxu1 %v19785_v15  ;;  %18768 = vmatpush3.bf16.msra.mxu0 %v19786_v39 }
 0xc09   : > { %18693 = vmatprep.subr.bf16.mxu1 %v19787_v12  ;;  %18769 = vmatprep.subr.bf16.mxu0 %v19788_v51 }
 0xc0c   : > { %18694 = vmatpush3.bf16.msra.mxu1 %v19789_v3  ;;  %18770 = vmatpush3.bf16.msra.mxu0 %v19790_v8 }
 0xc0d   : > { %18831 = vmatprep.subr.bf16.mxu1 %v19791_v33 }
 0xc0e   : > { %9461 = vmatmul.mubr.bf16.gmra.mrb[168].mxu1 %v24148_v34  ;;  %9594 = vmatmul.mubr.bf16.gmra.mrb[184].mxu0 %v24148_v34  ;;  %v25551_v34 = vld [vmem:[#allocation48_spill] sm:$0xff] }
 0xc0f   : > { %9470 = vmatprep.mubr.bf16.mxu1 %v25531_v47  ;;  %9603 = vmatprep.mubr.bf16.mxu0 %v25531_v47  ;;  %v24309_v35 = vrot.slane %v24300_v18, %v25551_v34 }
 0xc16   : > { %9471 = vmatmul.mubr.bf16.gmra.mrb[172].mxu1 %v24166_v44  ;;  %9604 = vmatmul.mubr.bf16.gmra.mrb[188].mxu0 %v24166_v44  ;;  %v24318_v44 = vrot.slane %v24300_v18, %v25390_v13 }
 0xc17   : > { %9480 = vmatprep.mubr.bf16.mxu1 %v25531_v47  ;;  %9613 = vmatprep.mubr.bf16.mxu0 %v25531_v47 }
 0xc1e   : > { %9481 = vmatmul.mubr.bf16.gmra.mrb[176].mxu1 %v24186_v40  ;;  %9614 = vmatmul.mubr.bf16.gmra.mrb[192].mxu0 %v24186_v40 }
 0xc1f   : > { %v9156_v4 = vpop.f32.mrb[112].mxu1  ;;  %v9289_v2 = vpop.f32.mrb[128].mxu0  ;;  %9490 = vmatprep.mubr.bf16.mxu1 %v25531_v47  ;;  %9623 = vmatprep.mubr.bf16.mxu0 %v25531_v47 }
 0xc20   : > { %v9157_v1 = vadd.f32 %v9156_v4, %v24305_v63  ;;  %v9290_v19 = vadd.f32 %v9289_v2, %v24309_v35  ;;  %v9158_v6 = vpop.f32.mrb[113].mxu1  ;;  %v9291_v43 = vpop.f32.mrb[129].mxu0 }
 0xc21   : > { %v9159_v53 = vadd.f32 %v9158_v6, %v24313_v62  ;;  %v9292_v36 = vadd.f32 %v9291_v43, %v24318_v44  ;;  %v9160_v60 = vpop.f32.mrb[114].mxu1  ;;  %v9293_v57 = vpop.f32.mrb[130].mxu0 }
 0xc22   : > { %v9161_v40 = vadd.f32 %v9160_v60, %v24305_v63  ;;  %v9294_v16 = vadd.f32 %v9293_v57, %v24309_v35  ;;  %v9162_v55 = vpop.f32.mrb[115].mxu1  ;;  %v9295_v48 = vpop.f32.mrb[131].mxu0  ;;  %v9654_v31 = vmax.f32 %v9157_v1, 0.0  ;;  %v9656_v26 = vmax.f32 %v9290_v19, 0.0 }
 0xc23   : > { %v9163_v37 = vadd.f32 %v9162_v55, %v24313_v62  ;;  %v9296_v56 = vadd.f32 %v9295_v48, %v24318_v44  ;;  %v9655_v20 = vmax.f32 %v9159_v53, 0.0  ;;  %v9657_v15 = vmax.f32 %v9292_v36, 0.0  ;;  %v24345_v55 = vld [vmem:[%s22334_s12 + $0x1c0] sm:$0xff]  }
 0xc24   : > { %v9662_v7 = vmax.f32 %v9161_v40, 0.0  ;;  %v9664_v27 = vmax.f32 %v9294_v16, 0.0  ;;  %18907 = vmatprep.subr.bf16.mxu0 %v24345_v55 }
 0xc25   : > { %v9663_v39 = vmax.f32 %v9163_v37, 0.0  ;;  %v9665_v12 = vmax.f32 %v9296_v56, 0.0 }
 0xc26   : > { %v9814_v51 = vpack.c.bf16 %v9662_v7, %v9654_v31  ;;  %v9816_v3 = vpack.c.bf16 %v9664_v27, %v9656_v26  ;;  %9491 = vmatmul.mubr.bf16.gmra.mrb[180].mxu1 %v24204_v52  ;;  %9624 = vmatmul.mubr.bf16.gmra.mrb[196].mxu0 %v24204_v52 }
 0xc27   : > { %v9815_v8 = vpack.c.bf16 %v9663_v39, %v9655_v20  ;;  %v9817_v33 = vpack.c.bf16 %v9665_v12, %v9657_v15  ;;  %v9166_v0 = vpop.f32.mrb[116].mxu1  ;;  %v9299_v34 = vpop.f32.mrb[132].mxu0  ;;  %9500 = vmatprep.mubr.bf16.mxu1 %v25531_v47  ;;  %9633 = vmatprep.mubr.bf16.mxu0 %v25531_v47 }
 0xc28   : > { %v9167_v5 = vadd.f32 %v9166_v0, %v24305_v63  ;;  %v9300_v4 = vadd.f32 %v9299_v34, %v24309_v35  ;;  %v9168_v2 = vpop.f32.mrb[117].mxu1  ;;  %v9301_v1 = vpop.f32.mrb[133].mxu0  ;;  %v19792_v34 = vld [vmem:[%s22334_s12 + $0x100] sm:$0xff]  }
 0xc29   : > { %v9169_v19 = vadd.f32 %v9168_v2, %v24313_v62  ;;  %v9302_v6 = vadd.f32 %v9301_v1, %v24318_v44  ;;  %v9170_v52 = vpop.f32.mrb[118].mxu1  ;;  %v9303_v43 = vpop.f32.mrb[134].mxu0  ;;  %v19803_v2 = vld [vmem:[%s22334_s12 + $0x158] sm:$0xff]  }
 0xc2a   : > { %v9171_v53 = vadd.f32 %v9170_v52, %v24305_v63  ;;  %v9304_v36 = vadd.f32 %v9303_v43, %v24309_v35  ;;  %v9172_v60 = vpop.f32.mrb[119].mxu1  ;;  %v9305_v57 = vpop.f32.mrb[135].mxu0  ;;  %v9670_v48 = vmax.f32 %v9167_v5, 0.0  ;;  %v9672_v37 = vmax.f32 %v9300_v4, 0.0  ;;  %v24356_v5 = vld [vmem:[%s22334_s12 + $0x180] sm:$0xff]   ;;  %v24360_v4 = vld [vmem:[%s22334_s12 + $0x1c8] sm:$0xff]  }
 0xc2b   : > { %v9173_v40 = vadd.f32 %v9172_v60, %v24313_v62  ;;  %v9306_v16 = vadd.f32 %v9305_v57, %v24318_v44  ;;  %v9671_v26 = vmax.f32 %v9169_v19, 0.0  ;;  %v9673_v7 = vmax.f32 %v9302_v6, 0.0  ;;  %v24380_v1 = vld [vmem:[%s22334_s12 + $0x1d8] sm:$0xff]   ;;  %v19807_v52 = vld [vmem:[%s22334_s12 + $0x160] sm:$0xff]   ;;  %v19811_v60 = vld [vmem:[%s22334_s12 + $0x168] sm:$0xff]  }
 0xc2c   : > { %v9678_v56 = vmax.f32 %v9171_v53, 0.0  ;;  %v9680_v31 = vmax.f32 %v9304_v36, 0.0  ;;  %v19805_v19 = vld [vmem:[%s22334_s12 + $0x118] sm:$0xff]   ;;  %v24390_v43 = vld [vmem:[%s22334_s12 + $0x1e0] sm:$0xff]   ;;  %v24400_v57 = vld [vmem:[%s22334_s12 + $0x1e8] sm:$0xff]  }
 0xc2d   : > { %v9679_v27 = vmax.f32 %v9173_v40, 0.0  ;;  %v9681_v20 = vmax.f32 %v9306_v16, 0.0  ;;  %v24385_v6 = vld [vmem:[%s22334_s12 + $0x198] sm:$0xff]   ;;  %v19809_v53 = vld [vmem:[%s22334_s12 + $0x120] sm:$0xff]   ;;  %v19813_v40 = vld [vmem:[%s22334_s12 + $0x128] sm:$0xff]  }
 0xc2e   : > { %v9822_v15 = vpack.c.bf16 %v9678_v56, %v9670_v48  ;;  %v9824_v39 = vpack.c.bf16 %v9680_v31, %v9672_v37  ;;  %9501 = vmatmul.mubr.bf16.gmra.mrb[184].mxu1 %v24222_v58  ;;  %9634 = vmatmul.mubr.bf16.gmra.mrb[200].mxu0 %v24222_v58  ;;  %v19793_v58 = vld [vmem:[%s22334_s12 + $0x148] sm:$0xff]   ;;  %v24395_v36 = vld [vmem:[%s22334_s12 + $0x1a0] sm:$0xff]   ;;  %v19815_v48 = vld [vmem:[%s22334_s12 + $0x170] sm:$0xff]  }
 0xc2f   : > { %v9823_v12 = vpack.c.bf16 %v9679_v27, %v9671_v26  ;;  %v9825_v0 = vpack.c.bf16 %v9681_v20, %v9673_v7  ;;  %9510 = vmatprep.mubr.bf16.mxu1 %v25531_v47  ;;  %9643 = vmatprep.mubr.bf16.mxu0 %v25531_v47  ;;  %v19794_v47 = vld [vmem:[%s22334_s12 + $0x108] sm:$0xff]   ;;  %v24410_v37 = vld [vmem:[%s22334_s12 + $0x1f0] sm:$0xff]   ;;  %v19819_v26 = vld [vmem:[%s22334_s12 + $0x178] sm:$0xff]  }
 0xc30   : > { %v24405_v16 = vld [vmem:[%s22334_s12 + $0x1a8] sm:$0xff]   ;;  %v19817_v56 = vld [vmem:[%s22334_s12 + $0x130] sm:$0xff]   ;;  %v24420_v7 = vld [vmem:[%s22334_s12 + $0x1f8] sm:$0xff]  }
 0xc31   : > { %v24415_v31 = vld [vmem:[%s22334_s12 + $0x1b0] sm:$0xff]   ;;  %v19821_v27 = vld [vmem:[%s22334_s12 + $0x138] sm:$0xff]  }
 0xc32   : > { %v24425_v20 = vld [vmem:[%s22334_s12 + $0x1b8] sm:$0xff]  }
 0xc36   : > { %9511 = vmatmul.mubr.bf16.gmra.mrb[188].mxu1 %v24238_v10  ;;  %9644 = vmatmul.mubr.bf16.gmra.mrb[204].mxu0 %v24238_v10  ;;  %v24365_v10 = vld [vmem:[%s22334_s12 + $0x188] sm:$0xff]  }
 0xc37   : > { %10445 = vmatprep.mubr.bf16.mxu1 %v9815_v8  ;;  %10558 = vmatprep.mubr.bf16.mxu0 %v9817_v33  ;;  %v19797_v8 = vld [vmem:[%s22334_s12 + $0x150] sm:$0xff]  }
 0xc38   : > { %v24370_v33 = vld [vmem:[%s22334_s12 + $0x1d0] sm:$0xff]  }
 0xc3e   : > { %10446 = vmatmul.mubr.bf16.vlgmr.msra.gmra.mrb[192].mxu1 %v9814_v51  ;;  %10559 = vmatmul.mubr.bf16.vlgmr.msra.gmra.mrb[208].mxu0 %v9816_v3  ;;  %v19798_v51 = vld [vmem:[%s22334_s12 + $0x110] sm:$0xff]  }
 0xc3f   : > { %10453 = vmatprep.mubr.bf16.mxu1 %v9823_v12  ;;  %10566 = vmatprep.mubr.bf16.mxu0 %v9825_v0  ;;  %v24375_v3 = vld [vmem:[%s22334_s12 + $0x190] sm:$0xff]   ;;  %s25559_s12 = scalar_lea.vmem [#allocation20], %s22286_s7  ;;  %s25560_s7 = sld [smem:[#allocation40_spill]] }
 0xc40   : > { %18832 = vmatpush3.bf16.msra.mxu1 %v19792_v34  ;;  %18908 = vmatpush3.bf16.msra.mxu0 %v24356_v5 }
 0xc41   : > { %18833 = vmatprep.subr.bf16.mxu1 %v19793_v58  ;;  %18909 = vmatprep.subr.bf16.mxu0 %v24360_v4 }
 0xc44   : > { %18834 = vmatpush3.bf16.msra.mxu1 %v19794_v47  ;;  %18910 = vmatpush3.bf16.msra.mxu0 %v24365_v10 }
 0xc45   : > { %18835 = vmatprep.subr.bf16.mxu1 %v19797_v8  ;;  %18911 = vmatprep.subr.bf16.mxu0 %v24370_v33  ;;  %p17803_p2 = scmp.ne.s32.totalorder %s25560_s7, 5 }
 0xc46   : > { %10454 = vmatmul.mubr.bf16.gmra.mrb[196].mxu1 %v9822_v15  ;;  %10567 = vmatmul.mubr.bf16.gmra.mrb[212].mxu0 %v9824_v39  ;;  %s25567_s25 = sld [smem:[#allocation88_spill]] (!%p17803_p2) }
 0xc48   : > { %18836 = vmatpush3.bf16.msra.mxu1 %v19798_v51  ;;  %18912 = vmatpush3.bf16.msra.mxu0 %v24375_v3 }
 0xc49   : > { %18837 = vmatprep.subr.bf16.mxu1 %v19803_v2  ;;  %18913 = vmatprep.subr.bf16.mxu0 %v24380_v1 }
 0xc4c   : > { %18838 = vmatpush3.bf16.msra.mxu1 %v19805_v19  ;;  %18914 = vmatpush3.bf16.msra.mxu0 %v24385_v6 }
 0xc4d   : > { %18839 = vmatprep.subr.bf16.mxu1 %v19807_v52  ;;  %18915 = vmatprep.subr.bf16.mxu0 %v24390_v43 }
 0xc50   : > { %18840 = vmatpush3.bf16.msra.mxu1 %v19809_v53  ;;  %18916 = vmatpush3.bf16.msra.mxu0 %v24395_v36 }
 0xc51   : > { %18841 = vmatprep.subr.bf16.mxu1 %v19811_v60  ;;  %18917 = vmatprep.subr.bf16.mxu0 %v24400_v57 }
 0xc54   : > { %18842 = vmatpush3.bf16.msra.mxu1 %v19813_v40  ;;  %18918 = vmatpush3.bf16.msra.mxu0 %v24405_v16 }
 0xc55   : > { %18843 = vmatprep.subr.bf16.mxu1 %v19815_v48  ;;  %18919 = vmatprep.subr.bf16.mxu0 %v24410_v37 }
 0xc58   : > { %18844 = vmatpush3.bf16.msra.mxu1 %v19817_v56  ;;  %18920 = vmatpush3.bf16.msra.mxu0 %v24415_v31 }
 0xc59   : > { %18845 = vmatprep.subr.bf16.mxu1 %v19819_v26  ;;  %18921 = vmatprep.subr.bf16.mxu0 %v24420_v7 }
 0xc5c   : > { %18846 = vmatpush3.bf16.msra.mxu1 %v19821_v27  ;;  %18922 = vmatpush3.bf16.msra.mxu0 %v24425_v20 }
 0xc5d   : > { %v9176_v15 = vpop.f32.mrb[120].mxu1  ;;  %v9309_v39 = vpop.f32.mrb[136].mxu0  ;;  %19499 = vmatprep.subr.bf16.mxu1 %v24345_v55 }
 0xc5e   : > { %v9177_v12 = vadd.f32 %v9176_v15, %v24305_v63  ;;  %v9310_v0 = vadd.f32 %v9309_v39, %v24309_v35  ;;  %v9178_v34 = vpop.f32.mrb[121].mxu1  ;;  %v9311_v58 = vpop.f32.mrb[137].mxu0 }
 0xc5f   : > { %v9179_v47 = vadd.f32 %v9178_v34, %v24313_v62  ;;  %v9312_v8 = vadd.f32 %v9311_v58, %v24318_v44  ;;  %v9180_v51 = vpop.f32.mrb[122].mxu1  ;;  %v9313_v2 = vpop.f32.mrb[138].mxu0 }
 0xc60   : > { %v9181_v19 = vadd.f32 %v9180_v51, %v24305_v63  ;;  %v9314_v52 = vadd.f32 %v9313_v2, %v24309_v35  ;;  %v9182_v53 = vpop.f32.mrb[123].mxu1  ;;  %v9315_v60 = vpop.f32.mrb[139].mxu0  ;;  %v9686_v56 = vmax.f32 %v9177_v12, 0.0  ;;  %v9688_v26 = vmax.f32 %v9310_v0, 0.0 }
 0xc61   : > { %v9183_v40 = vadd.f32 %v9182_v53, %v24313_v62  ;;  %v9316_v48 = vadd.f32 %v9315_v60, %v24318_v44  ;;  %v9687_v15 = vmax.f32 %v9179_v47, 0.0  ;;  %v9689_v39 = vmax.f32 %v9312_v8, 0.0 }
 0xc62   : > { %v9694_v27 = vmax.f32 %v9181_v19, 0.0  ;;  %v9696_v55 = vmax.f32 %v9314_v52, 0.0 }
 0xc63   : > { %v9695_v34 = vmax.f32 %v9183_v40, 0.0  ;;  %v9697_v58 = vmax.f32 %v9316_v48, 0.0 }
 0xc64   : > { %v9830_v13 = vpack.c.bf16 %v9694_v27, %v9686_v56  ;;  %v9832_v11 = vpack.c.bf16 %v9696_v55, %v9688_v26 }
 0xc65   : > { %v9831_v32 = vpack.c.bf16 %v9695_v34, %v9687_v15  ;;  %v9833_v51 = vpack.c.bf16 %v9697_v58, %v9689_v39  ;;  %v9186_v45 = vpop.f32.mrb[124].mxu1  ;;  %v9319_v2 = vpop.f32.mrb[140].mxu0 }
 0xc66   : > { %v9187_v49 = vadd.f32 %v9186_v45, %v24305_v63  ;;  %v9320_v53 = vadd.f32 %v9319_v2, %v24309_v35  ;;  %v9188_v17 = vpop.f32.mrb[125].mxu1  ;;  %v9321_v60 = vpop.f32.mrb[141].mxu0 }
 0xc67   : > { %v9189_v12 = vadd.f32 %v9188_v17, %v24313_v62  ;;  %v9322_v0 = vadd.f32 %v9321_v60, %v24318_v44  ;;  %v9190_v47 = vpop.f32.mrb[126].mxu1  ;;  %v9323_v8 = vpop.f32.mrb[142].mxu0  ;;  %10461 = vmatprep.mubr.bf16.mxu1 %v9831_v32  ;;  %10574 = vmatprep.mubr.bf16.mxu0 %v9833_v51 }
 0xc68   : > { %v9191_v19 = vadd.f32 %v9190_v47, %v24305_v63  ;;  %v9324_v52 = vadd.f32 %v9323_v8, %v24309_v35  ;;  %v9192_v40 = vpop.f32.mrb[127].mxu1  ;;  %v9325_v48 = vpop.f32.mrb[143].mxu0  ;;  %10462 = vmatmul.mubr.bf16.gmra.mrb[200].mxu1 %v9830_v13  ;;  %10575 = vmatmul.mubr.bf16.gmra.mrb[216].mxu0 %v9832_v11  ;;  %v9702_v26 = vmax.f32 %v9187_v49, 0.0  ;;  %v9704_v17 = vmax.f32 %v9320_v53, 0.0 }
 0xc69   : > { %v9193_v45 = vadd.f32 %v9192_v40, %v24313_v62  ;;  %v9326_v56 = vadd.f32 %v9325_v48, %v24318_v44  ;;  %v9703_v15 = vmax.f32 %v9189_v12, 0.0  ;;  %v9705_v39 = vmax.f32 %v9322_v0, 0.0 }
 0xc6a   : > { %v9710_v27 = vmax.f32 %v9191_v19, 0.0  ;;  %v9712_v55 = vmax.f32 %v9324_v52, 0.0 }
 0xc6b   : > { %v9711_v32 = vmax.f32 %v9193_v45, 0.0  ;;  %v9713_v34 = vmax.f32 %v9326_v56, 0.0 }
 0xc6c   : > { %v9838_v58 = vpack.c.bf16 %v9710_v27, %v9702_v26  ;;  %v9840_v51 = vpack.c.bf16 %v9712_v55, %v9704_v17 }
 0xc6d   : > { %v9839_v2 = vpack.c.bf16 %v9711_v32, %v9703_v15  ;;  %v9841_v60 = vpack.c.bf16 %v9713_v34, %v9705_v39  ;;  %v9196_v47 = vpop.f32.mrb[128].mxu1  ;;  %v9329_v8 = vpop.f32.mrb[144].mxu0 }
 0xc6e   : > { %v9197_v11 = vadd.f32 %v9196_v47, %v24305_v63  ;;  %v9330_v13 = vadd.f32 %v9329_v8, %v24309_v35  ;;  %v9198_v40 = vpop.f32.mrb[129].mxu1  ;;  %v9331_v48 = vpop.f32.mrb[145].mxu0 }
 0xc6f   : > { %v9199_v49 = vadd.f32 %v9198_v40, %v24313_v62  ;;  %v9332_v53 = vadd.f32 %v9331_v48, %v24318_v44  ;;  %v9200_v12 = vpop.f32.mrb[130].mxu1  ;;  %v9333_v0 = vpop.f32.mrb[146].mxu0  ;;  %10469 = vmatprep.mubr.bf16.mxu1 %v9839_v2  ;;  %10582 = vmatprep.mubr.bf16.mxu0 %v9841_v60 }
 0xc70   : > { %v9201_v19 = vadd.f32 %v9200_v12, %v24305_v63  ;;  %v9334_v52 = vadd.f32 %v9333_v0, %v24309_v35  ;;  %v9202_v45 = vpop.f32.mrb[131].mxu1  ;;  %v9335_v56 = vpop.f32.mrb[147].mxu0  ;;  %10470 = vmatmul.mubr.bf16.gmra.mrb[204].mxu1 %v9838_v58  ;;  %10583 = vmatmul.mubr.bf16.gmra.mrb[220].mxu0 %v9840_v51  ;;  %v9718_v27 = vmax.f32 %v9197_v11, 0.0  ;;  %v9720_v55 = vmax.f32 %v9330_v13, 0.0 }
 0xc71   : > { %v9203_v26 = vadd.f32 %v9202_v45, %v24313_v62  ;;  %v9336_v17 = vadd.f32 %v9335_v56, %v24318_v44  ;;  %v9719_v32 = vmax.f32 %v9199_v49, 0.0  ;;  %v9721_v34 = vmax.f32 %v9332_v53, 0.0 }
 0xc72   : > { %v9726_v15 = vmax.f32 %v9201_v19, 0.0  ;;  %v9728_v39 = vmax.f32 %v9334_v52, 0.0 }
 0xc73   : > { %v9727_v2 = vmax.f32 %v9203_v26, 0.0  ;;  %v9729_v60 = vmax.f32 %v9336_v17, 0.0 }
 0xc74   : > { %v9846_v47 = vpack.c.bf16 %v9726_v15, %v9718_v27  ;;  %v9848_v8 = vpack.c.bf16 %v9728_v39, %v9720_v55 }
 0xc75   : > { %v9847_v40 = vpack.c.bf16 %v9727_v2, %v9719_v32  ;;  %v9849_v48 = vpack.c.bf16 %v9729_v60, %v9721_v34  ;;  %v9206_v12 = vpop.f32.mrb[132].mxu1  ;;  %v9339_v0 = vpop.f32.mrb[148].mxu0 }
 0xc76   : > { %v9207_v58 = vadd.f32 %v9206_v12, %v24305_v63  ;;  %v9340_v51 = vadd.f32 %v9339_v0, %v24309_v35  ;;  %v9208_v45 = vpop.f32.mrb[133].mxu1  ;;  %v9341_v56 = vpop.f32.mrb[149].mxu0 }
 0xc77   : > { %v9209_v11 = vadd.f32 %v9208_v45, %v24313_v62  ;;  %v9342_v13 = vadd.f32 %v9341_v56, %v24318_v44  ;;  %v9210_v49 = vpop.f32.mrb[134].mxu1  ;;  %v9343_v53 = vpop.f32.mrb[150].mxu0  ;;  %10477 = vmatprep.mubr.bf16.mxu1 %v9847_v40  ;;  %10590 = vmatprep.mubr.bf16.mxu0 %v9849_v48 }
 0xc78   : > { %v9211_v19 = vadd.f32 %v9210_v49, %v24305_v63  ;;  %v9344_v52 = vadd.f32 %v9343_v53, %v24309_v35  ;;  %v9212_v26 = vpop.f32.mrb[135].mxu1  ;;  %v9345_v17 = vpop.f32.mrb[151].mxu0  ;;  %10478 = vmatmul.mubr.bf16.gmra.mrb[208].mxu1 %v9846_v47  ;;  %10591 = vmatmul.mubr.bf16.gmra.mrb[224].mxu0 %v9848_v8  ;;  %v9734_v15 = vmax.f32 %v9207_v58, 0.0  ;;  %v9736_v39 = vmax.f32 %v9340_v51, 0.0 }
 0xc79   : > { %v9213_v27 = vadd.f32 %v9212_v26, %v24313_v62  ;;  %v9346_v55 = vadd.f32 %v9345_v17, %v24318_v44  ;;  %v9735_v2 = vmax.f32 %v9209_v11, 0.0  ;;  %v9737_v60 = vmax.f32 %v9342_v13, 0.0 }
 0xc7a   : > { %v9742_v32 = vmax.f32 %v9211_v19, 0.0  ;;  %v9744_v34 = vmax.f32 %v9344_v52, 0.0 }
 0xc7b   : > { %v9743_v40 = vmax.f32 %v9213_v27, 0.0  ;;  %v9745_v48 = vmax.f32 %v9346_v55, 0.0 }
 0xc7c   : > { %v9854_v12 = vpack.c.bf16 %v9742_v32, %v9734_v15  ;;  %v9856_v0 = vpack.c.bf16 %v9744_v34, %v9736_v39 }
 0xc7d   : > { %v9855_v45 = vpack.c.bf16 %v9743_v40, %v9735_v2  ;;  %v9857_v56 = vpack.c.bf16 %v9745_v48, %v9737_v60 }
 0xc7f   : > { %10485 = vmatprep.mubr.bf16.mxu1 %v9855_v45  ;;  %10598 = vmatprep.mubr.bf16.mxu0 %v9857_v56 }
 0xc80   : > { %10486 = vmatmul.mubr.bf16.gmra.mrb[212].mxu1 %v9854_v12  ;;  %10599 = vmatmul.mubr.bf16.gmra.mrb[228].mxu0 %v9856_v0 }
 0xca1   : > { %v9216_v47 = vpop.f32.mrb[136].mxu1  ;;  %v9349_v8 = vpop.f32.mrb[152].mxu0 }
 0xca2   : > { %v9217_v49 = vadd.f32 %v9216_v47, %v24305_v63  ;;  %v9350_v58 = vadd.f32 %v9349_v8, %v24309_v35  ;;  %v9218_v51 = vpop.f32.mrb[137].mxu1  ;;  %v9351_v53 = vpop.f32.mrb[153].mxu0 }
 0xca3   : > { %v9219_v11 = vadd.f32 %v9218_v51, %v24313_v62  ;;  %v9352_v13 = vadd.f32 %v9351_v53, %v24318_v44  ;;  %v9220_v19 = vpop.f32.mrb[138].mxu1  ;;  %v9353_v52 = vpop.f32.mrb[154].mxu0 }
 0xca4   : > { %v9221_v26 = vadd.f32 %v9220_v19, %v24305_v63  ;;  %v9354_v17 = vadd.f32 %v9353_v52, %v24309_v35  ;;  %v9222_v27 = vpop.f32.mrb[139].mxu1  ;;  %v9355_v55 = vpop.f32.mrb[155].mxu0  ;;  %v9750_v32 = vmax.f32 %v9217_v49, 0.0  ;;  %v9752_v34 = vmax.f32 %v9350_v58, 0.0 }
 0xca5   : > { %v9223_v15 = vadd.f32 %v9222_v27, %v24313_v62  ;;  %v9356_v39 = vadd.f32 %v9355_v55, %v24318_v44  ;;  %v9751_v40 = vmax.f32 %v9219_v11, 0.0  ;;  %v9753_v48 = vmax.f32 %v9352_v13, 0.0 }
 0xca6   : > { %v9758_v2 = vmax.f32 %v9221_v26, 0.0  ;;  %v9760_v60 = vmax.f32 %v9354_v17, 0.0 }
 0xca7   : > { %v9759_v12 = vmax.f32 %v9223_v15, 0.0  ;;  %v9761_v0 = vmax.f32 %v9356_v39, 0.0 }
 0xca8   : > { %v9862_v45 = vpack.c.bf16 %v9758_v2, %v9750_v32  ;;  %v9864_v56 = vpack.c.bf16 %v9760_v60, %v9752_v34 }
 0xca9   : > { %v9863_v47 = vpack.c.bf16 %v9759_v12, %v9751_v40  ;;  %v9865_v8 = vpack.c.bf16 %v9761_v0, %v9753_v48  ;;  %v9226_v51 = vpop.f32.mrb[140].mxu1  ;;  %v9359_v53 = vpop.f32.mrb[156].mxu0 }
 0xcaa   : > { %v9227_v19 = vadd.f32 %v9226_v51, %v24305_v63  ;;  %v9360_v52 = vadd.f32 %v9359_v53, %v24309_v35  ;;  %v9228_v27 = vpop.f32.mrb[141].mxu1  ;;  %v9361_v55 = vpop.f32.mrb[157].mxu0 }
 0xcab   : > { %v9229_v49 = vadd.f32 %v9228_v27, %v24313_v62  ;;  %v9362_v58 = vadd.f32 %v9361_v55, %v24318_v44  ;;  %v9230_v11 = vpop.f32.mrb[142].mxu1  ;;  %v9363_v13 = vpop.f32.mrb[158].mxu0  ;;  %10493 = vmatprep.mubr.bf16.mxu1 %v9863_v47  ;;  %10606 = vmatprep.mubr.bf16.mxu0 %v9865_v8 }
 0xcac   : > { %v9231_v26 = vadd.f32 %v9230_v11, %v24305_v63  ;;  %v9364_v17 = vadd.f32 %v9363_v13, %v24309_v35  ;;  %v9232_v15 = vpop.f32.mrb[143].mxu1  ;;  %v9365_v39 = vpop.f32.mrb[159].mxu0  ;;  %10494 = vmatmul.mubr.bf16.gmra.mrb[216].mxu1 %v9862_v45  ;;  %10607 = vmatmul.mubr.bf16.gmra.mrb[232].mxu0 %v9864_v56  ;;  %v9766_v2 = vmax.f32 %v9227_v19, 0.0  ;;  %v9768_v60 = vmax.f32 %v9360_v52, 0.0 }
 0xcad   : > { %v9233_v32 = vadd.f32 %v9232_v15, %v24313_v62  ;;  %v9366_v34 = vadd.f32 %v9365_v39, %v24318_v44  ;;  %v9767_v12 = vmax.f32 %v9229_v49, 0.0  ;;  %v9769_v0 = vmax.f32 %v9362_v58, 0.0 }
 0xcae   : > { %v9774_v40 = vmax.f32 %v9231_v26, 0.0  ;;  %v9776_v48 = vmax.f32 %v9364_v17, 0.0 }
 0xcaf   : > { %v9775_v47 = vmax.f32 %v9233_v32, 0.0  ;;  %v9777_v8 = vmax.f32 %v9366_v34, 0.0 }
 0xcb0   : > { %v9870_v51 = vpack.c.bf16 %v9774_v40, %v9766_v2  ;;  %v9872_v53 = vpack.c.bf16 %v9776_v48, %v9768_v60  ;;  %v8780_v40 = vsub.s32 4, %v25549_v41 }
 0xcb1   : > { %v9871_v27 = vpack.c.bf16 %v9775_v47, %v9767_v12  ;;  %v9873_v55 = vpack.c.bf16 %v9777_v8, %v9769_v0  ;;  %v9236_v11 = vpop.f32.mrb[144].mxu1  ;;  %v9369_v13 = vpop.f32.mrb[160].mxu0 }
 0xcb2   : > { %v9237_v45 = vadd.f32 %v9236_v11, %v24305_v63  ;;  %v9370_v56 = vadd.f32 %v9369_v13, %v24309_v35  ;;  %v9238_v15 = vpop.f32.mrb[145].mxu1  ;;  %v9371_v39 = vpop.f32.mrb[161].mxu0 }
 0xcb3   : > { %v9239_v19 = vadd.f32 %v9238_v15, %v24313_v62  ;;  %v9372_v52 = vadd.f32 %v9371_v39, %v24318_v44  ;;  %v9240_v49 = vpop.f32.mrb[146].mxu1  ;;  %v9373_v58 = vpop.f32.mrb[162].mxu0  ;;  %10501 = vmatprep.mubr.bf16.mxu1 %v9871_v27  ;;  %10614 = vmatprep.mubr.bf16.mxu0 %v9873_v55  ;;  %v8788_v39 = vsub.s32 6, %v25549_v41 }
 0xcb4   : > { %v9241_v26 = vadd.f32 %v9240_v49, %v24305_v63  ;;  %v9374_v17 = vadd.f32 %v9373_v58, %v24309_v35  ;;  %v9242_v32 = vpop.f32.mrb[147].mxu1  ;;  %v9375_v34 = vpop.f32.mrb[163].mxu0  ;;  %10502 = vmatmul.mubr.bf16.gmra.mrb[220].mxu1 %v9870_v51  ;;  %10615 = vmatmul.mubr.bf16.gmra.mrb[236].mxu0 %v9872_v53  ;;  %v9782_v48 = vmax.f32 %v9237_v45, 0.0  ;;  %v9784_v12 = vmax.f32 %v9370_v56, 0.0 }
 0xcb5   : > { %v9243_v2 = vadd.f32 %v9242_v32, %v24313_v62  ;;  %v9376_v60 = vadd.f32 %v9375_v34, %v24318_v44  ;;  %v9783_v8 = vmax.f32 %v9239_v19, 0.0  ;;  %v9785_v27 = vmax.f32 %v9372_v52, 0.0 }
 0xcb6   : > { %v9790_v0 = vmax.f32 %v9241_v26, 0.0  ;;  %v9792_v47 = vmax.f32 %v9374_v17, 0.0  ;;  %v8784_v32 = vsub.s32 5, %v25549_v41  ;;  %v8792_v34 = vsub.s32 7, %v25549_v41 }
 0xcb7   : > { %v9791_v55 = vmax.f32 %v9243_v2, 0.0  ;;  %v9793_v11 = vmax.f32 %v9376_v60, 0.0 }
 0xcb8   : > { %v9878_v13 = vpack.c.bf16 %v9790_v0, %v9782_v48  ;;  %v9880_v15 = vpack.c.bf16 %v9792_v47, %v9784_v12  ;;  %v24495_v48 = vrot.slane %v24300_v18, %v8780_v40  ;;  %v24508_v40 = vrot.slane %v24300_v18, %v8792_v34 }
 0xcb9   : > { %v9879_v51 = vpack.c.bf16 %v9791_v55, %v9783_v8  ;;  %v9881_v53 = vpack.c.bf16 %v9793_v11, %v9785_v27  ;;  %v9246_v49 = vpop.f32.mrb[148].mxu1  ;;  %v9379_v58 = vpop.f32.mrb[164].mxu0  ;;  %v24500_v8 = vrot.slane %v24300_v18, %v8788_v39  ;;  %v24505_v11 = vrot.slane %v24300_v18, %v8784_v32 }
 0xcba   : > { %v9247_v45 = vadd.f32 %v9246_v49, %v24305_v63  ;;  %v9380_v56 = vadd.f32 %v9379_v58, %v24309_v35  ;;  %v9248_v19 = vpop.f32.mrb[149].mxu1  ;;  %v9381_v52 = vpop.f32.mrb[165].mxu0 }
 0xcbb   : > { %v9249_v26 = vadd.f32 %v9248_v19, %v24313_v62  ;;  %v9382_v17 = vadd.f32 %v9381_v52, %v24318_v44  ;;  %v9250_v2 = vpop.f32.mrb[150].mxu1  ;;  %v9383_v60 = vpop.f32.mrb[166].mxu0  ;;  %10509 = vmatprep.mubr.bf16.mxu1 %v9879_v51  ;;  %10622 = vmatprep.mubr.bf16.mxu0 %v9881_v53 }
 0xcbc   : > { %v9251_v12 = vadd.f32 %v9250_v2, %v24305_v63  ;;  %v9384_v41 = vadd.f32 %v9383_v60, %v24309_v35  ;;  %v9252_v0 = vpop.f32.mrb[151].mxu1  ;;  %v9385_v47 = vpop.f32.mrb[167].mxu0  ;;  %10510 = vmatmul.mubr.bf16.gmra.mrb[224].mxu1 %v9878_v13  ;;  %10623 = vmatmul.mubr.bf16.gmra.mrb[240].mxu0 %v9880_v15  ;;  %v9798_v63 = vmax.f32 %v9247_v45, 0.0  ;;  %v9800_v51 = vmax.f32 %v9380_v56, 0.0 }
 0xcbd   : > { %v9253_v27 = vadd.f32 %v9252_v0, %v24313_v62  ;;  %v9386_v55 = vadd.f32 %v9385_v47, %v24318_v44  ;;  %v9799_v49 = vmax.f32 %v9249_v26, 0.0  ;;  %v9801_v13 = vmax.f32 %v9382_v17, 0.0 }
 0xcbe   : > { %v9806_v35 = vmax.f32 %v9251_v12, 0.0  ;;  %v9808_v53 = vmax.f32 %v9384_v41, 0.0 }
 0xcbf   : > { %v9807_v15 = vmax.f32 %v9253_v27, 0.0  ;;  %v9809_v58 = vmax.f32 %v9386_v55, 0.0 }
 0xcc0   : > { %v9886_v39 = vpack.c.bf16 %v9806_v35, %v9798_v63  ;;  %v9888_v19 = vpack.c.bf16 %v9808_v53, %v9800_v51 }
 0xcc1   : > { %v9887_v52 = vpack.c.bf16 %v9807_v15, %v9799_v49  ;;  %v9889_v62 = vpack.c.bf16 %v9809_v58, %v9801_v13  ;;  %v9422_v2 = vpop.f32.mrb[152].mxu1  ;;  %v9555_v44 = vpop.f32.mrb[168].mxu0 }
 0xcc2   : > { %v9423_v32 = vadd.f32 %v9422_v2, %v24495_v48  ;;  %v9556_v60 = vadd.f32 %v9555_v44, %v24500_v8  ;;  %v9424_v18 = vpop.f32.mrb[153].mxu1  ;;  %v9557_v34 = vpop.f32.mrb[169].mxu0 }
 0xcc3   : > { %v9425_v45 = vadd.f32 %v9424_v18, %v24505_v11  ;;  %v9558_v56 = vadd.f32 %v9557_v34, %v24508_v40  ;;  %v9426_v26 = vpop.f32.mrb[154].mxu1  ;;  %v9559_v17 = vpop.f32.mrb[170].mxu0  ;;  %10517 = vmatprep.mubr.bf16.mxu1 %v9887_v52  ;;  %10630 = vmatprep.mubr.bf16.mxu0 %v9889_v62 }
 0xcc4   : > { %v9427_v12 = vadd.f32 %v9426_v26, %v24495_v48  ;;  %v9560_v41 = vadd.f32 %v9559_v17, %v24500_v8  ;;  %v9428_v0 = vpop.f32.mrb[155].mxu1  ;;  %v9561_v47 = vpop.f32.mrb[171].mxu0  ;;  %10518 = vmatmul.mubr.bf16.gmra.mrb[228].mxu1 %v9886_v39  ;;  %10631 = vmatmul.mubr.bf16.gmra.mrb[244].mxu0 %v9888_v19  ;;  %v9658_v63 = vmax.f32 %v9423_v32, 0.0  ;;  %v9660_v51 = vmax.f32 %v9556_v60, 0.0 }
 0xcc5   : > { %v9429_v27 = vadd.f32 %v9428_v0, %v24505_v11  ;;  %v9562_v55 = vadd.f32 %v9561_v47, %v24508_v40  ;;  %v9659_v49 = vmax.f32 %v9425_v45, 0.0  ;;  %v9661_v13 = vmax.f32 %v9558_v56, 0.0 }
 0xcc6   : > { %v9666_v35 = vmax.f32 %v9427_v12, 0.0  ;;  %v9668_v53 = vmax.f32 %v9560_v41, 0.0 }
 0xcc7   : > { %v9667_v15 = vmax.f32 %v9429_v27, 0.0  ;;  %v9669_v58 = vmax.f32 %v9562_v55, 0.0 }
 0xcc8   : > { %v9818_v52 = vpack.c.bf16 %v9666_v35, %v9658_v63  ;;  %v9820_v62 = vpack.c.bf16 %v9668_v53, %v9660_v51 }
 0xcc9   : > { %v9819_v2 = vpack.c.bf16 %v9667_v15, %v9659_v49  ;;  %v9821_v44 = vpack.c.bf16 %v9669_v58, %v9661_v13  ;;  %v9432_v18 = vpop.f32.mrb[156].mxu1  ;;  %v9565_v34 = vpop.f32.mrb[172].mxu0 }
 0xcca   : > { %v9433_v39 = vadd.f32 %v9432_v18, %v24495_v48  ;;  %v9566_v19 = vadd.f32 %v9565_v34, %v24500_v8  ;;  %v9434_v26 = vpop.f32.mrb[157].mxu1  ;;  %v9567_v17 = vpop.f32.mrb[173].mxu0 }
 0xccb   : > { %v9435_v32 = vadd.f32 %v9434_v26, %v24505_v11  ;;  %v9568_v60 = vadd.f32 %v9567_v17, %v24508_v40  ;;  %v9436_v45 = vpop.f32.mrb[158].mxu1  ;;  %v9569_v56 = vpop.f32.mrb[174].mxu0  ;;  %10671 = vmatprep.mubr.bf16.mxu1 %v9819_v2  ;;  %10784 = vmatprep.mubr.bf16.mxu0 %v9821_v44 }
 0xccc   : > { %v9437_v12 = vadd.f32 %v9436_v45, %v24495_v48  ;;  %v9570_v41 = vadd.f32 %v9569_v56, %v24500_v8  ;;  %v9438_v0 = vpop.f32.mrb[159].mxu1  ;;  %v9571_v47 = vpop.f32.mrb[175].mxu0  ;;  %10672 = vmatmul.mubr.bf16.vlgmr.msra.gmra.mrb[232].mxu1 %v9818_v52  ;;  %10785 = vmatmul.mubr.bf16.vlgmr.msra.gmra.mrb[248].mxu0 %v9820_v62  ;;  %v9674_v63 = vmax.f32 %v9433_v39, 0.0  ;;  %v9676_v51 = vmax.f32 %v9566_v19, 0.0 }
 0xccd   : > { %v9439_v27 = vadd.f32 %v9438_v0, %v24505_v11  ;;  %v9572_v55 = vadd.f32 %v9571_v47, %v24508_v40  ;;  %19507 = vmatpush3.bf16.msra.mxu1 %v24356_v5  ;;  %v9675_v49 = vmax.f32 %v9435_v32, 0.0  ;;  %v9677_v13 = vmax.f32 %v9568_v60, 0.0 }
 0xcce   : > { %v9682_v35 = vmax.f32 %v9437_v12, 0.0  ;;  %v9684_v53 = vmax.f32 %v9570_v41, 0.0  ;;  %19500 = vmatprep.subr.bf16.mxu1 %v24360_v4 }
 0xccf   : > { %v9683_v15 = vmax.f32 %v9439_v27, 0.0  ;;  %v9685_v58 = vmax.f32 %v9572_v55, 0.0 }
 0xcd0   : > { %v9826_v2 = vpack.c.bf16 %v9682_v35, %v9674_v63  ;;  %v9828_v44 = vpack.c.bf16 %v9684_v53, %v9676_v51 }
 0xcd1   : > { %v9827_v52 = vpack.c.bf16 %v9683_v15, %v9675_v49  ;;  %v9829_v62 = vpack.c.bf16 %v9685_v58, %v9677_v13  ;;  %v9442_v18 = vpop.f32.mrb[160].mxu1  ;;  %v9575_v34 = vpop.f32.mrb[176].mxu0  ;;  %19508 = vmatpush3.bf16.msra.mxu1 %v24365_v10 }
 0xcd2   : > { %v9443_v5 = vadd.f32 %v9442_v18, %v24495_v48  ;;  %v9576_v39 = vadd.f32 %v9575_v34, %v24500_v8  ;;  %v9444_v19 = vpop.f32.mrb[161].mxu1  ;;  %v9577_v26 = vpop.f32.mrb[177].mxu0  ;;  %19501 = vmatprep.subr.bf16.mxu1 %v24370_v33 }
 0xcd3   : > { %v9445_v4 = vadd.f32 %v9444_v19, %v24505_v11  ;;  %v9578_v17 = vadd.f32 %v9577_v26, %v24508_v40  ;;  %v9446_v32 = vpop.f32.mrb[162].mxu1  ;;  %v9579_v60 = vpop.f32.mrb[178].mxu0  ;;  %10679 = vmatprep.mubr.bf16.mxu1 %v9827_v52  ;;  %10792 = vmatprep.mubr.bf16.mxu0 %v9829_v62 }
 0xcd4   : > { %v9447_v45 = vadd.f32 %v9446_v32, %v24495_v48  ;;  %v9580_v10 = vadd.f32 %v9579_v60, %v24500_v8  ;;  %v9448_v56 = vpop.f32.mrb[163].mxu1  ;;  %v9581_v12 = vpop.f32.mrb[179].mxu0  ;;  %10680 = vmatmul.mubr.bf16.gmra.mrb[236].mxu1 %v9826_v2  ;;  %10793 = vmatmul.mubr.bf16.gmra.mrb[252].mxu0 %v9828_v44  ;;  %v9690_v0 = vmax.f32 %v9443_v5, 0.0  ;;  %v9692_v47 = vmax.f32 %v9576_v39, 0.0 }
 0xcd5   : > { %v9449_v41 = vadd.f32 %v9448_v56, %v24505_v11  ;;  %v9582_v33 = vadd.f32 %v9581_v12, %v24508_v40  ;;  %19509 = vmatpush3.bf16.msra.mxu1 %v24375_v3  ;;  %v9691_v63 = vmax.f32 %v9445_v4, 0.0  ;;  %v9693_v51 = vmax.f32 %v9578_v17, 0.0 }
 0xcd6   : > { %v9698_v27 = vmax.f32 %v9447_v45, 0.0  ;;  %v9700_v55 = vmax.f32 %v9580_v10, 0.0  ;;  %19502 = vmatprep.subr.bf16.mxu1 %v24380_v1 }
 0xcd7   : > { %v9699_v35 = vmax.f32 %v9449_v41, 0.0  ;;  %v9701_v53 = vmax.f32 %v9582_v33, 0.0 }
 0xcd8   : > { %v9834_v49 = vpack.c.bf16 %v9698_v27, %v9690_v0  ;;  %v9836_v13 = vpack.c.bf16 %v9700_v55, %v9692_v47 }
 0xcd9   : > { %v9835_v15 = vpack.c.bf16 %v9699_v35, %v9691_v63  ;;  %v9837_v58 = vpack.c.bf16 %v9701_v53, %v9693_v51  ;;  %v9452_v2 = vpop.f32.mrb[164].mxu1  ;;  %v9585_v44 = vpop.f32.mrb[180].mxu0  ;;  %19510 = vmatpush3.bf16.msra.mxu1 %v24385_v6 }
 0xcda   : > { %v9453_v3 = vadd.f32 %v9452_v2, %v24495_v48  ;;  %v9586_v52 = vadd.f32 %v9585_v44, %v24500_v8  ;;  %v9454_v62 = vpop.f32.mrb[165].mxu1  ;;  %v9587_v18 = vpop.f32.mrb[181].mxu0  ;;  %19503 = vmatprep.subr.bf16.mxu1 %v24390_v43 }
 0xcdb   : > { %v9455_v1 = vadd.f32 %v9454_v62, %v24505_v11  ;;  %v9588_v34 = vadd.f32 %v9587_v18, %v24508_v40  ;;  %v9456_v5 = vpop.f32.mrb[166].mxu1  ;;  %v9589_v39 = vpop.f32.mrb[182].mxu0  ;;  %10687 = vmatprep.mubr.bf16.mxu1 %v9835_v15  ;;  %10800 = vmatprep.mubr.bf16.mxu0 %v9837_v58 }
 0xcdc   : > { %v9457_v19 = vadd.f32 %v9456_v5, %v24495_v48  ;;  %v9590_v6 = vadd.f32 %v9589_v39, %v24500_v8  ;;  %v9458_v26 = vpop.f32.mrb[167].mxu1  ;;  %v9591_v4 = vpop.f32.mrb[183].mxu0  ;;  %10688 = vmatmul.mubr.bf16.gmra.mrb[240].mxu1 %v9834_v49  ;;  %10801 = vmatmul.mubr.bf16.gmra.mrb[0].mxu0 %v9836_v13  ;;  %v9706_v32 = vmax.f32 %v9453_v3, 0.0  ;;  %v9708_v60 = vmax.f32 %v9586_v52, 0.0 }
 0xcdd   : > { %v9459_v17 = vadd.f32 %v9458_v26, %v24505_v11  ;;  %v9592_v43 = vadd.f32 %v9591_v4, %v24508_v40  ;;  %19511 = vmatpush3.bf16.msra.mxu1 %v24395_v36  ;;  %v9707_v56 = vmax.f32 %v9455_v1, 0.0  ;;  %v9709_v12 = vmax.f32 %v9588_v34, 0.0 }
 0xcde   : > { %v9714_v45 = vmax.f32 %v9457_v19, 0.0  ;;  %v9716_v10 = vmax.f32 %v9590_v6, 0.0  ;;  %19504 = vmatprep.subr.bf16.mxu1 %v24400_v57 }
 0xcdf   : > { %v9715_v41 = vmax.f32 %v9459_v17, 0.0  ;;  %v9717_v33 = vmax.f32 %v9592_v43, 0.0 }
 0xce0   : > { %v9842_v0 = vpack.c.bf16 %v9714_v45, %v9706_v32  ;;  %v9844_v47 = vpack.c.bf16 %v9716_v10, %v9708_v60 }
 0xce1   : > { %v9843_v27 = vpack.c.bf16 %v9715_v41, %v9707_v56  ;;  %v9845_v55 = vpack.c.bf16 %v9717_v33, %v9709_v12  ;;  %v9462_v63 = vpop.f32.mrb[168].mxu1  ;;  %v9595_v51 = vpop.f32.mrb[184].mxu0  ;;  %19512 = vmatpush3.bf16.msra.mxu1 %v24405_v16 }
 0xce2   : > { %v9463_v36 = vadd.f32 %v9462_v63, %v24495_v48  ;;  %v9596_v35 = vadd.f32 %v9595_v51, %v24500_v8  ;;  %v9464_v53 = vpop.f32.mrb[169].mxu1  ;;  %v9597_v49 = vpop.f32.mrb[185].mxu0  ;;  %19505 = vmatprep.subr.bf16.mxu1 %v24410_v37 }
 0xce3   : > { %v9465_v57 = vadd.f32 %v9464_v53, %v24505_v11  ;;  %v9598_v13 = vadd.f32 %v9597_v49, %v24508_v40  ;;  %v9466_v15 = vpop.f32.mrb[170].mxu1  ;;  %v9599_v58 = vpop.f32.mrb[186].mxu0  ;;  %10695 = vmatprep.mubr.bf16.mxu1 %v9843_v27  ;;  %10808 = vmatprep.mubr.bf16.mxu0 %v9845_v55 }
 0xce4   : > { %v9467_v2 = vadd.f32 %v9466_v15, %v24495_v48  ;;  %v9600_v16 = vadd.f32 %v9599_v58, %v24500_v8  ;;  %v9468_v44 = vpop.f32.mrb[171].mxu1  ;;  %v9601_v3 = vpop.f32.mrb[187].mxu0  ;;  %10696 = vmatmul.mubr.bf16.gmra.mrb[244].mxu1 %v9842_v0  ;;  %10809 = vmatmul.mubr.bf16.gmra.mrb[4].mxu0 %v9844_v47  ;;  %v9722_v62 = vmax.f32 %v9463_v36, 0.0  ;;  %v9724_v18 = vmax.f32 %v9596_v35, 0.0 }
 0xce5   : > { %v9469_v52 = vadd.f32 %v9468_v44, %v24505_v11  ;;  %v9602_v37 = vadd.f32 %v9601_v3, %v24508_v40  ;;  %19513 = vmatpush3.bf16.msra.mxu1 %v24415_v31  ;;  %v9723_v5 = vmax.f32 %v9465_v57, 0.0  ;;  %v9725_v39 = vmax.f32 %v9598_v13, 0.0 }
 0xce6   : > { %v9730_v1 = vmax.f32 %v9467_v2, 0.0  ;;  %v9732_v34 = vmax.f32 %v9600_v16, 0.0  ;;  %19506 = vmatprep.subr.bf16.mxu1 %v24420_v7 }
 0xce7   : > { %v9731_v19 = vmax.f32 %v9469_v52, 0.0  ;;  %v9733_v6 = vmax.f32 %v9602_v37, 0.0 }
 0xce8   : > { %v9850_v26 = vpack.c.bf16 %v9730_v1, %v9722_v62  ;;  %v9852_v4 = vpack.c.bf16 %v9732_v34, %v9724_v18 }
 0xce9   : > { %v9851_v17 = vpack.c.bf16 %v9731_v19, %v9723_v5  ;;  %v9853_v43 = vpack.c.bf16 %v9733_v6, %v9725_v39  ;;  %v9472_v32 = vpop.f32.mrb[172].mxu1  ;;  %v9605_v60 = vpop.f32.mrb[188].mxu0  ;;  %19514 = vmatpush3.bf16.msra.mxu1 %v24425_v20 }
 0xcea   : > { %v9473_v31 = vadd.f32 %v9472_v32, %v24495_v48  ;;  %v9606_v45 = vadd.f32 %v9605_v60, %v24500_v8  ;;  %v9474_v10 = vpop.f32.mrb[173].mxu1  ;;  %v9607_v56 = vpop.f32.mrb[189].mxu0 }
 0xceb   : > { %v9475_v7 = vadd.f32 %v9474_v10, %v24505_v11  ;;  %v9608_v12 = vadd.f32 %v9607_v56, %v24508_v40  ;;  %v9476_v41 = vpop.f32.mrb[174].mxu1  ;;  %v9609_v33 = vpop.f32.mrb[190].mxu0  ;;  %10703 = vmatprep.mubr.bf16.mxu1 %v9851_v17  ;;  %10816 = vmatprep.mubr.bf16.mxu0 %v9853_v43 }
 0xcec   : > { %v9477_v0 = vadd.f32 %v9476_v41, %v24495_v48  ;;  %v9610_v47 = vadd.f32 %v9609_v33, %v24500_v8  ;;  %v9478_v27 = vpop.f32.mrb[175].mxu1  ;;  %v9611_v20 = vpop.f32.mrb[191].mxu0  ;;  %10704 = vmatmul.mubr.bf16.gmra.mrb[248].mxu1 %v9850_v26  ;;  %10817 = vmatmul.mubr.bf16.gmra.mrb[8].mxu0 %v9852_v4  ;;  %v9738_v51 = vmax.f32 %v9473_v31, 0.0  ;;  %v9740_v36 = vmax.f32 %v9606_v45, 0.0 }
 0xced   : > { %v9479_v55 = vadd.f32 %v9478_v27, %v24505_v11  ;;  %v9612_v63 = vadd.f32 %v9611_v20, %v24508_v40  ;;  %v9739_v49 = vmax.f32 %v9475_v7, 0.0  ;;  %v9741_v57 = vmax.f32 %v9608_v12, 0.0 }
 0xcee   : > { %v9746_v35 = vmax.f32 %v9477_v0, 0.0  ;;  %v9748_v53 = vmax.f32 %v9610_v47, 0.0 }
 0xcef   : > { %v9747_v13 = vmax.f32 %v9479_v55, 0.0  ;;  %v9749_v15 = vmax.f32 %v9612_v63, 0.0 }
 0xcf0   : > { %v9858_v58 = vpack.c.bf16 %v9746_v35, %v9738_v51  ;;  %v9860_v2 = vpack.c.bf16 %v9748_v53, %v9740_v36 }
 0xcf1   : > { %v9859_v16 = vpack.c.bf16 %v9747_v13, %v9739_v49  ;;  %v9861_v44 = vpack.c.bf16 %v9749_v15, %v9741_v57  ;;  %v9482_v3 = vpop.f32.mrb[176].mxu1  ;;  %v9615_v52 = vpop.f32.mrb[192].mxu0 }
 0xcf2   : > { %v9483_v37 = vadd.f32 %v9482_v3, %v24495_v48  ;;  %v9616_v62 = vadd.f32 %v9615_v52, %v24500_v8  ;;  %v9484_v18 = vpop.f32.mrb[177].mxu1  ;;  %v9617_v1 = vpop.f32.mrb[193].mxu0 }
 0xcf3   : > { %v9485_v34 = vadd.f32 %v9484_v18, %v24505_v11  ;;  %v9618_v5 = vadd.f32 %v9617_v1, %v24508_v40  ;;  %v9486_v39 = vpop.f32.mrb[178].mxu1  ;;  %v9619_v19 = vpop.f32.mrb[194].mxu0  ;;  %10711 = vmatprep.mubr.bf16.mxu1 %v9859_v16  ;;  %10824 = vmatprep.mubr.bf16.mxu0 %v9861_v44 }
 0xcf4   : > { %v9487_v6 = vadd.f32 %v9486_v39, %v24495_v48  ;;  %v9620_v26 = vadd.f32 %v9619_v19, %v24500_v8  ;;  %v9488_v4 = vpop.f32.mrb[179].mxu1  ;;  %v9621_v17 = vpop.f32.mrb[195].mxu0  ;;  %10712 = vmatmul.mubr.bf16.gmra.mrb[252].mxu1 %v9858_v58  ;;  %10825 = vmatmul.mubr.bf16.gmra.mrb[12].mxu0 %v9860_v2  ;;  %v9754_v60 = vmax.f32 %v9483_v37, 0.0  ;;  %v9756_v31 = vmax.f32 %v9616_v62, 0.0 }
 0xcf5   : > { %v9489_v43 = vadd.f32 %v9488_v4, %v24505_v11  ;;  %v9622_v32 = vadd.f32 %v9621_v17, %v24508_v40  ;;  %v9755_v56 = vmax.f32 %v9485_v34, 0.0  ;;  %v9757_v7 = vmax.f32 %v9618_v5, 0.0 }
 0xcf6   : > { %v9762_v45 = vmax.f32 %v9487_v6, 0.0  ;;  %v9764_v10 = vmax.f32 %v9620_v26, 0.0 }
 0xcf7   : > { %v9763_v12 = vmax.f32 %v9489_v43, 0.0  ;;  %v9765_v41 = vmax.f32 %v9622_v32, 0.0 }
 0xcf8   : > { %v9866_v33 = vpack.c.bf16 %v9762_v45, %v9754_v60  ;;  %v9868_v0 = vpack.c.bf16 %v9764_v10, %v9756_v31 }
 0xcf9   : > { %v9867_v47 = vpack.c.bf16 %v9763_v12, %v9755_v56  ;;  %v9869_v27 = vpack.c.bf16 %v9765_v41, %v9757_v7  ;;  %v9492_v20 = vpop.f32.mrb[180].mxu1  ;;  %v9625_v55 = vpop.f32.mrb[196].mxu0 }
 0xcfa   : > { %v9493_v63 = vadd.f32 %v9492_v20, %v24495_v48  ;;  %v9626_v51 = vadd.f32 %v9625_v55, %v24500_v8  ;;  %v9494_v36 = vpop.f32.mrb[181].mxu1  ;;  %v9627_v35 = vpop.f32.mrb[197].mxu0 }
 0xcfb   : > { %v9495_v53 = vadd.f32 %v9494_v36, %v24505_v11  ;;  %v9628_v49 = vadd.f32 %v9627_v35, %v24508_v40  ;;  %v9496_v57 = vpop.f32.mrb[182].mxu1  ;;  %v9629_v13 = vpop.f32.mrb[198].mxu0  ;;  %10719 = vmatprep.mubr.bf16.mxu1 %v9867_v47  ;;  %10832 = vmatprep.mubr.bf16.mxu0 %v9869_v27 }
 0xcfc   : > { %v9497_v15 = vadd.f32 %v9496_v57, %v24495_v48  ;;  %v9630_v58 = vadd.f32 %v9629_v13, %v24500_v8  ;;  %v9498_v2 = vpop.f32.mrb[183].mxu1  ;;  %v9631_v16 = vpop.f32.mrb[199].mxu0  ;;  %10720 = vmatmul.mubr.bf16.gmra.mrb[0].mxu1 %v9866_v33  ;;  %10833 = vmatmul.mubr.bf16.gmra.mrb[16].mxu0 %v9868_v0  ;;  %v9770_v52 = vmax.f32 %v9493_v63, 0.0  ;;  %v9772_v37 = vmax.f32 %v9626_v51, 0.0 }
 0xcfd   : > { %v9499_v44 = vadd.f32 %v9498_v2, %v24505_v11  ;;  %v9632_v3 = vadd.f32 %v9631_v16, %v24508_v40  ;;  %v9771_v1 = vmax.f32 %v9495_v53, 0.0  ;;  %v9773_v34 = vmax.f32 %v9628_v49, 0.0 }
 0xcfe   : > { %v9778_v62 = vmax.f32 %v9497_v15, 0.0  ;;  %v9780_v18 = vmax.f32 %v9630_v58, 0.0 }
 0xcff   : > { %v9779_v5 = vmax.f32 %v9499_v44, 0.0  ;;  %v9781_v39 = vmax.f32 %v9632_v3, 0.0 }
 0xd00   : > { %v9874_v19 = vpack.c.bf16 %v9778_v62, %v9770_v52  ;;  %v9876_v6 = vpack.c.bf16 %v9780_v18, %v9772_v37 }
 0xd01   : > { %v9875_v26 = vpack.c.bf16 %v9779_v5, %v9771_v1  ;;  %v9877_v4 = vpack.c.bf16 %v9781_v39, %v9773_v34  ;;  %v9502_v17 = vpop.f32.mrb[184].mxu1  ;;  %v9635_v43 = vpop.f32.mrb[200].mxu0 }
 0xd02   : > { %v9503_v32 = vadd.f32 %v9502_v17, %v24495_v48  ;;  %v9636_v60 = vadd.f32 %v9635_v43, %v24500_v8  ;;  %v9504_v31 = vpop.f32.mrb[185].mxu1  ;;  %v9637_v45 = vpop.f32.mrb[201].mxu0 }
 0xd03   : > { %v9505_v10 = vadd.f32 %v9504_v31, %v24505_v11  ;;  %v9638_v56 = vadd.f32 %v9637_v45, %v24508_v40  ;;  %v9506_v7 = vpop.f32.mrb[186].mxu1  ;;  %v9639_v12 = vpop.f32.mrb[202].mxu0  ;;  %10727 = vmatprep.mubr.bf16.mxu1 %v9875_v26  ;;  %10840 = vmatprep.mubr.bf16.mxu0 %v9877_v4 }
 0xd04   : > { %v9507_v41 = vadd.f32 %v9506_v7, %v24495_v48  ;;  %v9640_v33 = vadd.f32 %v9639_v12, %v24500_v8  ;;  %v9508_v0 = vpop.f32.mrb[187].mxu1  ;;  %v9641_v47 = vpop.f32.mrb[203].mxu0  ;;  %10728 = vmatmul.mubr.bf16.gmra.mrb[4].mxu1 %v9874_v19  ;;  %10841 = vmatmul.mubr.bf16.gmra.mrb[20].mxu0 %v9876_v6  ;;  %v9786_v55 = vmax.f32 %v9503_v32, 0.0  ;;  %v9788_v63 = vmax.f32 %v9636_v60, 0.0 }
 0xd05   : > { %v9509_v27 = vadd.f32 %v9508_v0, %v24505_v11  ;;  %v9642_v20 = vadd.f32 %v9641_v47, %v24508_v40  ;;  %v9787_v35 = vmax.f32 %v9505_v10, 0.0  ;;  %v9789_v53 = vmax.f32 %v9638_v56, 0.0  ;;  %v24607_v47 = vld [vmem:[%s25553_s29] ss:$0 sm:$0xff] }
 0xd06   : > { %v9794_v51 = vmax.f32 %v9507_v41, 0.0  ;;  %v9796_v36 = vmax.f32 %v9640_v33, 0.0 }
 0xd07   : > { %v9795_v49 = vmax.f32 %v9509_v27, 0.0  ;;  %v9797_v57 = vmax.f32 %v9642_v20, 0.0 }
 0xd08   : > { %v9882_v13 = vpack.c.bf16 %v9794_v51, %v9786_v55  ;;  %v9884_v15 = vpack.c.bf16 %v9796_v36, %v9788_v63 }
 0xd09   : > { %v9883_v58 = vpack.c.bf16 %v9795_v49, %v9787_v35  ;;  %v9885_v2 = vpack.c.bf16 %v9797_v57, %v9789_v53  ;;  %v9512_v16 = vpop.f32.mrb[188].mxu1  ;;  %v9645_v44 = vpop.f32.mrb[204].mxu0 }
 0xd0a   : > { %v9513_v3 = vadd.f32 %v9512_v16, %v24495_v48  ;;  %v9646_v52 = vadd.f32 %v9645_v44, %v24500_v8  ;;  %v9514_v37 = vpop.f32.mrb[189].mxu1  ;;  %v9647_v62 = vpop.f32.mrb[205].mxu0 }
 0xd0b   : > { %v9515_v18 = vadd.f32 %v9514_v37, %v24505_v11  ;;  %v9648_v1 = vadd.f32 %v9647_v62, %v24508_v40  ;;  %v9516_v34 = vpop.f32.mrb[190].mxu1  ;;  %v9649_v5 = vpop.f32.mrb[206].mxu0  ;;  %10735 = vmatprep.mubr.bf16.mxu1 %v9883_v58 }
 0xd0c   : > { %v9517_v39 = vadd.f32 %v9516_v34, %v24495_v48  ;;  %v9650_v19 = vadd.f32 %v9649_v5, %v24500_v8  ;;  %v9518_v6 = vpop.f32.mrb[191].mxu1  ;;  %v9651_v26 = vpop.f32.mrb[207].mxu0  ;;  %10736 = vmatmul.mubr.bf16.gmra.mrb[8].mxu1 %v9882_v13  ;;  %v9802_v43 = vmax.f32 %v9513_v3, 0.0  ;;  %v9804_v32 = vmax.f32 %v9646_v52, 0.0 }
 0xd0d   : > { %v9519_v4 = vadd.f32 %v9518_v6, %v24505_v11  ;;  %v9652_v17 = vadd.f32 %v9651_v26, %v24508_v40  ;;  %v9803_v45 = vmax.f32 %v9515_v18, 0.0  ;;  %v9805_v10 = vmax.f32 %v9648_v1, 0.0 }
 0xd0e   : > { %v9810_v60 = vmax.f32 %v9517_v39, 0.0  ;;  %v9812_v31 = vmax.f32 %v9650_v19, 0.0 }
 0xd0f   : > { %v9811_v56 = vmax.f32 %v9519_v4, 0.0  ;;  %v9813_v7 = vmax.f32 %v9652_v17, 0.0 }
 0xd10   : > { %v9890_v12 = vpack.c.bf16 %v9810_v60, %v9802_v43  ;;  %v9892_v48 = vpack.c.bf16 %v9812_v31, %v9804_v32 }
 0xd11   : > { %v9891_v41 = vpack.c.bf16 %v9811_v56, %v9803_v45  ;;  %v9893_v8 = vpack.c.bf16 %v9813_v7, %v9805_v10  ;;  %v18695_v33 = vpop.f32.mrb[192].mxu1  ;;  %v18771_v0 = vpop.f32.mrb[208].mxu0 }
 0xd12   : > { %v18696_v11 = vpop.f32.mrb[193].mxu1  ;;  %v18772_v27 = vpop.f32.mrb[209].mxu0 }
 0xd13   : > { %v18697_v40 = vadd.f32 %v18696_v11, %v18695_v33  ;;  %v18773_v20 = vadd.f32 %v18772_v27, %v18771_v0  ;;  %v18698_v55 = vpop.f32.mrb[194].mxu1  ;;  %v18774_v63 = vpop.f32.mrb[210].mxu0  ;;  %10743 = vmatprep.mubr.bf16.mxu1 %v9891_v41 }
 0xd14   : > { %v18699_v51 = vpop.f32.mrb[195].mxu1  ;;  %v18775_v36 = vpop.f32.mrb[211].mxu0  ;;  %10744 = vmatmul.mubr.bf16.gmra.mrb[12].mxu1 %v9890_v12 }
 0xd15   : > { %v10448_v35 = vadd.f32 %v18697_v40, %v24607_v47  ;;  %v18700_v53 = vadd.f32 %v18699_v51, %v18698_v55  ;;  %v18776_v49 = vadd.f32 %v18775_v36, %v18774_v63  ;;  %10848 = vmatprep.mubr.bf16.mxu1 %v9885_v2 }
 0xd17   : > { %v24610_v57 = vadd.f32 %v18773_v20, %v10448_v35  ;;  %v10451_v13 = vadd.f32 %v18700_v53, %v24607_v47 }
 0xd19   : > { %v24613_v58 = vadd.f32 %v18776_v49, %v10451_v13  ;;  %v18701_v16 = vpop.f32.mrb[196].mxu1  ;;  %v18777_v44 = vpop.f32.mrb[212].mxu0 }
 0xd1a   : > { %v18702_v3 = vpop.f32.mrb[197].mxu1  ;;  %v18778_v52 = vpop.f32.mrb[213].mxu0 }
 0xd1b   : > { %v18703_v37 = vadd.f32 %v18702_v3, %v18701_v16  ;;  %v18779_v62 = vadd.f32 %v18778_v52, %v18777_v44  ;;  %v18704_v18 = vpop.f32.mrb[198].mxu1  ;;  %v18780_v1 = vpop.f32.mrb[214].mxu0 }
 0xd1c   : > { %v18705_v34 = vpop.f32.mrb[199].mxu1  ;;  %v18781_v5 = vpop.f32.mrb[215].mxu0  ;;  %10849 = vmatmul.mubr.bf16.vlgmr.msra.gmra.mrb[16].mxu1 %v9884_v15 }
 0xd1d   : > { %v10456_v39 = vadd.f32 %v18703_v37, %v24607_v47  ;;  %v18706_v2 = vadd.f32 %v18705_v34, %v18704_v18  ;;  %v18782_v19 = vadd.f32 %v18781_v5, %v18780_v1  ;;  %10856 = vmatprep.mubr.bf16.mxu1 %v9893_v8 }
 0xd1f   : > { %v24616_v6 = vadd.f32 %v18779_v62, %v10456_v39  ;;  %v10459_v26 = vadd.f32 %v18706_v2, %v24607_v47 }
 0xd21   : > { %v24619_v4 = vadd.f32 %v18782_v19, %v10459_v26 }
 0xd24   : > { %10857 = vmatmul.mubr.bf16.gmra.mrb[20].mxu1 %v9892_v48 }
 0xd3b   : > { %v18707_v17 = vpop.f32.mrb[200].mxu1  ;;  %v18783_v43 = vpop.f32.mrb[216].mxu0 }
 0xd3c   : > { %v18708_v32 = vpop.f32.mrb[201].mxu1  ;;  %v18784_v60 = vpop.f32.mrb[217].mxu0 }
 0xd3d   : > { %v18709_v31 = vadd.f32 %v18708_v32, %v18707_v17  ;;  %v18785_v45 = vadd.f32 %v18784_v60, %v18783_v43  ;;  %v18710_v10 = vpop.f32.mrb[202].mxu1  ;;  %v18786_v15 = vpop.f32.mrb[218].mxu0 }
 0xd3e   : > { %v18711_v56 = vpop.f32.mrb[203].mxu1  ;;  %v18787_v7 = vpop.f32.mrb[219].mxu0 }
 0xd3f   : > { %v10464_v12 = vadd.f32 %v18709_v31, %v24607_v47  ;;  %v18712_v41 = vadd.f32 %v18711_v56, %v18710_v10  ;;  %v18788_v8 = vadd.f32 %v18787_v7, %v18786_v15 }
 0xd41   : > { %v24622_v33 = vadd.f32 %v18785_v45, %v10464_v12  ;;  %v10467_v0 = vadd.f32 %v18712_v41, %v24607_v47 }
 0xd43   : > { %v24625_v11 = vadd.f32 %v18788_v8, %v10467_v0  ;;  %v18713_v48 = vpop.f32.mrb[204].mxu1  ;;  %v18789_v27 = vpop.f32.mrb[220].mxu0 }
 0xd44   : > { %v18714_v40 = vpop.f32.mrb[205].mxu1  ;;  %v18790_v20 = vpop.f32.mrb[221].mxu0 }
 0xd45   : > { %v18715_v55 = vadd.f32 %v18714_v40, %v18713_v48  ;;  %v18791_v63 = vadd.f32 %v18790_v20, %v18789_v27  ;;  %v18716_v51 = vpop.f32.mrb[206].mxu1  ;;  %v18792_v36 = vpop.f32.mrb[222].mxu0 }
 0xd46   : > { %v18717_v35 = vpop.f32.mrb[207].mxu1  ;;  %v18793_v53 = vpop.f32.mrb[223].mxu0 }
 0xd47   : > { %v10472_v49 = vadd.f32 %v18715_v55, %v24607_v47  ;;  %v18718_v13 = vadd.f32 %v18717_v35, %v18716_v51  ;;  %v18794_v16 = vadd.f32 %v18793_v53, %v18792_v36 }
 0xd49   : > { %v24628_v44 = vadd.f32 %v18791_v63, %v10472_v49  ;;  %v10475_v3 = vadd.f32 %v18718_v13, %v24607_v47 }
 0xd4b   : > { %v24631_v52 = vadd.f32 %v18794_v16, %v10475_v3  ;;  %v18719_v37 = vpop.f32.mrb[208].mxu1  ;;  %v18795_v62 = vpop.f32.mrb[224].mxu0 }
 0xd4c   : > { %v18720_v18 = vpop.f32.mrb[209].mxu1  ;;  %v18796_v1 = vpop.f32.mrb[225].mxu0 }
 0xd4d   : > { %v18721_v34 = vadd.f32 %v18720_v18, %v18719_v37  ;;  %v18797_v5 = vadd.f32 %v18796_v1, %v18795_v62  ;;  %v18722_v39 = vpop.f32.mrb[210].mxu1  ;;  %v18798_v2 = vpop.f32.mrb[226].mxu0 }
 0xd4e   : > { %v18723_v19 = vpop.f32.mrb[211].mxu1  ;;  %v18799_v26 = vpop.f32.mrb[227].mxu0 }
 0xd4f   : > { %v10480_v17 = vadd.f32 %v18721_v34, %v24607_v47  ;;  %v18724_v43 = vadd.f32 %v18723_v19, %v18722_v39  ;;  %v18800_v32 = vadd.f32 %v18799_v26, %v18798_v2 }
 0xd51   : > { %v24634_v60 = vadd.f32 %v18797_v5, %v10480_v17  ;;  %v10483_v31 = vadd.f32 %v18724_v43, %v24607_v47 }
 0xd53   : > { %v24637_v45 = vadd.f32 %v18800_v32, %v10483_v31  ;;  %v18725_v10 = vpop.f32.mrb[212].mxu1  ;;  %v18801_v15 = vpop.f32.mrb[228].mxu0 }
 0xd54   : > { %v18726_v56 = vpop.f32.mrb[213].mxu1  ;;  %v18802_v7 = vpop.f32.mrb[229].mxu0 }
 0xd55   : > { %v18727_v12 = vadd.f32 %v18726_v56, %v18725_v10  ;;  %v18803_v41 = vadd.f32 %v18802_v7, %v18801_v15  ;;  %v18728_v8 = vpop.f32.mrb[214].mxu1  ;;  %v18804_v0 = vpop.f32.mrb[230].mxu0 }
 0xd56   : > { %v18729_v48 = vpop.f32.mrb[215].mxu1  ;;  %v18805_v27 = vpop.f32.mrb[231].mxu0 }
 0xd57   : > { %v10488_v40 = vadd.f32 %v18727_v12, %v24607_v47  ;;  %v18730_v20 = vadd.f32 %v18729_v48, %v18728_v8  ;;  %v18806_v55 = vadd.f32 %v18805_v27, %v18804_v0 }
 0xd59   : > { %v24640_v63 = vadd.f32 %v18803_v41, %v10488_v40  ;;  %v10491_v51 = vadd.f32 %v18730_v20, %v24607_v47 }
 0xd5b   : > { %v24643_v36 = vadd.f32 %v18806_v55, %v10491_v51 }
 0xd7f   : > { %v18731_v35 = vpop.f32.mrb[216].mxu1  ;;  %v18807_v53 = vpop.f32.mrb[232].mxu0 }
 0xd80   : > { %v18732_v49 = vpop.f32.mrb[217].mxu1  ;;  %v18808_v13 = vpop.f32.mrb[233].mxu0 }
 0xd81   : > { %v18733_v16 = vadd.f32 %v18732_v49, %v18731_v35  ;;  %v18809_v3 = vadd.f32 %v18808_v13, %v18807_v53  ;;  %v18734_v37 = vpop.f32.mrb[218].mxu1  ;;  %v18810_v62 = vpop.f32.mrb[234].mxu0 }
 0xd82   : > { %v18735_v18 = vpop.f32.mrb[219].mxu1  ;;  %v18811_v1 = vpop.f32.mrb[235].mxu0 }
 0xd83   : > { %v10496_v34 = vadd.f32 %v18733_v16, %v24607_v47  ;;  %v18736_v5 = vadd.f32 %v18735_v18, %v18734_v37  ;;  %v18812_v39 = vadd.f32 %v18811_v1, %v18810_v62 }
 0xd85   : > { %v24646_v2 = vadd.f32 %v18809_v3, %v10496_v34  ;;  %v10499_v19 = vadd.f32 %v18736_v5, %v24607_v47 }
 0xd87   : > { %v24649_v26 = vadd.f32 %v18812_v39, %v10499_v19  ;;  %v18737_v17 = vpop.f32.mrb[220].mxu1  ;;  %v18813_v43 = vpop.f32.mrb[236].mxu0 }
 0xd88   : > { %v18738_v32 = vpop.f32.mrb[221].mxu1  ;;  %v18814_v31 = vpop.f32.mrb[237].mxu0 }
 0xd89   : > { %v18739_v10 = vadd.f32 %v18738_v32, %v18737_v17  ;;  %v18815_v15 = vadd.f32 %v18814_v31, %v18813_v43  ;;  %v18740_v56 = vpop.f32.mrb[222].mxu1  ;;  %v18816_v7 = vpop.f32.mrb[238].mxu0 }
 0xd8a   : > { %v18741_v12 = vpop.f32.mrb[223].mxu1  ;;  %v18817_v41 = vpop.f32.mrb[239].mxu0 }
 0xd8b   : > { %v10504_v8 = vadd.f32 %v18739_v10, %v24607_v47  ;;  %v18742_v0 = vadd.f32 %v18741_v12, %v18740_v56  ;;  %v18818_v48 = vadd.f32 %v18817_v41, %v18816_v7 }
 0xd8d   : > { %v24652_v27 = vadd.f32 %v18815_v15, %v10504_v8  ;;  %v10507_v40 = vadd.f32 %v18742_v0, %v24607_v47 }
 0xd8f   : > { %v24655_v20 = vadd.f32 %v18818_v48, %v10507_v40  ;;  %v18743_v55 = vpop.f32.mrb[224].mxu1  ;;  %v18819_v51 = vpop.f32.mrb[240].mxu0 }
 0xd90   : > { %v18744_v35 = vpop.f32.mrb[225].mxu1  ;;  %v18820_v53 = vpop.f32.mrb[241].mxu0 }
 0xd91   : > { %v18745_v49 = vadd.f32 %v18744_v35, %v18743_v55  ;;  %v18821_v13 = vadd.f32 %v18820_v53, %v18819_v51  ;;  %v18746_v16 = vpop.f32.mrb[226].mxu1  ;;  %v18822_v3 = vpop.f32.mrb[242].mxu0 }
 0xd92   : > { %v18747_v37 = vpop.f32.mrb[227].mxu1  ;;  %v18823_v62 = vpop.f32.mrb[243].mxu0 }
 0xd93   : > { %v10512_v18 = vadd.f32 %v18745_v49, %v24607_v47  ;;  %v18748_v1 = vadd.f32 %v18747_v37, %v18746_v16  ;;  %v18824_v34 = vadd.f32 %v18823_v62, %v18822_v3 }
 0xd95   : > { %v24658_v5 = vadd.f32 %v18821_v13, %v10512_v18  ;;  %v10515_v39 = vadd.f32 %v18748_v1, %v24607_v47 }
 0xd97   : > { %v24661_v19 = vadd.f32 %v18824_v34, %v10515_v39  ;;  %v18749_v17 = vpop.f32.mrb[228].mxu1  ;;  %v18825_v43 = vpop.f32.mrb[244].mxu0 }
 0xd98   : > { %v18750_v32 = vpop.f32.mrb[229].mxu1  ;;  %v18826_v31 = vpop.f32.mrb[245].mxu0 }
 0xd99   : > { %v18751_v10 = vadd.f32 %v18750_v32, %v18749_v17  ;;  %v18827_v15 = vadd.f32 %v18826_v31, %v18825_v43  ;;  %v18752_v56 = vpop.f32.mrb[230].mxu1  ;;  %v18828_v7 = vpop.f32.mrb[246].mxu0 }
 0xd9a   : > { %v18753_v12 = vpop.f32.mrb[231].mxu1  ;;  %v18829_v41 = vpop.f32.mrb[247].mxu0 }
 0xd9b   : > { %v10520_v8 = vadd.f32 %v18751_v10, %v24607_v47  ;;  %v18754_v0 = vadd.f32 %v18753_v12, %v18752_v56  ;;  %v18830_v48 = vadd.f32 %v18829_v41, %v18828_v7 }
 0xd9d   : > { %v24664_v40 = vadd.f32 %v18827_v15, %v10520_v8  ;;  %v10523_v55 = vadd.f32 %v18754_v0, %v24607_v47 }
 0xd9f   : > { %v24667_v51 = vadd.f32 %v18830_v48, %v10523_v55  ;;  %v18847_v35 = vpop.f32.mrb[232].mxu1  ;;  %v18923_v53 = vpop.f32.mrb[248].mxu0 }
 0xda0   : > { %v18848_v49 = vpop.f32.mrb[233].mxu1  ;;  %v18924_v13 = vpop.f32.mrb[249].mxu0 }
 0xda1   : > { %v18849_v16 = vadd.f32 %v18848_v49, %v18847_v35  ;;  %v18925_v3 = vadd.f32 %v18924_v13, %v18923_v53  ;;  %v18850_v37 = vpop.f32.mrb[234].mxu1  ;;  %v18926_v62 = vpop.f32.mrb[250].mxu0 }
 0xda2   : > { %v18851_v18 = vpop.f32.mrb[235].mxu1  ;;  %v18927_v1 = vpop.f32.mrb[251].mxu0 }
 0xda3   : > { %v10674_v34 = vadd.f32 %v18849_v16, %v24610_v57  ;;  %v18852_v39 = vadd.f32 %v18851_v18, %v18850_v37  ;;  %v18928_v17 = vadd.f32 %v18927_v1, %v18926_v62 }
 0xda5   : > { %v10787_v43 = vadd.f32 %v18925_v3, %v10674_v34  ;;  %v10677_v32 = vadd.f32 %v18852_v39, %v24613_v58 }
 0xda7   : > { %v24672_v47 = vadd.f32 %v10787_v43, %v24036_v24  ;;  %v10790_v31 = vadd.f32 %v18928_v17, %v10677_v32  ;;  %v18853_v10 = vpop.f32.mrb[236].mxu1  ;;  %v18929_v15 = vpop.f32.mrb[252].mxu0 }
 0xda8   : > { %v18854_v56 = vpop.f32.mrb[237].mxu1  ;;  %v18930_v7 = vpop.f32.mrb[253].mxu0 }
 0xda9   : > { %v24675_v12 = vadd.f32 %v10790_v31, %v24039_v59  ;;  %v18855_v41 = vadd.f32 %v18854_v56, %v18853_v10  ;;  %v18931_v8 = vadd.f32 %v18930_v7, %v18929_v15  ;;  %v18856_v0 = vpop.f32.mrb[238].mxu1  ;;  %v18932_v57 = vpop.f32.mrb[254].mxu0  ;;  %v10887_v48 = vmul.f32 %v23770_v25, %v24672_v47 }
 0xdaa   : > { %v18857_v55 = vpop.f32.mrb[239].mxu1  ;;  %v18933_v58 = vpop.f32.mrb[255].mxu0 }
 0xdab   : > { %v10682_v24 = vadd.f32 %v18855_v41, %v24616_v6  ;;  %v18858_v35 = vadd.f32 %v18857_v55, %v18856_v0  ;;  %v18934_v53 = vadd.f32 %v18933_v58, %v18932_v57  ;;  %10907 = vadd.xlane.f32.xlu0 %v10887_v48  ;;  %v10888_v49 = vmul.f32 %v23770_v25, %v24675_v12 }
 0xdad   : > { %v10795_v13 = vadd.f32 %v18931_v8, %v10682_v24  ;;  %v10685_v59 = vadd.f32 %v18858_v35, %v24619_v4  ;;  %10909 = vadd.xlane.f32.xlu1 %v10888_v49 }
 0xdaf   : > { %v24684_v16 = vadd.f32 %v10795_v13, %v24060_v14  ;;  %v10798_v3 = vadd.f32 %v18934_v53, %v10685_v59  ;;  %v18859_v37 = vpop.f32.mrb[240].mxu1  ;;  %v18935_v62 = vpop.f32.mrb[0].mxu0 }
 0xdb0   : > { %v18860_v18 = vpop.f32.mrb[241].mxu1  ;;  %v18936_v1 = vpop.f32.mrb[1].mxu0 }
 0xdb1   : > { %v24687_v6 = vadd.f32 %v10798_v3, %v24057_v30  ;;  %v18861_v34 = vadd.f32 %v18860_v18, %v18859_v37  ;;  %v18937_v39 = vadd.f32 %v18936_v1, %v18935_v62  ;;  %v18862_v17 = vpop.f32.mrb[242].mxu1  ;;  %v18938_v43 = vpop.f32.mrb[2].mxu0  ;;  %v10889_v32 = vmul.f32 %v23770_v25, %v24684_v16 }
 0xdb2   : > { %v18863_v4 = vpop.f32.mrb[243].mxu1  ;;  %v18939_v31 = vpop.f32.mrb[3].mxu0 }
 0xdb3   : > { %v10690_v14 = vadd.f32 %v18861_v34, %v24622_v33  ;;  %v18864_v10 = vadd.f32 %v18863_v4, %v18862_v17  ;;  %v18940_v15 = vadd.f32 %v18939_v31, %v18938_v43  ;;  %10911 = vadd.xlane.f32.xlu0 %v10889_v32  ;;  %v10890_v56 = vmul.f32 %v23770_v25, %v24687_v6 }
 0xdb5   : > { %v10803_v7 = vadd.f32 %v18937_v39, %v10690_v14  ;;  %v10693_v30 = vadd.f32 %v18864_v10, %v24625_v11  ;;  %10913 = vadd.xlane.f32.xlu1 %v10890_v56 }
 0xdb7   : > { %v24696_v41 = vadd.f32 %v10803_v7, %v24105_v54  ;;  %v10806_v8 = vadd.f32 %v18940_v15, %v10693_v30  ;;  %v18865_v0 = vpop.f32.mrb[244].mxu1  ;;  %v18941_v57 = vpop.f32.mrb[4].mxu0 }
 0xdb8   : > { %v18866_v48 = vpop.f32.mrb[245].mxu1  ;;  %v18942_v55 = vpop.f32.mrb[5].mxu0 }
 0xdb9   : > { %v24699_v33 = vadd.f32 %v10806_v8, %v24108_v23  ;;  %v18867_v58 = vadd.f32 %v18866_v48, %v18865_v0  ;;  %v18943_v24 = vadd.f32 %v18942_v55, %v18941_v57  ;;  %v18868_v35 = vpop.f32.mrb[246].mxu1  ;;  %v18944_v53 = vpop.f32.mrb[6].mxu0  ;;  %v10891_v49 = vmul.f32 %v23770_v25, %v24696_v41 }
 0xdba   : > { %v18869_v11 = vpop.f32.mrb[247].mxu1  ;;  %v18945_v13 = vpop.f32.mrb[7].mxu0 }
 0xdbb   : > { %v10698_v54 = vadd.f32 %v18867_v58, %v24628_v44  ;;  %v18870_v59 = vadd.f32 %v18869_v11, %v18868_v35  ;;  %v18946_v3 = vadd.f32 %v18945_v13, %v18944_v53  ;;  %10915 = vadd.xlane.f32.xlu0 %v10891_v49  ;;  %v10892_v37 = vmul.f32 %v23770_v25, %v24699_v33 }
 0xdbd   : > { %v10811_v62 = vadd.f32 %v18943_v24, %v10698_v54  ;;  %v10701_v23 = vadd.f32 %v18870_v59, %v24631_v52  ;;  %10917 = vadd.xlane.f32.xlu1 %v10892_v37 }
 0xdbf   : > { %v24708_v18 = vadd.f32 %v10811_v62, %v24126_v9  ;;  %v10814_v1 = vadd.f32 %v18946_v3, %v10701_v23  ;;  %v18871_v34 = vpop.f32.mrb[248].mxu1  ;;  %v18947_v39 = vpop.f32.mrb[8].mxu0 }
 0xdc0   : > { %v18872_v17 = vpop.f32.mrb[249].mxu1  ;;  %v18948_v43 = vpop.f32.mrb[9].mxu0 }
 0xdc1   : > { %v24711_v44 = vadd.f32 %v10814_v1, %v24122_v42  ;;  %v18873_v32 = vadd.f32 %v18872_v17, %v18871_v34  ;;  %v18949_v4 = vadd.f32 %v18948_v43, %v18947_v39  ;;  %v18874_v31 = vpop.f32.mrb[250].mxu1  ;;  %v18950_v14 = vpop.f32.mrb[10].mxu0  ;;  %v10893_v10 = vmul.f32 %v23770_v25, %v24708_v18 }
 0xdc2   : > { %v18875_v52 = vpop.f32.mrb[251].mxu1  ;;  %v18951_v15 = vpop.f32.mrb[11].mxu0 }
 0xdc3   : > { %v10706_v9 = vadd.f32 %v18873_v32, %v24634_v60  ;;  %v18876_v56 = vadd.f32 %v18875_v52, %v18874_v31  ;;  %v18952_v7 = vadd.f32 %v18951_v15, %v18950_v14  ;;  %10919 = vadd.xlane.f32.xlu0 %v10893_v10  ;;  %v10894_v30 = vmul.f32 %v23770_v25, %v24711_v44 }
 0xdc5   : > { %v10819_v8 = vadd.f32 %v18949_v4, %v10706_v9  ;;  %v10709_v42 = vadd.f32 %v18876_v56, %v24637_v45  ;;  %10921 = vadd.xlane.f32.xlu1 %v10894_v30 }
 0xdc7   : > { %v24720_v0 = vadd.f32 %v10819_v8, %v24144_v22  ;;  %v10822_v57 = vadd.f32 %v18952_v7, %v10709_v42  ;;  %v18877_v48 = vpop.f32.mrb[252].mxu1  ;;  %v18953_v55 = vpop.f32.mrb[12].mxu0 }
 0xdc8   : > { %v18878_v58 = vpop.f32.mrb[253].mxu1  ;;  %v18954_v24 = vpop.f32.mrb[13].mxu0 }
 0xdc9   : > { %v24723_v60 = vadd.f32 %v10822_v57, %v24140_v38  ;;  %v18879_v35 = vadd.f32 %v18878_v58, %v18877_v48  ;;  %v18955_v53 = vadd.f32 %v18954_v24, %v18953_v55  ;;  %v18880_v49 = vpop.f32.mrb[254].mxu1  ;;  %v18956_v11 = vpop.f32.mrb[14].mxu0  ;;  %v10895_v13 = vmul.f32 %v23770_v25, %v24720_v0 }
 0xdca   : > { %v18881_v45 = vpop.f32.mrb[255].mxu1  ;;  %v18957_v54 = vpop.f32.mrb[15].mxu0 }
 0xdcb   : > { %v10714_v22 = vadd.f32 %v18879_v35, %v24640_v63  ;;  %v18882_v59 = vadd.f32 %v18881_v45, %v18880_v49  ;;  %v18958_v3 = vadd.f32 %v18957_v54, %v18956_v11  ;;  %10923 = vadd.xlane.f32.xlu0 %v10895_v13  ;;  %v10896_v37 = vmul.f32 %v23770_v25, %v24723_v60 }
 0xdcd   : > { %v10827_v62 = vadd.f32 %v18955_v53, %v10714_v22  ;;  %v10717_v38 = vadd.f32 %v18882_v59, %v24643_v36  ;;  %10925 = vadd.xlane.f32.xlu1 %v10896_v37 }
 0xdcf   : > { %v24732_v23 = vadd.f32 %v10827_v62, %v24160_v46  ;;  %v10830_v1 = vadd.f32 %v18958_v3, %v10717_v38  ;;  %v18883_v34 = vpop.f32.mrb[0].mxu1  ;;  %v18959_v39 = vpop.f32.mrb[16].mxu0 }
 0xdd0   : > { %v18884_v17 = vpop.f32.mrb[1].mxu1  ;;  %v18960_v43 = vpop.f32.mrb[17].mxu0 }
 0xdd1   : > { %v24735_v63 = vadd.f32 %v10830_v1, %v24157_v61  ;;  %v18885_v32 = vadd.f32 %v18884_v17, %v18883_v34  ;;  %v18961_v4 = vadd.f32 %v18960_v43, %v18959_v39  ;;  %v18886_v31 = vpop.f32.mrb[2].mxu1  ;;  %v18962_v14 = vpop.f32.mrb[18].mxu0  ;;  %v10897_v10 = vmul.f32 %v23770_v25, %v24732_v23 }
 0xdd2   : > { %v18887_v36 = vpop.f32.mrb[3].mxu1  ;;  %v18963_v52 = vpop.f32.mrb[19].mxu0 }
 0xdd3   : > { %v10722_v46 = vadd.f32 %v18885_v32, %v24646_v2  ;;  %v18888_v15 = vadd.f32 %v18887_v36, %v18886_v31  ;;  %v18964_v9 = vadd.f32 %v18963_v52, %v18962_v14  ;;  %10927 = vadd.xlane.f32.xlu0 %v10897_v10  ;;  %v10898_v56 = vmul.f32 %v23770_v25, %v24735_v63 }
 0xdd5   : > { %v10835_v7 = vadd.f32 %v18961_v4, %v10722_v46  ;;  %v10725_v61 = vadd.f32 %v18888_v15, %v24649_v26  ;;  %10929 = vadd.xlane.f32.xlu1 %v10898_v56 }
 0xdd7   : > { %v24744_v30 = vadd.f32 %v10835_v7, %v24179_v21  ;;  %v10838_v8 = vadd.f32 %v18964_v9, %v10725_v61  ;;  %v18889_v42 = vpop.f32.mrb[4].mxu1  ;;  %v18965_v57 = vpop.f32.mrb[20].mxu0 }
 0xdd8   : > { %v18890_v48 = vpop.f32.mrb[5].mxu1  ;;  %v18966_v55 = vpop.f32.mrb[21].mxu0 }
 0xdd9   : > { %v24747_v2 = vadd.f32 %v10838_v8, %v24182_v50  ;;  %v18891_v58 = vadd.f32 %v18890_v48, %v18889_v42  ;;  %v18967_v24 = vadd.f32 %v18966_v55, %v18965_v57  ;;  %v18892_v35 = vpop.f32.mrb[6].mxu1  ;;  %v18968_v53 = vpop.f32.mrb[22].mxu0  ;;  %v10899_v49 = vmul.f32 %v23770_v25, %v24744_v30  ;;  %v25554_v8 = vld [vmem:[#allocation57_spill] sm:$0xff]  ;;  %v25555_v57 = vld [vmem:[#allocation52_spill] sm:$0xff] }
 0xdda   : > { %v18893_v26 = vpop.f32.mrb[7].mxu1  ;;  %v18969_v11 = vpop.f32.mrb[23].mxu0 }
 0xddb   : > { %v10730_v21 = vadd.f32 %v18891_v58, %v24652_v27  ;;  %v18894_v13 = vadd.f32 %v18893_v26, %v18892_v35  ;;  %v18970_v45 = vadd.f32 %v18969_v11, %v18968_v53  ;;  %10931 = vadd.xlane.f32.xlu0 %v10899_v49  ;;  %v10900_v54 = vmul.f32 %v23770_v25, %v24747_v2  ;;  %v25556_v11 = vld [vmem:[#allocation53_spill] sm:$0xff] }
 0xddd   : > { %v10843_v22 = vadd.f32 %v18967_v24, %v10730_v21  ;;  %v10733_v50 = vadd.f32 %v18894_v13, %v24655_v20  ;;  %10933 = vadd.xlane.f32.xlu1 %v10900_v54 }
 0xddf   : > { %v24756_v59 = vadd.f32 %v10843_v22, %v24200_v29  ;;  %v10846_v3 = vadd.f32 %v18970_v45, %v10733_v50  ;;  %v18895_v37 = vpop.f32.mrb[8].mxu1  ;;  %v25557_v45 = vld [vmem:[#allocation74_spill] sm:$0xff] }
 0xde0   : > { %v18896_v62 = vpop.f32.mrb[9].mxu1 }
 0xde1   : > { %v24759_v38 = vadd.f32 %v10846_v3, %v24195_v28  ;;  %v18897_v27 = vadd.f32 %v18896_v62, %v18895_v37  ;;  %v18898_v1 = vpop.f32.mrb[10].mxu1  ;;  %v10901_v34 = vmul.f32 %v23770_v25, %v24756_v59 }
 0xde2   : > { %v18899_v39 = vpop.f32.mrb[11].mxu1 }
 0xde3   : > { %v10738_v17 = vadd.f32 %v18897_v27, %v24658_v5  ;;  %v18900_v43 = vadd.f32 %v18899_v39, %v18898_v1  ;;  %10935 = vadd.xlane.f32.xlu0 %v10901_v34  ;;  %v10902_v29 = vmul.f32 %v23770_v25, %v24759_v38 }
 0xde5   : > { %v10741_v20 = vadd.f32 %v18900_v43, %v24661_v19  ;;  %10937 = vadd.xlane.f32.xlu1 %v10902_v29 }
 0xde7   : > { %v18901_v32 = vpop.f32.mrb[12].mxu1 }
 0xde8   : > { %v18902_v4 = vpop.f32.mrb[13].mxu1 }
 0xde9   : > { %v18903_v28 = vadd.f32 %v18902_v4, %v18901_v32  ;;  %v18904_v31 = vpop.f32.mrb[14].mxu1 }
 0xdea   : > { %v18905_v14 = vpop.f32.mrb[15].mxu1 }
 0xdeb   : > { %v10746_v10 = vadd.f32 %v18903_v28, %v24664_v40  ;;  %v18906_v36 = vadd.f32 %v18905_v14, %v18904_v31 }
 0xded   : > { %v10749_v52 = vadd.f32 %v18906_v36, %v24667_v51 }
 0xdef   : > { %v18971_v46 = vpop.f32.mrb[16].mxu1 }
 0xdf0   : > { %v18972_v5 = vpop.f32.mrb[17].mxu1 }
 0xdf1   : > { %v18973_v15 = vadd.f32 %v18972_v5, %v18971_v46  ;;  %v18974_v9 = vpop.f32.mrb[18].mxu1 }
 0xdf2   : > { %v18975_v56 = vpop.f32.mrb[19].mxu1 }
 0xdf3   : > { %v10851_v7 = vadd.f32 %v18973_v15, %v10738_v17  ;;  %v18976_v61 = vadd.f32 %v18975_v56, %v18974_v9 }
 0xdf5   : > { %v24770_v19 = vadd.f32 %v10851_v7, %v25554_v8  ;;  %v10854_v42 = vadd.f32 %v18976_v61, %v10741_v20 }
 0xdf7   : > { %v24773_v48 = vadd.f32 %v10854_v42, %v25555_v57  ;;  %v18977_v55 = vpop.f32.mrb[20].mxu1  ;;  %v10903_v40 = vmul.f32 %v23770_v25, %v24770_v19 }
 0xdf8   : > { %v18978_v58 = vpop.f32.mrb[21].mxu1 }
 0xdf9   : > { %v18979_v51 = vadd.f32 %v18978_v58, %v18977_v55  ;;  %v18980_v24 = vpop.f32.mrb[22].mxu1  ;;  %10939 = vadd.xlane.f32.xlu0 %v10903_v40  ;;  %v10904_v35 = vmul.f32 %v23770_v25, %v24773_v48 }
 0xdfa   : > { %v18981_v53 = vpop.f32.mrb[23].mxu1 }
 0xdfb   : > { %v10859_v49 = vadd.f32 %v18979_v51, %v10746_v10  ;;  %v18982_v26 = vadd.f32 %v18981_v53, %v18980_v24  ;;  %10941 = vadd.xlane.f32.xlu1 %v10904_v35 }
 0xdfd   : > { %v24780_v21 = vadd.f32 %v10859_v49, %v25556_v11  ;;  %v10862_v13 = vadd.f32 %v18982_v26, %v10749_v52 }
 0xdff   : > { %v24783_v54 = vadd.f32 %v10862_v13, %v25557_v45  ;;  %v10905_v22 = vmul.f32 %v23770_v25, %v24780_v21 }
 0xe01   : > { %10943 = vadd.xlane.f32.xlu0 %v10905_v22  ;;  %v10906_v50 = vmul.f32 %v23770_v25, %v24783_v54 }
 0xe03   : > { %10945 = vadd.xlane.f32.xlu1 %v10906_v50 }
 0xe38   : > { %v10908_v3 = vpop.xlane.xlu0 %10907 }
 0xe39   : > { %v10947_v37 = vmul.f32 0.01, %v10908_v3 }
 0xe3a   : > { %v10910_v62 = vpop.xlane.xlu1 %10909 }
 0xe3b   : > { %v10967_v27 = vsub.f32 %v24672_v47, %v10947_v37  ;;  %v10948_v1 = vmul.f32 0.01, %v10910_v62 }
 0xe3d   : > { %v24791_v34 = vmul.f32 %v23770_v25, %v10967_v27  ;;  %v10968_v39 = vsub.f32 %v24675_v12, %v10948_v1 }
 0xe3f   : > { %v24795_v17 = vmul.f32 %v23770_v25, %v10968_v39  ;;  %v11007_v43 = vmul.f32 %v24791_v34, %v24791_v34 }
 0xe40   : > { %v10912_v29 = vpop.xlane.xlu0 %10911 }
 0xe41   : > { %v10949_v20 = vmul.f32 0.01, %v10912_v29  ;;  %11027 = vadd.xlane.f32.xlu0 %v11007_v43  ;;  %v11008_v32 = vmul.f32 %v24795_v17, %v24795_v17 }
 0xe42   : > { %v10914_v4 = vpop.xlane.xlu1 %10913 }
 0xe43   : > { %v10969_v47 = vsub.f32 %v24684_v16, %v10949_v20  ;;  %v10950_v28 = vmul.f32 0.01, %v10914_v4  ;;  %11029 = vadd.xlane.f32.xlu1 %v11008_v32 }
 0xe45   : > { %v24803_v31 = vmul.f32 %v23770_v25, %v10969_v47  ;;  %v10970_v12 = vsub.f32 %v24687_v6, %v10950_v28 }
 0xe47   : > { %v24807_v14 = vmul.f32 %v23770_v25, %v10970_v12  ;;  %v11009_v10 = vmul.f32 %v24803_v31, %v24803_v31 }
 0xe48   : > { %v10916_v36 = vpop.xlane.xlu0 %10915 }
 0xe49   : > { %v10951_v52 = vmul.f32 0.01, %v10916_v36  ;;  %11031 = vadd.xlane.f32.xlu0 %v11009_v10  ;;  %v11010_v46 = vmul.f32 %v24807_v14, %v24807_v14 }
 0xe4a   : > { %v10918_v16 = vpop.xlane.xlu1 %10917 }
 0xe4b   : > { %v10971_v5 = vsub.f32 %v24696_v41, %v10951_v52  ;;  %v10952_v15 = vmul.f32 0.01, %v10918_v16  ;;  %11033 = vadd.xlane.f32.xlu1 %v11010_v46 }
 0xe4d   : > { %v24815_v9 = vmul.f32 %v23770_v25, %v10971_v5  ;;  %v10972_v6 = vsub.f32 %v24699_v33, %v10952_v15 }
 0xe4f   : > { %v24819_v56 = vmul.f32 %v23770_v25, %v10972_v6  ;;  %v11011_v7 = vmul.f32 %v24815_v9, %v24815_v9 }
 0xe50   : > { %v10920_v61 = vpop.xlane.xlu0 %10919 }
 0xe51   : > { %v10953_v8 = vmul.f32 0.01, %v10920_v61  ;;  %11035 = vadd.xlane.f32.xlu0 %v11011_v7  ;;  %v11012_v42 = vmul.f32 %v24819_v56, %v24819_v56 }
 0xe52   : > { %v10922_v41 = vpop.xlane.xlu1 %10921 }
 0xe53   : > { %v10973_v57 = vsub.f32 %v24708_v18, %v10953_v8  ;;  %v10954_v55 = vmul.f32 0.01, %v10922_v41  ;;  %11037 = vadd.xlane.f32.xlu1 %v11012_v42 }
 0xe55   : > { %v24827_v40 = vmul.f32 %v23770_v25, %v10973_v57  ;;  %v10974_v33 = vsub.f32 %v24711_v44, %v10954_v55 }
 0xe57   : > { %v24831_v58 = vmul.f32 %v23770_v25, %v10974_v33  ;;  %v11013_v51 = vmul.f32 %v24827_v40, %v24827_v40 }
 0xe58   : > { %v10924_v24 = vpop.xlane.xlu0 %10923 }
 0xe59   : > { %v10955_v35 = vmul.f32 0.01, %v10924_v24  ;;  %11039 = vadd.xlane.f32.xlu0 %v11013_v51  ;;  %v11014_v53 = vmul.f32 %v24831_v58, %v24831_v58 }
 0xe5a   : > { %v10926_v18 = vpop.xlane.xlu1 %10925 }
 0xe5b   : > { %v10975_v49 = vsub.f32 %v24720_v0, %v10955_v35  ;;  %v10956_v26 = vmul.f32 0.01, %v10926_v18  ;;  %11041 = vadd.xlane.f32.xlu1 %v11014_v53 }
 0xe5d   : > { %v24839_v11 = vmul.f32 %v23770_v25, %v10975_v49  ;;  %v10976_v44 = vsub.f32 %v24723_v60, %v10956_v26 }
 0xe5f   : > { %v24843_v13 = vmul.f32 %v23770_v25, %v10976_v44  ;;  %v11015_v45 = vmul.f32 %v24839_v11, %v24839_v11 }
 0xe60   : > { %v10928_v22 = vpop.xlane.xlu0 %10927 }
 0xe61   : > { %v10957_v50 = vmul.f32 0.01, %v10928_v22  ;;  %11043 = vadd.xlane.f32.xlu0 %v11015_v45  ;;  %v11016_v3 = vmul.f32 %v24843_v13, %v24843_v13 }
 0xe62   : > { %v10930_v0 = vpop.xlane.xlu1 %10929 }
 0xe63   : > { %v10977_v37 = vsub.f32 %v24732_v23, %v10957_v50  ;;  %v10958_v62 = vmul.f32 0.01, %v10930_v0  ;;  %11045 = vadd.xlane.f32.xlu1 %v11016_v3 }
 0xe65   : > { %v24851_v27 = vmul.f32 %v23770_v25, %v10977_v37  ;;  %v10978_v60 = vsub.f32 %v24735_v63, %v10958_v62 }
 0xe67   : > { %v24855_v1 = vmul.f32 %v23770_v25, %v10978_v60  ;;  %v11017_v39 = vmul.f32 %v24851_v27, %v24851_v27 }
 0xe68   : > { %v10932_v43 = vpop.xlane.xlu0 %10931 }
 0xe69   : > { %v10959_v29 = vmul.f32 0.01, %v10932_v43  ;;  %11047 = vadd.xlane.f32.xlu0 %v11017_v39  ;;  %v11018_v20 = vmul.f32 %v24855_v1, %v24855_v1 }
 0xe6a   : > { %v10934_v23 = vpop.xlane.xlu1 %10933 }
 0xe6b   : > { %v10979_v32 = vsub.f32 %v24744_v30, %v10959_v29  ;;  %v10960_v4 = vmul.f32 0.01, %v10934_v23  ;;  %11049 = vadd.xlane.f32.xlu1 %v11018_v20  ;;  %v24911_v20 = vld [vmem:[%s25558_s28] ss:$0 sm:$0xff] }
 0xe6d   : > { %v24863_v47 = vmul.f32 %v23770_v25, %v10979_v32  ;;  %v10980_v63 = vsub.f32 %v24747_v2, %v10960_v4 }
 0xe6f   : > { %v24867_v28 = vmul.f32 %v23770_v25, %v10980_v63  ;;  %v11019_v12 = vmul.f32 %v24863_v47, %v24863_v47  ;;  %v24916_v63 = vld [vmem:[%s25559_s12] ss:$0 sm:$0xff] }
 0xe70   : > { %v10936_v10 = vpop.xlane.xlu0 %10935 }
 0xe71   : > { %v10961_v36 = vmul.f32 0.01, %v10936_v10  ;;  %11051 = vadd.xlane.f32.xlu0 %v11019_v12  ;;  %v11020_v52 = vmul.f32 %v24867_v28, %v24867_v28 }
 0xe72   : > { %v10938_v30 = vpop.xlane.xlu1 %10937 }
 0xe73   : > { %v10981_v46 = vsub.f32 %v24756_v59, %v10961_v36  ;;  %v10962_v16 = vmul.f32 0.01, %v10938_v30  ;;  %11053 = vadd.xlane.f32.xlu1 %v11020_v52 }
 0xe75   : > { %v24875_v5 = vmul.f32 %v23770_v25, %v10981_v46  ;;  %v10982_v2 = vsub.f32 %v24759_v38, %v10962_v16 }
 0xe77   : > { %v24879_v15 = vmul.f32 %v23770_v25, %v10982_v2  ;;  %v11021_v6 = vmul.f32 %v24875_v5, %v24875_v5 }
 0xe79   : > { %11055 = vadd.xlane.f32.xlu0 %v11021_v6  ;;  %v11022_v7 = vmul.f32 %v24879_v15, %v24879_v15 }
 0xe7b   : > { %11057 = vadd.xlane.f32.xlu1 %v11022_v7 }
 0xe86   : > { %v10940_v61 = vpop.xlane.xlu0 %10939 }
 0xe87   : > { %v10963_v59 = vmul.f32 0.01, %v10940_v61 }
 0xe88   : > { %v10942_v8 = vpop.xlane.xlu1 %10941 }
 0xe89   : > { %v10983_v42 = vsub.f32 %v24770_v19, %v10963_v59  ;;  %v10964_v41 = vmul.f32 0.01, %v10942_v8 }
 0xe8b   : > { %v24887_v57 = vmul.f32 %v23770_v25, %v10983_v42  ;;  %v10984_v38 = vsub.f32 %v24773_v48, %v10964_v41 }
 0xe8d   : > { %v24891_v55 = vmul.f32 %v23770_v25, %v10984_v38  ;;  %v11023_v33 = vmul.f32 %v24887_v57, %v24887_v57 }
 0xe8e   : > { %v10944_v51 = vpop.xlane.xlu0 %10943 }
 0xe8f   : > { %v10965_v24 = vmul.f32 0.01, %v10944_v51  ;;  %11059 = vadd.xlane.f32.xlu0 %v11023_v33  ;;  %v11024_v35 = vmul.f32 %v24891_v55, %v24891_v55 }
 0xe90   : > { %v10946_v53 = vpop.xlane.xlu1 %10945 }
 0xe91   : > { %v10985_v19 = vsub.f32 %v24780_v21, %v10965_v24  ;;  %v10966_v18 = vmul.f32 0.01, %v10946_v53  ;;  %11061 = vadd.xlane.f32.xlu1 %v11024_v35 }
 0xe93   : > { %v24899_v49 = vmul.f32 %v23770_v25, %v10985_v19  ;;  %v10986_v48 = vsub.f32 %v24783_v54, %v10966_v18 }
 0xe95   : > { %v24903_v26 = vmul.f32 %v23770_v25, %v10986_v48  ;;  %v11025_v44 = vmul.f32 %v24899_v49, %v24899_v49 }
 0xe97   : > { %11063 = vadd.xlane.f32.xlu0 %v11025_v44  ;;  %v11026_v45 = vmul.f32 %v24903_v26, %v24903_v26 }
 0xe99   : > { %11065 = vadd.xlane.f32.xlu1 %v11026_v45 }
 0xece   : > { %v11028_v22 = vpop.xlane.xlu0 %11027 }
 0xecf   : > { %v11067_v21 = vmul.f32 0.01, %v11028_v22 }
 0xed0   : > { %v11030_v50 = vpop.xlane.xlu1 %11029 }
 0xed1   : > { %v11087_v3 = vadd.f32 1e-05, %v11067_v21  ;;  %v11068_v0 = vmul.f32 0.01, %v11030_v50 }
 0xed3   : > { %20023 = vrsqrt.f32 %v11087_v3  ;;  %v11088_v54 = vadd.f32 1e-05, %v11068_v0 }
 0xed5   : > { %20025 = vrsqrt.f32 %v11088_v54 }
 0xed6   : > { %v11032_v25 = vpop.xlane.xlu0 %11031 }
 0xed7   : > { %v11069_v37 = vmul.f32 0.01, %v11032_v25 }
 0xed8   : > { %v11034_v62 = vpop.xlane.xlu1 %11033 }
 0xed9   : > { %v11089_v60 = vadd.f32 1e-05, %v11069_v37  ;;  %v11070_v39 = vmul.f32 0.01, %v11034_v62 }
 0xedb   : > { %20027 = vrsqrt.f32 %v11089_v60  ;;  %v11090_v43 = vadd.f32 1e-05, %v11070_v39 }
 0xedd   : > { %v20024_v29 = vpop.eup %20023  ;;  %20029 = vrsqrt.f32 %v11090_v43 }
 0xede   : > { %v11127_v23 = vmul.f32 %v20024_v29, %v24791_v34  ;;  %v11036_v32 = vpop.xlane.xlu0 %11035 }
 0xedf   : > { %v20026_v4 = vpop.eup %20025  ;;  %v11071_v12 = vmul.f32 0.01, %v11036_v32 }
 0xee0   : > { %v11153_v10 = vmul.f32 %v24911_v20, %v11127_v23  ;;  %v11128_v36 = vmul.f32 %v20026_v4, %v24795_v17  ;;  %v11038_v52 = vpop.xlane.xlu1 %11037 }
 0xee1   : > { %v11091_v30 = vadd.f32 1e-05, %v11071_v12  ;;  %v11072_v46 = vmul.f32 0.01, %v11038_v52 }
 0xee2   : > { %v24921_v16 = vadd.f32 %v24916_v63, %v11153_v10  ;;  %v11154_v2 = vmul.f32 %v24911_v20, %v11128_v36 }
 0xee3   : > { %20031 = vrsqrt.f32 %v11091_v30  ;;  %v11092_v34 = vadd.f32 1e-05, %v11072_v46 }
 0xee4   : > { %11199 = vst [vmem:[#allocation2] sm:$0xff] %v24921_v16  ;;  %v24926_v6 = vadd.f32 %v24916_v63, %v11154_v2 }
 0xee5   : > { %v20028_v7 = vpop.eup %20027  ;;  %20033 = vrsqrt.f32 %v11092_v34 }
 0xee6   : > { %11200 = vst [vmem:[#allocation2 + $0x8] sm:$0xff] %v24926_v6  ;;  %v11129_v17 = vmul.f32 %v20028_v7, %v24803_v31  ;;  %v11040_v61 = vpop.xlane.xlu0 %11039 }
 0xee7   : > { %v20030_v59 = vpop.eup %20029  ;;  %v11073_v8 = vmul.f32 0.01, %v11040_v61 }
 0xee8   : > { %v11155_v42 = vmul.f32 %v24911_v20, %v11129_v17  ;;  %v11130_v41 = vmul.f32 %v20030_v59, %v24807_v14  ;;  %v11042_v38 = vpop.xlane.xlu1 %11041 }
 0xee9   : > { %v11093_v33 = vadd.f32 1e-05, %v11073_v8  ;;  %v11074_v51 = vmul.f32 0.01, %v11042_v38 }
 0xeea   : > { %v24933_v24 = vadd.f32 %v24916_v63, %v11155_v42  ;;  %v11156_v35 = vmul.f32 %v24911_v20, %v11130_v41 }
 0xeeb   : > { %20035 = vrsqrt.f32 %v11093_v33  ;;  %v11094_v53 = vadd.f32 1e-05, %v11074_v51 }
 0xeec   : > { %11201 = vst [vmem:[#allocation2 + $0x10] sm:$0xff] %v24933_v24  ;;  %v24938_v31 = vadd.f32 %v24916_v63, %v11156_v35 }
 0xeed   : > { %v20032_v19 = vpop.eup %20031  ;;  %20037 = vrsqrt.f32 %v11094_v53 }
 0xeee   : > { %11202 = vst [vmem:[#allocation2 + $0x18] sm:$0xff] %v24938_v31  ;;  %v11131_v14 = vmul.f32 %v20032_v19, %v24815_v9  ;;  %v11044_v18 = vpop.xlane.xlu0 %11043 }
 0xeef   : > { %v20034_v48 = vpop.eup %20033  ;;  %v11075_v44 = vmul.f32 0.01, %v11044_v18 }
 0xef0   : > { %v11157_v45 = vmul.f32 %v24911_v20, %v11131_v14  ;;  %v11132_v22 = vmul.f32 %v20034_v48, %v24819_v56  ;;  %v11046_v21 = vpop.xlane.xlu1 %11045 }
 0xef1   : > { %v11095_v50 = vadd.f32 1e-05, %v11075_v44  ;;  %v11076_v3 = vmul.f32 0.01, %v11046_v21 }
 0xef2   : > { %v24945_v0 = vadd.f32 %v24916_v63, %v11157_v45  ;;  %v11158_v54 = vmul.f32 %v24911_v20, %v11132_v22 }
 0xef3   : > { %20039 = vrsqrt.f32 %v11095_v50  ;;  %v11096_v25 = vadd.f32 1e-05, %v11076_v3 }
 0xef4   : > { %11203 = vst [vmem:[#allocation2 + $0x20] sm:$0xff] %v24945_v0  ;;  %v24950_v9 = vadd.f32 %v24916_v63, %v11158_v54 }
 0xef5   : > { %v20036_v37 = vpop.eup %20035  ;;  %20041 = vrsqrt.f32 %v11096_v25 }
 0xef6   : > { %11204 = vst [vmem:[#allocation2 + $0x28] sm:$0xff] %v24950_v9  ;;  %v11133_v56 = vmul.f32 %v20036_v37, %v24827_v40  ;;  %v11048_v62 = vpop.xlane.xlu0 %11047 }
 0xef7   : > { %v20038_v60 = vpop.eup %20037  ;;  %v11077_v39 = vmul.f32 0.01, %v11048_v62 }
 0xef8   : > { %v11159_v43 = vmul.f32 %v24911_v20, %v11133_v56  ;;  %v11134_v29 = vmul.f32 %v20038_v60, %v24831_v58  ;;  %v11050_v23 = vpop.xlane.xlu1 %11049 }
 0xef9   : > { %v11097_v32 = vadd.f32 1e-05, %v11077_v39  ;;  %v11078_v4 = vmul.f32 0.01, %v11050_v23 }
 0xefa   : > { %v24957_v12 = vadd.f32 %v24916_v63, %v11159_v43  ;;  %v11160_v10 = vmul.f32 %v24911_v20, %v11134_v29 }
 0xefb   : > { %20043 = vrsqrt.f32 %v11097_v32  ;;  %v11098_v36 = vadd.f32 1e-05, %v11078_v4 }
 0xefc   : > { %11205 = vst [vmem:[#allocation2 + $0x30] sm:$0xff] %v24957_v12  ;;  %v24962_v40 = vadd.f32 %v24916_v63, %v11160_v10 }
 0xefd   : > { %v20040_v52 = vpop.eup %20039  ;;  %20045 = vrsqrt.f32 %v11098_v36 }
 0xefe   : > { %11206 = vst [vmem:[#allocation2 + $0x38] sm:$0xff] %v24962_v40  ;;  %v11135_v58 = vmul.f32 %v20040_v52, %v24839_v11  ;;  %v11052_v30 = vpop.xlane.xlu0 %11051 }
 0xeff   : > { %v20042_v46 = vpop.eup %20041  ;;  %v11079_v2 = vmul.f32 0.01, %v11052_v30 }
 0xf00   : > { %v11161_v34 = vmul.f32 %v24911_v20, %v11135_v58  ;;  %v11136_v7 = vmul.f32 %v20042_v46, %v24843_v13  ;;  %v11054_v17 = vpop.xlane.xlu1 %11053 }
 0xf01   : > { %v11099_v61 = vadd.f32 1e-05, %v11079_v2  ;;  %v11080_v59 = vmul.f32 0.01, %v11054_v17 }
 0xf02   : > { %v24969_v8 = vadd.f32 %v24916_v63, %v11161_v34  ;;  %v11162_v42 = vmul.f32 %v24911_v20, %v11136_v7 }
 0xf03   : > { %20047 = vrsqrt.f32 %v11099_v61  ;;  %v11100_v41 = vadd.f32 1e-05, %v11080_v59 }
 0xf04   : > { %11207 = vst [vmem:[#allocation2 + $0x40] sm:$0xff] %v24969_v8  ;;  %v24974_v11 = vadd.f32 %v24916_v63, %v11162_v42 }
 0xf05   : > { %v20044_v38 = vpop.eup %20043  ;;  %20049 = vrsqrt.f32 %v11100_v41 }
 0xf06   : > { %11208 = vst [vmem:[#allocation2 + $0x48] sm:$0xff] %v24974_v11  ;;  %v11137_v13 = vmul.f32 %v20044_v38, %v24851_v27  ;;  %v11056_v33 = vpop.xlane.xlu0 %11055 }
 0xf07   : > { %v20046_v51 = vpop.eup %20045  ;;  %v11081_v35 = vmul.f32 0.01, %v11056_v33 }
 0xf08   : > { %v11163_v53 = vmul.f32 %v24911_v20, %v11137_v13  ;;  %v11138_v19 = vmul.f32 %v20046_v51, %v24855_v1  ;;  %v11058_v14 = vpop.xlane.xlu1 %11057 }
 0xf09   : > { %v11101_v18 = vadd.f32 1e-05, %v11081_v35  ;;  %v11082_v48 = vmul.f32 0.01, %v11058_v14 }
 0xf0a   : > { %v24981_v44 = vadd.f32 %v24916_v63, %v11163_v53  ;;  %v11164_v45 = vmul.f32 %v24911_v20, %v11138_v19 }
 0xf0b   : > { %20051 = vrsqrt.f32 %v11101_v18  ;;  %v11102_v22 = vadd.f32 1e-05, %v11082_v48  ;;  %v20085_v18 = vld [vmem:[#allocation22 + $0x10c] ss:$16 sps:$4 sm:$0xff] (!%p17803_p2)   ;;  %v21651_v48 = vmov (!%p17803_p2), 0  }
 0xf0c   : > { %11209 = vst [vmem:[#allocation2 + $0x50] sm:$0xff] %v24981_v44  ;;  %v24986_v27 = vadd.f32 %v24916_v63, %v11164_v45  ;;  %11481 = vmatprep.mubr.bf16.mxu0 (!%p17803_p2), %v21651_v48  ;;  %11522 = vmatprep.mubr.bf16.mxu1 (!%p17803_p2), %v21651_v48  ;;  %v20089_v45 = vld [vmem:[#allocation22 + $0x124] ss:$16 sps:$4 sm:$0xff] (!%p17803_p2)  }
 0xf0d   : > { %v20048_v21 = vpop.eup %20047  ;;  %20053 = vrsqrt.f32 %v11102_v22  ;;  %11490 = vmatprep.subr.bf16.mxu1 (!%p17803_p2), %v20085_v18  ;;  %v20093_v22 = vld [vmem:[#allocation22 + $0x120] ss:$16 sps:$4 sm:$0xff] (!%p17803_p2)   ;;  %v20151_v18 = vld [vmem:[#allocation22 + $0x64] ss:$16 sps:$4 sm:$0xff] (!%p17803_p2)  }
 0xf0e   : > { %11210 = vst [vmem:[#allocation2 + $0x58] sm:$0xff] %v24986_v27  ;;  %v11139_v1 = vmul.f32 %v20048_v21, %v24863_v47  ;;  %v20094_v21 = vld [vmem:[#allocation22 + $0x128] ss:$16 sps:$4 sm:$0xff] (!%p17803_p2)  }
 0xf0f   : > { %v20050_v50 = vpop.eup %20049 }
 0xf10   : > { %v11165_v3 = vmul.f32 %v24911_v20, %v11139_v1  ;;  %v11140_v54 = vmul.f32 %v20050_v50, %v24867_v28  ;;  %v20095_v1 = vld [vmem:[#allocation22 + $0x144] ss:$16 sps:$4 sm:$0xff] (!%p17803_p2)   ;;  %v20097_v50 = vld [vmem:[#allocation22 + $0x14c] ss:$16 sps:$4 sm:$0xff] (!%p17803_p2)  }
 0xf12   : > { %v24993_v25 = vadd.f32 %v24916_v63, %v11165_v3  ;;  %v11166_v37 = vmul.f32 %v24911_v20, %v11140_v54  ;;  %v20099_v3 = vld [vmem:[#allocation22 + $0x140] ss:$16 sps:$4 sm:$0xff] (!%p17803_p2)   ;;  %v20100_v54 = vld [vmem:[#allocation22 + $0x148] ss:$16 sps:$4 sm:$0xff] (!%p17803_p2)  }
 0xf14   : > { %11211 = vst [vmem:[#allocation2 + $0x60] sm:$0xff] %v24993_v25  ;;  %v24998_v56 = vadd.f32 %v24916_v63, %v11166_v37  ;;  %v20101_v37 = vld [vmem:[#allocation22 + $0x164] ss:$16 sps:$4 sm:$0xff] (!%p17803_p2)  }
 0xf15   : > { %v20052_v62 = vpop.eup %20051 }
 0xf16   : > { %11212 = vst [vmem:[#allocation2 + $0x68] sm:$0xff] %v24998_v56  ;;  %v11141_v47 = vmul.f32 %v20052_v62, %v24875_v5  ;;  %v20103_v62 = vld [vmem:[#allocation22 + $0x16c] ss:$16 sps:$4 sm:$0xff] (!%p17803_p2)  }
 0xf17   : > { %v20054_v60 = vpop.eup %20053 }
 0xf18   : > { %v11167_v39 = vmul.f32 %v24911_v20, %v11141_v47  ;;  %v11142_v28 = vmul.f32 %v20054_v60, %v24879_v15  ;;  %v20105_v47 = vld [vmem:[#allocation22 + $0x160] ss:$16 sps:$4 sm:$0xff] (!%p17803_p2)   ;;  %v20106_v60 = vld [vmem:[#allocation22 + $0x168] ss:$16 sps:$4 sm:$0xff] (!%p17803_p2)  }
 0xf1a   : > { %v25005_v43 = vadd.f32 %v24916_v63, %v11167_v39  ;;  %v11168_v29 = vmul.f32 %v24911_v20, %v11142_v28  ;;  %v20107_v39 = vld [vmem:[#allocation22 + $0x184] ss:$16 sps:$4 sm:$0xff] (!%p17803_p2)   ;;  %v20109_v28 = vld [vmem:[#allocation22 + $0x18c] ss:$16 sps:$4 sm:$0xff] (!%p17803_p2)  }
 0xf1c   : > { %11213 = vst [vmem:[#allocation2 + $0x70] sm:$0xff] %v25005_v43  ;;  %v25010_v23 = vadd.f32 %v24916_v63, %v11168_v29  ;;  %v11060_v32 = vpop.xlane.xlu0 %11059  ;;  %v20111_v29 = vld [vmem:[#allocation22 + $0x180] ss:$16 sps:$4 sm:$0xff] (!%p17803_p2)  }
 0xf1d   : > { %v11083_v4 = vmul.f32 0.01, %v11060_v32  ;;  %v20112_v32 = vld [vmem:[#allocation22 + $0x188] ss:$16 sps:$4 sm:$0xff] (!%p17803_p2)  }
 0xf1e   : > { %11214 = vst [vmem:[#allocation2 + $0x78] sm:$0xff] %v25010_v23  ;;  %v11062_v5 = vpop.xlane.xlu1 %11061 }
 0xf1f   : > { %v11103_v10 = vadd.f32 1e-05, %v11083_v4  ;;  %v11084_v36 = vmul.f32 0.01, %v11062_v5  ;;  %v20113_v4 = vld [vmem:[#allocation22 + $0x1a4] ss:$16 sps:$4 sm:$0xff] (!%p17803_p2)  }
 0xf20   : > { %v20115_v5 = vld [vmem:[#allocation22 + $0x1ac] ss:$16 sps:$4 sm:$0xff] (!%p17803_p2)  }
 0xf21   : > { %20055 = vrsqrt.f32 %v11103_v10  ;;  %v11104_v52 = vadd.f32 1e-05, %v11084_v36  ;;  %v20117_v10 = vld [vmem:[#allocation22 + $0x1a0] ss:$16 sps:$4 sm:$0xff] (!%p17803_p2)   ;;  %v20118_v36 = vld [vmem:[#allocation22 + $0x1a8] ss:$16 sps:$4 sm:$0xff] (!%p17803_p2)  }
 0xf23   : > { %20057 = vrsqrt.f32 %v11104_v52  ;;  %v20119_v52 = vld [vmem:[#allocation22 + $0x1c4] ss:$16 sps:$4 sm:$0xff] (!%p17803_p2)  }
 0xf24   : > { %v11064_v15 = vpop.xlane.xlu0 %11063 }
 0xf25   : > { %v11085_v58 = vmul.f32 0.01, %v11064_v15  ;;  %v20121_v15 = vld [vmem:[#allocation22 + $0x1cc] ss:$16 sps:$4 sm:$0xff] (!%p17803_p2)  }
 0xf26   : > { %v11066_v30 = vpop.xlane.xlu1 %11065 }
 0xf27   : > { %v11105_v46 = vadd.f32 1e-05, %v11085_v58  ;;  %v11086_v2 = vmul.f32 0.01, %v11066_v30  ;;  %v20123_v58 = vld [vmem:[#allocation22 + $0x1c0] ss:$16 sps:$4 sm:$0xff] (!%p17803_p2)  }
 0xf28   : > { %v20124_v30 = vld [vmem:[#allocation22 + $0x1c8] ss:$16 sps:$4 sm:$0xff] (!%p17803_p2)  }
 0xf29   : > { %20059 = vrsqrt.f32 %v11105_v46  ;;  %v11106_v34 = vadd.f32 1e-05, %v11086_v2  ;;  %v20125_v46 = vld [vmem:[#allocation22 + $0x1e4] ss:$16 sps:$4 sm:$0xff] (!%p17803_p2)   ;;  %v20127_v2 = vld [vmem:[#allocation22 + $0x1ec] ss:$16 sps:$4 sm:$0xff] (!%p17803_p2)  }
 0xf2b   : > { %v20056_v7 = vpop.eup %20055  ;;  %20061 = vrsqrt.f32 %v11106_v34  ;;  %v20129_v34 = vld [vmem:[#allocation22 + $0x1e0] ss:$16 sps:$4 sm:$0xff] (!%p17803_p2)  }
 0xf2c   : > { %v11143_v17 = vmul.f32 %v20056_v7, %v24887_v57  ;;  %v20130_v7 = vld [vmem:[#allocation22 + $0x1e8] ss:$16 sps:$4 sm:$0xff] (!%p17803_p2)  }
 0xf2d   : > { %v20058_v61 = vpop.eup %20057 }
 0xf2e   : > { %v11169_v59 = vmul.f32 %v24911_v20, %v11143_v17  ;;  %v11144_v42 = vmul.f32 %v20058_v61, %v24891_v55  ;;  %v20133_v17 = vld [vmem:[#allocation22 + $0x4] ss:$16 sps:$4 sm:$0xff] (!%p17803_p2)   ;;  %v20136_v61 = vld [vmem:[#allocation22 + $0xc] ss:$16 sps:$4 sm:$0xff] (!%p17803_p2)  }
 0xf30   : > { %v25017_v41 = vadd.f32 %v24916_v63, %v11169_v59  ;;  %v11170_v38 = vmul.f32 %v24911_v20, %v11144_v42  ;;  %v11256_v59 = vpack.c.bf16 (!%p17803_p2), %v24926_v6, %v24926_v6  ;;  %v20131_v42 = vld [vmem:[#allocation22] ss:$16 sps:$4 sm:$0xff] (!%p17803_p2)  }
 0xf31   : > { %v20143_v6 = vld [vmem:[#allocation22 + $0x40] ss:$16 sps:$4 sm:$0xff] (!%p17803_p2)  }
 0xf32   : > { %11215 = vst [vmem:[#allocation2 + $0x80] sm:$0xff] %v25017_v41  ;;  %v25022_v13 = vadd.f32 %v24916_v63, %v11170_v38  ;;  %v20134_v38 = vld [vmem:[#allocation22 + $0x8] ss:$16 sps:$4 sm:$0xff] (!%p17803_p2)  }
 0xf33   : > { %v20060_v33 = vpop.eup %20059 }
 0xf34   : > { %11216 = vst [vmem:[#allocation2 + $0x88] sm:$0xff] %v25022_v13  ;;  %v11145_v57 = vmul.f32 %v20060_v33, %v24899_v49  ;;  %v20083_v49 = vld [vmem:[#allocation22 + $0x104] ss:$16 sps:$4 sm:$0xff] (!%p17803_p2)  }
 0xf35   : > { %v20062_v51 = vpop.eup %20061  ;;  %11449 = vmatprep.subr.bf16.mxu0 (!%p17803_p2), %v20083_v49  ;;  %v20139_v33 = vld [vmem:[#allocation22 + $0x24] ss:$16 sps:$4 sm:$0xff] (!%p17803_p2)   ;;  %v20146_v49 = vld [vmem:[#allocation22 + $0x48] ss:$16 sps:$4 sm:$0xff] (!%p17803_p2)  }
 0xf36   : > { %v11171_v35 = vmul.f32 %v24911_v20, %v11145_v57  ;;  %v11146_v55 = vmul.f32 %v20062_v51, %v24903_v26  ;;  %11222 = sbr.rel (%p17803_p2) target bundleno = 5287 (0x14a7), region = 160  ;;  %v20087_v26 = vld [vmem:[#allocation22 + $0x100] ss:$16 sps:$4 sm:$0xff] (!%p17803_p2)   ;;  %v20142_v57 = vld [vmem:[#allocation22 + $0x2c] ss:$16 sps:$4 sm:$0xff] (!%p17803_p2)  }
 0xf37   : > { %11450 = vmatpush1.bf16.msra.mxu0 (!%p17803_p2), %v20087_v26  ;;  %v20137_v51 = vld [vmem:[#allocation22 + $0x20] ss:$16 sps:$4 sm:$0xff] (!%p17803_p2)   ;;  %v20154_v26 = vld [vmem:[#allocation22 + $0x6c] ss:$16 sps:$4 sm:$0xff] (!%p17803_p2)  }
 0xf38   : > { %v25029_v53 = vadd.f32 %v24916_v63, %v11171_v35  ;;  %v11172_v19 = vmul.f32 %v24911_v20, %v11146_v55  ;;  %v20088_v20 = vld [vmem:[#allocation22 + $0x108] ss:$16 sps:$4 sm:$0xff] (!%p17803_p2)   ;;  %11451 = vmatprep.subr.bf16.mxu0 (!%p17803_p2), %v20089_v45  ;;  %v20145_v55 = vld [vmem:[#allocation22 + $0x44] ss:$16 sps:$4 sm:$0xff] (!%p17803_p2)  }
 0xf39   : > { %11491 = vmatpush1.bf16.msra.mxu1 (!%p17803_p2), %v20088_v20  ;;  %v20140_v35 = vld [vmem:[#allocation22 + $0x28] ss:$16 sps:$4 sm:$0xff] (!%p17803_p2)   ;;  %v20149_v20 = vld [vmem:[#allocation22 + $0x60] ss:$16 sps:$4 sm:$0xff] (!%p17803_p2)  }
 0xf3a   : > { %11217 = vst [vmem:[#allocation2 + $0x90] sm:$0xff] %v25029_v53  ;;  %v25034_v14 = vadd.f32 %v24916_v63, %v11172_v19  ;;  %v20091_v63 = vld [vmem:[#allocation22 + $0x12c] ss:$16 sps:$4 sm:$0xff] (!%p17803_p2)   ;;  %v20152_v45 = vld [vmem:[#allocation22 + $0x68] ss:$16 sps:$4 sm:$0xff] (!%p17803_p2)  }
 0xf3b   : > { %11492 = vmatprep.subr.bf16.mxu1 (!%p17803_p2), %v20091_v63  ;;  %11452 = vmatpush1.bf16.msra.mxu0 (!%p17803_p2), %v20093_v22  ;;  %v20148_v19 = vld [vmem:[#allocation22 + $0x4c] ss:$16 sps:$4 sm:$0xff] (!%p17803_p2)   ;;  %v20157_v63 = vld [vmem:[#allocation22 + $0x84] ss:$16 sps:$4 sm:$0xff] (!%p17803_p2)  }
 0xf3c   : > { %11218 = vst [vmem:[#allocation2 + $0x98] sm:$0xff] %v25034_v14  ;;  %11453 = vmatprep.subr.bf16.mxu0 (!%p17803_p2), %v20095_v1  ;;  %v20160_v22 = vld [vmem:[#allocation22 + $0x8c] ss:$16 sps:$4 sm:$0xff] (!%p17803_p2)   ;;  %v20158_v1 = vld [vmem:[#allocation22 + $0x88] ss:$16 sps:$4 sm:$0xff] (!%p17803_p2)  }
 0xf3d   : > { %11493 = vmatpush1.bf16.msra.mxu1 %v20094_v21  ;;  %v20155_v21 = vld [vmem:[#allocation22 + $0x80] ss:$16 sps:$4 sm:$0xff]  }
 0xf3e   : > { %11494 = vmatprep.subr.bf16.mxu1 %v20097_v50  ;;  %v20163_v50 = vld [vmem:[#allocation22 + $0xa4] ss:$16 sps:$4 sm:$0xff]  }
 0xf3f   : > { %11454 = vmatpush1.bf16.msra.mxu0 %v20099_v3  ;;  %v20166_v3 = vld [vmem:[#allocation22 + $0xac] ss:$16 sps:$4 sm:$0xff]  }
 0xf40   : > { %11455 = vmatprep.subr.bf16.mxu0 %v20101_v37  ;;  %v20164_v37 = vld [vmem:[#allocation22 + $0xa8] ss:$16 sps:$4 sm:$0xff]  }
 0xf41   : > { %11495 = vmatpush1.bf16.msra.mxu1 %v20100_v54  ;;  %v20161_v54 = vld [vmem:[#allocation22 + $0xa0] ss:$16 sps:$4 sm:$0xff]  }
 0xf42   : > { %11496 = vmatprep.subr.bf16.mxu1 %v20103_v62  ;;  %v20169_v62 = vld [vmem:[#allocation22 + $0xc4] ss:$16 sps:$4 sm:$0xff]  }
 0xf43   : > { %11456 = vmatpush1.bf16.msra.mxu0 %v20105_v47  ;;  %v20172_v47 = vld [vmem:[#allocation22 + $0xcc] ss:$16 sps:$4 sm:$0xff]  }
 0xf44   : > { %11457 = vmatprep.subr.bf16.mxu0 %v20107_v39  ;;  %v20170_v39 = vld [vmem:[#allocation22 + $0xc8] ss:$16 sps:$4 sm:$0xff]  }
 0xf45   : > { %11497 = vmatpush1.bf16.msra.mxu1 %v20106_v60  ;;  %v20167_v60 = vld [vmem:[#allocation22 + $0xc0] ss:$16 sps:$4 sm:$0xff]  }
 0xf46   : > { %11498 = vmatprep.subr.bf16.mxu1 %v20109_v28  ;;  %v20175_v28 = vld [vmem:[#allocation22 + $0xe4] ss:$16 sps:$4 sm:$0xff]  }
 0xf47   : > { %11458 = vmatpush1.bf16.msra.mxu0 %v20111_v29  ;;  %v20178_v29 = vld [vmem:[#allocation22 + $0xec] ss:$16 sps:$4 sm:$0xff]  }
 0xf48   : > { %11459 = vmatprep.subr.bf16.mxu0 %v20113_v4  ;;  %v20176_v4 = vld [vmem:[#allocation22 + $0xe8] ss:$16 sps:$4 sm:$0xff]  }
 0xf49   : > { %11499 = vmatpush1.bf16.msra.mxu1 %v20112_v32  ;;  %v20173_v32 = vld [vmem:[#allocation22 + $0xe0] ss:$16 sps:$4 sm:$0xff]  }
 0xf4a   : > { %11500 = vmatprep.subr.bf16.mxu1 %v20115_v5  ;;  %v20181_v5 = vld [vmem:[#allocation22 + $0x204] ss:$16 sps:$4 sm:$0xff]  }
 0xf4b   : > { %11460 = vmatpush1.bf16.msra.mxu0 %v20117_v10  ;;  %v20184_v10 = vld [vmem:[#allocation22 + $0x20c] ss:$16 sps:$4 sm:$0xff]  }
 0xf4c   : > { %11461 = vmatprep.subr.bf16.mxu0 %v20119_v52  ;;  %v20179_v52 = vld [vmem:[#allocation22 + $0x200] ss:$16 sps:$4 sm:$0xff]  }
 0xf4d   : > { %11501 = vmatpush1.bf16.msra.mxu1 %v20118_v36  ;;  %v11223_v36 = vpack.c.bf16 %v24921_v16, %v24921_v16  ;;  %v20191_v16 = vld [vmem:[#allocation22 + $0x240] ss:$16 sps:$4 sm:$0xff]  }
 0xf4e   : > { %11502 = vmatprep.subr.bf16.mxu1 %v20121_v15  ;;  %v20182_v15 = vld [vmem:[#allocation22 + $0x208] ss:$16 sps:$4 sm:$0xff]  }
 0xf4f   : > { %11462 = vmatpush1.bf16.msra.mxu0 %v20123_v58  ;;  %v20187_v58 = vld [vmem:[#allocation22 + $0x224] ss:$16 sps:$4 sm:$0xff]  }
 0xf50   : > { %11463 = vmatprep.subr.bf16.mxu0 %v20125_v46  ;;  %v20185_v46 = vld [vmem:[#allocation22 + $0x220] ss:$16 sps:$4 sm:$0xff]  }
 0xf51   : > { %11503 = vmatpush1.bf16.msra.mxu1 %v20124_v30  ;;  %v20190_v30 = vld [vmem:[#allocation22 + $0x22c] ss:$16 sps:$4 sm:$0xff]  }
 0xf52   : > { %11504 = vmatprep.subr.bf16.mxu1 %v20127_v2  ;;  %v20188_v2 = vld [vmem:[#allocation22 + $0x228] ss:$16 sps:$4 sm:$0xff]  }
 0xf53   : > { %11464 = vmatpush1.bf16.msra.mxu0 %v20129_v34  ;;  %v20193_v34 = vld [vmem:[#allocation22 + $0x244] ss:$16 sps:$4 sm:$0xff]  }
 0xf54   : > { %11691 = vmatprep.subr.bf16.mxu0 %v20133_v17  ;;  %v20194_v17 = vld [vmem:[#allocation22 + $0x248] ss:$16 sps:$4 sm:$0xff]  }
 0xf55   : > { %11505 = vmatpush1.bf16.msra.mxu1 %v20130_v7  ;;  %v20196_v7 = vld [vmem:[#allocation22 + $0x24c] ss:$16 sps:$4 sm:$0xff]  }
 0xf56   : > { %11732 = vmatprep.subr.bf16.mxu1 %v20136_v61  ;;  %11482 = vmatmul.mubr.bf16.vlgmr.msra.gmra.mrb[0].mxu0 %v11256_v59  ;;  %v20199_v61 = vld [vmem:[#allocation22 + $0x264] ss:$16 sps:$4 sm:$0xff]  }
 0xf57   : > { %11692 = vmatpush1.bf16.msra.mxu0 %v20131_v42  ;;  %11723 = vmatprep.mubr.bf16.mxu0 %v21651_v48  ;;  %v20197_v42 = vld [vmem:[#allocation22 + $0x260] ss:$16 sps:$4 sm:$0xff]  }
 0xf58   : > { %11523 = vmatmul.mubr.bf16.vlgmr.msra.gmra.mrb[0].mxu1 %v11256_v59  ;;  %11693 = vmatprep.subr.bf16.mxu0 %v20139_v33  ;;  %v20202_v59 = vld [vmem:[#allocation22 + $0x26c] ss:$16 sps:$4 sm:$0xff]   ;;  %v20205_v33 = vld [vmem:[#allocation22 + $0x284] ss:$16 sps:$4 sm:$0xff]  }
 0xf59   : > { %11733 = vmatpush1.bf16.msra.mxu1 %v20134_v38  ;;  %11764 = vmatprep.mubr.bf16.mxu1 %v21651_v48  ;;  %v20200_v38 = vld [vmem:[#allocation22 + $0x268] ss:$16 sps:$4 sm:$0xff]  }
 0xf5a   : > { %11734 = vmatprep.subr.bf16.mxu1 %v20142_v57  ;;  %v20208_v57 = vld [vmem:[#allocation22 + $0x28c] ss:$16 sps:$4 sm:$0xff]  }
 0xf5b   : > { %11694 = vmatpush1.bf16.msra.mxu0 %v20137_v51  ;;  %v20203_v51 = vld [vmem:[#allocation22 + $0x280] ss:$16 sps:$4 sm:$0xff]  }
 0xf5c   : > { %11695 = vmatprep.subr.bf16.mxu0 %v20145_v55  ;;  %v20211_v55 = vld [vmem:[#allocation22 + $0x2a4] ss:$16 sps:$4 sm:$0xff]  }
 0xf5d   : > { %11735 = vmatpush1.bf16.msra.mxu1 %v20140_v35  ;;  %v20206_v35 = vld [vmem:[#allocation22 + $0x288] ss:$16 sps:$4 sm:$0xff]  }
 0xf5e   : > { %11736 = vmatprep.subr.bf16.mxu1 %v20148_v19  ;;  %v20214_v19 = vld [vmem:[#allocation22 + $0x2ac] ss:$16 sps:$4 sm:$0xff]  }
 0xf5f   : > { %11696 = vmatpush1.bf16.msra.mxu0 %v20143_v6  ;;  %v20209_v6 = vld [vmem:[#allocation22 + $0x2a0] ss:$16 sps:$4 sm:$0xff]  }
 0xf60   : > { %11697 = vmatprep.subr.bf16.mxu0 %v20151_v18  ;;  %v20217_v18 = vld [vmem:[#allocation22 + $0x2c4] ss:$16 sps:$4 sm:$0xff]  }
 0xf61   : > { %11737 = vmatpush1.bf16.msra.mxu1 %v20146_v49  ;;  %v20212_v49 = vld [vmem:[#allocation22 + $0x2a8] ss:$16 sps:$4 sm:$0xff]  }
 0xf62   : > { %11738 = vmatprep.subr.bf16.mxu1 %v20154_v26  ;;  %v20220_v26 = vld [vmem:[#allocation22 + $0x2cc] ss:$16 sps:$4 sm:$0xff]  }
 0xf63   : > { %11698 = vmatpush1.bf16.msra.mxu0 %v20149_v20  ;;  %v20215_v20 = vld [vmem:[#allocation22 + $0x2c0] ss:$16 sps:$4 sm:$0xff]  }
 0xf64   : > { %11699 = vmatprep.subr.bf16.mxu0 %v20157_v63  ;;  %v20223_v63 = vld [vmem:[#allocation22 + $0x2e4] ss:$16 sps:$4 sm:$0xff]  }
 0xf65   : > { %11739 = vmatpush1.bf16.msra.mxu1 %v20152_v45  ;;  %v20218_v45 = vld [vmem:[#allocation22 + $0x2c8] ss:$16 sps:$4 sm:$0xff]  }
 0xf66   : > { %11740 = vmatprep.subr.bf16.mxu1 %v20160_v22  ;;  %v20226_v22 = vld [vmem:[#allocation22 + $0x2ec] ss:$16 sps:$4 sm:$0xff]  }
 0xf67   : > { %11700 = vmatpush1.bf16.msra.mxu0 %v20155_v21  ;;  %v20221_v21 = vld [vmem:[#allocation22 + $0x2e0] ss:$16 sps:$4 sm:$0xff]  }
 0xf68   : > { %11701 = vmatprep.subr.bf16.mxu0 %v20163_v50  ;;  %v20229_v50 = vld [vmem:[#allocation22 + $0x304] ss:$16 sps:$4 sm:$0xff]  }
 0xf69   : > { %11741 = vmatpush1.bf16.msra.mxu1 %v20158_v1  ;;  %v20224_v1 = vld [vmem:[#allocation22 + $0x2e8] ss:$16 sps:$4 sm:$0xff]  }
 0xf6a   : > { %11742 = vmatprep.subr.bf16.mxu1 %v20166_v3  ;;  %v20232_v3 = vld [vmem:[#allocation22 + $0x30c] ss:$16 sps:$4 sm:$0xff]  }
 0xf6b   : > { %11702 = vmatpush1.bf16.msra.mxu0 %v20161_v54  ;;  %v11773_v54 = vpack.c.bf16 %v24933_v24, %v24933_v24  ;;  %v20239_v24 = vld [vmem:[#allocation22 + $0x340] ss:$16 sps:$4 sm:$0xff]  }
 0xf6c   : > { %11703 = vmatprep.subr.bf16.mxu0 %v20169_v62  ;;  %v20230_v62 = vld [vmem:[#allocation22 + $0x308] ss:$16 sps:$4 sm:$0xff]  }
 0xf6d   : > { %11743 = vmatpush1.bf16.msra.mxu1 %v20164_v37  ;;  %v20227_v37 = vld [vmem:[#allocation22 + $0x300] ss:$16 sps:$4 sm:$0xff]  }
 0xf6e   : > { %11744 = vmatprep.subr.bf16.mxu1 %v20172_v47  ;;  %v20235_v47 = vld [vmem:[#allocation22 + $0x324] ss:$16 sps:$4 sm:$0xff]  }
 0xf6f   : > { %11704 = vmatpush1.bf16.msra.mxu0 %v20167_v60  ;;  %v20238_v60 = vld [vmem:[#allocation22 + $0x32c] ss:$16 sps:$4 sm:$0xff]  }
 0xf70   : > { %11705 = vmatprep.subr.bf16.mxu0 %v20175_v28  ;;  %v20236_v28 = vld [vmem:[#allocation22 + $0x328] ss:$16 sps:$4 sm:$0xff]  }
 0xf71   : > { %11745 = vmatpush1.bf16.msra.mxu1 %v20170_v39  ;;  %v20233_v39 = vld [vmem:[#allocation22 + $0x320] ss:$16 sps:$4 sm:$0xff]  }
 0xf72   : > { %11746 = vmatprep.subr.bf16.mxu1 %v20178_v29  ;;  %v20241_v29 = vld [vmem:[#allocation22 + $0x344] ss:$16 sps:$4 sm:$0xff]  }
 0xf73   : > { %11706 = vmatpush1.bf16.msra.mxu0 %v20173_v32  ;;  %v20244_v32 = vld [vmem:[#allocation22 + $0x34c] ss:$16 sps:$4 sm:$0xff]  }
 0xf74   : > { %11966 = vmatprep.subr.bf16.mxu0 %v20181_v5  ;;  %v20247_v5 = vld [vmem:[#allocation22 + $0x364] ss:$16 sps:$4 sm:$0xff]  }
 0xf75   : > { %11747 = vmatpush1.bf16.msra.mxu1 %v20176_v4  ;;  %v20242_v4 = vld [vmem:[#allocation22 + $0x348] ss:$16 sps:$4 sm:$0xff]  }
 0xf76   : > { %12007 = vmatprep.subr.bf16.mxu1 %v20184_v10  ;;  %11724 = vmatmul.mubr.bf16.vlgmr.msra.gmra.mrb[4].mxu0 %v11223_v36  ;;  %v20250_v10 = vld [vmem:[#allocation22 + $0x36c] ss:$16 sps:$4 sm:$0xff]  }
 0xf77   : > { %11967 = vmatpush1.bf16.msra.mxu0 %v20179_v52  ;;  %11998 = vmatprep.mubr.bf16.mxu0 %v21651_v48  ;;  %v20248_v52 = vld [vmem:[#allocation22 + $0x368] ss:$16 sps:$4 sm:$0xff]  }
 0xf78   : > { %11765 = vmatmul.mubr.bf16.vlgmr.msra.gmra.mrb[4].mxu1 %v11223_v36  ;;  %11968 = vmatprep.subr.bf16.mxu0 %v20187_v58  ;;  %v20245_v36 = vld [vmem:[#allocation22 + $0x360] ss:$16 sps:$4 sm:$0xff]   ;;  %v20256_v58 = vld [vmem:[#allocation22 + $0x38c] ss:$16 sps:$4 sm:$0xff]  }
 0xf79   : > { %12008 = vmatpush1.bf16.msra.mxu1 %v20182_v15  ;;  %12039 = vmatprep.mubr.bf16.mxu1 %v21651_v48  ;;  %v20253_v15 = vld [vmem:[#allocation22 + $0x384] ss:$16 sps:$4 sm:$0xff]  }
 0xf7a   : > { %12009 = vmatprep.subr.bf16.mxu1 %v20190_v30  ;;  %v20251_v30 = vld [vmem:[#allocation22 + $0x380] ss:$16 sps:$4 sm:$0xff]  }
 0xf7b   : > { %11969 = vmatpush1.bf16.msra.mxu0 %v20185_v46  ;;  %v20254_v46 = vld [vmem:[#allocation22 + $0x388] ss:$16 sps:$4 sm:$0xff]  }
 0xf7c   : > { %11970 = vmatprep.subr.bf16.mxu0 %v20193_v34  ;;  %v20262_v34 = vld [vmem:[#allocation22 + $0x3ac] ss:$16 sps:$4 sm:$0xff]  }
 0xf7d   : > { %12010 = vmatpush1.bf16.msra.mxu1 %v20188_v2  ;;  %v20259_v2 = vld [vmem:[#allocation22 + $0x3a4] ss:$16 sps:$4 sm:$0xff]  }
 0xf7e   : > { %12011 = vmatprep.subr.bf16.mxu1 %v20196_v7  ;;  %v20257_v7 = vld [vmem:[#allocation22 + $0x3a0] ss:$16 sps:$4 sm:$0xff]  }
 0xf7f   : > { %11971 = vmatpush1.bf16.msra.mxu0 %v20191_v16  ;;  %v20260_v16 = vld [vmem:[#allocation22 + $0x3a8] ss:$16 sps:$4 sm:$0xff]  }
 0xf80   : > { %11972 = vmatprep.subr.bf16.mxu0 %v20199_v61  ;;  %v20268_v61 = vld [vmem:[#allocation22 + $0x3cc] ss:$16 sps:$4 sm:$0xff]  }
 0xf81   : > { %12012 = vmatpush1.bf16.msra.mxu1 %v20194_v17  ;;  %v20265_v17 = vld [vmem:[#allocation22 + $0x3c4] ss:$16 sps:$4 sm:$0xff]  }
 0xf82   : > { %12013 = vmatprep.subr.bf16.mxu1 %v20202_v59  ;;  %v20263_v59 = vld [vmem:[#allocation22 + $0x3c0] ss:$16 sps:$4 sm:$0xff]  }
 0xf83   : > { %11973 = vmatpush1.bf16.msra.mxu0 %v20197_v42  ;;  %v20266_v42 = vld [vmem:[#allocation22 + $0x3c8] ss:$16 sps:$4 sm:$0xff]  }
 0xf84   : > { %11974 = vmatprep.subr.bf16.mxu0 %v20205_v33  ;;  %v20274_v33 = vld [vmem:[#allocation22 + $0x3ec] ss:$16 sps:$4 sm:$0xff]  }
 0xf85   : > { %12014 = vmatpush1.bf16.msra.mxu1 %v20200_v38  ;;  %v20271_v38 = vld [vmem:[#allocation22 + $0x3e4] ss:$16 sps:$4 sm:$0xff]  }
 0xf86   : > { %12015 = vmatprep.subr.bf16.mxu1 %v20208_v57  ;;  %v20269_v57 = vld [vmem:[#allocation22 + $0x3e0] ss:$16 sps:$4 sm:$0xff]  }
 0xf87   : > { %11975 = vmatpush1.bf16.msra.mxu0 %v20203_v51  ;;  %v20272_v51 = vld [vmem:[#allocation22 + $0x3e8] ss:$16 sps:$4 sm:$0xff]  }
 0xf88   : > { %11976 = vmatprep.subr.bf16.mxu0 %v20211_v55  ;;  %v20280_v55 = vld [vmem:[#allocation22 + $0x40c] ss:$16 sps:$4 sm:$0xff]  }
 0xf89   : > { %12016 = vmatpush1.bf16.msra.mxu1 %v20206_v35  ;;  %v20277_v35 = vld [vmem:[#allocation22 + $0x404] ss:$16 sps:$4 sm:$0xff]  }
 0xf8a   : > { %12017 = vmatprep.subr.bf16.mxu1 %v20214_v19  ;;  %v12052_v19 = vpack.c.bf16 %v24938_v31, %v24938_v31  ;;  %v20287_v31 = vld [vmem:[#allocation22 + $0x440] ss:$16 sps:$4 sm:$0xff]  }
 0xf8b   : > { %11977 = vmatpush1.bf16.msra.mxu0 %v20209_v6  ;;  %v20275_v6 = vld [vmem:[#allocation22 + $0x400] ss:$16 sps:$4 sm:$0xff]  }
 0xf8c   : > { %11978 = vmatprep.subr.bf16.mxu0 %v20217_v18  ;;  %v20283_v18 = vld [vmem:[#allocation22 + $0x424] ss:$16 sps:$4 sm:$0xff]  }
 0xf8d   : > { %12018 = vmatpush1.bf16.msra.mxu1 %v20212_v49  ;;  %v20278_v49 = vld [vmem:[#allocation22 + $0x408] ss:$16 sps:$4 sm:$0xff]  }
 0xf8e   : > { %12019 = vmatprep.subr.bf16.mxu1 %v20220_v26  ;;  %v20286_v26 = vld [vmem:[#allocation22 + $0x42c] ss:$16 sps:$4 sm:$0xff]  }
 0xf8f   : > { %11979 = vmatpush1.bf16.msra.mxu0 %v20215_v20  ;;  %v20281_v20 = vld [vmem:[#allocation22 + $0x420] ss:$16 sps:$4 sm:$0xff]  }
 0xf90   : > { %11980 = vmatprep.subr.bf16.mxu0 %v20223_v63  ;;  %v20289_v63 = vld [vmem:[#allocation22 + $0x444] ss:$16 sps:$4 sm:$0xff]  }
 0xf91   : > { %12020 = vmatpush1.bf16.msra.mxu1 %v20218_v45  ;;  %v20284_v45 = vld [vmem:[#allocation22 + $0x428] ss:$16 sps:$4 sm:$0xff]  }
 0xf92   : > { %12021 = vmatprep.subr.bf16.mxu1 %v20226_v22  ;;  %v20292_v22 = vld [vmem:[#allocation22 + $0x44c] ss:$16 sps:$4 sm:$0xff]  }
 0xf93   : > { %11981 = vmatpush1.bf16.msra.mxu0 %v20221_v21  ;;  %v20290_v21 = vld [vmem:[#allocation22 + $0x448] ss:$16 sps:$4 sm:$0xff]  }
 0xf94   : > { %12245 = vmatprep.subr.bf16.mxu0 %v20229_v50  ;;  %v20298_v50 = vld [vmem:[#allocation22 + $0x46c] ss:$16 sps:$4 sm:$0xff]  }
 0xf95   : > { %12022 = vmatpush1.bf16.msra.mxu1 %v20224_v1  ;;  %v20295_v1 = vld [vmem:[#allocation22 + $0x464] ss:$16 sps:$4 sm:$0xff]  }
 0xf96   : > { %12286 = vmatprep.subr.bf16.mxu1 %v20232_v3  ;;  %11999 = vmatmul.mubr.bf16.vlgmr.msra.gmra.mrb[8].mxu0 %v11773_v54  ;;  %v20293_v3 = vld [vmem:[#allocation22 + $0x460] ss:$16 sps:$4 sm:$0xff]  }
 0xf97   : > { %12246 = vmatpush1.bf16.msra.mxu0 %v20227_v37  ;;  %12277 = vmatprep.mubr.bf16.mxu0 %v21651_v48  ;;  %v20301_v37 = vld [vmem:[#allocation22 + $0x484] ss:$16 sps:$4 sm:$0xff]  }
 0xf98   : > { %12040 = vmatmul.mubr.bf16.vlgmr.msra.gmra.mrb[8].mxu1 %v11773_v54  ;;  %12247 = vmatprep.subr.bf16.mxu0 %v20235_v47  ;;  %v20296_v54 = vld [vmem:[#allocation22 + $0x468] ss:$16 sps:$4 sm:$0xff]   ;;  %v20299_v47 = vld [vmem:[#allocation22 + $0x480] ss:$16 sps:$4 sm:$0xff]  }
 0xf99   : > { %12287 = vmatpush1.bf16.msra.mxu1 %v20230_v62  ;;  %12318 = vmatprep.mubr.bf16.mxu1 %v21651_v48  ;;  %v20304_v62 = vld [vmem:[#allocation22 + $0x48c] ss:$16 sps:$4 sm:$0xff]  }
 0xf9a   : > { %12288 = vmatprep.subr.bf16.mxu1 %v20238_v60  ;;  %v20302_v60 = vld [vmem:[#allocation22 + $0x488] ss:$16 sps:$4 sm:$0xff]  }
 0xf9b   : > { %12248 = vmatpush1.bf16.msra.mxu0 %v20233_v39  ;;  %v20307_v39 = vld [vmem:[#allocation22 + $0x4a4] ss:$16 sps:$4 sm:$0xff]  }
 0xf9c   : > { %12249 = vmatprep.subr.bf16.mxu0 %v20241_v29  ;;  %v20305_v29 = vld [vmem:[#allocation22 + $0x4a0] ss:$16 sps:$4 sm:$0xff]  }
 0xf9d   : > { %12289 = vmatpush1.bf16.msra.mxu1 %v20236_v28  ;;  %v20310_v28 = vld [vmem:[#allocation22 + $0x4ac] ss:$16 sps:$4 sm:$0xff]  }
 0xf9e   : > { %12290 = vmatprep.subr.bf16.mxu1 %v20244_v32  ;;  %v20308_v32 = vld [vmem:[#allocation22 + $0x4a8] ss:$16 sps:$4 sm:$0xff]  }
 0xf9f   : > { %12250 = vmatpush1.bf16.msra.mxu0 %v20239_v24  ;;  %v20313_v24 = vld [vmem:[#allocation22 + $0x4c4] ss:$16 sps:$4 sm:$0xff]  }
 0xfa0   : > { %12251 = vmatprep.subr.bf16.mxu0 %v20247_v5  ;;  %v20311_v5 = vld [vmem:[#allocation22 + $0x4c0] ss:$16 sps:$4 sm:$0xff]  }
 0xfa1   : > { %12291 = vmatpush1.bf16.msra.mxu1 %v20242_v4  ;;  %v20316_v4 = vld [vmem:[#allocation22 + $0x4cc] ss:$16 sps:$4 sm:$0xff]  }
 0xfa2   : > { %12292 = vmatprep.subr.bf16.mxu1 %v20250_v10  ;;  %v20314_v10 = vld [vmem:[#allocation22 + $0x4c8] ss:$16 sps:$4 sm:$0xff]  }
 0xfa3   : > { %12252 = vmatpush1.bf16.msra.mxu0 %v20245_v36  ;;  %v20319_v36 = vld [vmem:[#allocation22 + $0x4e4] ss:$16 sps:$4 sm:$0xff]  }
 0xfa4   : > { %12253 = vmatprep.subr.bf16.mxu0 %v20253_v15  ;;  %v20317_v15 = vld [vmem:[#allocation22 + $0x4e0] ss:$16 sps:$4 sm:$0xff]  }
 0xfa5   : > { %12293 = vmatpush1.bf16.msra.mxu1 %v20248_v52  ;;  %v20322_v52 = vld [vmem:[#allocation22 + $0x4ec] ss:$16 sps:$4 sm:$0xff]  }
 0xfa6   : > { %12294 = vmatprep.subr.bf16.mxu1 %v20256_v58  ;;  %v20320_v58 = vld [vmem:[#allocation22 + $0x4e8] ss:$16 sps:$4 sm:$0xff]  }
 0xfa7   : > { %12254 = vmatpush1.bf16.msra.mxu0 %v20251_v30  ;;  %v20325_v30 = vld [vmem:[#allocation22 + $0x504] ss:$16 sps:$4 sm:$0xff]  }
 0xfa8   : > { %12255 = vmatprep.subr.bf16.mxu0 %v20259_v2  ;;  %v12331_v2 = vpack.c.bf16 %v24945_v0, %v24945_v0  ;;  %v20335_v0 = vld [vmem:[#allocation22 + $0x540] ss:$16 sps:$4 sm:$0xff]  }
 0xfa9   : > { %12295 = vmatpush1.bf16.msra.mxu1 %v20254_v46  ;;  %v20328_v46 = vld [vmem:[#allocation22 + $0x50c] ss:$16 sps:$4 sm:$0xff]  }
 0xfaa   : > { %12296 = vmatprep.subr.bf16.mxu1 %v20262_v34  ;;  %v20323_v34 = vld [vmem:[#allocation22 + $0x500] ss:$16 sps:$4 sm:$0xff]  }
 0xfab   : > { %12256 = vmatpush1.bf16.msra.mxu0 %v20257_v7  ;;  %v20326_v7 = vld [vmem:[#allocation22 + $0x508] ss:$16 sps:$4 sm:$0xff]  }
 0xfac   : > { %12257 = vmatprep.subr.bf16.mxu0 %v20265_v17  ;;  %v20334_v17 = vld [vmem:[#allocation22 + $0x52c] ss:$16 sps:$4 sm:$0xff]  }
 0xfad   : > { %12297 = vmatpush1.bf16.msra.mxu1 %v20260_v16  ;;  %v20331_v16 = vld [vmem:[#allocation22 + $0x524] ss:$16 sps:$4 sm:$0xff]  }
 0xfae   : > { %12298 = vmatprep.subr.bf16.mxu1 %v20268_v61  ;;  %v20329_v61 = vld [vmem:[#allocation22 + $0x520] ss:$16 sps:$4 sm:$0xff]  }
 0xfaf   : > { %12258 = vmatpush1.bf16.msra.mxu0 %v20263_v59  ;;  %v20332_v59 = vld [vmem:[#allocation22 + $0x528] ss:$16 sps:$4 sm:$0xff]  }
 0xfb0   : > { %12259 = vmatprep.subr.bf16.mxu0 %v20271_v38  ;;  %v20340_v38 = vld [vmem:[#allocation22 + $0x54c] ss:$16 sps:$4 sm:$0xff]  }
 0xfb1   : > { %12299 = vmatpush1.bf16.msra.mxu1 %v20266_v42  ;;  %v20337_v42 = vld [vmem:[#allocation22 + $0x544] ss:$16 sps:$4 sm:$0xff]  }
 0xfb2   : > { %12300 = vmatprep.subr.bf16.mxu1 %v20274_v33  ;;  %v20338_v33 = vld [vmem:[#allocation22 + $0x548] ss:$16 sps:$4 sm:$0xff]  }
 0xfb3   : > { %12260 = vmatpush1.bf16.msra.mxu0 %v20269_v57  ;;  %v20343_v57 = vld [vmem:[#allocation22 + $0x564] ss:$16 sps:$4 sm:$0xff]  }
 0xfb4   : > { %12524 = vmatprep.subr.bf16.mxu0 %v20277_v35  ;;  %v20341_v35 = vld [vmem:[#allocation22 + $0x560] ss:$16 sps:$4 sm:$0xff]  }
 0xfb5   : > { %12301 = vmatpush1.bf16.msra.mxu1 %v20272_v51  ;;  %v20346_v51 = vld [vmem:[#allocation22 + $0x56c] ss:$16 sps:$4 sm:$0xff]  }
 0xfb6   : > { %12565 = vmatprep.subr.bf16.mxu1 %v20280_v55  ;;  %12278 = vmatmul.mubr.bf16.vlgmr.msra.gmra.mrb[12].mxu0 %v12052_v19  ;;  %v20344_v55 = vld [vmem:[#allocation22 + $0x568] ss:$16 sps:$4 sm:$0xff]  }
 0xfb7   : > { %12525 = vmatpush1.bf16.msra.mxu0 %v20275_v6  ;;  %12556 = vmatprep.mubr.bf16.mxu0 %v21651_v48  ;;  %v20352_v6 = vld [vmem:[#allocation22 + $0x58c] ss:$16 sps:$4 sm:$0xff]  }
 0xfb8   : > { %12319 = vmatmul.mubr.bf16.vlgmr.msra.gmra.mrb[12].mxu1 %v12052_v19  ;;  %12526 = vmatprep.subr.bf16.mxu0 %v20283_v18  ;;  %v20349_v19 = vld [vmem:[#allocation22 + $0x584] ss:$16 sps:$4 sm:$0xff]   ;;  %v20350_v18 = vld [vmem:[#allocation22 + $0x588] ss:$16 sps:$4 sm:$0xff]  }
 0xfb9   : > { %12566 = vmatpush1.bf16.msra.mxu1 %v20278_v49  ;;  %12597 = vmatprep.mubr.bf16.mxu1 %v21651_v48  ;;  %v20347_v49 = vld [vmem:[#allocation22 + $0x580] ss:$16 sps:$4 sm:$0xff]  }
 0xfba   : > { %12567 = vmatprep.subr.bf16.mxu1 %v20286_v26  ;;  %v20355_v26 = vld [vmem:[#allocation22 + $0x5a4] ss:$16 sps:$4 sm:$0xff]  }
 0xfbb   : > { %12527 = vmatpush1.bf16.msra.mxu0 %v20281_v20  ;;  %v20358_v20 = vld [vmem:[#allocation22 + $0x5ac] ss:$16 sps:$4 sm:$0xff]  }
 0xfbc   : > { %12528 = vmatprep.subr.bf16.mxu0 %v20289_v63  ;;  %v20356_v63 = vld [vmem:[#allocation22 + $0x5a8] ss:$16 sps:$4 sm:$0xff]  }
 0xfbd   : > { %12568 = vmatpush1.bf16.msra.mxu1 %v20284_v45  ;;  %v20353_v45 = vld [vmem:[#allocation22 + $0x5a0] ss:$16 sps:$4 sm:$0xff]  }
 0xfbe   : > { %12569 = vmatprep.subr.bf16.mxu1 %v20292_v22  ;;  %v20361_v22 = vld [vmem:[#allocation22 + $0x5c4] ss:$16 sps:$4 sm:$0xff]  }
 0xfbf   : > { %12529 = vmatpush1.bf16.msra.mxu0 %v20287_v31  ;;  %v20364_v31 = vld [vmem:[#allocation22 + $0x5cc] ss:$16 sps:$4 sm:$0xff]  }
 0xfc0   : > { %12530 = vmatprep.subr.bf16.mxu0 %v20295_v1  ;;  %v20362_v1 = vld [vmem:[#allocation22 + $0x5c8] ss:$16 sps:$4 sm:$0xff]  }
 0xfc1   : > { %12570 = vmatpush1.bf16.msra.mxu1 %v20290_v21  ;;  %v20359_v21 = vld [vmem:[#allocation22 + $0x5c0] ss:$16 sps:$4 sm:$0xff]  }
 0xfc2   : > { %12571 = vmatprep.subr.bf16.mxu1 %v20298_v50  ;;  %v20367_v50 = vld [vmem:[#allocation22 + $0x5e4] ss:$16 sps:$4 sm:$0xff]  }
 0xfc3   : > { %12531 = vmatpush1.bf16.msra.mxu0 %v20293_v3  ;;  %v20370_v3 = vld [vmem:[#allocation22 + $0x5ec] ss:$16 sps:$4 sm:$0xff]  }
 0xfc4   : > { %12532 = vmatprep.subr.bf16.mxu0 %v20301_v37  ;;  %v20368_v37 = vld [vmem:[#allocation22 + $0x5e8] ss:$16 sps:$4 sm:$0xff]  }
 0xfc5   : > { %12572 = vmatpush1.bf16.msra.mxu1 %v20296_v54  ;;  %v20365_v54 = vld [vmem:[#allocation22 + $0x5e0] ss:$16 sps:$4 sm:$0xff]  }
 0xfc6   : > { %12573 = vmatprep.subr.bf16.mxu1 %v20304_v62  ;;  %v20373_v62 = vld [vmem:[#allocation22 + $0x604] ss:$16 sps:$4 sm:$0xff]  }
 0xfc7   : > { %12533 = vmatpush1.bf16.msra.mxu0 %v20299_v47  ;;  %v20376_v47 = vld [vmem:[#allocation22 + $0x60c] ss:$16 sps:$4 sm:$0xff]  }
 0xfc8   : > { %12534 = vmatprep.subr.bf16.mxu0 %v20307_v39  ;;  %v20371_v39 = vld [vmem:[#allocation22 + $0x600] ss:$16 sps:$4 sm:$0xff]  }
 0xfc9   : > { %12574 = vmatpush1.bf16.msra.mxu1 %v20302_v60  ;;  %v12610_v60 = vpack.c.bf16 %v24950_v9, %v24950_v9  ;;  %v20383_v9 = vld [vmem:[#allocation22 + $0x640] ss:$16 sps:$4 sm:$0xff]  }
 0xfca   : > { %12575 = vmatprep.subr.bf16.mxu1 %v20310_v28  ;;  %v20374_v28 = vld [vmem:[#allocation22 + $0x608] ss:$16 sps:$4 sm:$0xff]  }
 0xfcb   : > { %12535 = vmatpush1.bf16.msra.mxu0 %v20305_v29  ;;  %v20379_v29 = vld [vmem:[#allocation22 + $0x624] ss:$16 sps:$4 sm:$0xff]  }
 0xfcc   : > { %12536 = vmatprep.subr.bf16.mxu0 %v20313_v24  ;;  %v20377_v24 = vld [vmem:[#allocation22 + $0x620] ss:$16 sps:$4 sm:$0xff]  }
 0xfcd   : > { %12576 = vmatpush1.bf16.msra.mxu1 %v20308_v32  ;;  %v20382_v32 = vld [vmem:[#allocation22 + $0x62c] ss:$16 sps:$4 sm:$0xff]  }
 0xfce   : > { %12577 = vmatprep.subr.bf16.mxu1 %v20316_v4  ;;  %v20380_v4 = vld [vmem:[#allocation22 + $0x628] ss:$16 sps:$4 sm:$0xff]  }
 0xfcf   : > { %12537 = vmatpush1.bf16.msra.mxu0 %v20311_v5  ;;  %v20385_v5 = vld [vmem:[#allocation22 + $0x644] ss:$16 sps:$4 sm:$0xff]  }
 0xfd0   : > { %12538 = vmatprep.subr.bf16.mxu0 %v20319_v36  ;;  %v20386_v36 = vld [vmem:[#allocation22 + $0x648] ss:$16 sps:$4 sm:$0xff]  }
 0xfd1   : > { %12578 = vmatpush1.bf16.msra.mxu1 %v20314_v10  ;;  %v20388_v10 = vld [vmem:[#allocation22 + $0x64c] ss:$16 sps:$4 sm:$0xff]  }
 0xfd2   : > { %12579 = vmatprep.subr.bf16.mxu1 %v20322_v52  ;;  %v20391_v52 = vld [vmem:[#allocation22 + $0x664] ss:$16 sps:$4 sm:$0xff]  }
 0xfd3   : > { %12539 = vmatpush1.bf16.msra.mxu0 %v20317_v15  ;;  %v20394_v15 = vld [vmem:[#allocation22 + $0x66c] ss:$16 sps:$4 sm:$0xff]  }
 0xfd4   : > { %12803 = vmatprep.subr.bf16.mxu0 %v20325_v30  ;;  %v20392_v30 = vld [vmem:[#allocation22 + $0x668] ss:$16 sps:$4 sm:$0xff]  }
 0xfd5   : > { %12580 = vmatpush1.bf16.msra.mxu1 %v20320_v58  ;;  %v20389_v58 = vld [vmem:[#allocation22 + $0x660] ss:$16 sps:$4 sm:$0xff]  }
 0xfd6   : > { %12844 = vmatprep.subr.bf16.mxu1 %v20328_v46  ;;  %12557 = vmatmul.mubr.bf16.vlgmr.msra.gmra.mrb[16].mxu0 %v12331_v2  ;;  %v20397_v46 = vld [vmem:[#allocation22 + $0x684] ss:$16 sps:$4 sm:$0xff]  }
 0xfd7   : > { %12804 = vmatpush1.bf16.msra.mxu0 %v20323_v34  ;;  %12835 = vmatprep.mubr.bf16.mxu0 %v21651_v48  ;;  %v20395_v34 = vld [vmem:[#allocation22 + $0x680] ss:$16 sps:$4 sm:$0xff]  }
 0xfd8   : > { %12598 = vmatmul.mubr.bf16.vlgmr.msra.gmra.mrb[16].mxu1 %v12331_v2  ;;  %12805 = vmatprep.subr.bf16.mxu0 %v20331_v16  ;;  %v20400_v2 = vld [vmem:[#allocation22 + $0x68c] ss:$16 sps:$4 sm:$0xff]   ;;  %v20403_v16 = vld [vmem:[#allocation22 + $0x6a4] ss:$16 sps:$4 sm:$0xff]  }
 0xfd9   : > { %12845 = vmatpush1.bf16.msra.mxu1 %v20326_v7  ;;  %12876 = vmatprep.mubr.bf16.mxu1 %v21651_v48  ;;  %v20398_v7 = vld [vmem:[#allocation22 + $0x688] ss:$16 sps:$4 sm:$0xff]  }
 0xfda   : > { %12846 = vmatprep.subr.bf16.mxu1 %v20334_v17  ;;  %v20406_v17 = vld [vmem:[#allocation22 + $0x6ac] ss:$16 sps:$4 sm:$0xff]  }
 0xfdb   : > { %12806 = vmatpush1.bf16.msra.mxu0 %v20329_v61  ;;  %v20401_v61 = vld [vmem:[#allocation22 + $0x6a0] ss:$16 sps:$4 sm:$0xff]  }
 0xfdc   : > { %12807 = vmatprep.subr.bf16.mxu0 %v20337_v42  ;;  %v20409_v42 = vld [vmem:[#allocation22 + $0x6c4] ss:$16 sps:$4 sm:$0xff]  }
 0xfdd   : > { %12847 = vmatpush1.bf16.msra.mxu1 %v20332_v59  ;;  %v20404_v59 = vld [vmem:[#allocation22 + $0x6a8] ss:$16 sps:$4 sm:$0xff]  }
 0xfde   : > { %12848 = vmatprep.subr.bf16.mxu1 %v20340_v38  ;;  %v20412_v38 = vld [vmem:[#allocation22 + $0x6cc] ss:$16 sps:$4 sm:$0xff]  }
 0xfdf   : > { %12808 = vmatpush1.bf16.msra.mxu0 %v20335_v0  ;;  %v20407_v0 = vld [vmem:[#allocation22 + $0x6c0] ss:$16 sps:$4 sm:$0xff]  }
 0xfe0   : > { %12809 = vmatprep.subr.bf16.mxu0 %v20343_v57  ;;  %v20415_v57 = vld [vmem:[#allocation22 + $0x6e4] ss:$16 sps:$4 sm:$0xff]  }
 0xfe1   : > { %12849 = vmatpush1.bf16.msra.mxu1 %v20338_v33  ;;  %v20410_v33 = vld [vmem:[#allocation22 + $0x6c8] ss:$16 sps:$4 sm:$0xff]  }
 0xfe2   : > { %12850 = vmatprep.subr.bf16.mxu1 %v20346_v51  ;;  %v20418_v51 = vld [vmem:[#allocation22 + $0x6ec] ss:$16 sps:$4 sm:$0xff]  }
 0xfe3   : > { %12810 = vmatpush1.bf16.msra.mxu0 %v20341_v35  ;;  %v20413_v35 = vld [vmem:[#allocation22 + $0x6e0] ss:$16 sps:$4 sm:$0xff]  }
 0xfe4   : > { %12811 = vmatprep.subr.bf16.mxu0 %v20349_v19  ;;  %v20421_v19 = vld [vmem:[#allocation22 + $0x704] ss:$16 sps:$4 sm:$0xff]  }
 0xfe5   : > { %12851 = vmatpush1.bf16.msra.mxu1 %v20344_v55  ;;  %v20416_v55 = vld [vmem:[#allocation22 + $0x6e8] ss:$16 sps:$4 sm:$0xff]  }
 0xfe6   : > { %12852 = vmatprep.subr.bf16.mxu1 %v20352_v6  ;;  %v20424_v6 = vld [vmem:[#allocation22 + $0x70c] ss:$16 sps:$4 sm:$0xff]  }
 0xfe7   : > { %12812 = vmatpush1.bf16.msra.mxu0 %v20347_v49  ;;  %v12889_v49 = vpack.c.bf16 %v24957_v12, %v24957_v12  ;;  %v20431_v12 = vld [vmem:[#allocation22 + $0x740] ss:$16 sps:$4 sm:$0xff]  }
 0xfe8   : > { %12813 = vmatprep.subr.bf16.mxu0 %v20355_v26  ;;  %v20422_v26 = vld [vmem:[#allocation22 + $0x708] ss:$16 sps:$4 sm:$0xff]  }
 0xfe9   : > { %12853 = vmatpush1.bf16.msra.mxu1 %v20350_v18  ;;  %v20419_v18 = vld [vmem:[#allocation22 + $0x700] ss:$16 sps:$4 sm:$0xff]  }
 0xfea   : > { %12854 = vmatprep.subr.bf16.mxu1 %v20358_v20  ;;  %v20427_v20 = vld [vmem:[#allocation22 + $0x724] ss:$16 sps:$4 sm:$0xff]  }
 0xfeb   : > { %12814 = vmatpush1.bf16.msra.mxu0 %v20353_v45  ;;  %v20430_v45 = vld [vmem:[#allocation22 + $0x72c] ss:$16 sps:$4 sm:$0xff]  }
 0xfec   : > { %12815 = vmatprep.subr.bf16.mxu0 %v20361_v22  ;;  %v20428_v22 = vld [vmem:[#allocation22 + $0x728] ss:$16 sps:$4 sm:$0xff]  }
 0xfed   : > { %12855 = vmatpush1.bf16.msra.mxu1 %v20356_v63  ;;  %v20425_v63 = vld [vmem:[#allocation22 + $0x720] ss:$16 sps:$4 sm:$0xff]  }
 0xfee   : > { %12856 = vmatprep.subr.bf16.mxu1 %v20364_v31  ;;  %v20433_v31 = vld [vmem:[#allocation22 + $0x744] ss:$16 sps:$4 sm:$0xff]  }
 0xfef   : > { %12816 = vmatpush1.bf16.msra.mxu0 %v20359_v21  ;;  %v20436_v21 = vld [vmem:[#allocation22 + $0x74c] ss:$16 sps:$4 sm:$0xff]  }
 0xff0   : > { %12817 = vmatprep.subr.bf16.mxu0 %v20367_v50  ;;  %v20439_v50 = vld [vmem:[#allocation22 + $0x764] ss:$16 sps:$4 sm:$0xff]  }
 0xff1   : > { %12857 = vmatpush1.bf16.msra.mxu1 %v20362_v1  ;;  %v20434_v1 = vld [vmem:[#allocation22 + $0x748] ss:$16 sps:$4 sm:$0xff]  }
 0xff2   : > { %12858 = vmatprep.subr.bf16.mxu1 %v20370_v3  ;;  %v20442_v3 = vld [vmem:[#allocation22 + $0x76c] ss:$16 sps:$4 sm:$0xff]  }
 0xff3   : > { %12818 = vmatpush1.bf16.msra.mxu0 %v20365_v54  ;;  %v20437_v54 = vld [vmem:[#allocation22 + $0x760] ss:$16 sps:$4 sm:$0xff]  }
 0xff4   : > { %13082 = vmatprep.subr.bf16.mxu0 %v20373_v62  ;;  %v20445_v62 = vld [vmem:[#allocation22 + $0x784] ss:$16 sps:$4 sm:$0xff]  }
 0xff5   : > { %12859 = vmatpush1.bf16.msra.mxu1 %v20368_v37  ;;  %v20440_v37 = vld [vmem:[#allocation22 + $0x768] ss:$16 sps:$4 sm:$0xff]  }
 0xff6   : > { %13123 = vmatprep.subr.bf16.mxu1 %v20376_v47  ;;  %12836 = vmatmul.mubr.bf16.vlgmr.msra.gmra.mrb[20].mxu0 %v12610_v60  ;;  %v20448_v47 = vld [vmem:[#allocation22 + $0x78c] ss:$16 sps:$4 sm:$0xff]  }
 0xff7   : > { %13083 = vmatpush1.bf16.msra.mxu0 %v20371_v39  ;;  %13114 = vmatprep.mubr.bf16.mxu0 %v21651_v48  ;;  %v20446_v39 = vld [vmem:[#allocation22 + $0x788] ss:$16 sps:$4 sm:$0xff]  }
 0xff8   : > { %12877 = vmatmul.mubr.bf16.vlgmr.msra.gmra.mrb[20].mxu1 %v12610_v60  ;;  %13084 = vmatprep.subr.bf16.mxu0 %v20379_v29  ;;  %v20443_v60 = vld [vmem:[#allocation22 + $0x780] ss:$16 sps:$4 sm:$0xff]   ;;  %v20454_v29 = vld [vmem:[#allocation22 + $0x7ac] ss:$16 sps:$4 sm:$0xff]  }
 0xff9   : > { %13124 = vmatpush1.bf16.msra.mxu1 %v20374_v28  ;;  %13155 = vmatprep.mubr.bf16.mxu1 %v21651_v48  ;;  %v20451_v28 = vld [vmem:[#allocation22 + $0x7a4] ss:$16 sps:$4 sm:$0xff]  }
 0xffa   : > { %13125 = vmatprep.subr.bf16.mxu1 %v20382_v32  ;;  %v20449_v32 = vld [vmem:[#allocation22 + $0x7a0] ss:$16 sps:$4 sm:$0xff]  }
 0xffb   : > { %13085 = vmatpush1.bf16.msra.mxu0 %v20377_v24  ;;  %v20452_v24 = vld [vmem:[#allocation22 + $0x7a8] ss:$16 sps:$4 sm:$0xff]  }
 0xffc   : > { %13086 = vmatprep.subr.bf16.mxu0 %v20385_v5  ;;  %v20460_v5 = vld [vmem:[#allocation22 + $0x7cc] ss:$16 sps:$4 sm:$0xff]  }
 0xffd   : > { %13126 = vmatpush1.bf16.msra.mxu1 %v20380_v4  ;;  %v20457_v4 = vld [vmem:[#allocation22 + $0x7c4] ss:$16 sps:$4 sm:$0xff]  }
 0xffe   : > { %13127 = vmatprep.subr.bf16.mxu1 %v20388_v10 }
 0xfff   : > { %13087 = vmatpush1.bf16.msra.mxu0 %v20383_v9 }
0x1000   : > { %13088 = vmatprep.subr.bf16.mxu0 %v20391_v52 }
0x1001   : > { %13128 = vmatpush1.bf16.msra.mxu1 %v20386_v36 }
0x1002   : > { %13129 = vmatprep.subr.bf16.mxu1 %v20394_v15  ;;  %v20455_v15 = vld [vmem:[#allocation22 + $0x7c0] ss:$16 sps:$4 sm:$0xff]  }
0x1003   : > { %13089 = vmatpush1.bf16.msra.mxu0 %v20389_v58 }
0x1004   : > { %13090 = vmatprep.subr.bf16.mxu0 %v20397_v46  ;;  %v20458_v46 = vld [vmem:[#allocation22 + $0x7c8] ss:$16 sps:$4 sm:$0xff]  }
0x1005   : > { %13130 = vmatpush1.bf16.msra.mxu1 %v20392_v30 }
0x1006   : > { %13131 = vmatprep.subr.bf16.mxu1 %v20400_v2 }
0x1007   : > { %13091 = vmatpush1.bf16.msra.mxu0 %v20395_v34 }
0x1008   : > { %13092 = vmatprep.subr.bf16.mxu0 %v20403_v16  ;;  %v20466_v16 = vld [vmem:[#allocation22 + $0x7ec] ss:$16 sps:$4 sm:$0xff]  }
0x1009   : > { %13132 = vmatpush1.bf16.msra.mxu1 %v20398_v7  ;;  %v20463_v7 = vld [vmem:[#allocation22 + $0x7e4] ss:$16 sps:$4 sm:$0xff]  }
0x100a   : > { %13133 = vmatprep.subr.bf16.mxu1 %v20406_v17  ;;  %v20461_v17 = vld [vmem:[#allocation22 + $0x7e0] ss:$16 sps:$4 sm:$0xff]  }
0x100b   : > { %13093 = vmatpush1.bf16.msra.mxu0 %v20401_v61  ;;  %v20464_v61 = vld [vmem:[#allocation22 + $0x7e8] ss:$16 sps:$4 sm:$0xff]  }
0x100c   : > { %13094 = vmatprep.subr.bf16.mxu0 %v20409_v42  ;;  %v20472_v42 = vld [vmem:[#allocation22 + $0x80c] ss:$16 sps:$4 sm:$0xff]  }
0x100d   : > { %13134 = vmatpush1.bf16.msra.mxu1 %v20404_v59  ;;  %v20469_v59 = vld [vmem:[#allocation22 + $0x804] ss:$16 sps:$4 sm:$0xff]  }
0x100e   : > { %13135 = vmatprep.subr.bf16.mxu1 %v20412_v38  ;;  %v13168_v38 = vpack.c.bf16 %v24962_v40, %v24962_v40  ;;  %v20479_v40 = vld [vmem:[#allocation22 + $0x840] ss:$16 sps:$4 sm:$0xff]  }
0x100f   : > { %13095 = vmatpush1.bf16.msra.mxu0 %v20407_v0  ;;  %v20467_v0 = vld [vmem:[#allocation22 + $0x800] ss:$16 sps:$4 sm:$0xff]  }
0x1010   : > { %13096 = vmatprep.subr.bf16.mxu0 %v20415_v57  ;;  %v20475_v57 = vld [vmem:[#allocation22 + $0x824] ss:$16 sps:$4 sm:$0xff]  }
0x1011   : > { %13136 = vmatpush1.bf16.msra.mxu1 %v20410_v33  ;;  %v20470_v33 = vld [vmem:[#allocation22 + $0x808] ss:$16 sps:$4 sm:$0xff]  }
0x1012   : > { %13137 = vmatprep.subr.bf16.mxu1 %v20418_v51  ;;  %v20478_v51 = vld [vmem:[#allocation22 + $0x82c] ss:$16 sps:$4 sm:$0xff]  }
0x1013   : > { %13097 = vmatpush1.bf16.msra.mxu0 %v20413_v35  ;;  %v20473_v35 = vld [vmem:[#allocation22 + $0x820] ss:$16 sps:$4 sm:$0xff]  }
0x1014   : > { %13361 = vmatprep.subr.bf16.mxu0 %v20421_v19  ;;  %v20481_v19 = vld [vmem:[#allocation22 + $0x844] ss:$16 sps:$4 sm:$0xff]  }
0x1015   : > { %13138 = vmatpush1.bf16.msra.mxu1 %v20416_v55  ;;  %v20476_v55 = vld [vmem:[#allocation22 + $0x828] ss:$16 sps:$4 sm:$0xff]  }
0x1016   : > { %13402 = vmatprep.subr.bf16.mxu1 %v20424_v6  ;;  %13115 = vmatmul.mubr.bf16.vlgmr.msra.gmra.mrb[24].mxu0 %v12889_v49  ;;  %v20484_v6 = vld [vmem:[#allocation22 + $0x84c] ss:$16 sps:$4 sm:$0xff]  }
0x1017   : > { %13362 = vmatpush1.bf16.msra.mxu0 %v20419_v18  ;;  %13393 = vmatprep.mubr.bf16.mxu0 %v21651_v48  ;;  %v20487_v18 = vld [vmem:[#allocation22 + $0x864] ss:$16 sps:$4 sm:$0xff]  }
0x1018   : > { %13156 = vmatmul.mubr.bf16.vlgmr.msra.gmra.mrb[24].mxu1 %v12889_v49  ;;  %13363 = vmatprep.subr.bf16.mxu0 %v20427_v20  ;;  %v20482_v49 = vld [vmem:[#allocation22 + $0x848] ss:$16 sps:$4 sm:$0xff]   ;;  %v20485_v20 = vld [vmem:[#allocation22 + $0x860] ss:$16 sps:$4 sm:$0xff]  }
0x1019   : > { %13403 = vmatpush1.bf16.msra.mxu1 %v20422_v26  ;;  %13434 = vmatprep.mubr.bf16.mxu1 %v21651_v48  ;;  %v20490_v26 = vld [vmem:[#allocation22 + $0x86c] ss:$16 sps:$4 sm:$0xff]  }
0x101a   : > { %13404 = vmatprep.subr.bf16.mxu1 %v20430_v45  ;;  %v20488_v45 = vld [vmem:[#allocation22 + $0x868] ss:$16 sps:$4 sm:$0xff]  }
0x101b   : > { %13364 = vmatpush1.bf16.msra.mxu0 %v20425_v63  ;;  %v20493_v63 = vld [vmem:[#allocation22 + $0x884] ss:$16 sps:$4 sm:$0xff]  }
0x101c   : > { %13365 = vmatprep.subr.bf16.mxu0 %v20433_v31  ;;  %v20491_v31 = vld [vmem:[#allocation22 + $0x880] ss:$16 sps:$4 sm:$0xff]  }
0x101d   : > { %13405 = vmatpush1.bf16.msra.mxu1 %v20428_v22  ;;  %v20496_v22 = vld [vmem:[#allocation22 + $0x88c] ss:$16 sps:$4 sm:$0xff]  }
0x101e   : > { %13406 = vmatprep.subr.bf16.mxu1 %v20436_v21  ;;  %v20494_v21 = vld [vmem:[#allocation22 + $0x888] ss:$16 sps:$4 sm:$0xff]  }
0x101f   : > { %13366 = vmatpush1.bf16.msra.mxu0 %v20431_v12  ;;  %v20499_v12 = vld [vmem:[#allocation22 + $0x8a4] ss:$16 sps:$4 sm:$0xff]  }
0x1020   : > { %13367 = vmatprep.subr.bf16.mxu0 %v20439_v50  ;;  %v20497_v50 = vld [vmem:[#allocation22 + $0x8a0] ss:$16 sps:$4 sm:$0xff]  }
0x1021   : > { %13407 = vmatpush1.bf16.msra.mxu1 %v20434_v1  ;;  %v20502_v1 = vld [vmem:[#allocation22 + $0x8ac] ss:$16 sps:$4 sm:$0xff]  }
0x1022   : > { %13408 = vmatprep.subr.bf16.mxu1 %v20442_v3  ;;  %v20500_v3 = vld [vmem:[#allocation22 + $0x8a8] ss:$16 sps:$4 sm:$0xff]  }
0x1023   : > { %13368 = vmatpush1.bf16.msra.mxu0 %v20437_v54  ;;  %v20505_v54 = vld [vmem:[#allocation22 + $0x8c4] ss:$16 sps:$4 sm:$0xff]  }
0x1024   : > { %13369 = vmatprep.subr.bf16.mxu0 %v20445_v62 }
0x1025   : > { %13409 = vmatpush1.bf16.msra.mxu1 %v20440_v37  ;;  %v20508_v37 = vld [vmem:[#allocation22 + $0x8cc] ss:$16 sps:$4 sm:$0xff]  }
0x1026   : > { %13410 = vmatprep.subr.bf16.mxu1 %v20448_v47 }
0x1027   : > { %13370 = vmatpush1.bf16.msra.mxu0 %v20443_v60  ;;  %v20503_v60 = vld [vmem:[#allocation22 + $0x8c0] ss:$16 sps:$4 sm:$0xff]  }
0x1028   : > { %13371 = vmatprep.subr.bf16.mxu0 %v20451_v28 }
0x1029   : > { %13411 = vmatpush1.bf16.msra.mxu1 %v20446_v39  ;;  %v25068_v10 = vpop.f32.mrb[0].mxu0  ;;  %v20506_v39 = vld [vmem:[#allocation22 + $0x8c8] ss:$16 sps:$4 sm:$0xff]  }
0x102a   : > { %13412 = vmatprep.subr.bf16.mxu1 %v20454_v29  ;;  %v25072_v36 = vpop.f32.mrb[1].mxu0 }
0x102b   : > { %v25070_v9 = vpop.f32.mrb[0].mxu1  ;;  %v11487_v58 = vpop.f32.mrb[2].mxu0  ;;  %13372 = vmatpush1.bf16.msra.mxu0 %v20449_v32 }
0x102c   : > { %v25074_v52 = vpop.f32.mrb[1].mxu1  ;;  %v11488_v2 = vpop.f32.mrb[3].mxu0  ;;  %13373 = vmatprep.subr.bf16.mxu0 %v20457_v4 }
0x102d   : > { %v11528_v30 = vpop.f32.mrb[2].mxu1  ;;  %13413 = vmatpush1.bf16.msra.mxu1 %v20452_v24  ;;  %v20514_v2 = vld [vmem:[#allocation22 + $0x8ec] ss:$16 sps:$4 sm:$0xff]  }
0x102e   : > { %v11529_v34 = vpop.f32.mrb[3].mxu1  ;;  %13414 = vmatprep.subr.bf16.mxu1 %v20460_v5 }
0x102f   : > { %13374 = vmatpush1.bf16.msra.mxu0 %v20455_v15  ;;  %v20512_v34 = vld [vmem:[#allocation22 + $0x8e8] ss:$16 sps:$4 sm:$0xff]  }
0x1030   : > { %13375 = vmatprep.subr.bf16.mxu0 %v20463_v7  ;;  %v20520_v7 = vld [vmem:[#allocation22 + $0x90c] ss:$16 sps:$4 sm:$0xff]  }
0x1031   : > { %13415 = vmatpush1.bf16.msra.mxu1 %v20458_v46 }
0x1032   : > { %13416 = vmatprep.subr.bf16.mxu1 %v20466_v16  ;;  %v20518_v16 = vld [vmem:[#allocation22 + $0x908] ss:$16 sps:$4 sm:$0xff]  }
0x1033   : > { %13376 = vmatpush1.bf16.msra.mxu0 %v20461_v17  ;;  %v13447_v17 = vpack.c.bf16 %v24969_v8, %v24969_v8  ;;  %v20527_v8 = vld [vmem:[#allocation22 + $0x940] ss:$16 sps:$4 sm:$0xff]  }
0x1034   : > { %13640 = vmatprep.subr.bf16.mxu0 %v20469_v59  ;;  %v20526_v59 = vld [vmem:[#allocation22 + $0x92c] ss:$16 sps:$4 sm:$0xff]  }
0x1035   : > { %13417 = vmatpush1.bf16.msra.mxu1 %v20464_v61  ;;  %v20523_v61 = vld [vmem:[#allocation22 + $0x924] ss:$16 sps:$4 sm:$0xff]  }
0x1036   : > { %13681 = vmatprep.subr.bf16.mxu1 %v20472_v42  ;;  %13394 = vmatmul.mubr.bf16.vlgmr.msra.gmra.mrb[28].mxu0 %v13168_v38  ;;  %v20521_v42 = vld [vmem:[#allocation22 + $0x920] ss:$16 sps:$4 sm:$0xff]  }
0x1037   : > { %13641 = vmatpush1.bf16.msra.mxu0 %v20467_v0  ;;  %13672 = vmatprep.mubr.bf16.mxu0 %v21651_v48  ;;  %v20529_v0 = vld [vmem:[#allocation22 + $0x944] ss:$16 sps:$4 sm:$0xff]  }
0x1038   : > { %13435 = vmatmul.mubr.bf16.vlgmr.msra.gmra.mrb[28].mxu1 %v13168_v38  ;;  %13642 = vmatprep.subr.bf16.mxu0 %v20475_v57  ;;  %v20524_v38 = vld [vmem:[#allocation22 + $0x928] ss:$16 sps:$4 sm:$0xff]  }
0x1039   : > { %13682 = vmatpush1.bf16.msra.mxu1 %v20470_v33  ;;  %13713 = vmatprep.mubr.bf16.mxu1 %v21651_v48  ;;  %v20532_v33 = vld [vmem:[#allocation22 + $0x94c] ss:$16 sps:$4 sm:$0xff]   ;;  %v20530_v57 = vld [vmem:[#allocation22 + $0x948] ss:$16 sps:$4 sm:$0xff]  }
0x103a   : > { %13683 = vmatprep.subr.bf16.mxu1 %v20478_v51  ;;  %v20535_v51 = vld [vmem:[#allocation22 + $0x964] ss:$16 sps:$4 sm:$0xff]  }
0x103b   : > { %13643 = vmatpush1.bf16.msra.mxu0 %v20473_v35  ;;  %v20538_v35 = vld [vmem:[#allocation22 + $0x96c] ss:$16 sps:$4 sm:$0xff]  }
0x103c   : > { %13644 = vmatprep.subr.bf16.mxu0 %v20481_v19  ;;  %v20536_v19 = vld [vmem:[#allocation22 + $0x968] ss:$16 sps:$4 sm:$0xff]  }
0x103d   : > { %13684 = vmatpush1.bf16.msra.mxu1 %v20476_v55  ;;  %v20533_v55 = vld [vmem:[#allocation22 + $0x960] ss:$16 sps:$4 sm:$0xff]  }
0x103e   : > { %13685 = vmatprep.subr.bf16.mxu1 %v20484_v6  ;;  %v20541_v6 = vld [vmem:[#allocation22 + $0x984] ss:$16 sps:$4 sm:$0xff]  }
0x103f   : > { %13645 = vmatpush1.bf16.msra.mxu0 %v20479_v40  ;;  %v20544_v40 = vld [vmem:[#allocation22 + $0x98c] ss:$16 sps:$4 sm:$0xff]  }
0x1040   : > { %13646 = vmatprep.subr.bf16.mxu0 %v20487_v18  ;;  %v20542_v18 = vld [vmem:[#allocation22 + $0x988] ss:$16 sps:$4 sm:$0xff]  }
0x1041   : > { %13686 = vmatpush1.bf16.msra.mxu1 %v20482_v49  ;;  %v20539_v49 = vld [vmem:[#allocation22 + $0x980] ss:$16 sps:$4 sm:$0xff]  }
0x1042   : > { %13687 = vmatprep.subr.bf16.mxu1 %v20490_v26  ;;  %v20547_v26 = vld [vmem:[#allocation22 + $0x9a4] ss:$16 sps:$4 sm:$0xff]  }
0x1043   : > { %13647 = vmatpush1.bf16.msra.mxu0 %v20485_v20  ;;  %v20550_v20 = vld [vmem:[#allocation22 + $0x9ac] ss:$16 sps:$4 sm:$0xff]  }
0x1044   : > { %13648 = vmatprep.subr.bf16.mxu0 %v20493_v63  ;;  %v20548_v63 = vld [vmem:[#allocation22 + $0x9a8] ss:$16 sps:$4 sm:$0xff]  }
0x1045   : > { %13688 = vmatpush1.bf16.msra.mxu1 %v20488_v45  ;;  %v20545_v45 = vld [vmem:[#allocation22 + $0x9a0] ss:$16 sps:$4 sm:$0xff]  }
0x1046   : > { %13689 = vmatprep.subr.bf16.mxu1 %v20496_v22  ;;  %v20553_v22 = vld [vmem:[#allocation22 + $0x9c4] ss:$16 sps:$4 sm:$0xff]  }
0x1047   : > { %13649 = vmatpush1.bf16.msra.mxu0 %v20491_v31  ;;  %v20556_v31 = vld [vmem:[#allocation22 + $0x9cc] ss:$16 sps:$4 sm:$0xff]  }
0x1048   : > { %13650 = vmatprep.subr.bf16.mxu0 %v20499_v12 }
0x1049   : > { %13690 = vmatpush1.bf16.msra.mxu1 %v20494_v21  ;;  %v11725_v62 = vpop.f32.mrb[4].mxu0 }
0x104a   : > { %13691 = vmatprep.subr.bf16.mxu1 %v20502_v1  ;;  %v25081_v28 = vadd.f32 %v11725_v62, %v25068_v10  ;;  %v11727_v32 = vpop.f32.mrb[5].mxu0  ;;  %v20511_v10 = vld [vmem:[#allocation22 + $0x8e4] ss:$16 sps:$4 sm:$0xff]   ;;  %v20551_v1 = vld [vmem:[#allocation22 + $0x9c0] ss:$16 sps:$4 sm:$0xff]  }
0x104b   : > { %v11766_v47 = vpop.f32.mrb[4].mxu1  ;;  %v25087_v4 = vadd.f32 %v11727_v32, %v25072_v36  ;;  %v11729_v15 = vpop.f32.mrb[6].mxu0  ;;  %13651 = vmatpush1.bf16.msra.mxu0 %v20497_v50  ;;  %v20517_v36 = vld [vmem:[#allocation22 + $0x904] ss:$16 sps:$4 sm:$0xff]   ;;  %v20554_v50 = vld [vmem:[#allocation22 + $0x9c8] ss:$16 sps:$4 sm:$0xff]  }
0x104c   : > { %v25084_v29 = vadd.f32 %v11766_v47, %v25070_v9  ;;  %v11768_v24 = vpop.f32.mrb[5].mxu1  ;;  %v11730_v30 = vpop.f32.mrb[7].mxu0  ;;  %13652 = vmatprep.subr.bf16.mxu0 %v20505_v54  ;;  %v20509_v9 = vld [vmem:[#allocation22 + $0x8e0] ss:$16 sps:$4 sm:$0xff]  }
0x104d   : > { %v25090_v5 = vadd.f32 %v11768_v24, %v25074_v52  ;;  %v11770_v58 = vpop.f32.mrb[6].mxu1  ;;  %13692 = vmatpush1.bf16.msra.mxu1 %v20500_v3  ;;  %v20515_v52 = vld [vmem:[#allocation22 + $0x900] ss:$16 sps:$4 sm:$0xff]   ;;  %v20560_v30 = vld [vmem:[#allocation22 + $0x9e8] ss:$16 sps:$4 sm:$0xff]  }
0x104e   : > { %v11771_v46 = vpop.f32.mrb[7].mxu1  ;;  %13693 = vmatprep.subr.bf16.mxu1 %v20508_v37  ;;  %v20562_v58 = vld [vmem:[#allocation22 + $0x9ec] ss:$16 sps:$4 sm:$0xff]  }
0x104f   : > { %13653 = vmatpush1.bf16.msra.mxu0 %v20503_v60  ;;  %v20568_v46 = vld [vmem:[#allocation22 + $0xa0c] ss:$16 sps:$4 sm:$0xff]  }
0x1050   : > { %13654 = vmatprep.subr.bf16.mxu0 %v20511_v10  ;;  %v20566_v10 = vld [vmem:[#allocation22 + $0xa08] ss:$16 sps:$4 sm:$0xff]  }
0x1051   : > { %13694 = vmatpush1.bf16.msra.mxu1 %v20506_v39 }
0x1052   : > { %13695 = vmatprep.subr.bf16.mxu1 %v20514_v2  ;;  %v13726_v2 = vpack.c.bf16 %v24974_v11, %v24974_v11  ;;  %v20575_v11 = vld [vmem:[#allocation22 + $0xa40] ss:$16 sps:$4 sm:$0xff]  }
0x1053   : > { %13655 = vmatpush1.bf16.msra.mxu0 %v20509_v9  ;;  %v20571_v9 = vld [vmem:[#allocation22 + $0xa24] ss:$16 sps:$4 sm:$0xff]  }
0x1054   : > { %13919 = vmatprep.subr.bf16.mxu0 %v20517_v36  ;;  %v20569_v36 = vld [vmem:[#allocation22 + $0xa20] ss:$16 sps:$4 sm:$0xff]  }
0x1055   : > { %13696 = vmatpush1.bf16.msra.mxu1 %v20512_v34  ;;  %v20574_v34 = vld [vmem:[#allocation22 + $0xa2c] ss:$16 sps:$4 sm:$0xff]  }
0x1056   : > { %13960 = vmatprep.subr.bf16.mxu1 %v20520_v7  ;;  %13673 = vmatmul.mubr.bf16.vlgmr.msra.gmra.mrb[32].mxu0 %v13447_v17  ;;  %v20572_v7 = vld [vmem:[#allocation22 + $0xa28] ss:$16 sps:$4 sm:$0xff]  }
0x1057   : > { %13920 = vmatpush1.bf16.msra.mxu0 %v20515_v52  ;;  %13951 = vmatprep.mubr.bf16.mxu0 %v21651_v48  ;;  %v20577_v52 = vld [vmem:[#allocation22 + $0xa44] ss:$16 sps:$4 sm:$0xff]  }
0x1058   : > { %13714 = vmatmul.mubr.bf16.vlgmr.msra.gmra.mrb[32].mxu1 %v13447_v17  ;;  %13921 = vmatprep.subr.bf16.mxu0 %v20523_v61  ;;  %v20578_v17 = vld [vmem:[#allocation22 + $0xa48] ss:$16 sps:$4 sm:$0xff]   ;;  %v20583_v61 = vld [vmem:[#allocation22 + $0xa64] ss:$16 sps:$4 sm:$0xff]  }
0x1059   : > { %13961 = vmatpush1.bf16.msra.mxu1 %v20518_v16  ;;  %13992 = vmatprep.mubr.bf16.mxu1 %v21651_v48  ;;  %v20580_v16 = vld [vmem:[#allocation22 + $0xa4c] ss:$16 sps:$4 sm:$0xff]  }
0x105a   : > { %13962 = vmatprep.subr.bf16.mxu1 %v20526_v59  ;;  %v20586_v59 = vld [vmem:[#allocation22 + $0xa6c] ss:$16 sps:$4 sm:$0xff]  }
0x105b   : > { %13922 = vmatpush1.bf16.msra.mxu0 %v20521_v42  ;;  %v20581_v42 = vld [vmem:[#allocation22 + $0xa60] ss:$16 sps:$4 sm:$0xff]  }
0x105c   : > { %13923 = vmatprep.subr.bf16.mxu0 %v20529_v0  ;;  %v20589_v0 = vld [vmem:[#allocation22 + $0xa84] ss:$16 sps:$4 sm:$0xff]  }
0x105d   : > { %13963 = vmatpush1.bf16.msra.mxu1 %v20524_v38  ;;  %v20584_v38 = vld [vmem:[#allocation22 + $0xa68] ss:$16 sps:$4 sm:$0xff]  }
0x105e   : > { %13964 = vmatprep.subr.bf16.mxu1 %v20532_v33  ;;  %v20592_v33 = vld [vmem:[#allocation22 + $0xa8c] ss:$16 sps:$4 sm:$0xff]  }
0x105f   : > { %13924 = vmatpush1.bf16.msra.mxu0 %v20527_v8  ;;  %v20587_v8 = vld [vmem:[#allocation22 + $0xa80] ss:$16 sps:$4 sm:$0xff]  }
0x1060   : > { %13925 = vmatprep.subr.bf16.mxu0 %v20535_v51  ;;  %v20595_v51 = vld [vmem:[#allocation22 + $0xaa4] ss:$16 sps:$4 sm:$0xff]  }
0x1061   : > { %13965 = vmatpush1.bf16.msra.mxu1 %v20530_v57  ;;  %v20590_v57 = vld [vmem:[#allocation22 + $0xa88] ss:$16 sps:$4 sm:$0xff]  }
0x1062   : > { %13966 = vmatprep.subr.bf16.mxu1 %v20538_v35  ;;  %v20598_v35 = vld [vmem:[#allocation22 + $0xaac] ss:$16 sps:$4 sm:$0xff]  }
0x1063   : > { %13926 = vmatpush1.bf16.msra.mxu0 %v20533_v55  ;;  %v20593_v55 = vld [vmem:[#allocation22 + $0xaa0] ss:$16 sps:$4 sm:$0xff]  }
0x1064   : > { %13927 = vmatprep.subr.bf16.mxu0 %v20541_v6  ;;  %v20601_v6 = vld [vmem:[#allocation22 + $0xac4] ss:$16 sps:$4 sm:$0xff]  }
0x1065   : > { %13967 = vmatpush1.bf16.msra.mxu1 %v20536_v19  ;;  %v20596_v19 = vld [vmem:[#allocation22 + $0xaa8] ss:$16 sps:$4 sm:$0xff]  }
0x1066   : > { %13968 = vmatprep.subr.bf16.mxu1 %v20544_v40  ;;  %v20604_v40 = vld [vmem:[#allocation22 + $0xacc] ss:$16 sps:$4 sm:$0xff]  }
0x1067   : > { %13928 = vmatpush1.bf16.msra.mxu0 %v20539_v49 }
0x1068   : > { %13929 = vmatprep.subr.bf16.mxu0 %v20547_v26  ;;  %v20599_v26 = vld [vmem:[#allocation22 + $0xac0] ss:$16 sps:$4 sm:$0xff]  }
0x1069   : > { %13969 = vmatpush1.bf16.msra.mxu1 %v20542_v18  ;;  %v12000_v21 = vpop.f32.mrb[8].mxu0 }
0x106a   : > { %13970 = vmatprep.subr.bf16.mxu1 %v20550_v20  ;;  %v25097_v3 = vadd.f32 %v12000_v21, %v25081_v28  ;;  %v12002_v37 = vpop.f32.mrb[9].mxu0  ;;  %v20559_v28 = vld [vmem:[#allocation22 + $0x9e4] ss:$16 sps:$4 sm:$0xff]   ;;  %v20602_v20 = vld [vmem:[#allocation22 + $0xac8] ss:$16 sps:$4 sm:$0xff]  }
0x106b   : > { %v12041_v12 = vpop.f32.mrb[8].mxu1  ;;  %v25103_v47 = vadd.f32 %v12002_v37, %v25087_v4  ;;  %v12004_v39 = vpop.f32.mrb[10].mxu0  ;;  %13930 = vmatpush1.bf16.msra.mxu0 %v20545_v45  ;;  %v20565_v4 = vld [vmem:[#allocation22 + $0xa04] ss:$16 sps:$4 sm:$0xff]  }
0x106c   : > { %v25100_v54 = vadd.f32 %v12041_v12, %v25084_v29  ;;  %v12043_v62 = vpop.f32.mrb[9].mxu1  ;;  %v12005_v24 = vpop.f32.mrb[11].mxu0  ;;  %13931 = vmatprep.subr.bf16.mxu0 %v20553_v22  ;;  %v20557_v29 = vld [vmem:[#allocation22 + $0x9e0] ss:$16 sps:$4 sm:$0xff]   ;;  %v20610_v39 = vld [vmem:[#allocation22 + $0xaec] ss:$16 sps:$4 sm:$0xff]  }
0x106d   : > { %v25106_v60 = vadd.f32 %v12043_v62, %v25090_v5  ;;  %v12045_v32 = vpop.f32.mrb[10].mxu1  ;;  %13971 = vmatpush1.bf16.msra.mxu1 %v20548_v63  ;;  %v20563_v5 = vld [vmem:[#allocation22 + $0xa00] ss:$16 sps:$4 sm:$0xff]   ;;  %v20616_v24 = vld [vmem:[#allocation22 + $0xb0c] ss:$16 sps:$4 sm:$0xff]  }
0x106e   : > { %v12046_v15 = vpop.f32.mrb[11].mxu1  ;;  %13972 = vmatprep.subr.bf16.mxu1 %v20556_v31  ;;  %v20608_v32 = vld [vmem:[#allocation22 + $0xae8] ss:$16 sps:$4 sm:$0xff]  }
0x106f   : > { %13932 = vmatpush1.bf16.msra.mxu0 %v20551_v1  ;;  %v20614_v15 = vld [vmem:[#allocation22 + $0xb08] ss:$16 sps:$4 sm:$0xff]  }
0x1070   : > { %13933 = vmatprep.subr.bf16.mxu0 %v20559_v28  ;;  %v14005_v28 = vpack.c.bf16 %v24981_v44, %v24981_v44  ;;  %v20623_v44 = vld [vmem:[#allocation22 + $0xb40] ss:$16 sps:$4 sm:$0xff]  }
0x1071   : > { %13973 = vmatpush1.bf16.msra.mxu1 %v20554_v50 }
0x1072   : > { %13974 = vmatprep.subr.bf16.mxu1 %v20562_v58  ;;  %v20619_v58 = vld [vmem:[#allocation22 + $0xb24] ss:$16 sps:$4 sm:$0xff]  }
0x1073   : > { %13934 = vmatpush1.bf16.msra.mxu0 %v20557_v29  ;;  %v20622_v29 = vld [vmem:[#allocation22 + $0xb2c] ss:$16 sps:$4 sm:$0xff]  }
0x1074   : > { %14198 = vmatprep.subr.bf16.mxu0 %v20565_v4  ;;  %v20620_v4 = vld [vmem:[#allocation22 + $0xb28] ss:$16 sps:$4 sm:$0xff]  }
0x1075   : > { %13975 = vmatpush1.bf16.msra.mxu1 %v20560_v30  ;;  %v20617_v30 = vld [vmem:[#allocation22 + $0xb20] ss:$16 sps:$4 sm:$0xff]  }
0x1076   : > { %14239 = vmatprep.subr.bf16.mxu1 %v20568_v46  ;;  %13952 = vmatmul.mubr.bf16.vlgmr.msra.gmra.mrb[36].mxu0 %v13726_v2  ;;  %v20625_v46 = vld [vmem:[#allocation22 + $0xb44] ss:$16 sps:$4 sm:$0xff]  }
0x1077   : > { %14199 = vmatpush1.bf16.msra.mxu0 %v20563_v5  ;;  %14230 = vmatprep.mubr.bf16.mxu0 %v21651_v48  ;;  %v20628_v5 = vld [vmem:[#allocation22 + $0xb4c] ss:$16 sps:$4 sm:$0xff]  }
0x1078   : > { %13993 = vmatmul.mubr.bf16.vlgmr.msra.gmra.mrb[36].mxu1 %v13726_v2  ;;  %14200 = vmatprep.subr.bf16.mxu0 %v20571_v9  ;;  %v20631_v2 = vld [vmem:[#allocation22 + $0xb64] ss:$16 sps:$4 sm:$0xff]   ;;  %v20634_v9 = vld [vmem:[#allocation22 + $0xb6c] ss:$16 sps:$4 sm:$0xff]  }
0x1079   : > { %14240 = vmatpush1.bf16.msra.mxu1 %v20566_v10  ;;  %14271 = vmatprep.mubr.bf16.mxu1 %v21651_v48  ;;  %v20626_v10 = vld [vmem:[#allocation22 + $0xb48] ss:$16 sps:$4 sm:$0xff]  }
0x107a   : > { %14241 = vmatprep.subr.bf16.mxu1 %v20574_v34  ;;  %v20629_v34 = vld [vmem:[#allocation22 + $0xb60] ss:$16 sps:$4 sm:$0xff]  }
0x107b   : > { %14201 = vmatpush1.bf16.msra.mxu0 %v20569_v36  ;;  %v20632_v36 = vld [vmem:[#allocation22 + $0xb68] ss:$16 sps:$4 sm:$0xff]  }
0x107c   : > { %14202 = vmatprep.subr.bf16.mxu0 %v20577_v52  ;;  %v20640_v52 = vld [vmem:[#allocation22 + $0xb8c] ss:$16 sps:$4 sm:$0xff]  }
0x107d   : > { %14242 = vmatpush1.bf16.msra.mxu1 %v20572_v7  ;;  %v20637_v7 = vld [vmem:[#allocation22 + $0xb84] ss:$16 sps:$4 sm:$0xff]  }
0x107e   : > { %14243 = vmatprep.subr.bf16.mxu1 %v20580_v16  ;;  %v20635_v16 = vld [vmem:[#allocation22 + $0xb80] ss:$16 sps:$4 sm:$0xff]  }
0x107f   : > { %14203 = vmatpush1.bf16.msra.mxu0 %v20575_v11  ;;  %v20638_v11 = vld [vmem:[#allocation22 + $0xb88] ss:$16 sps:$4 sm:$0xff]  }
0x1080   : > { %14204 = vmatprep.subr.bf16.mxu0 %v20583_v61  ;;  %v20646_v61 = vld [vmem:[#allocation22 + $0xbac] ss:$16 sps:$4 sm:$0xff]  }
0x1081   : > { %14244 = vmatpush1.bf16.msra.mxu1 %v20578_v17  ;;  %v20643_v17 = vld [vmem:[#allocation22 + $0xba4] ss:$16 sps:$4 sm:$0xff]  }
0x1082   : > { %14245 = vmatprep.subr.bf16.mxu1 %v20586_v59  ;;  %v20641_v59 = vld [vmem:[#allocation22 + $0xba0] ss:$16 sps:$4 sm:$0xff]  }
0x1083   : > { %14205 = vmatpush1.bf16.msra.mxu0 %v20581_v42  ;;  %v20644_v42 = vld [vmem:[#allocation22 + $0xba8] ss:$16 sps:$4 sm:$0xff]  }
0x1084   : > { %14206 = vmatprep.subr.bf16.mxu0 %v20589_v0  ;;  %v20652_v0 = vld [vmem:[#allocation22 + $0xbcc] ss:$16 sps:$4 sm:$0xff]  }
0x1085   : > { %14246 = vmatpush1.bf16.msra.mxu1 %v20584_v38  ;;  %v20649_v38 = vld [vmem:[#allocation22 + $0xbc4] ss:$16 sps:$4 sm:$0xff]  }
0x1086   : > { %14247 = vmatprep.subr.bf16.mxu1 %v20592_v33 }
0x1087   : > { %14207 = vmatpush1.bf16.msra.mxu0 %v20587_v8 }
0x1088   : > { %14208 = vmatprep.subr.bf16.mxu0 %v20595_v51  ;;  %v20650_v51 = vld [vmem:[#allocation22 + $0xbc8] ss:$16 sps:$4 sm:$0xff]  }
0x1089   : > { %14248 = vmatpush1.bf16.msra.mxu1 %v20590_v57  ;;  %v12279_v49 = vpop.f32.mrb[12].mxu0  ;;  %v20647_v57 = vld [vmem:[#allocation22 + $0xbc0] ss:$16 sps:$4 sm:$0xff]  }
0x108a   : > { %14249 = vmatprep.subr.bf16.mxu1 %v20598_v35  ;;  %v25113_v45 = vadd.f32 %v12279_v49, %v25097_v3  ;;  %v12281_v22 = vpop.f32.mrb[13].mxu0  ;;  %v20607_v3 = vld [vmem:[#allocation22 + $0xae4] ss:$16 sps:$4 sm:$0xff]  }
0x108b   : > { %v12320_v18 = vpop.f32.mrb[12].mxu1  ;;  %v25119_v21 = vadd.f32 %v12281_v22, %v25103_v47  ;;  %v12283_v1 = vpop.f32.mrb[14].mxu0  ;;  %14209 = vmatpush1.bf16.msra.mxu0 %v20593_v55  ;;  %v20613_v47 = vld [vmem:[#allocation22 + $0xb04] ss:$16 sps:$4 sm:$0xff]  }
0x108c   : > { %v25116_v63 = vadd.f32 %v12320_v18, %v25100_v54  ;;  %v12322_v31 = vpop.f32.mrb[13].mxu1  ;;  %v12284_v37 = vpop.f32.mrb[15].mxu0  ;;  %14210 = vmatprep.subr.bf16.mxu0 %v20601_v6  ;;  %v20605_v54 = vld [vmem:[#allocation22 + $0xae0] ss:$16 sps:$4 sm:$0xff]   ;;  %v20656_v1 = vld [vmem:[#allocation22 + $0xbe8] ss:$16 sps:$4 sm:$0xff]  }
0x108d   : > { %v25122_v12 = vadd.f32 %v12322_v31, %v25106_v60  ;;  %v12324_v50 = vpop.f32.mrb[14].mxu1  ;;  %14250 = vmatpush1.bf16.msra.mxu1 %v20596_v19  ;;  %v20611_v60 = vld [vmem:[#allocation22 + $0xb00] ss:$16 sps:$4 sm:$0xff]   ;;  %v20658_v31 = vld [vmem:[#allocation22 + $0xbec] ss:$16 sps:$4 sm:$0xff]  }
0x108e   : > { %v12325_v62 = vpop.f32.mrb[15].mxu1  ;;  %14251 = vmatprep.subr.bf16.mxu1 %v20604_v40  ;;  %v20664_v50 = vld [vmem:[#allocation22 + $0xc0c] ss:$16 sps:$4 sm:$0xff]   ;;  %v20662_v37 = vld [vmem:[#allocation22 + $0xc08] ss:$16 sps:$4 sm:$0xff]  }
0x108f   : > { %14211 = vmatpush1.bf16.msra.mxu0 %v20599_v26  ;;  %v14284_v62 = vpack.c.bf16 %v24986_v27, %v24986_v27  ;;  %v20671_v27 = vld [vmem:[#allocation22 + $0xc40] ss:$16 sps:$4 sm:$0xff]  }
0x1090   : > { %14212 = vmatprep.subr.bf16.mxu0 %v20607_v3  ;;  %v20667_v3 = vld [vmem:[#allocation22 + $0xc24] ss:$16 sps:$4 sm:$0xff]  }
0x1091   : > { %14252 = vmatpush1.bf16.msra.mxu1 %v20602_v20 }
0x1092   : > { %14253 = vmatprep.subr.bf16.mxu1 %v20610_v39  ;;  %v20670_v39 = vld [vmem:[#allocation22 + $0xc2c] ss:$16 sps:$4 sm:$0xff]  }
0x1093   : > { %14213 = vmatpush1.bf16.msra.mxu0 %v20605_v54  ;;  %v20665_v54 = vld [vmem:[#allocation22 + $0xc20] ss:$16 sps:$4 sm:$0xff]  }
0x1094   : > { %14477 = vmatprep.subr.bf16.mxu0 %v20613_v47  ;;  %v20673_v47 = vld [vmem:[#allocation22 + $0xc44] ss:$16 sps:$4 sm:$0xff]  }
0x1095   : > { %14254 = vmatpush1.bf16.msra.mxu1 %v20608_v32  ;;  %v20668_v32 = vld [vmem:[#allocation22 + $0xc28] ss:$16 sps:$4 sm:$0xff]  }
0x1096   : > { %14518 = vmatprep.subr.bf16.mxu1 %v20616_v24  ;;  %14231 = vmatmul.mubr.bf16.vlgmr.msra.gmra.mrb[40].mxu0 %v14005_v28  ;;  %v20676_v24 = vld [vmem:[#allocation22 + $0xc4c] ss:$16 sps:$4 sm:$0xff]  }
0x1097   : > { %14478 = vmatpush1.bf16.msra.mxu0 %v20611_v60  ;;  %14509 = vmatprep.mubr.bf16.mxu0 %v21651_v48  ;;  %v20674_v60 = vld [vmem:[#allocation22 + $0xc48] ss:$16 sps:$4 sm:$0xff]  }
0x1098   : > { %14272 = vmatmul.mubr.bf16.vlgmr.msra.gmra.mrb[40].mxu1 %v14005_v28  ;;  %14479 = vmatprep.subr.bf16.mxu0 %v20619_v58  ;;  %v20682_v28 = vld [vmem:[#allocation22 + $0xc6c] ss:$16 sps:$4 sm:$0xff]   ;;  %v20677_v58 = vld [vmem:[#allocation22 + $0xc60] ss:$16 sps:$4 sm:$0xff]  }
0x1099   : > { %14519 = vmatpush1.bf16.msra.mxu1 %v20614_v15  ;;  %14550 = vmatprep.mubr.bf16.mxu1 %v21651_v48  ;;  %v20679_v15 = vld [vmem:[#allocation22 + $0xc64] ss:$16 sps:$4 sm:$0xff]  }
0x109a   : > { %14520 = vmatprep.subr.bf16.mxu1 %v20622_v29  ;;  %v20680_v29 = vld [vmem:[#allocation22 + $0xc68] ss:$16 sps:$4 sm:$0xff]  }
0x109b   : > { %14480 = vmatpush1.bf16.msra.mxu0 %v20617_v30  ;;  %v20685_v30 = vld [vmem:[#allocation22 + $0xc84] ss:$16 sps:$4 sm:$0xff]  }
0x109c   : > { %14481 = vmatprep.subr.bf16.mxu0 %v20625_v46  ;;  %v20683_v46 = vld [vmem:[#allocation22 + $0xc80] ss:$16 sps:$4 sm:$0xff]  }
0x109d   : > { %14521 = vmatpush1.bf16.msra.mxu1 %v20620_v4  ;;  %v20688_v4 = vld [vmem:[#allocation22 + $0xc8c] ss:$16 sps:$4 sm:$0xff]  }
0x109e   : > { %14522 = vmatprep.subr.bf16.mxu1 %v20628_v5  ;;  %v20686_v5 = vld [vmem:[#allocation22 + $0xc88] ss:$16 sps:$4 sm:$0xff]  }
0x109f   : > { %14482 = vmatpush1.bf16.msra.mxu0 %v20623_v44  ;;  %v20691_v44 = vld [vmem:[#allocation22 + $0xca4] ss:$16 sps:$4 sm:$0xff]  }
0x10a0   : > { %14483 = vmatprep.subr.bf16.mxu0 %v20631_v2  ;;  %v20689_v2 = vld [vmem:[#allocation22 + $0xca0] ss:$16 sps:$4 sm:$0xff]  }
0x10a1   : > { %14523 = vmatpush1.bf16.msra.mxu1 %v20626_v10  ;;  %v20694_v10 = vld [vmem:[#allocation22 + $0xcac] ss:$16 sps:$4 sm:$0xff]  }
0x10a2   : > { %14524 = vmatprep.subr.bf16.mxu1 %v20634_v9  ;;  %v20692_v9 = vld [vmem:[#allocation22 + $0xca8] ss:$16 sps:$4 sm:$0xff]  }
0x10a3   : > { %14484 = vmatpush1.bf16.msra.mxu0 %v20629_v34  ;;  %v20697_v34 = vld [vmem:[#allocation22 + $0xcc4] ss:$16 sps:$4 sm:$0xff]  }
0x10a4   : > { %14485 = vmatprep.subr.bf16.mxu0 %v20637_v7 }
0x10a5   : > { %14525 = vmatpush1.bf16.msra.mxu1 %v20632_v36  ;;  %v20700_v36 = vld [vmem:[#allocation22 + $0xccc] ss:$16 sps:$4 sm:$0xff]  }
0x10a6   : > { %14526 = vmatprep.subr.bf16.mxu1 %v20640_v52 }
0x10a7   : > { %14486 = vmatpush1.bf16.msra.mxu0 %v20635_v16  ;;  %v20695_v16 = vld [vmem:[#allocation22 + $0xcc0] ss:$16 sps:$4 sm:$0xff]  }
0x10a8   : > { %14487 = vmatprep.subr.bf16.mxu0 %v20643_v17 }
0x10a9   : > { %14527 = vmatpush1.bf16.msra.mxu1 %v20638_v11  ;;  %v12558_v33 = vpop.f32.mrb[16].mxu0  ;;  %v20698_v11 = vld [vmem:[#allocation22 + $0xcc8] ss:$16 sps:$4 sm:$0xff]  }
0x10aa   : > { %14528 = vmatprep.subr.bf16.mxu1 %v20646_v61  ;;  %v25129_v35 = vadd.f32 %v12558_v33, %v25113_v45  ;;  %v12560_v19 = vpop.f32.mrb[17].mxu0  ;;  %v20655_v45 = vld [vmem:[#allocation22 + $0xbe4] ss:$16 sps:$4 sm:$0xff]  }
0x10ab   : > { %v12599_v8 = vpop.f32.mrb[16].mxu1  ;;  %v25135_v40 = vadd.f32 %v12560_v19, %v25119_v21  ;;  %v12562_v18 = vpop.f32.mrb[18].mxu0  ;;  %14488 = vmatpush1.bf16.msra.mxu0 %v20641_v59  ;;  %v20661_v21 = vld [vmem:[#allocation22 + $0xc04] ss:$16 sps:$4 sm:$0xff]   ;;  %v20706_v19 = vld [vmem:[#allocation22 + $0xcec] ss:$16 sps:$4 sm:$0xff]  }
0x10ac   : > { %v25132_v55 = vadd.f32 %v12599_v8, %v25116_v63  ;;  %v12601_v6 = vpop.f32.mrb[17].mxu1  ;;  %v12563_v20 = vpop.f32.mrb[19].mxu0  ;;  %14489 = vmatprep.subr.bf16.mxu0 %v20649_v38  ;;  %v20653_v63 = vld [vmem:[#allocation22 + $0xbe0] ss:$16 sps:$4 sm:$0xff]   ;;  %v20712_v18 = vld [vmem:[#allocation22 + $0xd0c] ss:$16 sps:$4 sm:$0xff]  }
0x10ad   : > { %v25138_v49 = vadd.f32 %v12601_v6, %v25122_v12  ;;  %v12603_v26 = vpop.f32.mrb[18].mxu1  ;;  %14529 = vmatpush1.bf16.msra.mxu1 %v20644_v42  ;;  %v20659_v12 = vld [vmem:[#allocation22 + $0xc00] ss:$16 sps:$4 sm:$0xff]   ;;  %v20704_v6 = vld [vmem:[#allocation22 + $0xce8] ss:$16 sps:$4 sm:$0xff]   ;;  %v14563_v20 = vpack.c.bf16 %v24993_v25, %v24993_v25 }
0x10ae   : > { %v12604_v22 = vpop.f32.mrb[19].mxu1  ;;  %14530 = vmatprep.subr.bf16.mxu1 %v20652_v0  ;;  %v20710_v26 = vld [vmem:[#allocation22 + $0xd08] ss:$16 sps:$4 sm:$0xff]   ;;  %v20719_v25 = vld [vmem:[#allocation22 + $0xd40] ss:$16 sps:$4 sm:$0xff]  }
0x10af   : > { %14490 = vmatpush1.bf16.msra.mxu0 %v20647_v57  ;;  %v20715_v22 = vld [vmem:[#allocation22 + $0xd24] ss:$16 sps:$4 sm:$0xff]  }
0x10b0   : > { %14491 = vmatprep.subr.bf16.mxu0 %v20655_v45  ;;  %v20718_v45 = vld [vmem:[#allocation22 + $0xd2c] ss:$16 sps:$4 sm:$0xff]  }
0x10b1   : > { %14531 = vmatpush1.bf16.msra.mxu1 %v20650_v51 }
0x10b2   : > { %14532 = vmatprep.subr.bf16.mxu1 %v20658_v31  ;;  %v20713_v31 = vld [vmem:[#allocation22 + $0xd20] ss:$16 sps:$4 sm:$0xff]  }
0x10b3   : > { %14492 = vmatpush1.bf16.msra.mxu0 %v20653_v63  ;;  %v20716_v63 = vld [vmem:[#allocation22 + $0xd28] ss:$16 sps:$4 sm:$0xff]  }
0x10b4   : > { %14756 = vmatprep.subr.bf16.mxu0 %v20661_v21  ;;  %v20724_v21 = vld [vmem:[#allocation22 + $0xd4c] ss:$16 sps:$4 sm:$0xff]  }
0x10b5   : > { %14533 = vmatpush1.bf16.msra.mxu1 %v20656_v1  ;;  %v20721_v1 = vld [vmem:[#allocation22 + $0xd44] ss:$16 sps:$4 sm:$0xff]  }
0x10b6   : > { %14797 = vmatprep.subr.bf16.mxu1 %v20664_v50  ;;  %14510 = vmatmul.mubr.bf16.vlgmr.msra.gmra.mrb[44].mxu0 %v14284_v62  ;;  %v20722_v50 = vld [vmem:[#allocation22 + $0xd48] ss:$16 sps:$4 sm:$0xff]  }
0x10b7   : > { %14757 = vmatpush1.bf16.msra.mxu0 %v20659_v12  ;;  %14788 = vmatprep.mubr.bf16.mxu0 %v21651_v48  ;;  %v20727_v12 = vld [vmem:[#allocation22 + $0xd64] ss:$16 sps:$4 sm:$0xff]  }
0x10b8   : > { %14551 = vmatmul.mubr.bf16.vlgmr.msra.gmra.mrb[44].mxu1 %v14284_v62  ;;  %14758 = vmatprep.subr.bf16.mxu0 %v20667_v3  ;;  %v20725_v62 = vld [vmem:[#allocation22 + $0xd60] ss:$16 sps:$4 sm:$0xff]   ;;  %v20728_v3 = vld [vmem:[#allocation22 + $0xd68] ss:$16 sps:$4 sm:$0xff]  }
0x10b9   : > { %14798 = vmatpush1.bf16.msra.mxu1 %v20662_v37  ;;  %14829 = vmatprep.mubr.bf16.mxu1 %v21651_v48  ;;  %v20730_v37 = vld [vmem:[#allocation22 + $0xd6c] ss:$16 sps:$4 sm:$0xff]  }
0x10ba   : > { %14799 = vmatprep.subr.bf16.mxu1 %v20670_v39  ;;  %v20733_v39 = vld [vmem:[#allocation22 + $0xd84] ss:$16 sps:$4 sm:$0xff]  }
0x10bb   : > { %14759 = vmatpush1.bf16.msra.mxu0 %v20665_v54  ;;  %v20736_v54 = vld [vmem:[#allocation22 + $0xd8c] ss:$16 sps:$4 sm:$0xff]  }
0x10bc   : > { %14760 = vmatprep.subr.bf16.mxu0 %v20673_v47  ;;  %v20734_v47 = vld [vmem:[#allocation22 + $0xd88] ss:$16 sps:$4 sm:$0xff]  }
0x10bd   : > { %14800 = vmatpush1.bf16.msra.mxu1 %v20668_v32  ;;  %v20731_v32 = vld [vmem:[#allocation22 + $0xd80] ss:$16 sps:$4 sm:$0xff]  }
0x10be   : > { %14801 = vmatprep.subr.bf16.mxu1 %v20676_v24  ;;  %v20739_v24 = vld [vmem:[#allocation22 + $0xda4] ss:$16 sps:$4 sm:$0xff]  }
0x10bf   : > { %14761 = vmatpush1.bf16.msra.mxu0 %v20671_v27  ;;  %v20742_v27 = vld [vmem:[#allocation22 + $0xdac] ss:$16 sps:$4 sm:$0xff]  }
0x10c0   : > { %14762 = vmatprep.subr.bf16.mxu0 %v20679_v15  ;;  %v20740_v15 = vld [vmem:[#allocation22 + $0xda8] ss:$16 sps:$4 sm:$0xff]  }
0x10c1   : > { %14802 = vmatpush1.bf16.msra.mxu1 %v20674_v60  ;;  %v20737_v60 = vld [vmem:[#allocation22 + $0xda0] ss:$16 sps:$4 sm:$0xff]  }
0x10c2   : > { %14803 = vmatprep.subr.bf16.mxu1 %v20682_v28  ;;  %v20745_v28 = vld [vmem:[#allocation22 + $0xdc4] ss:$16 sps:$4 sm:$0xff]  }
0x10c3   : > { %14763 = vmatpush1.bf16.msra.mxu0 %v20677_v58  ;;  %v20748_v58 = vld [vmem:[#allocation22 + $0xdcc] ss:$16 sps:$4 sm:$0xff]  }
0x10c4   : > { %14764 = vmatprep.subr.bf16.mxu0 %v20685_v30 }
0x10c5   : > { %14804 = vmatpush1.bf16.msra.mxu1 %v20680_v29 }
0x10c6   : > { %14805 = vmatprep.subr.bf16.mxu1 %v20688_v4 }
0x10c7   : > { %14765 = vmatpush1.bf16.msra.mxu0 %v20683_v46 }
0x10c8   : > { %14766 = vmatprep.subr.bf16.mxu0 %v20691_v44 }
0x10c9   : > { %14806 = vmatpush1.bf16.msra.mxu1 %v20686_v5  ;;  %v12837_v7 = vpop.f32.mrb[20].mxu0 }
0x10ca   : > { %14807 = vmatprep.subr.bf16.mxu1 %v20694_v10  ;;  %v25145_v17 = vadd.f32 %v12837_v7, %v25129_v35  ;;  %v12839_v59 = vpop.f32.mrb[21].mxu0  ;;  %v20703_v35 = vld [vmem:[#allocation22 + $0xce4] ss:$16 sps:$4 sm:$0xff]   ;;  %v20746_v7 = vld [vmem:[#allocation22 + $0xdc8] ss:$16 sps:$4 sm:$0xff]  }
0x10cb   : > { %v12878_v52 = vpop.f32.mrb[20].mxu1  ;;  %v25151_v38 = vadd.f32 %v12839_v59, %v25135_v40  ;;  %v12841_v33 = vpop.f32.mrb[22].mxu0  ;;  %14767 = vmatpush1.bf16.msra.mxu0 %v20689_v2  ;;  %v20709_v40 = vld [vmem:[#allocation22 + $0xd04] ss:$16 sps:$4 sm:$0xff]   ;;  %v20752_v59 = vld [vmem:[#allocation22 + $0xde8] ss:$16 sps:$4 sm:$0xff]  }
0x10cc   : > { %v25148_v61 = vadd.f32 %v12878_v52, %v25132_v55  ;;  %v12880_v42 = vpop.f32.mrb[21].mxu1  ;;  %v12842_v57 = vpop.f32.mrb[23].mxu0  ;;  %14768 = vmatprep.subr.bf16.mxu0 %v20697_v34  ;;  %v20701_v55 = vld [vmem:[#allocation22 + $0xce0] ss:$16 sps:$4 sm:$0xff]  }
0x10cd   : > { %v25154_v0 = vadd.f32 %v12880_v42, %v25138_v49  ;;  %v12882_v8 = vpop.f32.mrb[22].mxu1  ;;  %14808 = vmatpush1.bf16.msra.mxu1 %v20692_v9  ;;  %v20707_v49 = vld [vmem:[#allocation22 + $0xd00] ss:$16 sps:$4 sm:$0xff]   ;;  %v20757_v42 = vld [vmem:[#allocation22 + $0xe04] ss:$16 sps:$4 sm:$0xff]  }
0x10ce   : > { %v12883_v51 = vpop.f32.mrb[23].mxu1  ;;  %14809 = vmatprep.subr.bf16.mxu1 %v20700_v36  ;;  %v20743_v36 = vld [vmem:[#allocation22 + $0xdc0] ss:$16 sps:$4 sm:$0xff]   ;;  %v20758_v8 = vld [vmem:[#allocation22 + $0xe08] ss:$16 sps:$4 sm:$0xff]  }
0x10cf   : > { %14769 = vmatpush1.bf16.msra.mxu0 %v20695_v16  ;;  %v20755_v33 = vld [vmem:[#allocation22 + $0xe00] ss:$16 sps:$4 sm:$0xff]   ;;  %v20763_v57 = vld [vmem:[#allocation22 + $0xe24] ss:$16 sps:$4 sm:$0xff]   ;;  %v20766_v51 = vld [vmem:[#allocation22 + $0xe2c] ss:$16 sps:$4 sm:$0xff]  }
0x10d0   : > { %14770 = vmatprep.subr.bf16.mxu0 %v20703_v35  ;;  %v20761_v35 = vld [vmem:[#allocation22 + $0xe20] ss:$16 sps:$4 sm:$0xff]  }
0x10d1   : > { %14810 = vmatpush1.bf16.msra.mxu1 %v20698_v11  ;;  %v20751_v11 = vld [vmem:[#allocation22 + $0xde4] ss:$16 sps:$4 sm:$0xff]  }
0x10d2   : > { %14811 = vmatprep.subr.bf16.mxu1 %v20706_v19  ;;  %v20764_v19 = vld [vmem:[#allocation22 + $0xe28] ss:$16 sps:$4 sm:$0xff]  }
0x10d3   : > { %14771 = vmatpush1.bf16.msra.mxu0 %v20701_v55  ;;  %v20769_v55 = vld [vmem:[#allocation22 + $0xe44] ss:$16 sps:$4 sm:$0xff]  }
0x10d4   : > { %15035 = vmatprep.subr.bf16.mxu0 %v20709_v40  ;;  %v20770_v40 = vld [vmem:[#allocation22 + $0xe48] ss:$16 sps:$4 sm:$0xff]  }
0x10d5   : > { %14812 = vmatpush1.bf16.msra.mxu1 %v20704_v6  ;;  %v20772_v6 = vld [vmem:[#allocation22 + $0xe4c] ss:$16 sps:$4 sm:$0xff]  }
0x10d6   : > { %15076 = vmatprep.subr.bf16.mxu1 %v20712_v18  ;;  %14789 = vmatmul.mubr.bf16.vlgmr.msra.gmra.mrb[48].mxu0 %v14563_v20  ;;  %v20775_v18 = vld [vmem:[#allocation22 + $0xe64] ss:$16 sps:$4 sm:$0xff]  }
0x10d7   : > { %15036 = vmatpush1.bf16.msra.mxu0 %v20707_v49  ;;  %15067 = vmatprep.mubr.bf16.mxu0 %v21651_v48  ;;  %v20778_v49 = vld [vmem:[#allocation22 + $0xe6c] ss:$16 sps:$4 sm:$0xff]  }
0x10d8   : > { %14830 = vmatmul.mubr.bf16.vlgmr.msra.gmra.mrb[48].mxu1 %v14563_v20  ;;  %15037 = vmatprep.subr.bf16.mxu0 %v20715_v22  ;;  %v20776_v20 = vld [vmem:[#allocation22 + $0xe68] ss:$16 sps:$4 sm:$0xff]   ;;  %v20781_v22 = vld [vmem:[#allocation22 + $0xe84] ss:$16 sps:$4 sm:$0xff]  }
0x10d9   : > { %15077 = vmatpush1.bf16.msra.mxu1 %v20710_v26  ;;  %15108 = vmatprep.mubr.bf16.mxu1 %v21651_v48  ;;  %v20773_v26 = vld [vmem:[#allocation22 + $0xe60] ss:$16 sps:$4 sm:$0xff]  }
0x10da   : > { %15078 = vmatprep.subr.bf16.mxu1 %v20718_v45  ;;  %v20784_v45 = vld [vmem:[#allocation22 + $0xe8c] ss:$16 sps:$4 sm:$0xff]  }
0x10db   : > { %15038 = vmatpush1.bf16.msra.mxu0 %v20713_v31  ;;  %v20779_v31 = vld [vmem:[#allocation22 + $0xe80] ss:$16 sps:$4 sm:$0xff]  }
0x10dc   : > { %15039 = vmatprep.subr.bf16.mxu0 %v20721_v1  ;;  %v20787_v1 = vld [vmem:[#allocation22 + $0xea4] ss:$16 sps:$4 sm:$0xff]  }
0x10dd   : > { %15079 = vmatpush1.bf16.msra.mxu1 %v20716_v63  ;;  %v20782_v63 = vld [vmem:[#allocation22 + $0xe88] ss:$16 sps:$4 sm:$0xff]  }
0x10de   : > { %15080 = vmatprep.subr.bf16.mxu1 %v20724_v21  ;;  %v20790_v21 = vld [vmem:[#allocation22 + $0xeac] ss:$16 sps:$4 sm:$0xff]  }
0x10df   : > { %15040 = vmatpush1.bf16.msra.mxu0 %v20719_v25  ;;  %v20785_v25 = vld [vmem:[#allocation22 + $0xea0] ss:$16 sps:$4 sm:$0xff]  }
0x10e0   : > { %15041 = vmatprep.subr.bf16.mxu0 %v20727_v12  ;;  %v20793_v12 = vld [vmem:[#allocation22 + $0xec4] ss:$16 sps:$4 sm:$0xff]  }
0x10e1   : > { %15081 = vmatpush1.bf16.msra.mxu1 %v20722_v50  ;;  %v20788_v50 = vld [vmem:[#allocation22 + $0xea8] ss:$16 sps:$4 sm:$0xff]  }
0x10e2   : > { %15082 = vmatprep.subr.bf16.mxu1 %v20730_v37  ;;  %v20796_v37 = vld [vmem:[#allocation22 + $0xecc] ss:$16 sps:$4 sm:$0xff]  }
0x10e3   : > { %15042 = vmatpush1.bf16.msra.mxu0 %v20725_v62 }
0x10e4   : > { %15043 = vmatprep.subr.bf16.mxu0 %v20733_v39 }
0x10e5   : > { %15083 = vmatpush1.bf16.msra.mxu1 %v20728_v3 }
0x10e6   : > { %15084 = vmatprep.subr.bf16.mxu1 %v20736_v54 }
0x10e7   : > { %15044 = vmatpush1.bf16.msra.mxu0 %v20731_v32 }
0x10e8   : > { %15045 = vmatprep.subr.bf16.mxu0 %v20739_v24 }
0x10e9   : > { %15085 = vmatpush1.bf16.msra.mxu1 %v20734_v47  ;;  %v13116_v29 = vpop.f32.mrb[24].mxu0 }
0x10ea   : > { %15086 = vmatprep.subr.bf16.mxu1 %v20742_v27  ;;  %v25161_v4 = vadd.f32 %v13116_v29, %v25145_v17  ;;  %v13118_v5 = vpop.f32.mrb[25].mxu0  ;;  %v20754_v17 = vld [vmem:[#allocation22 + $0xdec] ss:$16 sps:$4 sm:$0xff]  }
0x10eb   : > { %v13157_v30 = vpop.f32.mrb[24].mxu1  ;;  %v25167_v10 = vadd.f32 %v13118_v5, %v25151_v38  ;;  %v13120_v9 = vpop.f32.mrb[26].mxu0  ;;  %15046 = vmatpush1.bf16.msra.mxu0 %v20737_v60  ;;  %v20760_v38 = vld [vmem:[#allocation22 + $0xe0c] ss:$16 sps:$4 sm:$0xff]   ;;  %v20797_v5 = vld [vmem:[#allocation22 + $0xee0] ss:$16 sps:$4 sm:$0xff]  }
0x10ec   : > { %v25164_v46 = vadd.f32 %v13157_v30, %v25148_v61  ;;  %v13159_v44 = vpop.f32.mrb[25].mxu1  ;;  %v13121_v52 = vpop.f32.mrb[27].mxu0  ;;  %15047 = vmatprep.subr.bf16.mxu0 %v20745_v28  ;;  %v20749_v61 = vld [vmem:[#allocation22 + $0xde0] ss:$16 sps:$4 sm:$0xff]   ;;  %v15121_v9 = vpack.c.bf16 %v25005_v43, %v25005_v43 }
0x10ed   : > { %v25170_v2 = vadd.f32 %v13159_v44, %v25154_v0  ;;  %v13161_v34 = vpop.f32.mrb[26].mxu1  ;;  %15087 = vmatpush1.bf16.msra.mxu1 %v20740_v15  ;;  %v14842_v0 = vpack.c.bf16 %v24998_v56, %v24998_v56  ;;  %v20767_v56 = vld [vmem:[#allocation22 + $0xe40] ss:$16 sps:$4 sm:$0xff]   ;;  %v20800_v44 = vld [vmem:[#allocation22 + $0xee8] ss:$16 sps:$4 sm:$0xff]  }
0x10ee   : > { %v13162_v16 = vpop.f32.mrb[27].mxu1  ;;  %15088 = vmatprep.subr.bf16.mxu1 %v20748_v58  ;;  %v20791_v28 = vld [vmem:[#allocation22 + $0xec0] ss:$16 sps:$4 sm:$0xff]   ;;  %v20794_v58 = vld [vmem:[#allocation22 + $0xec8] ss:$16 sps:$4 sm:$0xff]  }
0x10ef   : > { %15048 = vmatpush1.bf16.msra.mxu0 %v20743_v36  ;;  %v20803_v34 = vld [vmem:[#allocation22 + $0xf00] ss:$16 sps:$4 sm:$0xff]   ;;  %v20806_v36 = vld [vmem:[#allocation22 + $0xf08] ss:$16 sps:$4 sm:$0xff]   ;;  %v20814_v52 = vld [vmem:[#allocation22 + $0xf2c] ss:$16 sps:$4 sm:$0xff]  }
0x10f0   : > { %15049 = vmatprep.subr.bf16.mxu0 %v20751_v11  ;;  %v20809_v16 = vld [vmem:[#allocation22 + $0xf20] ss:$16 sps:$4 sm:$0xff]   ;;  %v20812_v11 = vld [vmem:[#allocation22 + $0xf28] ss:$16 sps:$4 sm:$0xff]  }
0x10f1   : > { %15089 = vmatpush1.bf16.msra.mxu1 %v20746_v7  ;;  %v20811_v7 = vld [vmem:[#allocation22 + $0xf24] ss:$16 sps:$4 sm:$0xff]   ;;  %v20815_v43 = vld [vmem:[#allocation22 + $0xf40] ss:$16 sps:$4 sm:$0xff]  }
0x10f2   : > { %15090 = vmatprep.subr.bf16.mxu1 %v20754_v17  ;;  %v20817_v17 = vld [vmem:[#allocation22 + $0xf44] ss:$16 sps:$4 sm:$0xff]  }
0x10f3   : > { %15050 = vmatpush1.bf16.msra.mxu0 %v20749_v61  ;;  %v20820_v61 = vld [vmem:[#allocation22 + $0xf4c] ss:$16 sps:$4 sm:$0xff]  }
0x10f4   : > { %15314 = vmatprep.subr.bf16.mxu0 %v20757_v42  ;;  %v20823_v42 = vld [vmem:[#allocation22 + $0xf64] ss:$16 sps:$4 sm:$0xff]  }
0x10f5   : > { %15091 = vmatpush1.bf16.msra.mxu1 %v20752_v59  ;;  %v20818_v59 = vld [vmem:[#allocation22 + $0xf48] ss:$16 sps:$4 sm:$0xff]  }
0x10f6   : > { %15355 = vmatprep.subr.bf16.mxu1 %v20760_v38  ;;  %15068 = vmatmul.mubr.bf16.vlgmr.msra.gmra.mrb[52].mxu0 %v14842_v0  ;;  %v20826_v38 = vld [vmem:[#allocation22 + $0xf6c] ss:$16 sps:$4 sm:$0xff]  }
0x10f7   : > { %15315 = vmatpush1.bf16.msra.mxu0 %v20755_v33  ;;  %15346 = vmatprep.mubr.bf16.mxu0 %v21651_v48  ;;  %v20824_v33 = vld [vmem:[#allocation22 + $0xf68] ss:$16 sps:$4 sm:$0xff]  }
0x10f8   : > { %15109 = vmatmul.mubr.bf16.vlgmr.msra.gmra.mrb[52].mxu1 %v14842_v0  ;;  %15316 = vmatprep.subr.bf16.mxu0 %v20763_v57  ;;  %v20821_v0 = vld [vmem:[#allocation22 + $0xf60] ss:$16 sps:$4 sm:$0xff]   ;;  %v20832_v57 = vld [vmem:[#allocation22 + $0xf8c] ss:$16 sps:$4 sm:$0xff]  }
0x10f9   : > { %15356 = vmatpush1.bf16.msra.mxu1 %v20758_v8  ;;  %15387 = vmatprep.mubr.bf16.mxu1 %v21651_v48  ;;  %v20829_v8 = vld [vmem:[#allocation22 + $0xf84] ss:$16 sps:$4 sm:$0xff]  }
0x10fa   : > { %15357 = vmatprep.subr.bf16.mxu1 %v20766_v51  ;;  %v20827_v51 = vld [vmem:[#allocation22 + $0xf80] ss:$16 sps:$4 sm:$0xff]  }
0x10fb   : > { %15317 = vmatpush1.bf16.msra.mxu0 %v20761_v35  ;;  %v20830_v35 = vld [vmem:[#allocation22 + $0xf88] ss:$16 sps:$4 sm:$0xff]  }
0x10fc   : > { %15318 = vmatprep.subr.bf16.mxu0 %v20769_v55  ;;  %v20838_v55 = vld [vmem:[#allocation22 + $0xfac] ss:$16 sps:$4 sm:$0xff]  }
0x10fd   : > { %15358 = vmatpush1.bf16.msra.mxu1 %v20764_v19  ;;  %v20835_v19 = vld [vmem:[#allocation22 + $0xfa4] ss:$16 sps:$4 sm:$0xff]  }
0x10fe   : > { %15359 = vmatprep.subr.bf16.mxu1 %v20772_v6  ;;  %v20833_v6 = vld [vmem:[#allocation22 + $0xfa0] ss:$16 sps:$4 sm:$0xff]  }
0x10ff   : > { %15319 = vmatpush1.bf16.msra.mxu0 %v20767_v56  ;;  %v20836_v56 = vld [vmem:[#allocation22 + $0xfa8] ss:$16 sps:$4 sm:$0xff]  }
0x1100   : > { %15320 = vmatprep.subr.bf16.mxu0 %v20775_v18  ;;  %v20844_v18 = vld [vmem:[#allocation22 + $0xfcc] ss:$16 sps:$4 sm:$0xff]  }
0x1101   : > { %15360 = vmatpush1.bf16.msra.mxu1 %v20770_v40  ;;  %v20841_v40 = vld [vmem:[#allocation22 + $0xfc4] ss:$16 sps:$4 sm:$0xff]  }
0x1102   : > { %15361 = vmatprep.subr.bf16.mxu1 %v20778_v49 }
0x1103   : > { %15321 = vmatpush1.bf16.msra.mxu0 %v20773_v26 }
0x1104   : > { %15322 = vmatprep.subr.bf16.mxu0 %v20781_v22 }
0x1105   : > { %15362 = vmatpush1.bf16.msra.mxu1 %v20776_v20 }
0x1106   : > { %15363 = vmatprep.subr.bf16.mxu1 %v20784_v45 }
0x1107   : > { %15323 = vmatpush1.bf16.msra.mxu0 %v20779_v31 }
0x1108   : > { %15324 = vmatprep.subr.bf16.mxu0 %v20787_v1 }
0x1109   : > { %15364 = vmatpush1.bf16.msra.mxu1 %v20782_v63  ;;  %v13395_v62 = vpop.f32.mrb[28].mxu0 }
0x110a   : > { %15365 = vmatprep.subr.bf16.mxu1 %v20790_v21  ;;  %v25177_v39 = vadd.f32 %v13395_v62, %v25161_v4  ;;  %v13397_v32 = vpop.f32.mrb[29].mxu0  ;;  %v20799_v4 = vld [vmem:[#allocation22 + $0xee4] ss:$16 sps:$4 sm:$0xff]  }
0x110b   : > { %v13436_v3 = vpop.f32.mrb[28].mxu1  ;;  %v25183_v24 = vadd.f32 %v13397_v32, %v25167_v10  ;;  %v13399_v60 = vpop.f32.mrb[30].mxu0  ;;  %15325 = vmatpush1.bf16.msra.mxu0 %v20785_v25  ;;  %v20805_v10 = vld [vmem:[#allocation22 + $0xf04] ss:$16 sps:$4 sm:$0xff]   ;;  %v20848_v32 = vld [vmem:[#allocation22 + $0xfe8] ss:$16 sps:$4 sm:$0xff]  }
0x110c   : > { %v25180_v54 = vadd.f32 %v13436_v3, %v25164_v46  ;;  %v13438_v47 = vpop.f32.mrb[29].mxu1  ;;  %v13400_v29 = vpop.f32.mrb[31].mxu0  ;;  %15326 = vmatprep.subr.bf16.mxu0 %v20793_v12  ;;  %v20802_v46 = vld [vmem:[#allocation22 + $0xeec] ss:$16 sps:$4 sm:$0xff]   ;;  %v20842_v12 = vld [vmem:[#allocation22 + $0xfc8] ss:$16 sps:$4 sm:$0xff]  }
0x110d   : > { %v25186_v27 = vadd.f32 %v13438_v47, %v25170_v2  ;;  %v13440_v15 = vpop.f32.mrb[30].mxu1  ;;  %15366 = vmatpush1.bf16.msra.mxu1 %v20788_v50  ;;  %v20808_v2 = vld [vmem:[#allocation22 + $0xf0c] ss:$16 sps:$4 sm:$0xff]   ;;  %v20839_v50 = vld [vmem:[#allocation22 + $0xfc0] ss:$16 sps:$4 sm:$0xff]  }
0x110e   : > { %v13441_v30 = vpop.f32.mrb[31].mxu1  ;;  %15367 = vmatprep.subr.bf16.mxu1 %v20796_v37  ;;  %v20847_v3 = vld [vmem:[#allocation22 + $0xfe4] ss:$16 sps:$4 sm:$0xff]   ;;  %v20851_v60 = vld [vmem:[#allocation22 + $0x1000] ss:$16 sps:$4 sm:$0xff]  }
0x110f   : > { %15327 = vmatpush1.bf16.msra.mxu0 %v20791_v28  ;;  %v20853_v47 = vld [vmem:[#allocation22 + $0x1004] ss:$16 sps:$4 sm:$0xff]   ;;  %v20854_v15 = vld [vmem:[#allocation22 + $0x1008] ss:$16 sps:$4 sm:$0xff]   ;;  %v20857_v29 = vld [vmem:[#allocation22 + $0x1020] ss:$16 sps:$4 sm:$0xff]  }
0x1110   : > { %15328 = vmatprep.subr.bf16.mxu0 %v20799_v4  ;;  %v20859_v28 = vld [vmem:[#allocation22 + $0x1024] ss:$16 sps:$4 sm:$0xff]   ;;  %v20860_v30 = vld [vmem:[#allocation22 + $0x1028] ss:$16 sps:$4 sm:$0xff]  }
0x1111   : > { %15368 = vmatpush1.bf16.msra.mxu1 %v20794_v58  ;;  %v20862_v58 = vld [vmem:[#allocation22 + $0x102c] ss:$16 sps:$4 sm:$0xff]   ;;  %v20865_v4 = vld [vmem:[#allocation22 + $0x1044] ss:$16 sps:$4 sm:$0xff]  }
0x1112   : > { %15369 = vmatprep.subr.bf16.mxu1 %v20802_v46  ;;  %v20868_v46 = vld [vmem:[#allocation22 + $0x104c] ss:$16 sps:$4 sm:$0xff]  }
0x1113   : > { %15329 = vmatpush1.bf16.msra.mxu0 %v20797_v5  ;;  %v20866_v5 = vld [vmem:[#allocation22 + $0x1048] ss:$16 sps:$4 sm:$0xff]  }
0x1114   : > { %15593 = vmatprep.subr.bf16.mxu0 %v20805_v10  ;;  %v20874_v10 = vld [vmem:[#allocation22 + $0x106c] ss:$16 sps:$4 sm:$0xff]  }
0x1115   : > { %15370 = vmatpush1.bf16.msra.mxu1 %v20800_v44  ;;  %v20871_v44 = vld [vmem:[#allocation22 + $0x1064] ss:$16 sps:$4 sm:$0xff]  }
0x1116   : > { %15634 = vmatprep.subr.bf16.mxu1 %v20808_v2  ;;  %15347 = vmatmul.mubr.bf16.vlgmr.msra.gmra.mrb[56].mxu0 %v15121_v9  ;;  %v20869_v2 = vld [vmem:[#allocation22 + $0x1060] ss:$16 sps:$4 sm:$0xff]  }
0x1117   : > { %15594 = vmatpush1.bf16.msra.mxu0 %v20803_v34  ;;  %15625 = vmatprep.mubr.bf16.mxu0 %v21651_v48  ;;  %v20877_v34 = vld [vmem:[#allocation22 + $0x1084] ss:$16 sps:$4 sm:$0xff]  }
0x1118   : > { %15388 = vmatmul.mubr.bf16.vlgmr.msra.gmra.mrb[56].mxu1 %v15121_v9  ;;  %15595 = vmatprep.subr.bf16.mxu0 %v20811_v7  ;;  %v20872_v9 = vld [vmem:[#allocation22 + $0x1068] ss:$16 sps:$4 sm:$0xff]   ;;  %v20875_v7 = vld [vmem:[#allocation22 + $0x1080] ss:$16 sps:$4 sm:$0xff]  }
0x1119   : > { %15635 = vmatpush1.bf16.msra.mxu1 %v20806_v36  ;;  %15666 = vmatprep.mubr.bf16.mxu1 %v21651_v48  ;;  %v20880_v36 = vld [vmem:[#allocation22 + $0x108c] ss:$16 sps:$4 sm:$0xff]  }
0x111a   : > { %15636 = vmatprep.subr.bf16.mxu1 %v20814_v52  ;;  %v20878_v52 = vld [vmem:[#allocation22 + $0x1088] ss:$16 sps:$4 sm:$0xff]  }
0x111b   : > { %15596 = vmatpush1.bf16.msra.mxu0 %v20809_v16  ;;  %v20883_v16 = vld [vmem:[#allocation22 + $0x10a4] ss:$16 sps:$4 sm:$0xff]  }
0x111c   : > { %15597 = vmatprep.subr.bf16.mxu0 %v20817_v17  ;;  %v20881_v17 = vld [vmem:[#allocation22 + $0x10a0] ss:$16 sps:$4 sm:$0xff]  }
0x111d   : > { %15637 = vmatpush1.bf16.msra.mxu1 %v20812_v11  ;;  %v20886_v11 = vld [vmem:[#allocation22 + $0x10ac] ss:$16 sps:$4 sm:$0xff]  }
0x111e   : > { %15638 = vmatprep.subr.bf16.mxu1 %v20820_v61  ;;  %v20884_v61 = vld [vmem:[#allocation22 + $0x10a8] ss:$16 sps:$4 sm:$0xff]  }
0x111f   : > { %15598 = vmatpush1.bf16.msra.mxu0 %v20815_v43  ;;  %v20889_v43 = vld [vmem:[#allocation22 + $0x10c4] ss:$16 sps:$4 sm:$0xff]  }
0x1120   : > { %15599 = vmatprep.subr.bf16.mxu0 %v20823_v42 }
0x1121   : > { %15639 = vmatpush1.bf16.msra.mxu1 %v20818_v59  ;;  %v20892_v59 = vld [vmem:[#allocation22 + $0x10cc] ss:$16 sps:$4 sm:$0xff]  }
0x1122   : > { %15640 = vmatprep.subr.bf16.mxu1 %v20826_v38 }
0x1123   : > { %15600 = vmatpush1.bf16.msra.mxu0 %v20821_v0 }
0x1124   : > { %15601 = vmatprep.subr.bf16.mxu0 %v20829_v8 }
0x1125   : > { %15641 = vmatpush1.bf16.msra.mxu1 %v20824_v33 }
0x1126   : > { %15642 = vmatprep.subr.bf16.mxu1 %v20832_v57 }
0x1127   : > { %15602 = vmatpush1.bf16.msra.mxu0 %v20827_v51 }
0x1128   : > { %15603 = vmatprep.subr.bf16.mxu0 %v20835_v19 }
0x1129   : > { %15643 = vmatpush1.bf16.msra.mxu1 %v20830_v35  ;;  %v13674_v49 = vpop.f32.mrb[32].mxu0 }
0x112a   : > { %15644 = vmatprep.subr.bf16.mxu1 %v20838_v55  ;;  %v25193_v20 = vadd.f32 %v13674_v49, %v25177_v39  ;;  %v13676_v45 = vpop.f32.mrb[33].mxu0  ;;  %v20850_v39 = vld [vmem:[#allocation22 + $0xfec] ss:$16 sps:$4 sm:$0xff]   ;;  %v20895_v49 = vld [vmem:[#allocation22 + $0x10e4] ss:$16 sps:$4 sm:$0xff]  }
0x112b   : > { %v13715_v26 = vpop.f32.mrb[32].mxu1  ;;  %v25199_v63 = vadd.f32 %v13676_v45, %v25183_v24  ;;  %v13678_v21 = vpop.f32.mrb[34].mxu0  ;;  %15604 = vmatpush1.bf16.msra.mxu0 %v20833_v6  ;;  %v20856_v24 = vld [vmem:[#allocation22 + $0x100c] ss:$16 sps:$4 sm:$0xff]   ;;  %v20887_v6 = vld [vmem:[#allocation22 + $0x10c0] ss:$16 sps:$4 sm:$0xff]  }
0x112c   : > { %v25196_v22 = vadd.f32 %v13715_v26, %v25180_v54  ;;  %v13717_v31 = vpop.f32.mrb[33].mxu1  ;;  %v13679_v37 = vpop.f32.mrb[35].mxu0  ;;  %15605 = vmatprep.subr.bf16.mxu0 %v20841_v40  ;;  %v20845_v54 = vld [vmem:[#allocation22 + $0xfe0] ss:$16 sps:$4 sm:$0xff]   ;;  %v20898_v26 = vld [vmem:[#allocation22 + $0x10ec] ss:$16 sps:$4 sm:$0xff]  }
0x112d   : > { %v25202_v1 = vadd.f32 %v13717_v31, %v25186_v27  ;;  %v13719_v25 = vpop.f32.mrb[34].mxu1  ;;  %15645 = vmatpush1.bf16.msra.mxu1 %v20836_v56  ;;  %v15400_v27 = vpack.c.bf16 %v25010_v23, %v25010_v23  ;;  %v20863_v23 = vld [vmem:[#allocation22 + $0x1040] ss:$16 sps:$4 sm:$0xff]   ;;  %v20890_v56 = vld [vmem:[#allocation22 + $0x10c8] ss:$16 sps:$4 sm:$0xff]  }
0x112e   : > { %v13720_v62 = vpop.f32.mrb[35].mxu1  ;;  %15646 = vmatprep.subr.bf16.mxu1 %v20844_v18  ;;  %v20901_v45 = vld [vmem:[#allocation22 + $0x1104] ss:$16 sps:$4 sm:$0xff]   ;;  %v20904_v31 = vld [vmem:[#allocation22 + $0x110c] ss:$16 sps:$4 sm:$0xff]  }
0x112f   : > { %15606 = vmatpush1.bf16.msra.mxu0 %v20839_v50  ;;  %v20902_v21 = vld [vmem:[#allocation22 + $0x1108] ss:$16 sps:$4 sm:$0xff]   ;;  %v20907_v25 = vld [vmem:[#allocation22 + $0x1124] ss:$16 sps:$4 sm:$0xff]   ;;  %v20910_v50 = vld [vmem:[#allocation22 + $0x112c] ss:$16 sps:$4 sm:$0xff]  }
0x1130   : > { %15607 = vmatprep.subr.bf16.mxu0 %v20847_v3  ;;  %v20908_v37 = vld [vmem:[#allocation22 + $0x1128] ss:$16 sps:$4 sm:$0xff]   ;;  %v20913_v62 = vld [vmem:[#allocation22 + $0x1144] ss:$16 sps:$4 sm:$0xff]   ;;  %v20916_v3 = vld [vmem:[#allocation22 + $0x114c] ss:$16 sps:$4 sm:$0xff]  }
0x1131   : > { %15647 = vmatpush1.bf16.msra.mxu1 %v20842_v12  ;;  %v20905_v12 = vld [vmem:[#allocation22 + $0x1120] ss:$16 sps:$4 sm:$0xff]  }
0x1132   : > { %15648 = vmatprep.subr.bf16.mxu1 %v20850_v39  ;;  %v20914_v39 = vld [vmem:[#allocation22 + $0x1148] ss:$16 sps:$4 sm:$0xff]  }
0x1133   : > { %15608 = vmatpush1.bf16.msra.mxu0 %v20845_v54  ;;  %v20919_v54 = vld [vmem:[#allocation22 + $0x1164] ss:$16 sps:$4 sm:$0xff]  }
0x1134   : > { %15872 = vmatprep.subr.bf16.mxu0 %v20853_v47  ;;  %v20917_v47 = vld [vmem:[#allocation22 + $0x1160] ss:$16 sps:$4 sm:$0xff]  }
0x1135   : > { %15649 = vmatpush1.bf16.msra.mxu1 %v20848_v32  ;;  %v20922_v32 = vld [vmem:[#allocation22 + $0x116c] ss:$16 sps:$4 sm:$0xff]  }
0x1136   : > { %15913 = vmatprep.subr.bf16.mxu1 %v20856_v24  ;;  %15626 = vmatmul.mubr.bf16.vlgmr.msra.gmra.mrb[60].mxu0 %v15400_v27  ;;  %v20920_v24 = vld [vmem:[#allocation22 + $0x1168] ss:$16 sps:$4 sm:$0xff]  }
0x1137   : > { %15873 = vmatpush1.bf16.msra.mxu0 %v20851_v60  ;;  %15904 = vmatprep.mubr.bf16.mxu0 %v21651_v48  ;;  %v20928_v60 = vld [vmem:[#allocation22 + $0x118c] ss:$16 sps:$4 sm:$0xff]  }
0x1138   : > { %15667 = vmatmul.mubr.bf16.vlgmr.msra.gmra.mrb[60].mxu1 %v15400_v27  ;;  %15874 = vmatprep.subr.bf16.mxu0 %v20859_v28  ;;  %v20925_v27 = vld [vmem:[#allocation22 + $0x1184] ss:$16 sps:$4 sm:$0xff]   ;;  %v20926_v28 = vld [vmem:[#allocation22 + $0x1188] ss:$16 sps:$4 sm:$0xff]  }
0x1139   : > { %15914 = vmatpush1.bf16.msra.mxu1 %v20854_v15  ;;  %15945 = vmatprep.mubr.bf16.mxu1 %v21651_v48  ;;  %v20923_v15 = vld [vmem:[#allocation22 + $0x1180] ss:$16 sps:$4 sm:$0xff]  }
0x113a   : > { %15915 = vmatprep.subr.bf16.mxu1 %v20862_v58  ;;  %v20931_v58 = vld [vmem:[#allocation22 + $0x11a4] ss:$16 sps:$4 sm:$0xff]  }
0x113b   : > { %15875 = vmatpush1.bf16.msra.mxu0 %v20857_v29  ;;  %v20934_v29 = vld [vmem:[#allocation22 + $0x11ac] ss:$16 sps:$4 sm:$0xff]  }
0x113c   : > { %15876 = vmatprep.subr.bf16.mxu0 %v20865_v4  ;;  %v20932_v4 = vld [vmem:[#allocation22 + $0x11a8] ss:$16 sps:$4 sm:$0xff]  }
0x113d   : > { %15916 = vmatpush1.bf16.msra.mxu1 %v20860_v30  ;;  %v20929_v30 = vld [vmem:[#allocation22 + $0x11a0] ss:$16 sps:$4 sm:$0xff]  }
0x113e   : > { %15917 = vmatprep.subr.bf16.mxu1 %v20868_v46  ;;  %v20937_v46 = vld [vmem:[#allocation22 + $0x11c4] ss:$16 sps:$4 sm:$0xff]  }
0x113f   : > { %15877 = vmatpush1.bf16.msra.mxu0 %v20863_v23  ;;  %v20940_v23 = vld [vmem:[#allocation22 + $0x11cc] ss:$16 sps:$4 sm:$0xff]  }
0x1140   : > { %15878 = vmatprep.subr.bf16.mxu0 %v20871_v44 }
0x1141   : > { %15918 = vmatpush1.bf16.msra.mxu1 %v20866_v5 }
0x1142   : > { %15919 = vmatprep.subr.bf16.mxu1 %v20874_v10 }
0x1143   : > { %15879 = vmatpush1.bf16.msra.mxu0 %v20869_v2 }
0x1144   : > { %15880 = vmatprep.subr.bf16.mxu0 %v20877_v34 }
0x1145   : > { %15920 = vmatpush1.bf16.msra.mxu1 %v20872_v9 }
0x1146   : > { %15921 = vmatprep.subr.bf16.mxu1 %v20880_v36 }
0x1147   : > { %15881 = vmatpush1.bf16.msra.mxu0 %v20875_v7 }
0x1148   : > { %15882 = vmatprep.subr.bf16.mxu0 %v20883_v16 }
0x1149   : > { %15922 = vmatpush1.bf16.msra.mxu1 %v20878_v52  ;;  %v13953_v42 = vpop.f32.mrb[36].mxu0 }
0x114a   : > { %15923 = vmatprep.subr.bf16.mxu1 %v20886_v11  ;;  %v25209_v0 = vadd.f32 %v13953_v42, %v25193_v20  ;;  %v13955_v8 = vpop.f32.mrb[37].mxu0  ;;  %v20893_v20 = vld [vmem:[#allocation22 + $0x10e0] ss:$16 sps:$4 sm:$0xff]   ;;  %v20946_v42 = vld [vmem:[#allocation22 + $0x11ec] ss:$16 sps:$4 sm:$0xff]  }
0x114b   : > { %v13994_v38 = vpop.f32.mrb[36].mxu1  ;;  %v25215_v51 = vadd.f32 %v13955_v8, %v25199_v63  ;;  %v13957_v19 = vpop.f32.mrb[38].mxu0  ;;  %15883 = vmatpush1.bf16.msra.mxu0 %v20881_v17  ;;  %v15679_v63 = vpack.c.bf16 %v25017_v41, %v25017_v41  ;;  %v20911_v41 = vld [vmem:[#allocation22 + $0x1140] ss:$16 sps:$4 sm:$0xff]   ;;  %v20938_v17 = vld [vmem:[#allocation22 + $0x11c8] ss:$16 sps:$4 sm:$0xff]  }
0x114c   : > { %v25212_v33 = vadd.f32 %v13994_v38, %v25196_v22  ;;  %v13996_v57 = vpop.f32.mrb[37].mxu1  ;;  %v13958_v40 = vpop.f32.mrb[39].mxu0  ;;  %15884 = vmatprep.subr.bf16.mxu0 %v20889_v43  ;;  %v20896_v22 = vld [vmem:[#allocation22 + $0x10e8] ss:$16 sps:$4 sm:$0xff]   ;;  %v20935_v11 = vld [vmem:[#allocation22 + $0x11c0] ss:$16 sps:$4 sm:$0xff]  }
0x114d   : > { %v25218_v35 = vadd.f32 %v13996_v57, %v25202_v1  ;;  %v13998_v55 = vpop.f32.mrb[38].mxu1  ;;  %15924 = vmatpush1.bf16.msra.mxu1 %v20884_v61  ;;  %v20899_v1 = vld [vmem:[#allocation22 + $0x1100] ss:$16 sps:$4 sm:$0xff]   ;;  %v20952_v8 = vld [vmem:[#allocation22 + $0x120c] ss:$16 sps:$4 sm:$0xff]   ;;  %v15958_v57 = vpack.c.bf16 %v25022_v13, %v25022_v13 }
0x114e   : > { %v13999_v18 = vpop.f32.mrb[39].mxu1  ;;  %15925 = vmatprep.subr.bf16.mxu1 %v20892_v59  ;;  %v20943_v59 = vld [vmem:[#allocation22 + $0x11e4] ss:$16 sps:$4 sm:$0xff]   ;;  %v20941_v38 = vld [vmem:[#allocation22 + $0x11e0] ss:$16 sps:$4 sm:$0xff]  }
0x114f   : > { %15885 = vmatpush1.bf16.msra.mxu0 %v20887_v6  ;;  %v20955_v19 = vld [vmem:[#allocation22 + $0x1224] ss:$16 sps:$4 sm:$0xff]   ;;  %v20958_v55 = vld [vmem:[#allocation22 + $0x122c] ss:$16 sps:$4 sm:$0xff]   ;;  %v20953_v6 = vld [vmem:[#allocation22 + $0x1220] ss:$16 sps:$4 sm:$0xff]  }
0x1150   : > { %15886 = vmatprep.subr.bf16.mxu0 %v20895_v49  ;;  %v20961_v40 = vld [vmem:[#allocation22 + $0x1244] ss:$16 sps:$4 sm:$0xff]   ;;  %v20964_v18 = vld [vmem:[#allocation22 + $0x124c] ss:$16 sps:$4 sm:$0xff]   ;;  %v20959_v13 = vld [vmem:[#allocation22 + $0x1240] ss:$16 sps:$4 sm:$0xff]  }
0x1151   : > { %15926 = vmatpush1.bf16.msra.mxu1 %v20890_v56  ;;  %v20956_v56 = vld [vmem:[#allocation22 + $0x1228] ss:$16 sps:$4 sm:$0xff]  }
0x1152   : > { %15927 = vmatprep.subr.bf16.mxu1 %v20898_v26  ;;  %v20962_v49 = vld [vmem:[#allocation22 + $0x1248] ss:$16 sps:$4 sm:$0xff]   ;;  %v20967_v26 = vld [vmem:[#allocation22 + $0x1264] ss:$16 sps:$4 sm:$0xff]  }
0x1153   : > { %15887 = vmatpush1.bf16.msra.mxu0 %v20893_v20  ;;  %v20970_v20 = vld [vmem:[#allocation22 + $0x126c] ss:$16 sps:$4 sm:$0xff]  }
0x1154   : > { %16151 = vmatprep.subr.bf16.mxu0 %v20901_v45  ;;  %v20968_v45 = vld [vmem:[#allocation22 + $0x1268] ss:$16 sps:$4 sm:$0xff]  }
0x1155   : > { %15928 = vmatpush1.bf16.msra.mxu1 %v20896_v22  ;;  %v20965_v22 = vld [vmem:[#allocation22 + $0x1260] ss:$16 sps:$4 sm:$0xff]  }
0x1156   : > { %16192 = vmatprep.subr.bf16.mxu1 %v20904_v31  ;;  %15905 = vmatmul.mubr.bf16.vlgmr.msra.gmra.mrb[64].mxu0 %v15679_v63  ;;  %v20973_v31 = vld [vmem:[#allocation22 + $0x1284] ss:$16 sps:$4 sm:$0xff]  }
0x1157   : > { %16152 = vmatpush1.bf16.msra.mxu0 %v20899_v1  ;;  %16183 = vmatprep.mubr.bf16.mxu0 %v21651_v48  ;;  %v20971_v1 = vld [vmem:[#allocation22 + $0x1280] ss:$16 sps:$4 sm:$0xff]  }
0x1158   : > { %15946 = vmatmul.mubr.bf16.vlgmr.msra.gmra.mrb[64].mxu1 %v15679_v63  ;;  %16153 = vmatprep.subr.bf16.mxu0 %v20907_v25  ;;  %v20976_v63 = vld [vmem:[#allocation22 + $0x128c] ss:$16 sps:$4 sm:$0xff]   ;;  %v20979_v25 = vld [vmem:[#allocation22 + $0x12a4] ss:$16 sps:$4 sm:$0xff]  }
0x1159   : > { %16193 = vmatpush1.bf16.msra.mxu1 %v20902_v21  ;;  %16224 = vmatprep.mubr.bf16.mxu1 %v21651_v48  ;;  %v20974_v21 = vld [vmem:[#allocation22 + $0x1288] ss:$16 sps:$4 sm:$0xff]  }
0x115a   : > { %16194 = vmatprep.subr.bf16.mxu1 %v20910_v50  ;;  %v20982_v50 = vld [vmem:[#allocation22 + $0x12ac] ss:$16 sps:$4 sm:$0xff]  }
0x115b   : > { %16154 = vmatpush1.bf16.msra.mxu0 %v20905_v12  ;;  %v20977_v12 = vld [vmem:[#allocation22 + $0x12a0] ss:$16 sps:$4 sm:$0xff]  }
0x115c   : > { %16155 = vmatprep.subr.bf16.mxu0 %v20913_v62  ;;  %v20985_v62 = vld [vmem:[#allocation22 + $0x12c4] ss:$16 sps:$4 sm:$0xff]  }
0x115d   : > { %16195 = vmatpush1.bf16.msra.mxu1 %v20908_v37  ;;  %v20980_v37 = vld [vmem:[#allocation22 + $0x12a8] ss:$16 sps:$4 sm:$0xff]  }
0x115e   : > { %16196 = vmatprep.subr.bf16.mxu1 %v20916_v3  ;;  %v20988_v3 = vld [vmem:[#allocation22 + $0x12cc] ss:$16 sps:$4 sm:$0xff]  }
0x115f   : > { %16156 = vmatpush1.bf16.msra.mxu0 %v20911_v41 }
0x1160   : > { %16157 = vmatprep.subr.bf16.mxu0 %v20919_v54 }
0x1161   : > { %16197 = vmatpush1.bf16.msra.mxu1 %v20914_v39 }
0x1162   : > { %16198 = vmatprep.subr.bf16.mxu1 %v20922_v32 }
0x1163   : > { %16158 = vmatpush1.bf16.msra.mxu0 %v20917_v47 }
0x1164   : > { %16159 = vmatprep.subr.bf16.mxu0 %v20925_v27 }
0x1165   : > { %16199 = vmatpush1.bf16.msra.mxu1 %v20920_v24 }
0x1166   : > { %16200 = vmatprep.subr.bf16.mxu1 %v20928_v60 }
0x1167   : > { %16160 = vmatpush1.bf16.msra.mxu0 %v20923_v15 }
0x1168   : > { %16161 = vmatprep.subr.bf16.mxu0 %v20931_v58  ;;  %v20983_v58 = vld [vmem:[#allocation22 + $0x12c0] ss:$16 sps:$4 sm:$0xff]  }
0x1169   : > { %16201 = vmatpush1.bf16.msra.mxu1 %v20926_v28  ;;  %v14232_v5 = vpop.f32.mrb[40].mxu0 }
0x116a   : > { %16202 = vmatprep.subr.bf16.mxu1 %v20934_v29  ;;  %v25225_v10 = vadd.f32 %v14232_v5, %v25209_v0  ;;  %v14234_v9 = vpop.f32.mrb[41].mxu0  ;;  %v20944_v0 = vld [vmem:[#allocation22 + $0x11e8] ss:$16 sps:$4 sm:$0xff]   ;;  %v20989_v5 = vld [vmem:[#allocation22 + $0x12e0] ss:$16 sps:$4 sm:$0xff]  }
0x116b   : > { %v14273_v44 = vpop.f32.mrb[40].mxu1  ;;  %v25231_v36 = vadd.f32 %v14234_v9, %v25215_v51  ;;  %v14236_v52 = vpop.f32.mrb[42].mxu0  ;;  %16162 = vmatpush1.bf16.msra.mxu0 %v20929_v30  ;;  %v20947_v51 = vld [vmem:[#allocation22 + $0x1200] ss:$16 sps:$4 sm:$0xff]   ;;  %v20986_v29 = vld [vmem:[#allocation22 + $0x12c8] ss:$16 sps:$4 sm:$0xff]   ;;  %v16237_v9 = vpack.c.bf16 %v25029_v53, %v25029_v53 }
0x116c   : > { %v25228_v2 = vadd.f32 %v14273_v44, %v25212_v33  ;;  %v14275_v34 = vpop.f32.mrb[41].mxu1  ;;  %v14237_v61 = vpop.f32.mrb[43].mxu0  ;;  %16163 = vmatprep.subr.bf16.mxu0 %v20937_v46  ;;  %v20949_v33 = vld [vmem:[#allocation22 + $0x1204] ss:$16 sps:$4 sm:$0xff]   ;;  %v20992_v44 = vld [vmem:[#allocation22 + $0x12e8] ss:$16 sps:$4 sm:$0xff]  }
0x116d   : > { %v25234_v7 = vadd.f32 %v14275_v34, %v25218_v35  ;;  %v14277_v16 = vpop.f32.mrb[42].mxu1  ;;  %16203 = vmatpush1.bf16.msra.mxu1 %v20932_v4  ;;  %v20950_v35 = vld [vmem:[#allocation22 + $0x1208] ss:$16 sps:$4 sm:$0xff]   ;;  %v20991_v46 = vld [vmem:[#allocation22 + $0x12e4] ss:$16 sps:$4 sm:$0xff]  }
0x116e   : > { %v14278_v43 = vpop.f32.mrb[43].mxu1  ;;  %16204 = vmatprep.subr.bf16.mxu1 %v20940_v23  ;;  %v20994_v23 = vld [vmem:[#allocation22 + $0x12ec] ss:$16 sps:$4 sm:$0xff]   ;;  %v20995_v34 = vld [vmem:[#allocation22 + $0x1300] ss:$16 sps:$4 sm:$0xff]  }
0x116f   : > { %16164 = vmatpush1.bf16.msra.mxu0 %v20935_v11  ;;  %v21006_v52 = vld [vmem:[#allocation22 + $0x132c] ss:$16 sps:$4 sm:$0xff]   ;;  %v21001_v16 = vld [vmem:[#allocation22 + $0x1320] ss:$16 sps:$4 sm:$0xff]   ;;  %v21004_v11 = vld [vmem:[#allocation22 + $0x1328] ss:$16 sps:$4 sm:$0xff]  }
0x1170   : > { %16165 = vmatprep.subr.bf16.mxu0 %v20943_v59  ;;  %v21012_v61 = vld [vmem:[#allocation22 + $0x134c] ss:$16 sps:$4 sm:$0xff]   ;;  %v21007_v53 = vld [vmem:[#allocation22 + $0x1340] ss:$16 sps:$4 sm:$0xff]   ;;  %v21010_v43 = vld [vmem:[#allocation22 + $0x1348] ss:$16 sps:$4 sm:$0xff]  }
0x1171   : > { %16205 = vmatpush1.bf16.msra.mxu1 %v20938_v17  ;;  %v21009_v17 = vld [vmem:[#allocation22 + $0x1344] ss:$16 sps:$4 sm:$0xff]  }
0x1172   : > { %16206 = vmatprep.subr.bf16.mxu1 %v20946_v42  ;;  %v21015_v59 = vld [vmem:[#allocation22 + $0x1364] ss:$16 sps:$4 sm:$0xff]   ;;  %v21018_v42 = vld [vmem:[#allocation22 + $0x136c] ss:$16 sps:$4 sm:$0xff]  }
0x1173   : > { %16166 = vmatpush1.bf16.msra.mxu0 %v20941_v38  ;;  %v21013_v38 = vld [vmem:[#allocation22 + $0x1360] ss:$16 sps:$4 sm:$0xff]  }
0x1174   : > { %16430 = vmatprep.subr.bf16.mxu0 %v20949_v33  ;;  %v21021_v33 = vld [vmem:[#allocation22 + $0x1384] ss:$16 sps:$4 sm:$0xff]  }
0x1175   : > { %16207 = vmatpush1.bf16.msra.mxu1 %v20944_v0  ;;  %v21016_v0 = vld [vmem:[#allocation22 + $0x1368] ss:$16 sps:$4 sm:$0xff]  }
0x1176   : > { %16471 = vmatprep.subr.bf16.mxu1 %v20952_v8  ;;  %16184 = vmatmul.mubr.bf16.vlgmr.msra.gmra.mrb[68].mxu0 %v15958_v57  ;;  %v21024_v8 = vld [vmem:[#allocation22 + $0x138c] ss:$16 sps:$4 sm:$0xff]  }
0x1177   : > { %16431 = vmatpush1.bf16.msra.mxu0 %v20947_v51  ;;  %16462 = vmatprep.mubr.bf16.mxu0 %v21651_v48  ;;  %v21027_v51 = vld [vmem:[#allocation22 + $0x13a4] ss:$16 sps:$4 sm:$0xff]  }
0x1178   : > { %16225 = vmatmul.mubr.bf16.vlgmr.msra.gmra.mrb[68].mxu1 %v15958_v57  ;;  %16432 = vmatprep.subr.bf16.mxu0 %v20955_v19  ;;  %v21019_v57 = vld [vmem:[#allocation22 + $0x1380] ss:$16 sps:$4 sm:$0xff]  }
0x1179   : > { %16472 = vmatpush1.bf16.msra.mxu1 %v20950_v35  ;;  %16503 = vmatprep.mubr.bf16.mxu1 %v21651_v48  ;;  %v21030_v35 = vld [vmem:[#allocation22 + $0x13ac] ss:$16 sps:$4 sm:$0xff]   ;;  %v21025_v19 = vld [vmem:[#allocation22 + $0x13a0] ss:$16 sps:$4 sm:$0xff]  }
0x117a   : > { %16473 = vmatprep.subr.bf16.mxu1 %v20958_v55  ;;  %v21028_v55 = vld [vmem:[#allocation22 + $0x13a8] ss:$16 sps:$4 sm:$0xff]  }
0x117b   : > { %16433 = vmatpush1.bf16.msra.mxu0 %v20953_v6  ;;  %v21033_v6 = vld [vmem:[#allocation22 + $0x13c4] ss:$16 sps:$4 sm:$0xff]  }
0x117c   : > { %16434 = vmatprep.subr.bf16.mxu0 %v20961_v40 }
0x117d   : > { %16474 = vmatpush1.bf16.msra.mxu1 %v20956_v56  ;;  %v21036_v56 = vld [vmem:[#allocation22 + $0x13cc] ss:$16 sps:$4 sm:$0xff]  }
0x117e   : > { %16475 = vmatprep.subr.bf16.mxu1 %v20964_v18 }
0x117f   : > { %16435 = vmatpush1.bf16.msra.mxu0 %v20959_v13 }
0x1180   : > { %16436 = vmatprep.subr.bf16.mxu0 %v20967_v26 }
0x1181   : > { %16476 = vmatpush1.bf16.msra.mxu1 %v20962_v49 }
0x1182   : > { %16477 = vmatprep.subr.bf16.mxu1 %v20970_v20 }
0x1183   : > { %16437 = vmatpush1.bf16.msra.mxu0 %v20965_v22 }
0x1184   : > { %16438 = vmatprep.subr.bf16.mxu0 %v20973_v31 }
0x1185   : > { %16478 = vmatpush1.bf16.msra.mxu1 %v20968_v45 }
0x1186   : > { %16479 = vmatprep.subr.bf16.mxu1 %v20976_v63 }
0x1187   : > { %16439 = vmatpush1.bf16.msra.mxu0 %v20971_v1  ;;  %v21031_v1 = vld [vmem:[#allocation22 + $0x13c0] ss:$16 sps:$4 sm:$0xff]  }
0x1188   : > { %16440 = vmatprep.subr.bf16.mxu0 %v20979_v25 }
0x1189   : > { %16480 = vmatpush1.bf16.msra.mxu1 %v20974_v21  ;;  %v14511_v41 = vpop.f32.mrb[44].mxu0  ;;  %v21034_v21 = vld [vmem:[#allocation22 + $0x13c8] ss:$16 sps:$4 sm:$0xff]  }
0x118a   : > { %16481 = vmatprep.subr.bf16.mxu1 %v20982_v50  ;;  %v25241_v54 = vadd.f32 %v14511_v41, %v25225_v10  ;;  %v14513_v47 = vpop.f32.mrb[45].mxu0  ;;  %v20997_v10 = vld [vmem:[#allocation22 + $0x1304] ss:$16 sps:$4 sm:$0xff]   ;;  %v16516_v41 = vpack.c.bf16 %v25034_v14, %v25034_v14 }
0x118b   : > { %v14552_v39 = vpop.f32.mrb[44].mxu1  ;;  %v25247_v27 = vadd.f32 %v14513_v47, %v25231_v36  ;;  %v14515_v15 = vpop.f32.mrb[46].mxu0  ;;  %16441 = vmatpush1.bf16.msra.mxu0 %v20977_v12  ;;  %v20998_v36 = vld [vmem:[#allocation22 + $0x1308] ss:$16 sps:$4 sm:$0xff]   ;;  %v21039_v12 = vld [vmem:[#allocation22 + $0x13e4] ss:$16 sps:$4 sm:$0xff]  }
0x118c   : > { %v25244_v32 = vadd.f32 %v14552_v39, %v25228_v2  ;;  %v14554_v24 = vpop.f32.mrb[45].mxu1  ;;  %v14516_v30 = vpop.f32.mrb[47].mxu0  ;;  %16442 = vmatprep.subr.bf16.mxu0 %v20985_v62  ;;  %v21000_v2 = vld [vmem:[#allocation22 + $0x130c] ss:$16 sps:$4 sm:$0xff]   ;;  %v21037_v62 = vld [vmem:[#allocation22 + $0x13e0] ss:$16 sps:$4 sm:$0xff]  }
0x118d   : > { %v25250_v60 = vadd.f32 %v14554_v24, %v25234_v7  ;;  %v14556_v28 = vpop.f32.mrb[46].mxu1  ;;  %16482 = vmatpush1.bf16.msra.mxu1 %v20980_v37  ;;  %v21003_v7 = vld [vmem:[#allocation22 + $0x1324] ss:$16 sps:$4 sm:$0xff]   ;;  %v21042_v37 = vld [vmem:[#allocation22 + $0x13ec] ss:$16 sps:$4 sm:$0xff]  }
0x118e   : > { %v14557_v4 = vpop.f32.mrb[47].mxu1  ;;  %16483 = vmatprep.subr.bf16.mxu1 %v20988_v3  ;;  %v21040_v3 = vld [vmem:[#allocation22 + $0x13e8] ss:$16 sps:$4 sm:$0xff]  }
0x118f   : > { %16443 = vmatpush1.bf16.msra.mxu0 %v20983_v58 }
0x1190   : > { %16444 = vmatprep.subr.bf16.mxu0 %v20991_v46 }
0x1191   : > { %16484 = vmatpush1.bf16.msra.mxu1 %v20986_v29 }
0x1192   : > { %16485 = vmatprep.subr.bf16.mxu1 %v20994_v23 }
0x1193   : > { %16445 = vmatpush1.bf16.msra.mxu0 %v20989_v5 }
0x1194   : > { %16709 = vmatprep.subr.bf16.mxu0 %v20997_v10 }
0x1195   : > { %16486 = vmatpush1.bf16.msra.mxu1 %v20992_v44 }
0x1196   : > { %16750 = vmatprep.subr.bf16.mxu1 %v21000_v2  ;;  %16463 = vmatmul.mubr.bf16.vlgmr.msra.gmra.mrb[72].mxu0 %v16237_v9 }
0x1197   : > { %16710 = vmatpush1.bf16.msra.mxu0 %v20995_v34  ;;  %16741 = vmatprep.mubr.bf16.mxu0 %v21651_v48 }
0x1198   : > { %16504 = vmatmul.mubr.bf16.vlgmr.msra.gmra.mrb[72].mxu1 %v16237_v9  ;;  %16711 = vmatprep.subr.bf16.mxu0 %v21003_v7 }
0x1199   : > { %16751 = vmatpush1.bf16.msra.mxu1 %v20998_v36  ;;  %16782 = vmatprep.mubr.bf16.mxu1 %v21651_v48  ;;  %v21022_v48 = vld [vmem:[#allocation22 + $0x1388] ss:$16 sps:$4 sm:$0xff]  }
0x119a   : > { %16752 = vmatprep.subr.bf16.mxu1 %v21006_v52  ;;  %v21043_v52 = vld [vmem:[#allocation25 + $0x40] sm:$0xff]  }
0x119b   : > { %16712 = vmatpush1.bf16.msra.mxu0 %v21001_v16  ;;  %v21044_v16 = vld [vmem:[#allocation25 + $0xc0] sm:$0xff]  }
0x119c   : > { %16713 = vmatprep.subr.bf16.mxu0 %v21009_v17  ;;  %v21046_v17 = vld [vmem:[#allocation25 + $0x80] sm:$0xff]  }
0x119d   : > { %16753 = vmatpush1.bf16.msra.mxu1 %v21004_v11  ;;  %v21045_v11 = vld [vmem:[#allocation25] sm:$0xff]  }
0x119e   : > { %16754 = vmatprep.subr.bf16.mxu1 %v21012_v61  ;;  %v21047_v61 = vld [vmem:[#allocation25 + $0x48] sm:$0xff]  }
0x119f   : > { %16714 = vmatpush1.bf16.msra.mxu0 %v21007_v53  ;;  %v21048_v53 = vld [vmem:[#allocation25 + $0xc8] sm:$0xff]  }
0x11a0   : > { %16715 = vmatprep.subr.bf16.mxu0 %v21015_v59  ;;  %v21050_v59 = vld [vmem:[#allocation25 + $0x88] sm:$0xff]  }
0x11a1   : > { %16755 = vmatpush1.bf16.msra.mxu1 %v21010_v43  ;;  %v21049_v43 = vld [vmem:[#allocation25 + $0x8] sm:$0xff]  }
0x11a2   : > { %16756 = vmatprep.subr.bf16.mxu1 %v21018_v42  ;;  %v21051_v42 = vld [vmem:[#allocation25 + $0x50] sm:$0xff]  }
0x11a3   : > { %16716 = vmatpush1.bf16.msra.mxu0 %v21013_v38  ;;  %v21052_v38 = vld [vmem:[#allocation25 + $0xd0] sm:$0xff]  }
0x11a4   : > { %16717 = vmatprep.subr.bf16.mxu0 %v21021_v33  ;;  %v21054_v33 = vld [vmem:[#allocation25 + $0x90] sm:$0xff]  }
0x11a5   : > { %16757 = vmatpush1.bf16.msra.mxu1 %v21016_v0  ;;  %v21053_v0 = vld [vmem:[#allocation25 + $0x10] sm:$0xff]  }
0x11a6   : > { %16758 = vmatprep.subr.bf16.mxu1 %v21024_v8  ;;  %v21055_v8 = vld [vmem:[#allocation25 + $0x58] sm:$0xff]  }
0x11a7   : > { %16718 = vmatpush1.bf16.msra.mxu0 %v21019_v57  ;;  %v21056_v57 = vld [vmem:[#allocation25 + $0xd8] sm:$0xff]  }
0x11a8   : > { %16719 = vmatprep.subr.bf16.mxu0 %v21027_v51  ;;  %v21058_v51 = vld [vmem:[#allocation25 + $0x98] sm:$0xff]  }
0x11a9   : > { %16759 = vmatpush1.bf16.msra.mxu1 %v21022_v48  ;;  %v14790_v40 = vpop.f32.mrb[48].mxu0  ;;  %v21057_v48 = vld [vmem:[#allocation25 + $0x18] sm:$0xff]  }
0x11aa   : > { %16760 = vmatprep.subr.bf16.mxu1 %v21030_v35  ;;  %v14838_v13 = vadd.f32 %v14790_v40, %v25241_v54  ;;  %v14792_v26 = vpop.f32.mrb[49].mxu0  ;;  %v21059_v35 = vld [vmem:[#allocation25 + $0x60] sm:$0xff]   ;;  %v21064_v40 = vld [vmem:[#allocation25 + $0xe8] sm:$0xff]  }
0x11ab   : > { %v14831_v18 = vpop.f32.mrb[48].mxu1  ;;  %v14839_v22 = vadd.f32 %v14792_v26, %v25247_v27  ;;  %v14794_v31 = vpop.f32.mrb[50].mxu0  ;;  %16720 = vmatpush1.bf16.msra.mxu0 %v21025_v19  ;;  %v21060_v19 = vld [vmem:[#allocation25 + $0xe0] sm:$0xff]   ;;  %v21068_v26 = vld [vmem:[#allocation25 + $0xf0] sm:$0xff]  }
0x11ac   : > { %v14840_v49 = vadd.f32 %v14831_v18, %v25244_v32  ;;  %v14833_v20 = vpop.f32.mrb[49].mxu1  ;;  %v14795_v25 = vpop.f32.mrb[51].mxu0  ;;  %16721 = vmatprep.subr.bf16.mxu0 %v21033_v6  ;;  %v21062_v6 = vld [vmem:[#allocation25 + $0xa0] sm:$0xff]   ;;  %v21065_v18 = vld [vmem:[#allocation25 + $0x28] sm:$0xff]   ;;  %v21070_v31 = vld [vmem:[#allocation25 + $0xb0] sm:$0xff]  }
0x11ad   : > { %v14841_v45 = vadd.f32 %v14833_v20, %v25250_v60  ;;  %v14835_v63 = vpop.f32.mrb[50].mxu1  ;;  %16761 = vmatpush1.bf16.msra.mxu1 %v21028_v55  ;;  %v21061_v55 = vld [vmem:[#allocation25 + $0x20] sm:$0xff]  }
0x11ae   : > { %v14836_v50 = vpop.f32.mrb[51].mxu1  ;;  %16762 = vmatprep.subr.bf16.mxu1 %v21036_v56  ;;  %v21063_v56 = vld [vmem:[#allocation25 + $0x68] sm:$0xff]  }
0x11af   : > { %16722 = vmatpush1.bf16.msra.mxu0 %v21031_v1 }
0x11b0   : > { %16723 = vmatprep.subr.bf16.mxu0 %v21039_v12 }
0x11b1   : > { %16763 = vmatpush1.bf16.msra.mxu1 %v21034_v21 }
0x11b2   : > { %16764 = vmatprep.subr.bf16.mxu1 %v21042_v37 }
0x11b3   : > { %16724 = vmatpush1.bf16.msra.mxu0 %v21037_v62 }
0x11b4   : > { %18983 = vmatprep.subr.bf16.mxu0 %v21043_v52 }
0x11b5   : > { %16765 = vmatpush1.bf16.msra.mxu1 %v21040_v3 }
0x11b6   : > { %16742 = vmatmul.mubr.bf16.vlgmr.msra.gmra.mrb[76].mxu0 %v16516_v41  ;;  %19005 = vmatprep.subr.bf16.mxu1 %v21044_v16 }
0x11b7   : > { %18984 = vmatpush3.bf16.msra.mxu0 %v21045_v11 }
0x11b8   : > { %16783 = vmatmul.mubr.bf16.vlgmr.msra.gmra.mrb[76].mxu1 %v16516_v41  ;;  %18985 = vmatprep.subr.bf16.mxu0 %v21047_v61 }
0x11b9   : > { %19006 = vmatpush3.bf16.msra.mxu1 %v21046_v17 }
0x11ba   : > { %19007 = vmatprep.subr.bf16.mxu1 %v21048_v53 }
0x11bb   : > { %18986 = vmatpush3.bf16.msra.mxu0 %v21049_v43 }
0x11bc   : > { %18987 = vmatprep.subr.bf16.mxu0 %v21051_v42 }
0x11bd   : > { %19008 = vmatpush3.bf16.msra.mxu1 %v21050_v59 }
0x11be   : > { %19009 = vmatprep.subr.bf16.mxu1 %v21052_v38 }
0x11bf   : > { %18988 = vmatpush3.bf16.msra.mxu0 %v21053_v0 }
0x11c0   : > { %18989 = vmatprep.subr.bf16.mxu0 %v21055_v8 }
0x11c1   : > { %19010 = vmatpush3.bf16.msra.mxu1 %v21054_v33 }
0x11c2   : > { %19011 = vmatprep.subr.bf16.mxu1 %v21056_v57 }
0x11c3   : > { %18990 = vmatpush3.bf16.msra.mxu0 %v21057_v48 }
0x11c4   : > { %18991 = vmatprep.subr.bf16.mxu0 %v21059_v35  ;;  %v16795_v35 = vld [vmem:[#allocation23] sm:$0xf] }
0x11c5   : > { %19012 = vmatpush3.bf16.msra.mxu1 %v21058_v51 }
0x11c6   : > { %19013 = vmatprep.subr.bf16.mxu1 %v21060_v19  ;;  %v25561_v19 = vld [vmem:[#allocation47_spill] sm:$0xff] }
0x11c7   : > { %18992 = vmatpush3.bf16.msra.mxu0 %v21061_v55  ;;  %v16800_v55 = vrot.slane %v16795_v35, %v25561_v19 }
0x11c8   : > { %18993 = vmatprep.subr.bf16.mxu0 %v21063_v56 }
0x11c9   : > { %v15069_v39 = vpop.f32.mrb[52].mxu0  ;;  %19014 = vmatpush3.bf16.msra.mxu1 %v21062_v6  ;;  %v25562_v6 = vld [vmem:[#allocation48_spill] sm:$0xff] }
0x11ca   : > { %v15117_v32 = vadd.f32 %v15069_v39, %v14838_v13  ;;  %v15071_v24 = vpop.f32.mrb[53].mxu0  ;;  %v21066_v13 = vld [vmem:[#allocation25 + $0xa8] sm:$0xff]   ;;  %19015 = vmatprep.subr.bf16.mxu1 %v21064_v40  ;;  %v21071_v39 = vld [vmem:[#allocation25 + $0x78] sm:$0xff]   ;;  %v16808_v56 = vrot.slane %v16795_v35, %v25562_v6 }
0x11cb   : > { %v15110_v54 = vpop.f32.mrb[52].mxu1  ;;  %v15118_v60 = vadd.f32 %v15071_v24, %v14839_v22  ;;  %v15073_v28 = vpop.f32.mrb[54].mxu0  ;;  %18994 = vmatpush3.bf16.msra.mxu0 %v21065_v18 }
0x11cc   : > { %v15119_v47 = vadd.f32 %v15110_v54, %v14840_v49  ;;  %v15112_v27 = vpop.f32.mrb[53].mxu1  ;;  %v15074_v29 = vpop.f32.mrb[55].mxu0  ;;  %v21067_v49 = vld [vmem:[#allocation25 + $0x70] sm:$0xff]   ;;  %v21072_v54 = vld [vmem:[#allocation25 + $0xf8] sm:$0xff]  }
0x11cd   : > { %v15120_v15 = vadd.f32 %v15112_v27, %v14841_v45  ;;  %v15114_v58 = vpop.f32.mrb[54].mxu1  ;;  %19016 = vmatpush3.bf16.msra.mxu1 %v21066_v13  ;;  %v21069_v45 = vld [vmem:[#allocation25 + $0x30] sm:$0xff]   ;;  %18995 = vmatprep.subr.bf16.mxu0 %v21067_v49 }
0x11ce   : > { %v15115_v30 = vpop.f32.mrb[55].mxu1  ;;  %19017 = vmatprep.subr.bf16.mxu1 %v21068_v26  ;;  %v25563_v13 = vld [vmem:[#allocation46_spill] sm:$0xff]  ;;  %v25564_v26 = vld [vmem:[#allocation45_spill] sm:$0xff] }
0x11cf   : > { %18996 = vmatpush3.bf16.msra.mxu0 %v21069_v45  ;;  %v16804_v49 = vrot.slane %v16795_v35, %v25563_v13 }
0x11d0   : > { %18997 = vmatprep.subr.bf16.mxu0 %v21071_v39 }
0x11d1   : > { %19018 = vmatpush3.bf16.msra.mxu1 %v21070_v31 }
0x11d2   : > { %19019 = vmatprep.subr.bf16.mxu1 %v21072_v54 }
0x11e9   : > { %v15348_v4 = vpop.f32.mrb[56].mxu0 }
0x11ea   : > { %v25262_v23 = vadd.f32 %v15348_v4, %v15117_v32  ;;  %v15350_v5 = vpop.f32.mrb[57].mxu0  ;;  %v21073_v32 = vld [vmem:[#allocation25 + $0x38] sm:$0xff]  }
0x11eb   : > { %v15389_v46 = vpop.f32.mrb[56].mxu1  ;;  %v25266_v10 = vadd.f32 %v15350_v5, %v15118_v60  ;;  %v15352_v9 = vpop.f32.mrb[58].mxu0  ;;  %18998 = vmatpush3.bf16.msra.mxu0 %v21073_v32 }
0x11ec   : > { %v25264_v14 = vadd.f32 %v15389_v46, %v15119_v47  ;;  %v15391_v44 = vpop.f32.mrb[57].mxu1  ;;  %v15353_v36 = vpop.f32.mrb[59].mxu0  ;;  %v21074_v47 = vld [vmem:[#allocation25 + $0xb8] sm:$0xff]  }
0x11ed   : > { %v25268_v2 = vadd.f32 %v15391_v44, %v15120_v15  ;;  %v15393_v34 = vpop.f32.mrb[58].mxu1  ;;  %19020 = vmatpush3.bf16.msra.mxu1 %v21074_v47 }
0x11ee   : > { %v15394_v7 = vpop.f32.mrb[59].mxu1 }
0x1209   : > { %v15627_v20 = vpop.f32.mrb[60].mxu0 }
0x120a   : > { %v15675_v63 = vadd.f32 %v15627_v20, %v25262_v23  ;;  %v15629_v21 = vpop.f32.mrb[61].mxu0  ;;  %v25565_v20 = vsub.s32 3, %v25564_v26 }
0x120b   : > { %v15668_v22 = vpop.f32.mrb[60].mxu1  ;;  %v15676_v50 = vadd.f32 %v15629_v21, %v25266_v10  ;;  %v15631_v37 = vpop.f32.mrb[62].mxu0 }
0x120c   : > { %v15677_v1 = vadd.f32 %v15668_v22, %v25264_v14  ;;  %v15670_v25 = vpop.f32.mrb[61].mxu1  ;;  %v15632_v3 = vpop.f32.mrb[63].mxu0  ;;  %v16812_v22 = vrot.slane %v16795_v35, %v25565_v20 }
0x120d   : > { %v15678_v12 = vadd.f32 %v15670_v25, %v25268_v2  ;;  %v15672_v62 = vpop.f32.mrb[62].mxu1 }
0x120e   : > { %v15673_v41 = vpop.f32.mrb[63].mxu1 }
0x1229   : > { %v15906_v24 = vpop.f32.mrb[64].mxu0 }
0x122a   : > { %v15954_v60 = vadd.f32 %v15906_v24, %v15675_v63  ;;  %v15908_v28 = vpop.f32.mrb[65].mxu0 }
0x122b   : > { %v15947_v27 = vpop.f32.mrb[64].mxu1  ;;  %v15955_v29 = vadd.f32 %v15908_v28, %v15676_v50  ;;  %v15910_v4 = vpop.f32.mrb[66].mxu0  ;;  %v18444_v28 = vld [vmem:[#allocation26] ss:$0 sm:$0xff] }
0x122c   : > { %v15956_v15 = vadd.f32 %v15947_v27, %v15677_v1  ;;  %v15949_v58 = vpop.f32.mrb[65].mxu1  ;;  %v15911_v23 = vpop.f32.mrb[67].mxu0 }
0x122d   : > { %v15957_v30 = vadd.f32 %v15949_v58, %v15678_v12  ;;  %v15951_v46 = vpop.f32.mrb[66].mxu1 }
0x122e   : > { %v15952_v14 = vpop.f32.mrb[67].mxu1 }
0x1249   : > { %v16185_v5 = vpop.f32.mrb[68].mxu0 }
0x124a   : > { %v16233_v10 = vadd.f32 %v16185_v5, %v15954_v60  ;;  %v16187_v9 = vpop.f32.mrb[69].mxu0 }
0x124b   : > { %v16226_v44 = vpop.f32.mrb[68].mxu1  ;;  %v16234_v36 = vadd.f32 %v16187_v9, %v15955_v29  ;;  %v16189_v52 = vpop.f32.mrb[70].mxu0 }
0x124c   : > { %v16235_v2 = vadd.f32 %v16226_v44, %v15956_v15  ;;  %v16228_v34 = vpop.f32.mrb[69].mxu1  ;;  %v16190_v11 = vpop.f32.mrb[71].mxu0 }
0x124d   : > { %v16236_v7 = vadd.f32 %v16228_v34, %v15957_v30  ;;  %v16230_v16 = vpop.f32.mrb[70].mxu1 }
0x124e   : > { %v16231_v17 = vpop.f32.mrb[71].mxu1 }
0x1269   : > { %v16464_v61 = vpop.f32.mrb[72].mxu0 }
0x126a   : > { %v16512_v43 = vadd.f32 %v16464_v61, %v16233_v10  ;;  %v16466_v42 = vpop.f32.mrb[73].mxu0  ;;  %v25566_v10 = vld [vmem:[#allocation55_spill] sm:$0xff] }
0x126b   : > { %v16505_v53 = vpop.f32.mrb[72].mxu1  ;;  %v16513_v0 = vadd.f32 %v16466_v42, %v16234_v36  ;;  %v16468_v8 = vpop.f32.mrb[74].mxu0  ;;  %vm17168_vm4 = vcmp.lt.s32.totalorder %v25566_v10, 3 }
0x126c   : > { %v16514_v59 = vadd.f32 %v16505_v53, %v16235_v2  ;;  %v16507_v38 = vpop.f32.mrb[73].mxu1  ;;  %v16469_v48 = vpop.f32.mrb[75].mxu0 }
0x126d   : > { %v16515_v33 = vadd.f32 %v16507_v38, %v16236_v7  ;;  %v16509_v57 = vpop.f32.mrb[74].mxu1 }
0x126e   : > { %v16510_v51 = vpop.f32.mrb[75].mxu1 }
0x1289   : > { %v16743_v40 = vpop.f32.mrb[76].mxu0 }
0x128a   : > { %v16791_v45 = vadd.f32 %v16743_v40, %v16512_v43  ;;  %v16745_v63 = vpop.f32.mrb[77].mxu0 }
0x128b   : > { %v16784_v18 = vpop.f32.mrb[76].mxu1  ;;  %v16792_v21 = vadd.f32 %v16745_v63, %v16513_v0  ;;  %v16747_v50 = vpop.f32.mrb[78].mxu0 }
0x128c   : > { %v16793_v31 = vadd.f32 %v16784_v18, %v16514_v59  ;;  %v16786_v1 = vpop.f32.mrb[77].mxu1  ;;  %v16817_v37 = vadd.f32 %v16800_v55, %v16791_v45  ;;  %v16748_v3 = vpop.f32.mrb[79].mxu0 }
0x128d   : > { %v16794_v25 = vadd.f32 %v16786_v1, %v16515_v33  ;;  %v16788_v12 = vpop.f32.mrb[78].mxu1  ;;  %v16818_v39 = vadd.f32 %v16804_v49, %v16792_v21 }
0x128e   : > { %v16819_v62 = vadd.f32 %v16808_v56, %v16793_v31  ;;  %v16789_v41 = vpop.f32.mrb[79].mxu1  ;;  %v16821_v24 = vpack.c.bf16 %v16817_v37, %v16817_v37 }
0x128f   : > { %v16820_v54 = vadd.f32 %v16812_v22, %v16794_v25  ;;  %v16822_v32 = vpack.c.bf16 %v16818_v39, %v16818_v39 }
0x1290   : > { %v16823_v27 = vpack.c.bf16 %v16819_v62, %v16819_v62 }
0x1291   : > { %v16824_v47 = vpack.c.bf16 %v16820_v54, %v16820_v54  ;;  %17120 = vmatprep.mubr.bf16.mxu0 %v16822_v32 }
0x1292   : > { %17121 = vmatmul.mubr.bf16.vlgmr.msra.gmra.mrb[80].mxu0 %v16821_v24 }
0x1293   : > { %17160 = vmatprep.mubr.bf16.mxu1 %v16824_v47 }
0x1294   : > { %17161 = vmatmul.mubr.bf16.vlgmr.msra.gmra.mrb[80].mxu1 %v16823_v27 }
0x1365   : > { %v18999_v60 = vpop.f32.mrb[80].mxu0 }
0x1366   : > { %v19000_v58 = vpop.f32.mrb[81].mxu0 }
0x1367   : > { %v19021_v15 = vpop.f32.mrb[80].mxu1  ;;  %v19001_v30 = vadd.f32 %v19000_v58, %v18999_v60  ;;  %v19002_v46 = vpop.f32.mrb[82].mxu0 }
0x1368   : > { %v19022_v29 = vpop.f32.mrb[81].mxu1  ;;  %v19003_v14 = vpop.f32.mrb[83].mxu0 }
0x1369   : > { %v19023_v4 = vadd.f32 %v19022_v29, %v19021_v15  ;;  %v19024_v23 = vpop.f32.mrb[82].mxu1  ;;  %v17123_v44 = vadd.f32 %v19001_v30, %v18444_v28 }
0x136a   : > { %v19025_v5 = vpop.f32.mrb[83].mxu1 }
0x136b   : > { %v17163_v2 = vadd.f32 %v19023_v4, %v17123_v44 }
0x136d   : > { %v17171_v9 = vsel %vm17168_vm4, %v17163_v2, -1e+30 }
0x136e   : > { %17172 = vmax.xlane.f32.xlu0 %v17171_v9 }
0x13fb   : > { %v17173_v34 = vpop.xlane.xlu0 %17172 }
0x13fc   : > { %v17174_v36 = vsub.f32 %v17171_v9, %v17173_v34 }
0x13fe   : > { %v17175_v7 = vmul.f32 1.442695, %v17174_v36 }
0x1400   : > { %21075 = vpow2.f32 %v17175_v7 }
0x140a   : > { %v21076_v52 = vpop.eup %21075 }
0x140b   : > { %17177 = vadd.xlane.f32.xlu0 %v21076_v52 }
0x1498   : > { %v17178_v16 = vpop.xlane.xlu0 %17177 }
0x1499   : > { %21077 = vrcp.f32 %v17178_v16 }
0x14a3   : > { %v21078_v11 = vpop.eup %21077 }
0x14a4   : > { %v17180_v17 = vmul.f32 %v21078_v11, %v21076_v52 }
0x14a6   : > { %17181 = vst [vmem:[%s25567_s25] sm:$0xff] %v17180_v17 }
0x14a7 PF: > { %s25568_s27 = sld [smem:[#allocation41_spill]]  ;;  %s25569_s24 = sld [smem:[#allocation38_spill]] }
0x14a8   : > { %s25570_s25 = sld [smem:[#allocation39_spill]]  ;;  %s25571_s26 = sld [smem:[#allocation42_spill]] }
0x14ad   : > { %p47_p4 = scmp.ge.s32.totalorder %s25568_s27, 8  }
0x14af   :  { %49 = sbr.rel (!%p47_p4) target bundleno = 28 (0x1c), region = 281 }
0x14b6   :  { %17193 = vsyncpa [#allocation4], 1 }
0x14b7   :  { %17195 = vsyncpa [#allocation4 + $0x1], 1 }
0x14b8   :  { %17196 = vsyncpa [#allocation6], 1 }
0x14b9   :  { %17198 = vsyncpa [#allocation6 + $0x1], 1 }
0x14ba   :  { %17199 = vsyncpa [#allocation9], 1 }
0x14bb   :  { %17201 = vsyncpa [#allocation9 + $0x1], 1 }
0x14bc   :  { %17202 = vsyncpa [#allocation12], 1 }
0x14bd   :  { %17204 = vsyncpa [#allocation12 + $0x1], 1 }
0x14be   :  { %17205 = vsyncpa [#allocation15], 1 }
0x14bf   :  { %17207 = vsyncpa [#allocation15 + $0x1], 1 }
0x14c0   :  { %17208 = vsyncpa [#allocation18], 1 }
0x14c1   :  { %17210 = vsyncpa [#allocation18 + $0x1], 1 }
0x14c2   :  { %17211 = vsyncpa [#allocation21], 1 }
0x14c3   :  { %17213 = vsyncpa [#allocation21 + $0x1], 1 }
0x14c4   :  { %17214 = vsyncpa [#allocation24], 1 }
0x14c5   :  { %17215 = vsyncpa [#allocation27], 1 }

</bundles_post_ra>
